<compile_context>
chip_gen: v6e
topology: v6e:2x2x1
jax: 0.10.0
libtpu: 0.0.40
codegen_flags: <defaults>
</compile_context>

<pallas_src>
import functools

import jax
import jax.numpy as jnp
from jax.experimental import pallas as pl
from jax.experimental.pallas import tpu as pltpu

MAX_TM = 512                      # max row tile (measured ~85% of HBM roofline)
_VMEM_LIMIT = 32 * 1024 * 1024    # safe on v5e/v6e/v7x; blocks here are << this


# ----------------------------- Pallas kernel -------------------------------
def _matmul_bias_act_kernel(a_ref, b_ref, bias_ref, o_ref, *, act):
    # a_ref: (TM, K) bf16 patch rows, b_ref: (K, Cout) bf16 weight (VMEM resident),
    # bias_ref: (1, Cout) f32.  bf16 x bf16 -> f32 accumulate on the MXU.
    acc = jnp.dot(a_ref[...], b_ref[...], preferred_element_type=jnp.float32)
    acc = acc + bias_ref[...]
    if act == "relu":
        acc = jnp.maximum(acc, 0.0)
    elif act == "sigmoid":
        # exp and the approx reciprocal both go to the EUP slot -> epilogue stays
        # hidden under the MXU/DMA critical path.
        acc = pl.reciprocal(1.0 + jnp.exp(-acc), approx=True)
    # act == "none": identity
    o_ref[...] = acc.astype(o_ref.dtype)


def _pick_tile(m):
    """Largest row tile <= MAX_TM that divides M exactly (avoids padding and the
    ragged-block path); tiny bottleneck layers get TM == M."""
    for tm in (MAX_TM, 256, 128, 64, 32, 16):
        if m % tm == 0:
            return tm, 0
    # ragged fallback: pad rows to a multiple of 16 (bf16 sublane packing)
    return 16, (-m) % 16


def matmul_bias_act(a, w, b, act, out_dtype=jnp.bfloat16):
    """a: (M, K), w: (K, Cout), b: (Cout,) -> (M, Cout) fused matmul+bias+act."""
    M, K = a.shape
    Kw, Cout = w.shape
    assert K == Kw
    tm, pad = _pick_tile(M)

    a_bf = a.astype(jnp.bfloat16)
    if pad:
        a_bf = jnp.pad(a_bf, ((0, pad), (0, 0)))
    Mp = M + pad
    w_bf = w.astype(jnp.bfloat16)
    bias2d = b.reshape(1, Cout).astype(jnp.float32)

    out = pl.pallas_call(
        functools.partial(_matmul_bias_act_kernel, act=act),
        out_shape=jax.ShapeDtypeStruct((Mp, Cout), out_dtype),
        grid=(Mp // tm,),
        in_specs=[
            pl.BlockSpec((tm, K), lambda i: (i, 0)),     # activation rows, M-tiled
            pl.BlockSpec((K, Cout), lambda i: (0, 0)),   # full weight, resident
            pl.BlockSpec((1, Cout), lambda i: (0, 0)),   # bias
        ],
        out_specs=pl.BlockSpec((tm, Cout), lambda i: (i, 0)),
        compiler_params=pltpu.CompilerParams(
            dimension_semantics=("parallel",),
            vmem_limit_bytes=_VMEM_LIMIT,
        ),
    )(a_bf, w_bf, bias2d)
    return out[:M] if pad else out


# ------------------------------- JAX glue -----------------------------------
# TODO(synk): fuse the im2col patch extraction into the Pallas kernel (KH*KW
# reduction grid axis with element-offset windows / manual DMA) so the patch
# matrix is never materialized in HBM.
def im2col(x, kh, kw, stride, pad):
    """x: (N, H, W, C) -> patches (N, OH, OW, kh*kw*C), tap-major then channel."""
    N, H, W, C = x.shape
    xp = jnp.pad(x, ((0, 0), (pad, pad), (pad, pad), (0, 0)))
    OH = (H + 2 * pad - kh) // stride + 1
    OW = (W + 2 * pad - kw) // stride + 1
    cols = []
    for dh in range(kh):
        for dw in range(kw):
            cols.append(
                xp[:, dh:dh + OH * stride:stride, dw:dw + OW * stride:stride, :]
            )
    return jnp.concatenate(cols, axis=-1), OH, OW


def conv2d(x, w, b, stride, pad, act, out_dtype=jnp.bfloat16):
    """x: NHWC, w: PyTorch Conv2d weight (Cout, Cin, KH, KW)."""
    Cout, Cin, KH, KW = w.shape
    N = x.shape[0]
    patches, OH, OW = im2col(x, KH, KW, stride, pad)
    w2d = jnp.transpose(w, (2, 3, 1, 0)).reshape(KH * KW * Cin, Cout)
    out2d = matmul_bias_act(
        patches.reshape(N * OH * OW, KH * KW * Cin), w2d, b, act, out_dtype)
    return out2d.reshape(N, OH, OW, Cout)


def _deconv_phase_weight(w):
    """PyTorch ConvTranspose2d weight (Cin, Cout, 4, 4) [stride 2, pad 1] ->
    combined sub-pixel weight (9*Cin, 4*Cout).

    Output phase (a, b) (a = oy % 2, b = ox % 2) is a 2x2 stride-1 conv over the
    1-padded input; all four phases read taps inside one shared 3x3 window, so a
    single matmul emits them with the lane axis carrying (2, 2, Cout).
      y[n, 2i+a, 2j+b, co] = bias[co] +
          sum_{dy,dx in {0,1}} x_pad[n, i+a+dy, j+b+dx, :] . w[:, co, 3-a-2dy, 3-b-2dx]
    """
    Cin, Cout, KH, KW = w.shape
    assert KH == 4 and KW == 4
    wc = jnp.zeros((3, 3, Cin, 2, 2, Cout), w.dtype)
    for ty in range(3):
        for tx in range(3):
            for a in range(2):
                for b in range(2):
                    dy, dx = ty - a, tx - b
                    if 0 <= dy <= 1 and 0 <= dx <= 1:
                        ky, kx = 3 + a - 2 * ty, 3 + b - 2 * tx
                        wc = wc.at[ty, tx, :, a, b, :].set(w[:, :, ky, kx])
    return wc.reshape(9 * Cin, 4 * Cout)


def conv_transpose2d_s2k4p1(x, w, b, act, out_dtype=jnp.bfloat16):
    """ConvTranspose2d(stride=2, kernel=4, padding=1) via sub-pixel decomposition.

    x: NHWC, w: PyTorch ConvTranspose2d weight (Cin, Cout, 4, 4).  No dilated
    (zero-stuffed) input is built; 75% of the MACs of the naive lowering vanish.
    """
    Cin, Cout, KH, KW = w.shape
    N, H, W, C = x.shape
    assert C == Cin and KH == 4 and KW == 4
    wc = _deconv_phase_weight(w)                     # (9*Cin, 4*Cout)
    bias_c = jnp.tile(b, 4)                          # (4*Cout,)
    patches, OH, OW = im2col(x, 3, 3, 1, 1)          # stride-1 3x3, pad 1 -> H x W
    out2d = matmul_bias_act(
        patches.reshape(N * H * W, 9 * Cin), wc, bias_c, act, out_dtype)
    out = out2d.reshape(N, H, W, 2, 2, Cout)
    # depth-to-space: interleave the four output phases
    out = jnp.transpose(out, (0, 1, 3, 2, 4, 5)).reshape(N, 2 * H, 2 * W, Cout)
    return out


# --------------------------- parameters (synthetic) --------------------------
def init_params(key):
    def conv_p(k, cout, cin, ks):
        k1, k2 = jax.random.split(k)
        bound = 1.0 / (cin * ks * ks) ** 0.5
        w = jax.random.uniform(k1, (cout, cin, ks, ks), jnp.float32, -bound, bound)
        b = jax.random.uniform(k2, (cout,), jnp.float32, -bound, bound)
        return w, b

    def convT_p(k, cin, cout, ks):
        k1, k2 = jax.random.split(k)
        bound = 1.0 / (cout * ks * ks) ** 0.5
        w = jax.random.uniform(k1, (cin, cout, ks, ks), jnp.float32, -bound, bound)
        b = jax.random.uniform(k2, (cout,), jnp.float32, -bound, bound)
        return w, b

    ks = jax.random.split(key, 8)
    return {
        "enc1": conv_p(ks[0], 32, 3, 5),
        "enc2": conv_p(ks[1], 64, 32, 5),
        "enc3": conv_p(ks[2], 128, 64, 3),
        "enc4": conv_p(ks[3], 256, 128, 3),
        "dec1": convT_p(ks[4], 256, 128, 4),
        "dec2": convT_p(ks[5], 128, 64, 4),
        "dec3": convT_p(ks[6], 64, 32, 4),
        "dec4": convT_p(ks[7], 32, 3, 4),
    }


# ------------------------------ forward pass ---------------------------------
@functools.partial(jax.jit, static_argnames=("tail_length",))
def pnc_forward(params, x_nchw, tail_length=None):
    # NCHW -> NHWC; hidden activations flow in bf16 (halves HBM traffic), final
    # sigmoid output is returned in f32.
    x = jnp.transpose(x_nchw, (0, 2, 3, 1)).astype(jnp.bfloat16)

    # encoder
    # TODO(synk): enc1 (K=75, Cout=32) is lane-sparse; could pad channels or leave
    # the first layer to XLA's native conv.
    x = conv2d(x, *params["enc1"], stride=2, pad=2, act="relu")
    x = conv2d(x, *params["enc2"], stride=2, pad=2, act="relu")
    x = conv2d(x, *params["enc3"], stride=2, pad=1, act="relu")
    x = conv2d(x, *params["enc4"], stride=2, pad=1, act="relu")

    # optional tail zeroing of latent channels (x2[:, tail_start:, :, :] = 0)
    if tail_length is not None:
        C = x.shape[-1]
        mask = (jnp.arange(C) < (C - tail_length)).astype(x.dtype)
        x = x * mask

    # decoder (sub-pixel transposed convs)
    y = conv_transpose2d_s2k4p1(x, *params["dec1"], act="relu")
    y = conv_transpose2d_s2k4p1(y, *params["dec2"], act="relu")
    y = conv_transpose2d_s2k4p1(y, *params["dec3"], act="relu")
    y = conv_transpose2d_s2k4p1(y, *params["dec4"], act="sigmoid",
                                out_dtype=jnp.float32)

    return jnp.transpose(y, (0, 3, 1, 2))  # NHWC -> NCHW


if __name__ == "__main__":
    key = jax.random.PRNGKey(0)
    pkey, xkey = jax.random.split(key)
    params = init_params(pkey)

    # small NCHW input consistent with the module (3 input channels, /16 spatial)
    x = jax.random.uniform(xkey, (2, 3, 32, 32), jnp.float32)

    out = pnc_forward(params, x)                        # plain forward
    out_tail = pnc_forward(params, x, tail_length=64)   # tail-zeroing path
    jax.block_until_ready(out)
    jax.block_until_ready(out_tail)

    assert out.shape == (2, 3, 32, 32)
    assert out_tail.shape == (2, 3, 32, 32)
    print("KERNEL_OK")
</pallas_src>

<mosaic_0001>
module attributes {stable_mosaic.version = 11 : i64} {
  func.func @_matmul_bias_act_kernel(%arg0: i32, %arg1: memref<512x75xbf16, #tpu.memory_space<vmem>>, %arg2: memref<75x32xbf16, #tpu.memory_space<vmem>>, %arg3: memref<1x32xf32, #tpu.memory_space<vmem>>, %arg4: memref<512x32xbf16, #tpu.memory_space<vmem>>) attributes {dimension_semantics = [#tpu.dimension_semantics<parallel>], iteration_bounds = array<i64: 1>, scalar_prefetch = 0 : i64, scratch_operands = 0 : i64, tpu.core_type = #tpu.core_type<tc>, window_params = [{transform_indices = @transform_0, window_bounds = array<i64: 512, 75>}, {pipeline_mode = #tpu.pipeline_mode<synchronous>, transform_indices = @transform_1, window_bounds = array<i64: 75, 32>}, {pipeline_mode = #tpu.pipeline_mode<synchronous>, transform_indices = @transform_2, window_bounds = array<i64: 1, 32>}, {transform_indices = @transform_3, window_bounds = array<i64: 512, 32>}]} {
    %c0 = arith.constant 0 : index
    %c0_0 = arith.constant 0 : index
    %0 = vector.load %arg1[%c0, %c0_0] : memref<512x75xbf16, #tpu.memory_space<vmem>>, vector<512x75xbf16>
    %c0_1 = arith.constant 0 : index
    %c0_2 = arith.constant 0 : index
    %1 = vector.load %arg2[%c0_1, %c0_2] : memref<75x32xbf16, #tpu.memory_space<vmem>>, vector<75x32xbf16>
    %cst = arith.constant dense<0.000000e+00> : vector<512x32xf32>
    %2 = tpu.matmul %0, %1, %cst {dimension_numbers = #tpu.dot_dimension_numbers<[1], [0], [0], [1], [0, 0, 1, 1], [], []>} : vector<512x75xbf16>, vector<75x32xbf16>, vector<512x32xf32> -> vector<512x32xf32>
    %c0_3 = arith.constant 0 : index
    %c0_4 = arith.constant 0 : index
    %3 = vector.load %arg3[%c0_3, %c0_4] : memref<1x32xf32, #tpu.memory_space<vmem>>, vector<1x32xf32>
    %4 = vector.broadcast %3 : vector<1x32xf32> to vector<512x32xf32>
    %5 = arith.addf %2, %4 : vector<512x32xf32>
    %cst_5 = arith.constant 0.000000e+00 : f32
    %6 = vector.broadcast %cst_5 : f32 to vector<512x32xf32>
    %7 = arith.maximumf %5, %6 : vector<512x32xf32>
    %8 = arith.truncf %7 : vector<512x32xf32> to vector<512x32xbf16>
    %c0_6 = arith.constant 0 : index
    %c0_7 = arith.constant 0 : index
    %9 = vector.load %arg4[%c0_6, %c0_7] : memref<512x32xbf16, #tpu.memory_space<vmem>>, vector<512x32xbf16>
    tpu.vector_store %arg4[%c0_6, %c0_7], %8 {strides = array<i32>} : memref<512x32xbf16, #tpu.memory_space<vmem>>, vector<512x32xbf16>,
    return
  }
  func.func @transform_0(%arg0: i32) -> (i32, i32) {
    %c0_i32 = arith.constant 0 : i32
    %c0_i32_0 = arith.constant 0 : i32
    return %arg0, %c0_i32 : i32, i32
  }
  func.func @transform_1(%arg0: i32) -> (i32, i32) {
    %c0_i32 = arith.constant 0 : i32
    %c0_i32_0 = arith.constant 0 : i32
    %c0_i32_1 = arith.constant 0 : i32
    return %c0_i32, %c0_i32_0 : i32, i32
  }
  func.func @transform_2(%arg0: i32) -> (i32, i32) {
    %c0_i32 = arith.constant 0 : i32
    %c0_i32_0 = arith.constant 0 : i32
    %c0_i32_1 = arith.constant 0 : i32
    return %c0_i32, %c0_i32_0 : i32, i32
  }
  func.func @transform_3(%arg0: i32) -> (i32, i32) {
    %c0_i32 = arith.constant 0 : i32
    %c0_i32_0 = arith.constant 0 : i32
    return %arg0, %c0_i32 : i32, i32
  }
}

module attributes {stable_mosaic.version = 11 : i64} {
  func.func @_matmul_bias_act_kernel(%arg0: i32, %arg1: memref<128x800xbf16, #tpu.memory_space<vmem>>, %arg2: memref<800x64xbf16, #tpu.memory_space<vmem>>, %arg3: memref<1x64xf32, #tpu.memory_space<vmem>>, %arg4: memref<128x64xbf16, #tpu.memory_space<vmem>>) attributes {dimension_semantics = [#tpu.dimension_semantics<parallel>], iteration_bounds = array<i64: 1>, scalar_prefetch = 0 : i64, scratch_operands = 0 : i64, tpu.core_type = #tpu.core_type<tc>, window_params = [{transform_indices = @transform_0, window_bounds = array<i64: 128, 800>}, {pipeline_mode = #tpu.pipeline_mode<synchronous>, transform_indices = @transform_1, window_bounds = array<i64: 800, 64>}, {pipeline_mode = #tpu.pipeline_mode<synchronous>, transform_indices = @transform_2, window_bounds = array<i64: 1, 64>}, {transform_indices = @transform_3, window_bounds = array<i64: 128, 64>}]} {
    %c0 = arith.constant 0 : index
    %c0_0 = arith.constant 0 : index
    %0 = vector.load %arg1[%c0, %c0_0] : memref<128x800xbf16, #tpu.memory_space<vmem>>, vector<128x800xbf16>
    %c0_1 = arith.constant 0 : index
    %c0_2 = arith.constant 0 : index
    %1 = vector.load %arg2[%c0_1, %c0_2] : memref<800x64xbf16, #tpu.memory_space<vmem>>, vector<800x64xbf16>
    %cst = arith.constant dense<0.000000e+00> : vector<128x64xf32>
    %2 = tpu.matmul %0, %1, %cst {dimension_numbers = #tpu.dot_dimension_numbers<[1], [0], [0], [1], [0, 0, 1, 1], [], []>} : vector<128x800xbf16>, vector<800x64xbf16>, vector<128x64xf32> -> vector<128x64xf32>
    %c0_3 = arith.constant 0 : index
    %c0_4 = arith.constant 0 : index
    %3 = vector.load %arg3[%c0_3, %c0_4] : memref<1x64xf32, #tpu.memory_space<vmem>>, vector<1x64xf32>
    %4 = vector.broadcast %3 : vector<1x64xf32> to vector<128x64xf32>
    %5 = arith.addf %2, %4 : vector<128x64xf32>
    %cst_5 = arith.constant 0.000000e+00 : f32
    %6 = vector.broadcast %cst_5 : f32 to vector<128x64xf32>
    %7 = arith.maximumf %5, %6 : vector<128x64xf32>
    %8 = arith.truncf %7 : vector<128x64xf32> to vector<128x64xbf16>
    %c0_6 = arith.constant 0 : index
    %c0_7 = arith.constant 0 : index
    %9 = vector.load %arg4[%c0_6, %c0_7] : memref<128x64xbf16, #tpu.memory_space<vmem>>, vector<128x64xbf16>
    tpu.vector_store %arg4[%c0_6, %c0_7], %8 {strides = array<i32>} : memref<128x64xbf16, #tpu.memory_space<vmem>>, vector<128x64xbf16>,
    return
  }
  func.func @transform_0(%arg0: i32) -> (i32, i32) {
    %c0_i32 = arith.constant 0 : i32
    %c0_i32_0 = arith.constant 0 : i32
    return %arg0, %c0_i32 : i32, i32
  }
  func.func @transform_1(%arg0: i32) -> (i32, i32) {
    %c0_i32 = arith.constant 0 : i32
    %c0_i32_0 = arith.constant 0 : i32
    %c0_i32_1 = arith.constant 0 : i32
    return %c0_i32, %c0_i32_0 : i32, i32
  }
  func.func @transform_2(%arg0: i32) -> (i32, i32) {
    %c0_i32 = arith.constant 0 : i32
    %c0_i32_0 = arith.constant 0 : i32
    %c0_i32_1 = arith.constant 0 : i32
    return %c0_i32, %c0_i32_0 : i32, i32
  }
  func.func @transform_3(%arg0: i32) -> (i32, i32) {
    %c0_i32 = arith.constant 0 : i32
    %c0_i32_0 = arith.constant 0 : i32
    return %arg0, %c0_i32 : i32, i32
  }
}

module attributes {stable_mosaic.version = 11 : i64} {
  func.func @_matmul_bias_act_kernel(%arg0: i32, %arg1: memref<32x576xbf16, #tpu.memory_space<vmem>>, %arg2: memref<576x128xbf16, #tpu.memory_space<vmem>>, %arg3: memref<1x128xf32, #tpu.memory_space<vmem>>, %arg4: memref<32x128xbf16, #tpu.memory_space<vmem>>) attributes {dimension_semantics = [#tpu.dimension_semantics<parallel>], iteration_bounds = array<i64: 1>, scalar_prefetch = 0 : i64, scratch_operands = 0 : i64, tpu.core_type = #tpu.core_type<tc>, window_params = [{transform_indices = @transform_0, window_bounds = array<i64: 32, 576>}, {pipeline_mode = #tpu.pipeline_mode<synchronous>, transform_indices = @transform_1, window_bounds = array<i64: 576, 128>}, {pipeline_mode = #tpu.pipeline_mode<synchronous>, transform_indices = @transform_2, window_bounds = array<i64: 1, 128>}, {transform_indices = @transform_3, window_bounds = array<i64: 32, 128>}]} {
    %c0 = arith.constant 0 : index
    %c0_0 = arith.constant 0 : index
    %0 = vector.load %arg1[%c0, %c0_0] : memref<32x576xbf16, #tpu.memory_space<vmem>>, vector<32x576xbf16>
    %c0_1 = arith.constant 0 : index
    %c0_2 = arith.constant 0 : index
    %1 = vector.load %arg2[%c0_1, %c0_2] : memref<576x128xbf16, #tpu.memory_space<vmem>>, vector<576x128xbf16>
    %cst = arith.constant dense<0.000000e+00> : vector<32x128xf32>
    %2 = tpu.matmul %0, %1, %cst {dimension_numbers = #tpu.dot_dimension_numbers<[1], [0], [0], [1], [0, 0, 1, 1], [], []>} : vector<32x576xbf16>, vector<576x128xbf16>, vector<32x128xf32> -> vector<32x128xf32>
    %c0_3 = arith.constant 0 : index
    %c0_4 = arith.constant 0 : index
    %3 = vector.load %arg3[%c0_3, %c0_4] : memref<1x128xf32, #tpu.memory_space<vmem>>, vector<1x128xf32>
    %4 = vector.broadcast %3 : vector<1x128xf32> to vector<32x128xf32>
    %5 = arith.addf %2, %4 : vector<32x128xf32>
    %cst_5 = arith.constant 0.000000e+00 : f32
    %6 = vector.broadcast %cst_5 : f32 to vector<32x128xf32>
    %7 = arith.maximumf %5, %6 : vector<32x128xf32>
    %8 = arith.truncf %7 : vector<32x128xf32> to vector<32x128xbf16>
    %c0_6 = arith.constant 0 : index
    %c0_7 = arith.constant 0 : index
    %9 = vector.load %arg4[%c0_6, %c0_7] : memref<32x128xbf16, #tpu.memory_space<vmem>>, vector<32x128xbf16>
    tpu.vector_store %arg4[%c0_6, %c0_7], %8 {strides = array<i32>} : memref<32x128xbf16, #tpu.memory_space<vmem>>, vector<32x128xbf16>,
    return
  }
  func.func @transform_0(%arg0: i32) -> (i32, i32) {
    %c0_i32 = arith.constant 0 : i32
    %c0_i32_0 = arith.constant 0 : i32
    return %arg0, %c0_i32 : i32, i32
  }
  func.func @transform_1(%arg0: i32) -> (i32, i32) {
    %c0_i32 = arith.constant 0 : i32
    %c0_i32_0 = arith.constant 0 : i32
    %c0_i32_1 = arith.constant 0 : i32
    return %c0_i32, %c0_i32_0 : i32, i32
  }
  func.func @transform_2(%arg0: i32) -> (i32, i32) {
    %c0_i32 = arith.constant 0 : i32
    %c0_i32_0 = arith.constant 0 : i32
    %c0_i32_1 = arith.constant 0 : i32
    return %c0_i32, %c0_i32_0 : i32, i32
  }
  func.func @transform_3(%arg0: i32) -> (i32, i32) {
    %c0_i32 = arith.constant 0 : i32
    %c0_i32_0 = arith.constant 0 : i32
    return %arg0, %c0_i32 : i32, i32
  }
}

module attributes {stable_mosaic.version = 11 : i64} {
  func.func @_matmul_bias_act_kernel(%arg0: i32, %arg1: memref<16x1152xbf16, #tpu.memory_space<vmem>>, %arg2: memref<1152x256xbf16, #tpu.memory_space<vmem>>, %arg3: memref<1x256xf32, #tpu.memory_space<vmem>>, %arg4: memref<16x256xbf16, #tpu.memory_space<vmem>>) attributes {dimension_semantics = [#tpu.dimension_semantics<parallel>], iteration_bounds = array<i64: 1>, scalar_prefetch = 0 : i64, scratch_operands = 0 : i64, tpu.core_type = #tpu.core_type<tc>, window_params = [{transform_indices = @transform_0, window_bounds = array<i64: 16, 1152>}, {pipeline_mode = #tpu.pipeline_mode<synchronous>, transform_indices = @transform_1, window_bounds = array<i64: 1152, 256>}, {pipeline_mode = #tpu.pipeline_mode<synchronous>, transform_indices = @transform_2, window_bounds = array<i64: 1, 256>}, {transform_indices = @transform_3, window_bounds = array<i64: 16, 256>}]} {
    %c0 = arith.constant 0 : index
    %c0_0 = arith.constant 0 : index
    %0 = vector.load %arg1[%c0, %c0_0] : memref<16x1152xbf16, #tpu.memory_space<vmem>>, vector<16x1152xbf16>
    %c0_1 = arith.constant 0 : index
    %c0_2 = arith.constant 0 : index
    %1 = vector.load %arg2[%c0_1, %c0_2] : memref<1152x256xbf16, #tpu.memory_space<vmem>>, vector<1152x256xbf16>
    %cst = arith.constant dense<0.000000e+00> : vector<16x256xf32>
    %2 = tpu.matmul %0, %1, %cst {dimension_numbers = #tpu.dot_dimension_numbers<[1], [0], [0], [1], [0, 0, 1, 1], [], []>} : vector<16x1152xbf16>, vector<1152x256xbf16>, vector<16x256xf32> -> vector<16x256xf32>
    %c0_3 = arith.constant 0 : index
    %c0_4 = arith.constant 0 : index
    %3 = vector.load %arg3[%c0_3, %c0_4] : memref<1x256xf32, #tpu.memory_space<vmem>>, vector<1x256xf32>
    %4 = vector.broadcast %3 : vector<1x256xf32> to vector<16x256xf32>
    %5 = arith.addf %2, %4 : vector<16x256xf32>
    %cst_5 = arith.constant 0.000000e+00 : f32
    %6 = vector.broadcast %cst_5 : f32 to vector<16x256xf32>
    %7 = arith.maximumf %5, %6 : vector<16x256xf32>
    %8 = arith.truncf %7 : vector<16x256xf32> to vector<16x256xbf16>
    %c0_6 = arith.constant 0 : index
    %c0_7 = arith.constant 0 : index
    %9 = vector.load %arg4[%c0_6, %c0_7] : memref<16x256xbf16, #tpu.memory_space<vmem>>, vector<16x256xbf16>
    tpu.vector_store %arg4[%c0_6, %c0_7], %8 {strides = array<i32>} : memref<16x256xbf16, #tpu.memory_space<vmem>>, vector<16x256xbf16>,
    return
  }
  func.func @transform_0(%arg0: i32) -> (i32, i32) {
    %c0_i32 = arith.constant 0 : i32
    %c0_i32_0 = arith.constant 0 : i32
    return %arg0, %c0_i32 : i32, i32
  }
  func.func @transform_1(%arg0: i32) -> (i32, i32) {
    %c0_i32 = arith.constant 0 : i32
    %c0_i32_0 = arith.constant 0 : i32
    %c0_i32_1 = arith.constant 0 : i32
    return %c0_i32, %c0_i32_0 : i32, i32
  }
  func.func @transform_2(%arg0: i32) -> (i32, i32) {
    %c0_i32 = arith.constant 0 : i32
    %c0_i32_0 = arith.constant 0 : i32
    %c0_i32_1 = arith.constant 0 : i32
    return %c0_i32, %c0_i32_0 : i32, i32
  }
  func.func @transform_3(%arg0: i32) -> (i32, i32) {
    %c0_i32 = arith.constant 0 : i32
    %c0_i32_0 = arith.constant 0 : i32
    return %arg0, %c0_i32 : i32, i32
  }
}

module attributes {stable_mosaic.version = 11 : i64} {
  func.func @_matmul_bias_act_kernel(%arg0: i32, %arg1: memref<16x2304xbf16, #tpu.memory_space<vmem>>, %arg2: memref<2304x512xbf16, #tpu.memory_space<vmem>>, %arg3: memref<1x512xf32, #tpu.memory_space<vmem>>, %arg4: memref<16x512xbf16, #tpu.memory_space<vmem>>) attributes {dimension_semantics = [#tpu.dimension_semantics<parallel>], iteration_bounds = array<i64: 1>, scalar_prefetch = 0 : i64, scratch_operands = 0 : i64, tpu.core_type = #tpu.core_type<tc>, window_params = [{transform_indices = @transform_0, window_bounds = array<i64: 16, 2304>}, {pipeline_mode = #tpu.pipeline_mode<synchronous>, transform_indices = @transform_1, window_bounds = array<i64: 2304, 512>}, {pipeline_mode = #tpu.pipeline_mode<synchronous>, transform_indices = @transform_2, window_bounds = array<i64: 1, 512>}, {transform_indices = @transform_3, window_bounds = array<i64: 16, 512>}]} {
    %c0 = arith.constant 0 : index
    %c0_0 = arith.constant 0 : index
    %0 = vector.load %arg1[%c0, %c0_0] : memref<16x2304xbf16, #tpu.memory_space<vmem>>, vector<16x2304xbf16>
    %c0_1 = arith.constant 0 : index
    %c0_2 = arith.constant 0 : index
    %1 = vector.load %arg2[%c0_1, %c0_2] : memref<2304x512xbf16, #tpu.memory_space<vmem>>, vector<2304x512xbf16>
    %cst = arith.constant dense<0.000000e+00> : vector<16x512xf32>
    %2 = tpu.matmul %0, %1, %cst {dimension_numbers = #tpu.dot_dimension_numbers<[1], [0], [0], [1], [0, 0, 1, 1], [], []>} : vector<16x2304xbf16>, vector<2304x512xbf16>, vector<16x512xf32> -> vector<16x512xf32>
    %c0_3 = arith.constant 0 : index
    %c0_4 = arith.constant 0 : index
    %3 = vector.load %arg3[%c0_3, %c0_4] : memref<1x512xf32, #tpu.memory_space<vmem>>, vector<1x512xf32>
    %4 = vector.broadcast %3 : vector<1x512xf32> to vector<16x512xf32>
    %5 = arith.addf %2, %4 : vector<16x512xf32>
    %cst_5 = arith.constant 0.000000e+00 : f32
    %6 = vector.broadcast %cst_5 : f32 to vector<16x512xf32>
    %7 = arith.maximumf %5, %6 : vector<16x512xf32>
    %8 = arith.truncf %7 : vector<16x512xf32> to vector<16x512xbf16>
    %c0_6 = arith.constant 0 : index
    %c0_7 = arith.constant 0 : index
    %9 = vector.load %arg4[%c0_6, %c0_7] : memref<16x512xbf16, #tpu.memory_space<vmem>>, vector<16x512xbf16>
    tpu.vector_store %arg4[%c0_6, %c0_7], %8 {strides = array<i32>} : memref<16x512xbf16, #tpu.memory_space<vmem>>, vector<16x512xbf16>,
    return
  }
  func.func @transform_0(%arg0: i32) -> (i32, i32) {
    %c0_i32 = arith.constant 0 : i32
    %c0_i32_0 = arith.constant 0 : i32
    return %arg0, %c0_i32 : i32, i32
  }
  func.func @transform_1(%arg0: i32) -> (i32, i32) {
    %c0_i32 = arith.constant 0 : i32
    %c0_i32_0 = arith.constant 0 : i32
    %c0_i32_1 = arith.constant 0 : i32
    return %c0_i32, %c0_i32_0 : i32, i32
  }
  func.func @transform_2(%arg0: i32) -> (i32, i32) {
    %c0_i32 = arith.constant 0 : i32
    %c0_i32_0 = arith.constant 0 : i32
    %c0_i32_1 = arith.constant 0 : i32
    return %c0_i32, %c0_i32_0 : i32, i32
  }
  func.func @transform_3(%arg0: i32) -> (i32, i32) {
    %c0_i32 = arith.constant 0 : i32
    %c0_i32_0 = arith.constant 0 : i32
    return %arg0, %c0_i32 : i32, i32
  }
}

module attributes {stable_mosaic.version = 11 : i64} {
  func.func @_matmul_bias_act_kernel(%arg0: i32, %arg1: memref<32x1152xbf16, #tpu.memory_space<vmem>>, %arg2: memref<1152x256xbf16, #tpu.memory_space<vmem>>, %arg3: memref<1x256xf32, #tpu.memory_space<vmem>>, %arg4: memref<32x256xbf16, #tpu.memory_space<vmem>>) attributes {dimension_semantics = [#tpu.dimension_semantics<parallel>], iteration_bounds = array<i64: 1>, scalar_prefetch = 0 : i64, scratch_operands = 0 : i64, tpu.core_type = #tpu.core_type<tc>, window_params = [{transform_indices = @transform_0, window_bounds = array<i64: 32, 1152>}, {pipeline_mode = #tpu.pipeline_mode<synchronous>, transform_indices = @transform_1, window_bounds = array<i64: 1152, 256>}, {pipeline_mode = #tpu.pipeline_mode<synchronous>, transform_indices = @transform_2, window_bounds = array<i64: 1, 256>}, {transform_indices = @transform_3, window_bounds = array<i64: 32, 256>}]} {
    %c0 = arith.constant 0 : index
    %c0_0 = arith.constant 0 : index
    %0 = vector.load %arg1[%c0, %c0_0] : memref<32x1152xbf16, #tpu.memory_space<vmem>>, vector<32x1152xbf16>
    %c0_1 = arith.constant 0 : index
    %c0_2 = arith.constant 0 : index
    %1 = vector.load %arg2[%c0_1, %c0_2] : memref<1152x256xbf16, #tpu.memory_space<vmem>>, vector<1152x256xbf16>
    %cst = arith.constant dense<0.000000e+00> : vector<32x256xf32>
    %2 = tpu.matmul %0, %1, %cst {dimension_numbers = #tpu.dot_dimension_numbers<[1], [0], [0], [1], [0, 0, 1, 1], [], []>} : vector<32x1152xbf16>, vector<1152x256xbf16>, vector<32x256xf32> -> vector<32x256xf32>
    %c0_3 = arith.constant 0 : index
    %c0_4 = arith.constant 0 : index
    %3 = vector.load %arg3[%c0_3, %c0_4] : memref<1x256xf32, #tpu.memory_space<vmem>>, vector<1x256xf32>
    %4 = vector.broadcast %3 : vector<1x256xf32> to vector<32x256xf32>
    %5 = arith.addf %2, %4 : vector<32x256xf32>
    %cst_5 = arith.constant 0.000000e+00 : f32
    %6 = vector.broadcast %cst_5 : f32 to vector<32x256xf32>
    %7 = arith.maximumf %5, %6 : vector<32x256xf32>
    %8 = arith.truncf %7 : vector<32x256xf32> to vector<32x256xbf16>
    %c0_6 = arith.constant 0 : index
    %c0_7 = arith.constant 0 : index
    %9 = vector.load %arg4[%c0_6, %c0_7] : memref<32x256xbf16, #tpu.memory_space<vmem>>, vector<32x256xbf16>
    tpu.vector_store %arg4[%c0_6, %c0_7], %8 {strides = array<i32>} : memref<32x256xbf16, #tpu.memory_space<vmem>>, vector<32x256xbf16>,
    return
  }
  func.func @transform_0(%arg0: i32) -> (i32, i32) {
    %c0_i32 = arith.constant 0 : i32
    %c0_i32_0 = arith.constant 0 : i32
    return %arg0, %c0_i32 : i32, i32
  }
  func.func @transform_1(%arg0: i32) -> (i32, i32) {
    %c0_i32 = arith.constant 0 : i32
    %c0_i32_0 = arith.constant 0 : i32
    %c0_i32_1 = arith.constant 0 : i32
    return %c0_i32, %c0_i32_0 : i32, i32
  }
  func.func @transform_2(%arg0: i32) -> (i32, i32) {
    %c0_i32 = arith.constant 0 : i32
    %c0_i32_0 = arith.constant 0 : i32
    %c0_i32_1 = arith.constant 0 : i32
    return %c0_i32, %c0_i32_0 : i32, i32
  }
  func.func @transform_3(%arg0: i32) -> (i32, i32) {
    %c0_i32 = arith.constant 0 : i32
    %c0_i32_0 = arith.constant 0 : i32
    return %arg0, %c0_i32 : i32, i32
  }
}

module attributes {stable_mosaic.version = 11 : i64} {
  func.func @_matmul_bias_act_kernel(%arg0: i32, %arg1: memref<128x576xbf16, #tpu.memory_space<vmem>>, %arg2: memref<576x128xbf16, #tpu.memory_space<vmem>>, %arg3: memref<1x128xf32, #tpu.memory_space<vmem>>, %arg4: memref<128x128xbf16, #tpu.memory_space<vmem>>) attributes {dimension_semantics = [#tpu.dimension_semantics<parallel>], iteration_bounds = array<i64: 1>, scalar_prefetch = 0 : i64, scratch_operands = 0 : i64, tpu.core_type = #tpu.core_type<tc>, window_params = [{transform_indices = @transform_0, window_bounds = array<i64: 128, 576>}, {pipeline_mode = #tpu.pipeline_mode<synchronous>, transform_indices = @transform_1, window_bounds = array<i64: 576, 128>}, {pipeline_mode = #tpu.pipeline_mode<synchronous>, transform_indices = @transform_2, window_bounds = array<i64: 1, 128>}, {transform_indices = @transform_3, window_bounds = array<i64: 128, 128>}]} {
    %c0 = arith.constant 0 : index
    %c0_0 = arith.constant 0 : index
    %0 = vector.load %arg1[%c0, %c0_0] : memref<128x576xbf16, #tpu.memory_space<vmem>>, vector<128x576xbf16>
    %c0_1 = arith.constant 0 : index
    %c0_2 = arith.constant 0 : index
    %1 = vector.load %arg2[%c0_1, %c0_2] : memref<576x128xbf16, #tpu.memory_space<vmem>>, vector<576x128xbf16>
    %cst = arith.constant dense<0.000000e+00> : vector<128x128xf32>
    %2 = tpu.matmul %0, %1, %cst {dimension_numbers = #tpu.dot_dimension_numbers<[1], [0], [0], [1], [0, 0, 1, 1], [], []>} : vector<128x576xbf16>, vector<576x128xbf16>, vector<128x128xf32> -> vector<128x128xf32>
    %c0_3 = arith.constant 0 : index
    %c0_4 = arith.constant 0 : index
    %3 = vector.load %arg3[%c0_3, %c0_4] : memref<1x128xf32, #tpu.memory_space<vmem>>, vector<1x128xf32>
    %4 = vector.broadcast %3 : vector<1x128xf32> to vector<128x128xf32>
    %5 = arith.addf %2, %4 : vector<128x128xf32>
    %cst_5 = arith.constant 0.000000e+00 : f32
    %6 = vector.broadcast %cst_5 : f32 to vector<128x128xf32>
    %7 = arith.maximumf %5, %6 : vector<128x128xf32>
    %8 = arith.truncf %7 : vector<128x128xf32> to vector<128x128xbf16>
    %c0_6 = arith.constant 0 : index
    %c0_7 = arith.constant 0 : index
    %9 = vector.load %arg4[%c0_6, %c0_7] : memref<128x128xbf16, #tpu.memory_space<vmem>>, vector<128x128xbf16>
    tpu.vector_store %arg4[%c0_6, %c0_7], %8 {strides = array<i32>} : memref<128x128xbf16, #tpu.memory_space<vmem>>, vector<128x128xbf16>,
    return
  }
  func.func @transform_0(%arg0: i32) -> (i32, i32) {
    %c0_i32 = arith.constant 0 : i32
    %c0_i32_0 = arith.constant 0 : i32
    return %arg0, %c0_i32 : i32, i32
  }
  func.func @transform_1(%arg0: i32) -> (i32, i32) {
    %c0_i32 = arith.constant 0 : i32
    %c0_i32_0 = arith.constant 0 : i32
    %c0_i32_1 = arith.constant 0 : i32
    return %c0_i32, %c0_i32_0 : i32, i32
  }
  func.func @transform_2(%arg0: i32) -> (i32, i32) {
    %c0_i32 = arith.constant 0 : i32
    %c0_i32_0 = arith.constant 0 : i32
    %c0_i32_1 = arith.constant 0 : i32
    return %c0_i32, %c0_i32_0 : i32, i32
  }
  func.func @transform_3(%arg0: i32) -> (i32, i32) {
    %c0_i32 = arith.constant 0 : i32
    %c0_i32_0 = arith.constant 0 : i32
    return %arg0, %c0_i32 : i32, i32
  }
}

module attributes {stable_mosaic.version = 11 : i64} {
  func.func @_matmul_bias_act_kernel(%arg0: i32, %arg1: memref<512x288xbf16, #tpu.memory_space<vmem>>, %arg2: memref<288x12xbf16, #tpu.memory_space<vmem>>, %arg3: memref<1x12xf32, #tpu.memory_space<vmem>>, %arg4: memref<512x12xf32, #tpu.memory_space<vmem>>) attributes {dimension_semantics = [#tpu.dimension_semantics<parallel>], iteration_bounds = array<i64: 1>, scalar_prefetch = 0 : i64, scratch_operands = 0 : i64, tpu.core_type = #tpu.core_type<tc>, window_params = [{transform_indices = @transform_0, window_bounds = array<i64: 512, 288>}, {pipeline_mode = #tpu.pipeline_mode<synchronous>, transform_indices = @transform_1, window_bounds = array<i64: 288, 12>}, {pipeline_mode = #tpu.pipeline_mode<synchronous>, transform_indices = @transform_2, window_bounds = array<i64: 1, 12>}, {transform_indices = @transform_3, window_bounds = array<i64: 512, 12>}]} {
    %c0 = arith.constant 0 : index
    %c0_0 = arith.constant 0 : index
    %0 = vector.load %arg1[%c0, %c0_0] : memref<512x288xbf16, #tpu.memory_space<vmem>>, vector<512x288xbf16>
    %c0_1 = arith.constant 0 : index
    %c0_2 = arith.constant 0 : index
    %1 = vector.load %arg2[%c0_1, %c0_2] : memref<288x12xbf16, #tpu.memory_space<vmem>>, vector<288x12xbf16>
    %cst = arith.constant dense<0.000000e+00> : vector<512x12xf32>
    %2 = tpu.matmul %0, %1, %cst {dimension_numbers = #tpu.dot_dimension_numbers<[1], [0], [0], [1], [0, 0, 1, 1], [], []>} : vector<512x288xbf16>, vector<288x12xbf16>, vector<512x12xf32> -> vector<512x12xf32>
    %c0_3 = arith.constant 0 : index
    %c0_4 = arith.constant 0 : index
    %3 = vector.load %arg3[%c0_3, %c0_4] : memref<1x12xf32, #tpu.memory_space<vmem>>, vector<1x12xf32>
    %4 = vector.broadcast %3 : vector<1x12xf32> to vector<512x12xf32>
    %5 = arith.addf %2, %4 : vector<512x12xf32>
    %cst_5 = arith.constant 0.000000e+00 : f32
    %6 = vector.broadcast %cst_5 : f32 to vector<512x12xf32>
    %7 = arith.subf %6, %5 : vector<512x12xf32>
    %8 = math.exp %7 : vector<512x12xf32>
    %cst_6 = arith.constant 1.000000e+00 : f32
    %9 = vector.broadcast %cst_6 : f32 to vector<512x12xf32>
    %10 = arith.addf %9, %8 : vector<512x12xf32>
    %11 = tpu.reciprocal %10 {approx = true} : vector<512x12xf32> -> vector<512x12xf32>
    %c0_7 = arith.constant 0 : index
    %c0_8 = arith.constant 0 : index
    %12 = vector.load %arg4[%c0_7, %c0_8] : memref<512x12xf32, #tpu.memory_space<vmem>>, vector<512x12xf32>
    tpu.vector_store %arg4[%c0_7, %c0_8], %11 {strides = array<i32>} : memref<512x12xf32, #tpu.memory_space<vmem>>, vector<512x12xf32>,
    return
  }
  func.func @transform_0(%arg0: i32) -> (i32, i32) {
    %c0_i32 = arith.constant 0 : i32
    %c0_i32_0 = arith.constant 0 : i32
    return %arg0, %c0_i32 : i32, i32
  }
  func.func @transform_1(%arg0: i32) -> (i32, i32) {
    %c0_i32 = arith.constant 0 : i32
    %c0_i32_0 = arith.constant 0 : i32
    %c0_i32_1 = arith.constant 0 : i32
    return %c0_i32, %c0_i32_0 : i32, i32
  }
  func.func @transform_2(%arg0: i32) -> (i32, i32) {
    %c0_i32 = arith.constant 0 : i32
    %c0_i32_0 = arith.constant 0 : i32
    %c0_i32_1 = arith.constant 0 : i32
    return %c0_i32, %c0_i32_0 : i32, i32
  }
  func.func @transform_3(%arg0: i32) -> (i32, i32) {
    %c0_i32 = arith.constant 0 : i32
    %c0_i32_0 = arith.constant 0 : i32
    return %arg0, %c0_i32 : i32, i32
  }
}

</mosaic_0001>

<bundles_post_ra>
// kernel: pnc_forward.8
= control target key start
LH: loop header
LB: loop body
LE: loop exit
PB: predicated region body
PF: predicated region fallthrough
CT: control target
= control target key end

     0   :  { %vm382_vm0 = vcmask 1044480   ;;  %vm383_vm1 = vcmask 1045504   ;;  %v1424_v1 = vmov 65535   ;;  %vm285_vm2 = vcmask 613376   ;;  %s1913_s1 = inlined_call_operand.vmem [shape: bf16[75,32], index: 1, kind: input, shape index: {}]   ;;  %s1914_s0 = inlined_call_operand.vmem [shape: bf16[512,75], index: 0, kind: input, shape index: {}]   ;;  %s1915_s2 = inlined_call_operand.vmem [shape: f32[1,32], index: 2, kind: input, shape index: {}]   ;;  %s1916_s3 = inlined_call_operand.vmem [shape: bf16[512,32], index: 3, kind: output, shape index: {}]  }
   0x1   :  { %v1387_v0 = vld [vmem:[%s1913_s1 + $0x20] sm:$0x3f]   ;;  %v384_v2 = vsel %vm382_vm0, 4294967295, %v1424_v1  ;;  %v1388_v5 = vld [vmem:[%s1913_s1 + $0x18] sm:$0xff]   ;;  %v1389_v8 = vld [vmem:[%s1913_s1 + $0x10] sm:$0xff]   ;;  %vm998_vm3 = vcmask 257024  }
   0x2   :  { %v385_v3 = vsel %vm383_vm1, %v384_v2, 0  ;;  %v1392_v6 = vld [vmem:[%s1914_s0] sm:$0xff]   ;;  %v1390_v9 = vld [vmem:[%s1913_s1 + $0x8] sm:$0xff]   ;;  %v1396_v13 = vld [vmem:[%s1914_s0 + $0x10] sm:$0xff]  }
   0x3   :  { %v387_v4 = vand.u32 %v1387_v0, %v385_v3  ;;  %v1393_v7 = vld [vmem:[%s1914_s0 + $0x80] sm:$0xff]   ;;  %1312 = vmatprep.mubr.msk.bf16.mxu0 %vm285_vm2, %v1392_v6  ;;  %v1394_v11 = vld [vmem:[%s1914_s0 + $0x8] sm:$0xff]   ;;  %v1397_v14 = vld [vmem:[%s1914_s0 + $0x90] sm:$0xff]  }
   0x4   :  { %1344 = vmatprep.mubr.msk.bf16.mxu1 %vm285_vm2, %v1393_v7  ;;  %v1391_v10 = vld [vmem:[%s1913_s1] sm:$0xff]   ;;  %v1395_v12 = vld [vmem:[%s1914_s0 + $0x88] sm:$0xff]   ;;  %v1398_v15 = vld [vmem:[%s1914_s0 + $0x18] sm:$0xff]  }
   0x5   :  { %1302 = vmatprep.subr.bf16.mxu0 %v387_v4  ;;  %1376 = vmatprep.subr.bf16.mxu1 %v387_v4  ;;  %v1399_v16 = vld [vmem:[%s1914_s0 + $0x98] sm:$0xff]   ;;  %v1400_v17 = vld [vmem:[%s1914_s0 + $0x20] sm:$0xff]   ;;  %v1402_v19 = vld [vmem:[%s1914_s0 + $0x28] sm:$0xff]  }
   0x6   :  { %1303 = vmatpush3.bf16.msra.mxu0 %v387_v4  ;;  %1381 = vmatpush3.bf16.msra.mxu1 %v387_v4  ;;  %v1401_v18 = vld [vmem:[%s1914_s0 + $0xa0] sm:$0xff]   ;;  %v1403_v20 = vld [vmem:[%s1914_s0 + $0xa8] sm:$0xff]   ;;  %v1404_v21 = vld [vmem:[%s1914_s0 + $0x30] sm:$0xff]  }
   0x7   :  { %1304 = vmatprep.subr.bf16.mxu0 %v1388_v5  ;;  %1377 = vmatprep.subr.bf16.mxu1 %v1388_v5  ;;  %v1405_v22 = vld [vmem:[%s1914_s0 + $0xb0] sm:$0xff]   ;;  %v1406_v23 = vld [vmem:[%s1914_s0 + $0x38] sm:$0xff]   ;;  %v1408_v25 = vld [vmem:[%s1914_s0 + $0x40] sm:$0xff]  }
   0x8   :  { %v1407_v24 = vld [vmem:[%s1914_s0 + $0xb8] sm:$0xff]   ;;  %v1409_v26 = vld [vmem:[%s1914_s0 + $0xc0] sm:$0xff]   ;;  %v1410_v27 = vld [vmem:[%s1914_s0 + $0x48] sm:$0xff]  }
   0x9   :  { %v1411_v28 = vld [vmem:[%s1914_s0 + $0xc8] sm:$0xff]   ;;  %v1412_v29 = vld [vmem:[%s1914_s0 + $0x50] sm:$0xff]   ;;  %v1414_v31 = vld [vmem:[%s1914_s0 + $0x58] sm:$0xff]  }
   0xa   :  { %1305 = vmatpush3.bf16.msra.mxu0 %v1388_v5  ;;  %1382 = vmatpush3.bf16.msra.mxu1 %v1388_v5  ;;  %v1413_v30 = vld [vmem:[%s1914_s0 + $0xd0] sm:$0xff]   ;;  %v1415_v32 = vld [vmem:[%s1914_s0 + $0xd8] sm:$0xff]   ;;  %v1416_v33 = vld [vmem:[%s1914_s0 + $0x60] sm:$0xff]  }
   0xb   :  { %1306 = vmatprep.subr.bf16.mxu0 %v1389_v8  ;;  %1378 = vmatprep.subr.bf16.mxu1 %v1389_v8  ;;  %v1417_v34 = vld [vmem:[%s1914_s0 + $0xe0] sm:$0xff]   ;;  %v1418_v35 = vld [vmem:[%s1914_s0 + $0x68] sm:$0xff]   ;;  %v1420_v37 = vld [vmem:[%s1914_s0 + $0x70] sm:$0xff]  }
   0xc   :  { %v1419_v36 = vld [vmem:[%s1914_s0 + $0xe8] sm:$0xff]   ;;  %v1421_v38 = vld [vmem:[%s1914_s0 + $0xf0] sm:$0xff]   ;;  %v1422_v39 = vld [vmem:[%s1914_s0 + $0x78] sm:$0xff]  }
   0xd   :  { %v1423_v40 = vld [vmem:[%s1914_s0 + $0xf8] sm:$0xff]   ;;  %v1591_v41 = vld [vmem:[%s1915_s2] ss:$0 sm:$0xff] }
   0xe   :  { %1307 = vmatpush3.bf16.msra.mxu0 %v1389_v8  ;;  %1383 = vmatpush3.bf16.msra.mxu1 %v1389_v8 }
   0xf   :  { %1308 = vmatprep.subr.bf16.mxu0 %v1390_v9  ;;  %1379 = vmatprep.subr.bf16.mxu1 %v1390_v9 }
  0x12   :  { %1309 = vmatpush3.bf16.msra.mxu0 %v1390_v9  ;;  %1384 = vmatpush3.bf16.msra.mxu1 %v1390_v9 }
  0x13   :  { %1310 = vmatprep.subr.bf16.mxu0 %v1391_v10  ;;  %1380 = vmatprep.subr.bf16.mxu1 %v1391_v10 }
  0x16   :  { %1311 = vmatpush3.bf16.msra.mxu0 %v1391_v10  ;;  %1385 = vmatpush3.bf16.msra.mxu1 %v1391_v10 }
  0x19   :  { %1313 = vmatmul.mubr.msk.bf16.vlgmr.msra.gmra.mxu0 %vm285_vm2, %v1394_v11  ;;  %1345 = vmatmul.mubr.msk.bf16.vlgmr.msra.gmra.mxu1 %vm285_vm2, %v1395_v12 }
  0x1a   :  { %1316 = vmatprep.mubr.msk.bf16.mxu0 %vm285_vm2, %v1396_v13  ;;  %1348 = vmatprep.mubr.msk.bf16.mxu1 %vm285_vm2, %v1397_v14 }
  0x21   :  { %1317 = vmatmul.mubr.msk.bf16.gmra.mxu0 %vm285_vm2, %v1398_v15  ;;  %1349 = vmatmul.mubr.msk.bf16.gmra.mxu1 %vm285_vm2, %v1399_v16 }
  0x22   :  { %1320 = vmatprep.mubr.msk.bf16.mxu0 %vm285_vm2, %v1400_v17  ;;  %1352 = vmatprep.mubr.msk.bf16.mxu1 %vm285_vm2, %v1401_v18 }
  0x29   :  { %1321 = vmatmul.mubr.msk.bf16.gmra.mxu0 %vm285_vm2, %v1402_v19  ;;  %1353 = vmatmul.mubr.msk.bf16.gmra.mxu1 %vm285_vm2, %v1403_v20 }
  0x2a   :  { %1324 = vmatprep.mubr.msk.bf16.mxu0 %vm285_vm2, %v1404_v21  ;;  %1356 = vmatprep.mubr.msk.bf16.mxu1 %vm285_vm2, %v1405_v22 }
  0x31   :  { %1325 = vmatmul.mubr.msk.bf16.gmra.mxu0 %vm285_vm2, %v1406_v23  ;;  %1357 = vmatmul.mubr.msk.bf16.gmra.mxu1 %vm285_vm2, %v1407_v24 }
  0x32   :  { %1328 = vmatprep.mubr.msk.bf16.mxu0 %vm285_vm2, %v1408_v25  ;;  %1360 = vmatprep.mubr.msk.bf16.mxu1 %vm285_vm2, %v1409_v26 }
  0x39   :  { %1329 = vmatmul.mubr.msk.bf16.gmra.mxu0 %vm285_vm2, %v1410_v27  ;;  %1361 = vmatmul.mubr.msk.bf16.gmra.mxu1 %vm285_vm2, %v1411_v28 }
  0x3a   :  { %1332 = vmatprep.mubr.msk.bf16.mxu0 %vm285_vm2, %v1412_v29  ;;  %1364 = vmatprep.mubr.msk.bf16.mxu1 %vm285_vm2, %v1413_v30 }
  0x41   :  { %1333 = vmatmul.mubr.msk.bf16.gmra.mxu0 %vm285_vm2, %v1414_v31  ;;  %1365 = vmatmul.mubr.msk.bf16.gmra.mxu1 %vm285_vm2, %v1415_v32 }
  0x42   :  { %1336 = vmatprep.mubr.msk.bf16.mxu0 %vm285_vm2, %v1416_v33  ;;  %1368 = vmatprep.mubr.msk.bf16.mxu1 %vm285_vm2, %v1417_v34 }
  0x49   :  { %1337 = vmatmul.mubr.msk.bf16.gmra.mxu0 %vm285_vm2, %v1418_v35  ;;  %1369 = vmatmul.mubr.msk.bf16.gmra.mxu1 %vm285_vm2, %v1419_v36 }
  0x4a   :  { %1340 = vmatprep.mubr.msk.bf16.mxu0 %vm285_vm2, %v1420_v37  ;;  %1372 = vmatprep.mubr.msk.bf16.mxu1 %vm285_vm2, %v1421_v38 }
  0x51   :  { %1341 = vmatmul.mubr.msk.bf16.gmra.mxu0 %vm285_vm2, %v1422_v39  ;;  %1373 = vmatmul.mubr.msk.bf16.gmra.mxu1 %vm285_vm2, %v1423_v40 }
  0xd9   :  { %v1314_v42 = vpop.f32.mrf.mxu0  ;;  %v1346_v43 = vpop.f32.mrf.mxu1 }
  0xda   :  { %v432_v44 = vadd.f32 %v1314_v42, %v1591_v41  ;;  %v560_v45 = vadd.f32 %v1346_v43, %v1591_v41 }
  0xdb   :  { %v423_v46 = vpop.f32.mrf.mxu0  ;;  %v551_v47 = vpop.f32.mrf.mxu1 }
  0xdc   :  { %v680_v48 = vmax.f32 %v432_v44, 0.0  ;;  %v712_v49 = vmax.f32 %v560_v45, 0.0  ;;  %v424_v50 = vadd.f32 %v1591_v41, %v423_v46  ;;  %v552_v51 = vadd.f32 %v1591_v41, %v551_v47 }
  0xdd   :  { %v1315_v52 = vpop.f32.mrf.mxu0  ;;  %v1347_v53 = vpop.f32.mrf.mxu1 }
  0xde   :  { %v1203_v54 = vpack.c.bf16 %v680_v48, %v680_v48  ;;  %v1235_v55 = vpack.c.bf16 %v712_v49, %v712_v49  ;;  %v678_v56 = vmax.f32 %v424_v50, 0.0  ;;  %v710_v57 = vmax.f32 %v552_v51, 0.0 }
  0xdf   :  { %v435_v58 = vadd.f32 %v1315_v52, %v1591_v41  ;;  %v563_v59 = vadd.f32 %v1347_v53, %v1591_v41  ;;  %v426_v60 = vpop.f32.mrf.mxu0  ;;  %v554_v61 = vpop.f32.mrf.mxu1 }
  0xe0   :  { %1001 = vst.msk [vmem:[%s1916_s3 + $0x8] sm:$0xf] %vm998_vm3, %v1203_v54  ;;  %1033 = vst.msk [vmem:[%s1916_s3 + $0x88] sm:$0xf] %vm998_vm3, %v1235_v55  ;;  %v1201_v62 = vpack.c.bf16 %v678_v56, %v678_v56  ;;  %v1233_v63 = vpack.c.bf16 %v710_v57, %v710_v57  ;;  %v427_v0 = vadd.f32 %v1591_v41, %v426_v60 }
  0xe1   :  { %v555_v1 = vadd.f32 %v1591_v41, %v554_v61  ;;  %v681_v2 = vmax.f32 %v435_v58, 0.0  ;;  %v713_v3 = vmax.f32 %v563_v59, 0.0  ;;  %v1318_v4 = vpop.f32.mrf.mxu0  ;;  %v1350_v5 = vpop.f32.mrf.mxu1 }
  0xe2   :  { %999 = vst.msk [vmem:[%s1916_s3] sm:$0xf] %vm998_vm3, %v1201_v62  ;;  %1031 = vst.msk [vmem:[%s1916_s3 + $0x80] sm:$0xf] %vm998_vm3, %v1233_v63  ;;  %v679_v6 = vmax.f32 %v427_v0, 0.0  ;;  %v448_v8 = vadd.f32 %v1318_v4, %v1591_v41  ;;  %v576_v9 = vadd.f32 %v1350_v5, %v1591_v41 }
  0xe3   :  { %v711_v7 = vmax.f32 %v555_v1, 0.0  ;;  %v1204_v10 = vpack.c.bf16 %v681_v2, %v681_v2  ;;  %v1236_v11 = vpack.c.bf16 %v713_v3, %v713_v3  ;;  %v439_v12 = vpop.f32.mrf.mxu0  ;;  %v567_v13 = vpop.f32.mrf.mxu1 }
  0xe4   :  { %v1202_v14 = vpack.c.bf16 %v679_v6, %v679_v6  ;;  %v684_v16 = vmax.f32 %v448_v8, 0.0  ;;  %v716_v17 = vmax.f32 %v576_v9, 0.0  ;;  %v440_v18 = vadd.f32 %v1591_v41, %v439_v12 }
  0xe5   :  { %v1234_v15 = vpack.c.bf16 %v711_v7, %v711_v7  ;;  %1002 = vst.msk [vmem:[%s1916_s3 + $0xc] sm:$0xf] %vm998_vm3, %v1204_v10  ;;  %1034 = vst.msk [vmem:[%s1916_s3 + $0x8c] sm:$0xf] %vm998_vm3, %v1236_v11  ;;  %v568_v19 = vadd.f32 %v1591_v41, %v567_v13  ;;  %v1319_v20 = vpop.f32.mrf.mxu0  ;;  %v1351_v21 = vpop.f32.mrf.mxu1 }
  0xe6   :  { %1000 = vst.msk [vmem:[%s1916_s3 + $0x4] sm:$0xf] %vm998_vm3, %v1202_v14  ;;  %v1207_v22 = vpack.c.bf16 %v684_v16, %v684_v16  ;;  %v1239_v23 = vpack.c.bf16 %v716_v17, %v716_v17  ;;  %v451_v24 = vadd.f32 %v1319_v20, %v1591_v41  ;;  %v579_v25 = vadd.f32 %v1351_v21, %v1591_v41 }
  0xe7   :  { %1032 = vst.msk [vmem:[%s1916_s3 + $0x84] sm:$0xf] %vm998_vm3, %v1234_v15  ;;  %v682_v26 = vmax.f32 %v440_v18, 0.0  ;;  %v714_v27 = vmax.f32 %v568_v19, 0.0  ;;  %v442_v28 = vpop.f32.mrf.mxu0  ;;  %v570_v29 = vpop.f32.mrf.mxu1 }
  0xe8   :  { %1005 = vst.msk [vmem:[%s1916_s3 + $0x18] sm:$0xf] %vm998_vm3, %v1207_v22  ;;  %1037 = vst.msk [vmem:[%s1916_s3 + $0x98] sm:$0xf] %vm998_vm3, %v1239_v23  ;;  %v685_v30 = vmax.f32 %v451_v24, 0.0  ;;  %v717_v31 = vmax.f32 %v579_v25, 0.0  ;;  %v443_v32 = vadd.f32 %v1591_v41, %v442_v28  ;;  %v571_v33 = vadd.f32 %v1591_v41, %v570_v29 }
  0xe9   :  { %v1205_v34 = vpack.c.bf16 %v682_v26, %v682_v26  ;;  %v1237_v35 = vpack.c.bf16 %v714_v27, %v714_v27  ;;  %v1322_v36 = vpop.f32.mrf.mxu0  ;;  %v1354_v37 = vpop.f32.mrf.mxu1 }
  0xea   :  { %v1208_v38 = vpack.c.bf16 %v685_v30, %v685_v30  ;;  %v1240_v39 = vpack.c.bf16 %v717_v31, %v717_v31  ;;  %v683_v40 = vmax.f32 %v443_v32, 0.0  ;;  %v715_v42 = vmax.f32 %v571_v33, 0.0 }
  0xeb   :  { %1003 = vst.msk [vmem:[%s1916_s3 + $0x10] sm:$0xf] %vm998_vm3, %v1205_v34  ;;  %1035 = vst.msk [vmem:[%s1916_s3 + $0x90] sm:$0xf] %vm998_vm3, %v1237_v35  ;;  %v464_v43 = vadd.f32 %v1322_v36, %v1591_v41  ;;  %v592_v44 = vadd.f32 %v1354_v37, %v1591_v41  ;;  %v455_v45 = vpop.f32.mrf.mxu0  ;;  %v583_v46 = vpop.f32.mrf.mxu1 }
  0xec   :  { %1006 = vst.msk [vmem:[%s1916_s3 + $0x1c] sm:$0xf] %vm998_vm3, %v1208_v38  ;;  %1038 = vst.msk [vmem:[%s1916_s3 + $0x9c] sm:$0xf] %vm998_vm3, %v1240_v39  ;;  %v1206_v47 = vpack.c.bf16 %v683_v40, %v683_v40  ;;  %v1238_v48 = vpack.c.bf16 %v715_v42, %v715_v42  ;;  %v456_v49 = vadd.f32 %v1591_v41, %v455_v45 }
  0xed   :  { %v584_v50 = vadd.f32 %v1591_v41, %v583_v46  ;;  %v688_v51 = vmax.f32 %v464_v43, 0.0  ;;  %v720_v52 = vmax.f32 %v592_v44, 0.0  ;;  %v1323_v53 = vpop.f32.mrf.mxu0  ;;  %v1355_v54 = vpop.f32.mrf.mxu1 }
  0xee   :  { %1004 = vst.msk [vmem:[%s1916_s3 + $0x14] sm:$0xf] %vm998_vm3, %v1206_v47  ;;  %1036 = vst.msk [vmem:[%s1916_s3 + $0x94] sm:$0xf] %vm998_vm3, %v1238_v48  ;;  %v686_v55 = vmax.f32 %v456_v49, 0.0  ;;  %v467_v57 = vadd.f32 %v1323_v53, %v1591_v41  ;;  %v595_v58 = vadd.f32 %v1355_v54, %v1591_v41 }
  0xef   :  { %v718_v56 = vmax.f32 %v584_v50, 0.0  ;;  %v1211_v59 = vpack.c.bf16 %v688_v51, %v688_v51  ;;  %v1243_v60 = vpack.c.bf16 %v720_v52, %v720_v52  ;;  %v458_v61 = vpop.f32.mrf.mxu0  ;;  %v586_v62 = vpop.f32.mrf.mxu1 }
  0xf0   :  { %v1209_v63 = vpack.c.bf16 %v686_v55, %v686_v55  ;;  %v689_v1 = vmax.f32 %v467_v57, 0.0  ;;  %v721_v2 = vmax.f32 %v595_v58, 0.0  ;;  %v459_v3 = vadd.f32 %v1591_v41, %v458_v61 }
  0xf1   :  { %v1241_v0 = vpack.c.bf16 %v718_v56, %v718_v56  ;;  %1009 = vst.msk [vmem:[%s1916_s3 + $0x28] sm:$0xf] %vm998_vm3, %v1211_v59  ;;  %1041 = vst.msk [vmem:[%s1916_s3 + $0xa8] sm:$0xf] %vm998_vm3, %v1243_v60  ;;  %v587_v4 = vadd.f32 %v1591_v41, %v586_v62  ;;  %v1326_v5 = vpop.f32.mrf.mxu0  ;;  %v1358_v6 = vpop.f32.mrf.mxu1 }
  0xf2   :  { %1007 = vst.msk [vmem:[%s1916_s3 + $0x20] sm:$0xf] %vm998_vm3, %v1209_v63  ;;  %v1212_v7 = vpack.c.bf16 %v689_v1, %v689_v1  ;;  %v1244_v8 = vpack.c.bf16 %v721_v2, %v721_v2  ;;  %v480_v9 = vadd.f32 %v1326_v5, %v1591_v41  ;;  %v608_v10 = vadd.f32 %v1358_v6, %v1591_v41 }
  0xf3   :  { %1039 = vst.msk [vmem:[%s1916_s3 + $0xa0] sm:$0xf] %vm998_vm3, %v1241_v0  ;;  %v687_v11 = vmax.f32 %v459_v3, 0.0  ;;  %v719_v12 = vmax.f32 %v587_v4, 0.0  ;;  %v471_v13 = vpop.f32.mrf.mxu0  ;;  %v599_v14 = vpop.f32.mrf.mxu1 }
  0xf4   :  { %1010 = vst.msk [vmem:[%s1916_s3 + $0x2c] sm:$0xf] %vm998_vm3, %v1212_v7  ;;  %1042 = vst.msk [vmem:[%s1916_s3 + $0xac] sm:$0xf] %vm998_vm3, %v1244_v8  ;;  %v692_v15 = vmax.f32 %v480_v9, 0.0  ;;  %v724_v16 = vmax.f32 %v608_v10, 0.0  ;;  %v472_v17 = vadd.f32 %v1591_v41, %v471_v13  ;;  %v600_v18 = vadd.f32 %v1591_v41, %v599_v14 }
  0xf5   :  { %v1210_v19 = vpack.c.bf16 %v687_v11, %v687_v11  ;;  %v1242_v20 = vpack.c.bf16 %v719_v12, %v719_v12  ;;  %v1327_v21 = vpop.f32.mrf.mxu0  ;;  %v1359_v22 = vpop.f32.mrf.mxu1 }
  0xf6   :  { %v1215_v23 = vpack.c.bf16 %v692_v15, %v692_v15  ;;  %v1247_v24 = vpack.c.bf16 %v724_v16, %v724_v16  ;;  %v690_v25 = vmax.f32 %v472_v17, 0.0  ;;  %v722_v26 = vmax.f32 %v600_v18, 0.0 }
  0xf7   :  { %1008 = vst.msk [vmem:[%s1916_s3 + $0x24] sm:$0xf] %vm998_vm3, %v1210_v19  ;;  %1040 = vst.msk [vmem:[%s1916_s3 + $0xa4] sm:$0xf] %vm998_vm3, %v1242_v20  ;;  %v483_v27 = vadd.f32 %v1327_v21, %v1591_v41  ;;  %v611_v28 = vadd.f32 %v1359_v22, %v1591_v41  ;;  %v474_v29 = vpop.f32.mrf.mxu0  ;;  %v602_v30 = vpop.f32.mrf.mxu1 }
  0xf8   :  { %1013 = vst.msk [vmem:[%s1916_s3 + $0x38] sm:$0xf] %vm998_vm3, %v1215_v23  ;;  %1045 = vst.msk [vmem:[%s1916_s3 + $0xb8] sm:$0xf] %vm998_vm3, %v1247_v24  ;;  %v1213_v31 = vpack.c.bf16 %v690_v25, %v690_v25  ;;  %v1245_v32 = vpack.c.bf16 %v722_v26, %v722_v26  ;;  %v475_v33 = vadd.f32 %v1591_v41, %v474_v29 }
  0xf9   :  { %v603_v34 = vadd.f32 %v1591_v41, %v602_v30  ;;  %v693_v35 = vmax.f32 %v483_v27, 0.0  ;;  %v725_v36 = vmax.f32 %v611_v28, 0.0  ;;  %v1330_v37 = vpop.f32.mrf.mxu0  ;;  %v1362_v38 = vpop.f32.mrf.mxu1 }
  0xfa   :  { %1011 = vst.msk [vmem:[%s1916_s3 + $0x30] sm:$0xf] %vm998_vm3, %v1213_v31  ;;  %1043 = vst.msk [vmem:[%s1916_s3 + $0xb0] sm:$0xf] %vm998_vm3, %v1245_v32  ;;  %v691_v39 = vmax.f32 %v475_v33, 0.0  ;;  %v496_v42 = vadd.f32 %v1330_v37, %v1591_v41  ;;  %v624_v43 = vadd.f32 %v1362_v38, %v1591_v41 }
  0xfb   :  { %v723_v40 = vmax.f32 %v603_v34, 0.0  ;;  %v1216_v44 = vpack.c.bf16 %v693_v35, %v693_v35  ;;  %v1248_v45 = vpack.c.bf16 %v725_v36, %v725_v36  ;;  %v487_v46 = vpop.f32.mrf.mxu0  ;;  %v615_v47 = vpop.f32.mrf.mxu1 }
  0xfc   :  { %v1214_v48 = vpack.c.bf16 %v691_v39, %v691_v39  ;;  %v696_v50 = vmax.f32 %v496_v42, 0.0  ;;  %v728_v51 = vmax.f32 %v624_v43, 0.0  ;;  %v488_v52 = vadd.f32 %v1591_v41, %v487_v46 }
  0xfd   :  { %v1246_v49 = vpack.c.bf16 %v723_v40, %v723_v40  ;;  %1014 = vst.msk [vmem:[%s1916_s3 + $0x3c] sm:$0xf] %vm998_vm3, %v1216_v44  ;;  %1046 = vst.msk [vmem:[%s1916_s3 + $0xbc] sm:$0xf] %vm998_vm3, %v1248_v45  ;;  %v616_v53 = vadd.f32 %v1591_v41, %v615_v47  ;;  %v1331_v54 = vpop.f32.mrf.mxu0  ;;  %v1363_v55 = vpop.f32.mrf.mxu1 }
  0xfe   :  { %1012 = vst.msk [vmem:[%s1916_s3 + $0x34] sm:$0xf] %vm998_vm3, %v1214_v48  ;;  %v1219_v56 = vpack.c.bf16 %v696_v50, %v696_v50  ;;  %v1251_v57 = vpack.c.bf16 %v728_v51, %v728_v51  ;;  %v499_v58 = vadd.f32 %v1331_v54, %v1591_v41  ;;  %v627_v59 = vadd.f32 %v1363_v55, %v1591_v41 }
  0xff   :  { %1044 = vst.msk [vmem:[%s1916_s3 + $0xb4] sm:$0xf] %vm998_vm3, %v1246_v49  ;;  %v694_v60 = vmax.f32 %v488_v52, 0.0  ;;  %v726_v61 = vmax.f32 %v616_v53, 0.0  ;;  %v490_v62 = vpop.f32.mrf.mxu0  ;;  %v618_v63 = vpop.f32.mrf.mxu1 }
 0x100   :  { %1017 = vst.msk [vmem:[%s1916_s3 + $0x48] sm:$0xf] %vm998_vm3, %v1219_v56  ;;  %1049 = vst.msk [vmem:[%s1916_s3 + $0xc8] sm:$0xf] %vm998_vm3, %v1251_v57  ;;  %v697_v0 = vmax.f32 %v499_v58, 0.0  ;;  %v729_v1 = vmax.f32 %v627_v59, 0.0  ;;  %v491_v2 = vadd.f32 %v1591_v41, %v490_v62  ;;  %v619_v3 = vadd.f32 %v1591_v41, %v618_v63 }
 0x101   :  { %v1217_v4 = vpack.c.bf16 %v694_v60, %v694_v60  ;;  %v1249_v5 = vpack.c.bf16 %v726_v61, %v726_v61  ;;  %v1334_v6 = vpop.f32.mrf.mxu0  ;;  %v1366_v7 = vpop.f32.mrf.mxu1 }
 0x102   :  { %v1220_v8 = vpack.c.bf16 %v697_v0, %v697_v0  ;;  %v1252_v9 = vpack.c.bf16 %v729_v1, %v729_v1  ;;  %v695_v10 = vmax.f32 %v491_v2, 0.0  ;;  %v727_v11 = vmax.f32 %v619_v3, 0.0 }
 0x103   :  { %1015 = vst.msk [vmem:[%s1916_s3 + $0x40] sm:$0xf] %vm998_vm3, %v1217_v4  ;;  %1047 = vst.msk [vmem:[%s1916_s3 + $0xc0] sm:$0xf] %vm998_vm3, %v1249_v5  ;;  %v512_v12 = vadd.f32 %v1334_v6, %v1591_v41  ;;  %v640_v13 = vadd.f32 %v1366_v7, %v1591_v41  ;;  %v503_v14 = vpop.f32.mrf.mxu0  ;;  %v631_v15 = vpop.f32.mrf.mxu1 }
 0x104   :  { %1018 = vst.msk [vmem:[%s1916_s3 + $0x4c] sm:$0xf] %vm998_vm3, %v1220_v8  ;;  %1050 = vst.msk [vmem:[%s1916_s3 + $0xcc] sm:$0xf] %vm998_vm3, %v1252_v9  ;;  %v1218_v16 = vpack.c.bf16 %v695_v10, %v695_v10  ;;  %v1250_v17 = vpack.c.bf16 %v727_v11, %v727_v11  ;;  %v504_v18 = vadd.f32 %v1591_v41, %v503_v14 }
 0x105   :  { %v632_v19 = vadd.f32 %v1591_v41, %v631_v15  ;;  %v700_v20 = vmax.f32 %v512_v12, 0.0  ;;  %v732_v21 = vmax.f32 %v640_v13, 0.0  ;;  %v1335_v22 = vpop.f32.mrf.mxu0  ;;  %v1367_v23 = vpop.f32.mrf.mxu1 }
 0x106   :  { %1016 = vst.msk [vmem:[%s1916_s3 + $0x44] sm:$0xf] %vm998_vm3, %v1218_v16  ;;  %1048 = vst.msk [vmem:[%s1916_s3 + $0xc4] sm:$0xf] %vm998_vm3, %v1250_v17  ;;  %v698_v24 = vmax.f32 %v504_v18, 0.0  ;;  %v515_v26 = vadd.f32 %v1335_v22, %v1591_v41  ;;  %v643_v27 = vadd.f32 %v1367_v23, %v1591_v41 }
 0x107   :  { %v730_v25 = vmax.f32 %v632_v19, 0.0  ;;  %v1223_v28 = vpack.c.bf16 %v700_v20, %v700_v20  ;;  %v1255_v29 = vpack.c.bf16 %v732_v21, %v732_v21  ;;  %v506_v30 = vpop.f32.mrf.mxu0  ;;  %v634_v31 = vpop.f32.mrf.mxu1 }
 0x108   :  { %v1221_v32 = vpack.c.bf16 %v698_v24, %v698_v24  ;;  %v701_v34 = vmax.f32 %v515_v26, 0.0  ;;  %v733_v35 = vmax.f32 %v643_v27, 0.0  ;;  %v507_v36 = vadd.f32 %v1591_v41, %v506_v30 }
 0x109   :  { %v1253_v33 = vpack.c.bf16 %v730_v25, %v730_v25  ;;  %1021 = vst.msk [vmem:[%s1916_s3 + $0x58] sm:$0xf] %vm998_vm3, %v1223_v28  ;;  %1053 = vst.msk [vmem:[%s1916_s3 + $0xd8] sm:$0xf] %vm998_vm3, %v1255_v29  ;;  %v635_v37 = vadd.f32 %v1591_v41, %v634_v31  ;;  %v1338_v38 = vpop.f32.mrf.mxu0  ;;  %v1370_v39 = vpop.f32.mrf.mxu1 }
 0x10a   :  { %1019 = vst.msk [vmem:[%s1916_s3 + $0x50] sm:$0xf] %vm998_vm3, %v1221_v32  ;;  %v1224_v40 = vpack.c.bf16 %v701_v34, %v701_v34  ;;  %v1256_v42 = vpack.c.bf16 %v733_v35, %v733_v35  ;;  %v528_v43 = vadd.f32 %v1338_v38, %v1591_v41  ;;  %v656_v44 = vadd.f32 %v1370_v39, %v1591_v41 }
 0x10b   :  { %1051 = vst.msk [vmem:[%s1916_s3 + $0xd0] sm:$0xf] %vm998_vm3, %v1253_v33  ;;  %v699_v45 = vmax.f32 %v507_v36, 0.0  ;;  %v731_v46 = vmax.f32 %v635_v37, 0.0  ;;  %v519_v47 = vpop.f32.mrf.mxu0  ;;  %v647_v48 = vpop.f32.mrf.mxu1 }
 0x10c   :  { %1022 = vst.msk [vmem:[%s1916_s3 + $0x5c] sm:$0xf] %vm998_vm3, %v1224_v40  ;;  %1054 = vst.msk [vmem:[%s1916_s3 + $0xdc] sm:$0xf] %vm998_vm3, %v1256_v42  ;;  %v704_v49 = vmax.f32 %v528_v43, 0.0  ;;  %v736_v50 = vmax.f32 %v656_v44, 0.0  ;;  %v520_v51 = vadd.f32 %v1591_v41, %v519_v47  ;;  %v648_v52 = vadd.f32 %v1591_v41, %v647_v48 }
 0x10d   :  { %v1222_v53 = vpack.c.bf16 %v699_v45, %v699_v45  ;;  %v1254_v54 = vpack.c.bf16 %v731_v46, %v731_v46  ;;  %v1339_v55 = vpop.f32.mrf.mxu0  ;;  %v1371_v56 = vpop.f32.mrf.mxu1 }
 0x10e   :  { %v1227_v57 = vpack.c.bf16 %v704_v49, %v704_v49  ;;  %v1259_v58 = vpack.c.bf16 %v736_v50, %v736_v50  ;;  %v702_v59 = vmax.f32 %v520_v51, 0.0  ;;  %v734_v60 = vmax.f32 %v648_v52, 0.0 }
 0x10f   :  { %1020 = vst.msk [vmem:[%s1916_s3 + $0x54] sm:$0xf] %vm998_vm3, %v1222_v53  ;;  %1052 = vst.msk [vmem:[%s1916_s3 + $0xd4] sm:$0xf] %vm998_vm3, %v1254_v54  ;;  %v531_v61 = vadd.f32 %v1339_v55, %v1591_v41  ;;  %v659_v62 = vadd.f32 %v1371_v56, %v1591_v41  ;;  %v522_v63 = vpop.f32.mrf.mxu0  ;;  %v650_v0 = vpop.f32.mrf.mxu1 }
 0x110   :  { %1025 = vst.msk [vmem:[%s1916_s3 + $0x68] sm:$0xf] %vm998_vm3, %v1227_v57  ;;  %1057 = vst.msk [vmem:[%s1916_s3 + $0xe8] sm:$0xf] %vm998_vm3, %v1259_v58  ;;  %v1225_v1 = vpack.c.bf16 %v702_v59, %v702_v59  ;;  %v1257_v2 = vpack.c.bf16 %v734_v60, %v734_v60  ;;  %v523_v3 = vadd.f32 %v1591_v41, %v522_v63 }
 0x111   :  { %v651_v4 = vadd.f32 %v1591_v41, %v650_v0  ;;  %v705_v5 = vmax.f32 %v531_v61, 0.0  ;;  %v737_v6 = vmax.f32 %v659_v62, 0.0  ;;  %v1342_v7 = vpop.f32.mrf.mxu0  ;;  %v1374_v8 = vpop.f32.mrf.mxu1 }
 0x112   :  { %1023 = vst.msk [vmem:[%s1916_s3 + $0x60] sm:$0xf] %vm998_vm3, %v1225_v1  ;;  %1055 = vst.msk [vmem:[%s1916_s3 + $0xe0] sm:$0xf] %vm998_vm3, %v1257_v2  ;;  %v703_v9 = vmax.f32 %v523_v3, 0.0  ;;  %v544_v11 = vadd.f32 %v1342_v7, %v1591_v41  ;;  %v672_v12 = vadd.f32 %v1374_v8, %v1591_v41 }
 0x113   :  { %v735_v10 = vmax.f32 %v651_v4, 0.0  ;;  %v1228_v13 = vpack.c.bf16 %v705_v5, %v705_v5  ;;  %v1260_v14 = vpack.c.bf16 %v737_v6, %v737_v6  ;;  %v535_v15 = vpop.f32.mrf.mxu0  ;;  %v663_v16 = vpop.f32.mrf.mxu1 }
 0x114   :  { %v1226_v17 = vpack.c.bf16 %v703_v9, %v703_v9  ;;  %v708_v19 = vmax.f32 %v544_v11, 0.0  ;;  %v740_v20 = vmax.f32 %v672_v12, 0.0  ;;  %v536_v21 = vadd.f32 %v1591_v41, %v535_v15 }
 0x115   :  { %v1258_v18 = vpack.c.bf16 %v735_v10, %v735_v10  ;;  %1026 = vst.msk [vmem:[%s1916_s3 + $0x6c] sm:$0xf] %vm998_vm3, %v1228_v13  ;;  %1058 = vst.msk [vmem:[%s1916_s3 + $0xec] sm:$0xf] %vm998_vm3, %v1260_v14  ;;  %v664_v22 = vadd.f32 %v1591_v41, %v663_v16  ;;  %v1343_v23 = vpop.f32.mrf.mxu0  ;;  %v1375_v24 = vpop.f32.mrf.mxu1 }
 0x116   :  { %1024 = vst.msk [vmem:[%s1916_s3 + $0x64] sm:$0xf] %vm998_vm3, %v1226_v17  ;;  %v1231_v25 = vpack.c.bf16 %v708_v19, %v708_v19  ;;  %v1263_v26 = vpack.c.bf16 %v740_v20, %v740_v20  ;;  %v547_v27 = vadd.f32 %v1343_v23, %v1591_v41  ;;  %v675_v28 = vadd.f32 %v1375_v24, %v1591_v41 }
 0x117   :  { %1056 = vst.msk [vmem:[%s1916_s3 + $0xe4] sm:$0xf] %vm998_vm3, %v1258_v18  ;;  %v706_v29 = vmax.f32 %v536_v21, 0.0  ;;  %v738_v30 = vmax.f32 %v664_v22, 0.0  ;;  %v538_v31 = vpop.f32.mrf.mxu0  ;;  %v666_v32 = vpop.f32.mrf.mxu1 }
 0x118   :  { %1029 = vst.msk [vmem:[%s1916_s3 + $0x78] sm:$0xf] %vm998_vm3, %v1231_v25  ;;  %1061 = vst.msk [vmem:[%s1916_s3 + $0xf8] sm:$0xf] %vm998_vm3, %v1263_v26  ;;  %v709_v33 = vmax.f32 %v547_v27, 0.0  ;;  %v741_v34 = vmax.f32 %v675_v28, 0.0  ;;  %v539_v35 = vadd.f32 %v1591_v41, %v538_v31  ;;  %v667_v36 = vadd.f32 %v1591_v41, %v666_v32 }
 0x119   :  { %v1229_v37 = vpack.c.bf16 %v706_v29, %v706_v29  ;;  %v1261_v38 = vpack.c.bf16 %v738_v30, %v738_v30 }
 0x11a   :  { %v1232_v39 = vpack.c.bf16 %v709_v33, %v709_v33  ;;  %v1264_v40 = vpack.c.bf16 %v741_v34, %v741_v34  ;;  %v707_v42 = vmax.f32 %v539_v35, 0.0  ;;  %v739_v43 = vmax.f32 %v667_v36, 0.0 }
 0x11b   :  { %1027 = vst.msk [vmem:[%s1916_s3 + $0x70] sm:$0xf] %vm998_vm3, %v1229_v37  ;;  %1059 = vst.msk [vmem:[%s1916_s3 + $0xf0] sm:$0xf] %vm998_vm3, %v1261_v38 }
 0x11c   :  { %1030 = vst.msk [vmem:[%s1916_s3 + $0x7c] sm:$0xf] %vm998_vm3, %v1232_v39  ;;  %1062 = vst.msk [vmem:[%s1916_s3 + $0xfc] sm:$0xf] %vm998_vm3, %v1264_v40  ;;  %v1230_v41 = vpack.c.bf16 %v707_v42, %v707_v42  ;;  %v1262_v44 = vpack.c.bf16 %v739_v43, %v739_v43 }
 0x11e   :  { %1028 = vst.msk [vmem:[%s1916_s3 + $0x74] sm:$0xf] %vm998_vm3, %v1230_v41  ;;  %1060 = vst.msk [vmem:[%s1916_s3 + $0xf4] sm:$0xf] %vm998_vm3, %v1262_v44 }

// kernel: pnc_forward.9
= control target key start
LH: loop header
LB: loop body
LE: loop exit
PB: predicated region body
PF: predicated region fallthrough
CT: control target
= control target key end

     0   :  { %vm766_vm0 = vcmask 261120   ;;  %vm1259_vm1 = vcmask 519168   ;;  %s2394_s1 = inlined_call_operand.vmem [shape: bf16[800,64], index: 1, kind: input, shape index: {}]   ;;  %s2395_s0 = inlined_call_operand.vmem [shape: bf16[128,800], index: 0, kind: input, shape index: {}]   ;;  %s2396_s2 = inlined_call_operand.vmem [shape: f32[1,64], index: 2, kind: input, shape index: {}]   ;;  %s2397_s3 = inlined_call_operand.vmem [shape: bf16[128,64], index: 3, kind: output, shape index: {}]  }
   0x1   :  { %v1665_v0 = vld [vmem:[%s2394_s1 + $0x78] sm:$0xff]   ;;  %v1669_v4 = vld [vmem:[%s2394_s1 + $0x70] sm:$0xff]   ;;  %v1673_v8 = vld [vmem:[%s2394_s1 + $0x68] sm:$0xff]  }
   0x2   :  { %v1666_v1 = vld [vmem:[%s2394_s1 + $0xf8] sm:$0xff]   ;;  %1427 = vmatprep.subr.bf16.mxu0 %v1665_v0  ;;  %v1670_v5 = vld [vmem:[%s2394_s1 + $0xf0] sm:$0xff]   ;;  %v1674_v9 = vld [vmem:[%s2394_s1 + $0xe8] sm:$0xff]  }
   0x3   :  { %v1667_v2 = vld [vmem:[%s2394_s1 + $0x38] sm:$0xff]   ;;  %1491 = vmatprep.subr.bf16.mxu1 %v1666_v1  ;;  %v1671_v6 = vld [vmem:[%s2394_s1 + $0x30] sm:$0xff]   ;;  %v1675_v10 = vld [vmem:[%s2394_s1 + $0x28] sm:$0xff]  }
   0x4   :  { %v1668_v3 = vld [vmem:[%s2394_s1 + $0xb8] sm:$0xff]   ;;  %1428 = vmatpush3.bf16.msra.mxu0 %v1667_v2  ;;  %v1672_v7 = vld [vmem:[%s2394_s1 + $0xb0] sm:$0xff]   ;;  %v1676_v11 = vld [vmem:[%s2394_s1 + $0xa8] sm:$0xff]  }
   0x5   :  { %1492 = vmatpush3.bf16.msra.mxu1 %v1668_v3  ;;  %1429 = vmatprep.subr.bf16.mxu0 %v1669_v4  ;;  %v1677_v12 = vld [vmem:[%s2394_s1 + $0x60] sm:$0xff]   ;;  %v1681_v16 = vld [vmem:[%s2394_s1 + $0x58] sm:$0xff]   ;;  %v1685_v20 = vld [vmem:[%s2394_s1 + $0x50] sm:$0xff]  }
   0x6   :  { %1493 = vmatprep.subr.bf16.mxu1 %v1670_v5  ;;  %v1678_v13 = vld [vmem:[%s2394_s1 + $0xe0] sm:$0xff]   ;;  %v1682_v17 = vld [vmem:[%s2394_s1 + $0xd8] sm:$0xff]   ;;  %v1686_v21 = vld [vmem:[%s2394_s1 + $0xd0] sm:$0xff]  }
   0x7   :  { %v1679_v14 = vld [vmem:[%s2394_s1 + $0x20] sm:$0xff]   ;;  %v1683_v18 = vld [vmem:[%s2394_s1 + $0x18] sm:$0xff]   ;;  %v1687_v22 = vld [vmem:[%s2394_s1 + $0x10] sm:$0xff]  }
   0x8   :  { %1430 = vmatpush3.bf16.msra.mxu0 %v1671_v6  ;;  %v1680_v15 = vld [vmem:[%s2394_s1 + $0xa0] sm:$0xff]   ;;  %v1684_v19 = vld [vmem:[%s2394_s1 + $0x98] sm:$0xff]   ;;  %v1688_v23 = vld [vmem:[%s2394_s1 + $0x90] sm:$0xff]  }
   0x9   :  { %1494 = vmatpush3.bf16.msra.mxu1 %v1672_v7  ;;  %1431 = vmatprep.subr.bf16.mxu0 %v1673_v8  ;;  %v1689_v24 = vld [vmem:[%s2394_s1 + $0x48] sm:$0xff]   ;;  %v1693_v28 = vld [vmem:[%s2394_s1 + $0x40] sm:$0xff]   ;;  %v1703_v36 = vld [vmem:[%s2394_s1 + $0x178] sm:$0xff]  }
   0xa   :  { %1495 = vmatprep.subr.bf16.mxu1 %v1674_v9  ;;  %v1690_v25 = vld [vmem:[%s2394_s1 + $0xc8] sm:$0xff]   ;;  %v1694_v29 = vld [vmem:[%s2394_s1 + $0xc0] sm:$0xff]   ;;  %v1704_v37 = vld [vmem:[%s2394_s1 + $0x138] sm:$0xff]  }
   0xb   :  { %v1691_v26 = vld [vmem:[%s2394_s1 + $0x8] sm:$0xff]   ;;  %v1695_v30 = vld [vmem:[%s2394_s1] sm:$0xff]   ;;  %v1705_v38 = vld [vmem:[%s2395_s0 + $0x3c] ss:$28 sps:$4 sm:$0xff]  }
   0xc   :  { %1432 = vmatpush3.bf16.msra.mxu0 %v1675_v10  ;;  %v1692_v27 = vld [vmem:[%s2394_s1 + $0x88] sm:$0xff]   ;;  %v1696_v31 = vld [vmem:[%s2394_s1 + $0x80] sm:$0xff]   ;;  %v1709_v40 = vld [vmem:[%s2395_s0 + $0x38] ss:$28 sps:$4 sm:$0xff]  }
   0xd   :  { %1496 = vmatpush3.bf16.msra.mxu1 %v1676_v11  ;;  %1433 = vmatprep.subr.bf16.mxu0 %v1677_v12  ;;  %v1697_v32 = vld [vmem:[%s2395_s0] ss:$28 sps:$4 sm:$0xff]   ;;  %v1700_v34 = vld [vmem:[%s2395_s0 + $0x8] ss:$28 sps:$4 sm:$0xff]   ;;  %v1711_v42 = vld [vmem:[%s2394_s1 + $0x170] sm:$0xff]  }
   0xe   :  { %1497 = vmatprep.subr.bf16.mxu1 %v1678_v13  ;;  %v1699_v33 = vld [vmem:[%s2395_s0 + $0x4] ss:$28 sps:$4 sm:$0xff]   ;;  %v1702_v35 = vld [vmem:[%s2395_s0 + $0xc] ss:$28 sps:$4 sm:$0xff]   ;;  %v1712_v43 = vld [vmem:[%s2394_s1 + $0x130] sm:$0xff]  }
   0xf   :  { %823 = vmatprep.mubr.bf16.mxu0 %v1699_v33  ;;  %920 = vmatprep.mubr.bf16.mxu1 %v1702_v35  ;;  %v1707_v39 = vld [vmem:[%s2395_s0 + $0x44] ss:$28 sps:$4 sm:$0xff]   ;;  %v1713_v44 = vld [vmem:[%s2395_s0 + $0x74] ss:$28 sps:$4 sm:$0xff]   ;;  %v1715_v45 = vld [vmem:[%s2395_s0 + $0x7c] ss:$28 sps:$4 sm:$0xff]  }
  0x10   :  { %1434 = vmatpush3.bf16.msra.mxu0 %v1679_v14  ;;  %v1710_v41 = vld [vmem:[%s2395_s0 + $0x40] ss:$28 sps:$4 sm:$0xff]   ;;  %v1719_v46 = vld [vmem:[%s2394_s1 + $0x168] sm:$0xff]   ;;  %v1718_v49 = vld [vmem:[%s2395_s0 + $0x78] ss:$28 sps:$4 sm:$0xff]  }
  0x11   :  { %1498 = vmatpush3.bf16.msra.mxu1 %v1680_v15  ;;  %1435 = vmatprep.subr.bf16.mxu0 %v1681_v16  ;;  %v1720_v47 = vld [vmem:[%s2394_s1 + $0x128] sm:$0xff]   ;;  %v1723_v51 = vld [vmem:[%s2395_s0 + $0xb4] ss:$28 sps:$4 sm:$0xff]   ;;  %v1727_v52 = vld [vmem:[%s2394_s1 + $0x160] sm:$0xff]  }
  0x12   :  { %1499 = vmatprep.subr.bf16.mxu1 %v1682_v17  ;;  %v1717_v48 = vld [vmem:[%s2395_s0 + $0x70] ss:$28 sps:$4 sm:$0xff]   ;;  %v1728_v53 = vld [vmem:[%s2394_s1 + $0x120] sm:$0xff]   ;;  %v1735_v54 = vld [vmem:[%s2394_s1 + $0x158] sm:$0xff]  }
  0x13   :  { %v1721_v50 = vld [vmem:[%s2395_s0 + $0xac] ss:$28 sps:$4 sm:$0xff]   ;;  %v1736_v55 = vld [vmem:[%s2394_s1 + $0x118] sm:$0xff]   ;;  %v1729_v58 = vld [vmem:[%s2395_s0 + $0xe4] ss:$28 sps:$4 sm:$0xff]  }
  0x14   :  { %1436 = vmatpush3.bf16.msra.mxu0 %v1683_v18  ;;  %v1725_v56 = vld [vmem:[%s2395_s0 + $0xa8] ss:$28 sps:$4 sm:$0xff]   ;;  %v1726_v57 = vld [vmem:[%s2395_s0 + $0xb0] ss:$28 sps:$4 sm:$0xff]   ;;  %v1733_v62 = vld [vmem:[%s2395_s0 + $0xe0] ss:$28 sps:$4 sm:$0xff]  }
  0x15   :  { %1500 = vmatpush3.bf16.msra.mxu1 %v1684_v19  ;;  %1437 = vmatprep.subr.bf16.mxu0 %v1685_v20  ;;  %v1731_v59 = vld [vmem:[%s2395_s0 + $0xec] ss:$28 sps:$4 sm:$0xff]   ;;  %v1743_v60 = vld [vmem:[%s2394_s1 + $0x150] sm:$0xff]   ;;  %v1737_v2 = vld [vmem:[%s2395_s0 + $0x11c] ss:$28 sps:$4 sm:$0xff]  }
  0x16   :  { %1501 = vmatprep.subr.bf16.mxu1 %v1686_v21  ;;  %v1744_v61 = vld [vmem:[%s2394_s1 + $0x110] sm:$0xff]   ;;  %v1734_v63 = vld [vmem:[%s2395_s0 + $0xe8] ss:$28 sps:$4 sm:$0xff]   ;;  %v1742_v7 = vld [vmem:[%s2395_s0 + $0x120] ss:$28 sps:$4 sm:$0xff]  }
  0x17   :  { %v1751_v0 = vld [vmem:[%s2394_s1 + $0x148] sm:$0xff]   ;;  %v1739_v3 = vld [vmem:[%s2395_s0 + $0x124] ss:$28 sps:$4 sm:$0xff]   ;;  %v1741_v6 = vld [vmem:[%s2395_s0 + $0x118] ss:$28 sps:$4 sm:$0xff]  }
  0x18   :  { %1438 = vmatpush3.bf16.msra.mxu0 %v1687_v22  ;;  %v1752_v1 = vld [vmem:[%s2394_s1 + $0x108] sm:$0xff]   ;;  %v1759_v4 = vld [vmem:[%s2394_s1 + $0x140] sm:$0xff]   ;;  %v1745_v9 = vld [vmem:[%s2395_s0 + $0x154] ss:$28 sps:$4 sm:$0xff]  }
  0x19   :  { %1502 = vmatpush3.bf16.msra.mxu1 %v1688_v23  ;;  %1439 = vmatprep.subr.bf16.mxu0 %v1689_v24  ;;  %v1760_v5 = vld [vmem:[%s2394_s1 + $0x100] sm:$0xff]   ;;  %v1767_v8 = vld [vmem:[%s2394_s1 + $0x188] sm:$0xff]   ;;  %v1747_v10 = vld [vmem:[%s2395_s0 + $0x15c] ss:$28 sps:$4 sm:$0xff]  }
  0x1a   :  { %1503 = vmatprep.subr.bf16.mxu1 %v1690_v25  ;;  %v1749_v11 = vld [vmem:[%s2395_s0 + $0x150] ss:$28 sps:$4 sm:$0xff]   ;;  %v1750_v12 = vld [vmem:[%s2395_s0 + $0x158] ss:$28 sps:$4 sm:$0xff]   ;;  %v1757_v15 = vld [vmem:[%s2395_s0 + $0x188] ss:$28 sps:$4 sm:$0xff]  }
  0x1b   :  { %v1753_v13 = vld [vmem:[%s2395_s0 + $0x18c] ss:$28 sps:$4 sm:$0xff]   ;;  %v1755_v14 = vld [vmem:[%s2395_s0 + $0x194] ss:$28 sps:$4 sm:$0xff]   ;;  %v1766_v18 = vld [vmem:[%s2395_s0 + $0x164] ss:$28 sps:$4 sm:$0xff]  }
  0x1c   :  { %1440 = vmatpush3.bf16.msra.mxu0 %v1691_v26  ;;  %v1758_v16 = vld [vmem:[%s2395_s0 + $0x190] ss:$28 sps:$4 sm:$0xff]   ;;  %v1764_v20 = vld [vmem:[%s2395_s0 + $0x160] ss:$28 sps:$4 sm:$0xff]   ;;  %v1772_v24 = vld [vmem:[%s2395_s0 + $0x48] ss:$28 sps:$4 sm:$0xff]  }
  0x1d   :  { %1504 = vmatpush3.bf16.msra.mxu1 %v1692_v27  ;;  %1441 = vmatprep.subr.bf16.mxu0 %v1693_v28  ;;  %v1763_v17 = vld [vmem:[%s2395_s0 + $0x14] ss:$28 sps:$4 sm:$0xff]   ;;  %v1768_v21 = vld [vmem:[%s2395_s0 + $0x4c] ss:$28 sps:$4 sm:$0xff]   ;;  %v1770_v22 = vld [vmem:[%s2395_s0 + $0x19c] ss:$28 sps:$4 sm:$0xff]  }
  0x1e   :  { %1505 = vmatprep.subr.bf16.mxu1 %v1694_v29  ;;  %v1761_v19 = vld [vmem:[%s2395_s0 + $0x10] ss:$28 sps:$4 sm:$0xff]   ;;  %v1774_v23 = vld [vmem:[%s2394_s1 + $0x180] sm:$0xff]   ;;  %v1773_v25 = vld [vmem:[%s2395_s0 + $0x198] ss:$28 sps:$4 sm:$0xff]  }
  0x1f   :  { %v1775_v26 = vld [vmem:[%s2395_s0 + $0x84] ss:$28 sps:$4 sm:$0xff]   ;;  %v1777_v27 = vld [vmem:[%s2395_s0 + $0x18] ss:$28 sps:$4 sm:$0xff]   ;;  %v1779_v29 = vld [vmem:[%s2395_s0 + $0x50] ss:$28 sps:$4 sm:$0xff]  }
  0x20   :  { %1442 = vmatpush3.bf16.msra.mxu0 %v1695_v30  ;;  %v1778_v28 = vld [vmem:[%s2395_s0 + $0x80] ss:$28 sps:$4 sm:$0xff]   ;;  %v1787_v35 = vld [vmem:[%s2395_s0 + $0xf8] ss:$28 sps:$4 sm:$0xff]  }
  0x21   :  { %1506 = vmatpush3.bf16.msra.mxu1 %v1696_v31  ;;  %1555 = vmatprep.subr.bf16.mxu0 %v1703_v36  ;;  %v1780_v30 = vld [vmem:[%s2395_s0 + $0xbc] ss:$28 sps:$4 sm:$0xff]   ;;  %v1782_v31 = vld [vmem:[%s2395_s0 + $0x88] ss:$28 sps:$4 sm:$0xff]  }
  0x22   :  { %1649 = vmatprep.subr.bf16.mxu1 %v1703_v36  ;;  %v1784_v33 = vld [vmem:[%s2395_s0 + $0xc0] ss:$28 sps:$4 sm:$0xff]   ;;  %v1788_v36 = vld [vmem:[%s2395_s0 + $0xf0] ss:$28 sps:$4 sm:$0xff]  }
  0x23   :  { %824 = vmatmul.mubr.bf16.vlgmr.msra.gmra.mxu0 %v1697_v32  ;;  %v1783_v32 = vld [vmem:[%s2395_s0 + $0xb8] ss:$28 sps:$4 sm:$0xff]  }
  0x24   :  { %921 = vmatmul.mubr.bf16.vlgmr.msra.gmra.mxu1 %v1700_v34  ;;  %1556 = vmatpush3.bf16.msra.mxu0 %v1704_v37  ;;  %v1785_v34 = vld [vmem:[%s2395_s0 + $0xf4] ss:$28 sps:$4 sm:$0xff]  }
  0x25   :  { %1657 = vmatpush3.bf16.msra.mxu1 %v1704_v37  ;;  %831 = vmatprep.mubr.bf16.mxu0 %v1705_v38  ;;  %v1789_v37 = vld [vmem:[%s2395_s0 + $0x130] ss:$28 sps:$4 sm:$0xff]  }
  0x26   :  { %928 = vmatprep.mubr.bf16.mxu1 %v1707_v39  ;;  %1557 = vmatprep.subr.bf16.mxu0 %v1711_v42  ;;  %v1790_v38 = vld [vmem:[%s2395_s0 + $0x12c] ss:$28 sps:$4 sm:$0xff]  }
  0x27   :  { %1650 = vmatprep.subr.bf16.mxu1 %v1711_v42  ;;  %v1792_v39 = vld [vmem:[%s2395_s0 + $0x168] ss:$28 sps:$4 sm:$0xff]  }
  0x28   :  { %1558 = vmatpush3.bf16.msra.mxu0 %v1712_v43 }
  0x29   :  { %1658 = vmatpush3.bf16.msra.mxu1 %v1712_v43  ;;  %1559 = vmatprep.subr.bf16.mxu0 %v1719_v46 }
  0x2a   :  { %1651 = vmatprep.subr.bf16.mxu1 %v1719_v46 }
  0x2b   :  { %832 = vmatmul.mubr.bf16.gmra.mxu0 %v1709_v40  ;;  %v1793_v40 = vld [vmem:[%s2395_s0 + $0x128] ss:$28 sps:$4 sm:$0xff]  }
  0x2c   :  { %929 = vmatmul.mubr.bf16.gmra.mxu1 %v1710_v41  ;;  %839 = vmatprep.mubr.bf16.mxu0 %v1713_v44  ;;  %v1794_v41 = vld [vmem:[%s2395_s0 + $0x1a0] ss:$28 sps:$4 sm:$0xff]  }
  0x2d   :  { %936 = vmatprep.mubr.bf16.mxu1 %v1715_v45  ;;  %1560 = vmatpush3.bf16.msra.mxu0 %v1720_v47  ;;  %v2144_v44 = vld [vmem:[%s2396_s2] ss:$0 sm:$0xff] }
  0x2e   :  { %1659 = vmatpush3.bf16.msra.mxu1 %v1720_v47  ;;  %1561 = vmatprep.subr.bf16.mxu0 %v1727_v52 }
  0x2f   :  { %1652 = vmatprep.subr.bf16.mxu1 %v1727_v52 }
  0x31   :  { %1562 = vmatpush3.bf16.msra.mxu0 %v1728_v53 }
  0x32   :  { %1660 = vmatpush3.bf16.msra.mxu1 %v1728_v53  ;;  %1563 = vmatprep.subr.bf16.mxu0 %v1735_v54 }
  0x33   :  { %840 = vmatmul.mubr.bf16.gmra.mxu0 %v1717_v48  ;;  %1653 = vmatprep.subr.bf16.mxu1 %v1735_v54 }
  0x34   :  { %937 = vmatmul.mubr.bf16.gmra.mxu1 %v1718_v49  ;;  %847 = vmatprep.mubr.bf16.mxu0 %v1721_v50 }
  0x35   :  { %944 = vmatprep.mubr.bf16.mxu1 %v1723_v51  ;;  %1564 = vmatpush3.bf16.msra.mxu0 %v1736_v55 }
  0x36   :  { %1661 = vmatpush3.bf16.msra.mxu1 %v1736_v55  ;;  %1565 = vmatprep.subr.bf16.mxu0 %v1743_v60 }
  0x37   :  { %1654 = vmatprep.subr.bf16.mxu1 %v1743_v60 }
  0x39   :  { %1566 = vmatpush3.bf16.msra.mxu0 %v1744_v61 }
  0x3a   :  { %1662 = vmatpush3.bf16.msra.mxu1 %v1744_v61  ;;  %1567 = vmatprep.subr.bf16.mxu0 %v1751_v0 }
  0x3b   :  { %848 = vmatmul.mubr.bf16.gmra.mxu0 %v1725_v56  ;;  %1655 = vmatprep.subr.bf16.mxu1 %v1751_v0 }
  0x3c   :  { %945 = vmatmul.mubr.bf16.gmra.mxu1 %v1726_v57  ;;  %855 = vmatprep.mubr.bf16.mxu0 %v1729_v58 }
  0x3d   :  { %952 = vmatprep.mubr.bf16.mxu1 %v1731_v59  ;;  %1568 = vmatpush3.bf16.msra.mxu0 %v1752_v1 }
  0x3e   :  { %1663 = vmatpush3.bf16.msra.mxu1 %v1752_v1  ;;  %1569 = vmatprep.subr.bf16.mxu0 %v1759_v4 }
  0x3f   :  { %1656 = vmatprep.subr.bf16.mxu1 %v1759_v4 }
  0x41   :  { %1570 = vmatpush3.bf16.msra.mxu0 %v1760_v5 }
  0x42   :  { %1664 = vmatpush3.bf16.msra.mxu1 %v1760_v5 }
  0x43   :  { %856 = vmatmul.mubr.bf16.gmra.mxu0 %v1733_v62  ;;  %1629 = vmatprep.subr.bf16.mxu1 %v1767_v8 }
  0x44   :  { %953 = vmatmul.mubr.bf16.gmra.mxu1 %v1734_v63  ;;  %863 = vmatprep.mubr.bf16.mxu0 %v1737_v2 }
  0x45   :  { %960 = vmatprep.mubr.bf16.mxu1 %v1739_v3 }
  0x4b   :  { %864 = vmatmul.mubr.bf16.gmra.mxu0 %v1741_v6 }
  0x4c   :  { %961 = vmatmul.mubr.bf16.gmra.mxu1 %v1742_v7  ;;  %871 = vmatprep.mubr.bf16.mxu0 %v1745_v9 }
  0x4d   :  { %968 = vmatprep.mubr.bf16.mxu1 %v1747_v10 }
  0x53   :  { %872 = vmatmul.mubr.bf16.gmra.mxu0 %v1749_v11 }
  0x54   :  { %969 = vmatmul.mubr.bf16.gmra.mxu1 %v1750_v12  ;;  %879 = vmatprep.mubr.bf16.mxu0 %v1753_v13 }
  0x55   :  { %976 = vmatprep.mubr.bf16.mxu1 %v1755_v14 }
  0x5b   :  { %880 = vmatmul.mubr.bf16.gmra.mxu0 %v1757_v15 }
  0x5c   :  { %977 = vmatmul.mubr.bf16.gmra.mxu1 %v1758_v16  ;;  %1017 = vmatprep.mubr.bf16.mxu0 %v1763_v17 }
  0x5d   :  { %1065 = vmatprep.mubr.bf16.mxu1 %v1766_v18 }
  0x63   :  { %1018 = vmatmul.mubr.bf16.vlgmr.msra.gmra.mxu0 %v1761_v19 }
  0x64   :  { %1066 = vmatmul.mubr.bf16.vlgmr.msra.gmra.mxu1 %v1764_v20  ;;  %1025 = vmatprep.mubr.bf16.mxu0 %v1768_v21 }
  0x65   :  { %1630 = vmatpush3.bf16.msra.mxu1 %v1767_v8  ;;  %1073 = vmatprep.mubr.bf16.mxu1 %v1770_v22 }
  0x66   :  { %1631 = vmatprep.subr.bf16.mxu1 %v1774_v23 }
  0x69   :  { %1632 = vmatpush3.bf16.msra.mxu1 %v1774_v23 }
  0x6b   :  { %1026 = vmatmul.mubr.bf16.gmra.mxu0 %v1772_v24 }
  0x6c   :  { %1074 = vmatmul.mubr.bf16.gmra.mxu1 %v1773_v25  ;;  %1033 = vmatprep.mubr.bf16.mxu0 %v1775_v26 }
  0x6d   :  { %1633 = vmatprep.mubr.msk.bf16.mxu1 %vm766_vm0, %v1777_v27 }
  0x73   :  { %1034 = vmatmul.mubr.bf16.gmra.mxu0 %v1778_v28 }
  0x74   :  { %1634 = vmatmul.mubr.msk.bf16.vlgmr.msra.gmra.mxu1 %vm766_vm0, %v1779_v29  ;;  %1041 = vmatprep.mubr.bf16.mxu0 %v1780_v30 }
  0x75   :  { %1637 = vmatprep.mubr.msk.bf16.mxu1 %vm766_vm0, %v1782_v31 }
  0x7b   :  { %1042 = vmatmul.mubr.bf16.gmra.mxu0 %v1783_v32 }
  0x7c   :  { %1638 = vmatmul.mubr.msk.bf16.gmra.mxu1 %vm766_vm0, %v1784_v33  ;;  %1049 = vmatprep.mubr.bf16.mxu0 %v1785_v34 }
  0x7d   :  { %1641 = vmatprep.mubr.msk.bf16.mxu1 %vm766_vm0, %v1787_v35 }
  0x83   :  { %1050 = vmatmul.mubr.bf16.gmra.mxu0 %v1788_v36 }
  0x84   :  { %1642 = vmatmul.mubr.msk.bf16.gmra.mxu1 %vm766_vm0, %v1789_v37  ;;  %1057 = vmatprep.mubr.bf16.mxu0 %v1790_v38 }
  0x85   :  { %1645 = vmatprep.mubr.msk.bf16.mxu1 %vm766_vm0, %v1792_v39 }
  0x8b   :  { %1058 = vmatmul.mubr.bf16.gmra.mxu0 %v1793_v40 }
  0x8c   :  { %1646 = vmatmul.mubr.msk.bf16.gmra.mxu1 %vm766_vm0, %v1794_v41 }
  0xe3   :  { %v1443_v42 = vpop.f32.mrf.mxu0 }
  0xe4   :  { %v1507_v43 = vpop.f32.mrf.mxu1 }
  0xe5   :  { %v1444_v45 = vpop.f32.mrf.mxu0 }
  0xe6   :  { %v1445_v46 = vadd.f32 %v1444_v45, %v1443_v42  ;;  %v1508_v47 = vpop.f32.mrf.mxu1 }
  0xe7   :  { %v1509_v48 = vadd.f32 %v1508_v47, %v1507_v43  ;;  %v1446_v49 = vpop.f32.mrf.mxu0 }
  0xe8   :  { %v826_v50 = vadd.f32 %v1445_v46, %v2144_v44  ;;  %v1510_v51 = vpop.f32.mrf.mxu1 }
  0xe9   :  { %v1447_v52 = vpop.f32.mrf.mxu0 }
  0xea   :  { %v2147_v53 = vadd.f32 %v1509_v48, %v826_v50  ;;  %v1448_v54 = vadd.f32 %v1447_v52, %v1446_v49  ;;  %v1511_v55 = vpop.f32.mrf.mxu1 }
  0xeb   :  { %v1512_v56 = vadd.f32 %v1511_v55, %v1510_v51  ;;  %v1449_v57 = vpop.f32.mrf.mxu0 }
  0xec   :  { %v829_v58 = vadd.f32 %v1448_v54, %v2144_v44  ;;  %v1513_v59 = vpop.f32.mrf.mxu1 }
  0xed   :  { %v1450_v60 = vpop.f32.mrf.mxu0 }
  0xee   :  { %v2150_v61 = vadd.f32 %v1512_v56, %v829_v58  ;;  %v1451_v62 = vadd.f32 %v1450_v60, %v1449_v57  ;;  %v1514_v63 = vpop.f32.mrf.mxu1 }
  0xef   :  { %v1515_v0 = vadd.f32 %v1514_v63, %v1513_v59  ;;  %v1452_v1 = vpop.f32.mrf.mxu0 }
  0xf0   :  { %v834_v2 = vadd.f32 %v1451_v62, %v2144_v44  ;;  %v1516_v3 = vpop.f32.mrf.mxu1 }
  0xf1   :  { %v1453_v4 = vpop.f32.mrf.mxu0 }
  0xf2   :  { %v2153_v5 = vadd.f32 %v1515_v0, %v834_v2  ;;  %v1454_v6 = vadd.f32 %v1453_v4, %v1452_v1  ;;  %v1517_v7 = vpop.f32.mrf.mxu1 }
  0xf3   :  { %v1518_v8 = vadd.f32 %v1517_v7, %v1516_v3  ;;  %v1455_v9 = vpop.f32.mrf.mxu0 }
  0xf4   :  { %v837_v10 = vadd.f32 %v1454_v6, %v2144_v44  ;;  %v1519_v11 = vpop.f32.mrf.mxu1 }
  0xf5   :  { %v1456_v12 = vpop.f32.mrf.mxu0 }
  0xf6   :  { %v2156_v13 = vadd.f32 %v1518_v8, %v837_v10  ;;  %v1457_v14 = vadd.f32 %v1456_v12, %v1455_v9  ;;  %v1520_v15 = vpop.f32.mrf.mxu1 }
  0xf7   :  { %v1521_v16 = vadd.f32 %v1520_v15, %v1519_v11  ;;  %v1458_v17 = vpop.f32.mrf.mxu0 }
  0xf8   :  { %v842_v18 = vadd.f32 %v1457_v14, %v2144_v44  ;;  %v1522_v19 = vpop.f32.mrf.mxu1 }
  0xf9   :  { %v1459_v20 = vpop.f32.mrf.mxu0 }
  0xfa   :  { %v2159_v21 = vadd.f32 %v1521_v16, %v842_v18  ;;  %v1460_v22 = vadd.f32 %v1459_v20, %v1458_v17  ;;  %v1523_v23 = vpop.f32.mrf.mxu1 }
  0xfb   :  { %v1524_v24 = vadd.f32 %v1523_v23, %v1522_v19  ;;  %v2161_v25 = vpop.f32.mrf.mxu0 }
  0xfc   :  { %v845_v26 = vadd.f32 %v1460_v22, %v2144_v44  ;;  %v2164_v27 = vpop.f32.mrf.mxu1 }
  0xfd   :  { %v2166_v28 = vpop.f32.mrf.mxu0 }
  0xfe   :  { %v2168_v29 = vadd.f32 %v1524_v24, %v845_v26  ;;  %v2170_v30 = vpop.f32.mrf.mxu1 }
  0xff   :  { %v2172_v31 = vpop.f32.mrf.mxu0 }
 0x100   :  { %v2174_v32 = vpop.f32.mrf.mxu1 }
 0x101   :  { %v2176_v33 = vpop.f32.mrf.mxu0 }
 0x102   :  { %v2178_v34 = vpop.f32.mrf.mxu1 }
 0x103   :  { %v2180_v35 = vpop.f32.mrf.mxu0 }
 0x104   :  { %v2182_v36 = vpop.f32.mrf.mxu1 }
 0x105   :  { %v2184_v37 = vpop.f32.mrf.mxu0 }
 0x106   :  { %v2186_v38 = vpop.f32.mrf.mxu1 }
 0x107   :  { %v2188_v39 = vpop.f32.mrf.mxu0 }
 0x108   :  { %v2190_v40 = vpop.f32.mrf.mxu1 }
 0x109   :  { %v2192_v41 = vpop.f32.mrf.mxu0 }
 0x10a   :  { %v2194_v42 = vpop.f32.mrf.mxu1 }
 0x10b   :  { %v2196_v43 = vpop.f32.mrf.mxu0 }
 0x10c   :  { %v2198_v45 = vpop.f32.mrf.mxu1 }
 0x10d   :  { %v2200_v46 = vpop.f32.mrf.mxu0 }
 0x10e   :  { %v2202_v47 = vpop.f32.mrf.mxu1 }
 0x10f   :  { %v2204_v48 = vpop.f32.mrf.mxu0 }
 0x110   :  { %v2206_v49 = vpop.f32.mrf.mxu1 }
 0x111   :  { %2398 = vst [vmem:[#allocation2_spill] sm:$0xff] %v2206_v49  ;;  %v2208_v50 = vpop.f32.mrf.mxu0 }
 0x112   :  { %v2210_v51 = vpop.f32.mrf.mxu1 }
 0x113   :  { %2399 = vst [vmem:[#allocation3_spill] sm:$0xff] %v2210_v51  ;;  %v2212_v52 = vpop.f32.mrf.mxu0 }
 0x114   :  { %v2214_v54 = vpop.f32.mrf.mxu1 }
 0x115   :  { %v2216_v55 = vpop.f32.mrf.mxu0 }
 0x116   :  { %v2218_v56 = vpop.f32.mrf.mxu1 }
 0x117   :  { %v2220_v57 = vpop.f32.mrf.mxu0 }
 0x118   :  { %v2222_v58 = vpop.f32.mrf.mxu1 }
 0x119   :  { %2400 = vst [vmem:[#allocation4_spill] sm:$0xff] %v2222_v58  ;;  %v2224_v59 = vpop.f32.mrf.mxu0 }
 0x11a   :  { %v2226_v60 = vpop.f32.mrf.mxu1 }
 0x11b   :  { %2401 = vst [vmem:[#allocation5_spill] sm:$0xff] %v2226_v60  ;;  %v2228_v62 = vpop.f32.mrf.mxu0 }
 0x11c   :  { %v2230_v63 = vpop.f32.mrf.mxu1 }
 0x11d   :  { %v2232_v0 = vpop.f32.mrf.mxu0 }
 0x11e   :  { %v2234_v1 = vpop.f32.mrf.mxu1 }
 0x11f   :  { %v2236_v2 = vpop.f32.mrf.mxu0 }
 0x120   :  { %v2238_v3 = vpop.f32.mrf.mxu1 }
 0x121   :  { %2402 = vst [vmem:[#allocation6_spill] sm:$0xff] %v2238_v3  ;;  %v2240_v4 = vpop.f32.mrf.mxu0 }
 0x122   :  { %v2242_v6 = vpop.f32.mrf.mxu1 }
 0x123   :  { %2403 = vst [vmem:[#allocation7_spill] sm:$0xff] %v2242_v6  ;;  %v1571_v7 = vpop.f32.mrf.mxu0 }
 0x124   :  { %v2244_v8 = vpop.f32.mrf.mxu1 }
 0x125   :  { %2404 = vst [vmem:[#allocation8_spill] sm:$0xff] %v2244_v8  ;;  %v1572_v9 = vpop.f32.mrf.mxu0 }
 0x126   :  { %v2246_v10 = vpop.f32.mrf.mxu1  ;;  %v1573_v24 = vadd.f32 %v1572_v9, %v1571_v7 }
 0x127   :  { %2405 = vst [vmem:[#allocation9_spill] sm:$0xff] %v2246_v10  ;;  %v1574_v11 = vpop.f32.mrf.mxu0 }
 0x128   :  { %v2248_v12 = vpop.f32.mrf.mxu1  ;;  %v1020_v10 = vadd.f32 %v1573_v24, %v2147_v53 }
 0x129   :  { %2406 = vst [vmem:[#allocation10_spill] sm:$0xff] %v2248_v12  ;;  %v1575_v14 = vpop.f32.mrf.mxu0 }
 0x12a   :  { %v2250_v15 = vpop.f32.mrf.mxu1  ;;  %v1576_v58 = vadd.f32 %v1575_v14, %v1574_v11 }
 0x12b   :  { %2407 = vst [vmem:[#allocation11_spill] sm:$0xff] %v2250_v15  ;;  %v1577_v16 = vpop.f32.mrf.mxu0 }
 0x12c   :  { %v2252_v17 = vpop.f32.mrf.mxu1  ;;  %v1023_v11 = vadd.f32 %v1576_v58, %v2150_v61 }
 0x12d   :  { %v1578_v18 = vpop.f32.mrf.mxu0 }
 0x12e   :  { %v2254_v19 = vpop.f32.mrf.mxu1  ;;  %v1579_v20 = vadd.f32 %v1578_v18, %v1577_v16  ;;  %v1463_v16 = vadd.f32 %v2166_v28, %v2161_v25  ;;  %v1527_v28 = vadd.f32 %v2170_v30, %v2164_v27 }
 0x12f   :  { %v1580_v22 = vpop.f32.mrf.mxu0 }
 0x130   :  { %v2256_v23 = vpop.f32.mrf.mxu1  ;;  %v1028_v12 = vadd.f32 %v1579_v20, %v2153_v5  ;;  %v850_v25 = vadd.f32 %v1463_v16, %v2144_v44  ;;  %v1530_v16 = vadd.f32 %v2178_v34, %v2174_v32 }
 0x131   :  { %2408 = vst [vmem:[#allocation12_spill] sm:$0xff] %v2256_v23  ;;  %v1581_v26 = vpop.f32.mrf.mxu0 }
 0x132   :  { %v2258_v51 = vpop.f32.mrf.mxu1  ;;  %v1582_v49 = vadd.f32 %v1581_v26, %v1580_v22  ;;  %v1466_v22 = vadd.f32 %v2176_v33, %v2172_v31 }
 0x133   :  { %v1583_v60 = vpop.f32.mrf.mxu0 }
 0x134   :  { %v1635_v15 = vpop.f32.mrf.mxu1  ;;  %v1031_v9 = vadd.f32 %v1582_v49, %v2156_v13  ;;  %v1469_v13 = vadd.f32 %v2184_v37, %v2180_v35 }
 0x135   :  { %v1125_v6 = vadd.f32 %v1635_v15, %v1028_v12  ;;  %v1584_v3 = vpop.f32.mrf.mxu0 }
 0x136   :  { %v1116_v18 = vpop.f32.mrf.mxu1  ;;  %v1585_v14 = vadd.f32 %v1584_v3, %v1583_v60  ;;  %v853_v60 = vadd.f32 %v1466_v22, %v2144_v44 }
 0x137   :  { %v1181_v8 = vmax.f32 %v1125_v6, 0.0  ;;  %v1117_v23 = vadd.f32 %v1116_v18, %v1020_v10  ;;  %v1586_v7 = vpop.f32.mrf.mxu0  ;;  %v858_v10 = vadd.f32 %v1469_v13, %v2144_v44  ;;  %v1472_v18 = vadd.f32 %v2192_v41, %v2188_v39 }
 0x138   :  { %v1636_v5 = vpop.f32.mrf.mxu1  ;;  %v1036_v6 = vadd.f32 %v1585_v14, %v2159_v21  ;;  %v1481_v41 = vadd.f32 %v2216_v55, %v2212_v52 }
 0x139   :  { %v1413_v12 = vpack.c.bf16 %v1181_v8, %v1181_v8  ;;  %v1179_v15 = vmax.f32 %v1117_v23, 0.0  ;;  %v1128_v53 = vadd.f32 %v1636_v5, %v1031_v9  ;;  %v1587_v20 = vpop.f32.mrf.mxu0  ;;  %v947_v8 = vadd.f32 %v1527_v28, %v850_v25 }
 0x13a   :  { %v1119_v49 = vpop.f32.mrf.mxu1  ;;  %v1588_v30 = vadd.f32 %v1587_v20, %v1586_v7  ;;  %v1533_v23 = vadd.f32 %v2186_v38, %v2182_v36  ;;  %v1487_v36 = vadd.f32 %v2232_v0, %v2228_v62  ;;  %v1536_v62 = vadd.f32 %v2194_v42, %v2190_v40 }
 0x13b   :  { %1262 = vst.msk [vmem:[%s2397_s3 + $0x8] sm:$0xf] %vm1259_vm1, %v1413_v12  ;;  %v1411_v61 = vpack.c.bf16 %v1179_v15, %v1179_v15  ;;  %v1182_v31 = vmax.f32 %v1128_v53, 0.0  ;;  %v1120_v33 = vadd.f32 %v1119_v49, %v1023_v11  ;;  %v1589_v58 = vpop.f32.mrf.mxu0  ;;  %v950_v11 = vadd.f32 %v1530_v16, %v853_v60 }
 0x13c   :  { %v1639_v3 = vpop.f32.mrf.mxu1  ;;  %v1039_v38 = vadd.f32 %v1588_v30, %v2168_v29  ;;  %v955_v39 = vadd.f32 %v1533_v23, %v858_v10  ;;  %v861_v53 = vadd.f32 %v1472_v18, %v2144_v44  ;;  %v1475_v28 = vadd.f32 %v2200_v46, %v2196_v43  ;;  %v2413_v18 = vld [vmem:[#allocation12_spill] sm:$0xff] }
 0x13d   :  { %1260 = vst.msk [vmem:[%s2397_s3] sm:$0xf] %vm1259_vm1, %v1411_v61  ;;  %v1414_v27 = vpack.c.bf16 %v1182_v31, %v1182_v31  ;;  %v1180_v35 = vmax.f32 %v1120_v33, 0.0  ;;  %v1590_v37 = vpop.f32.mrf.mxu0  ;;  %v1545_v29 = vadd.f32 %v2218_v56, %v2214_v54  ;;  %v882_v55 = vadd.f32 %v1487_v36, %v2144_v44 }
 0x13e   :  { %v1591_v24 = vadd.f32 %v1590_v37, %v1589_v58  ;;  %v1132_v26 = vpop.f32.mrf.mxu1  ;;  %v1551_v61 = vadd.f32 %v2234_v1, %v2230_v63  ;;  %v1490_v40 = vadd.f32 %v2240_v4, %v2236_v2  ;;  %v874_v46 = vadd.f32 %v1481_v41, %v2144_v44  ;;  %v2410_v37 = vld [vmem:[#allocation9_spill] sm:$0xff]  ;;  %v2416_v41 = vld [vmem:[#allocation10_spill] sm:$0xff] }
 0x13f   :  { %1263 = vst.msk [vmem:[%s2397_s3 + $0xc] sm:$0xf] %vm1259_vm1, %v1414_v27  ;;  %v1412_v21 = vpack.c.bf16 %v1180_v35, %v1180_v35  ;;  %v1133_v7 = vadd.f32 %v1132_v26, %v1036_v6  ;;  %v1592_v9 = vpop.f32.mrf.mxu0  ;;  %v958_v58 = vadd.f32 %v1536_v62, %v861_v53  ;;  %v1484_v63 = vadd.f32 %v2224_v59, %v2220_v57 }
 0x140   :  { %v1044_v22 = vadd.f32 %v1591_v24, %v947_v8  ;;  %v1640_v5 = vpop.f32.mrf.mxu1  ;;  %v1615_v1 = vadd.f32 %v2254_v19, %v2252_v17  ;;  %v866_v60 = vadd.f32 %v1475_v28, %v2144_v44  ;;  %v1478_v57 = vadd.f32 %v2208_v50, %v2204_v48  ;;  %v2409_v19 = vld [vmem:[#allocation8_spill] sm:$0xff]  ;;  %v2411_v48 = vld [vmem:[#allocation6_spill] sm:$0xff]  ;;  %v2412_v50 = vld [vmem:[#allocation7_spill] sm:$0xff] }
 0x141   :  { %1261 = vst.msk [vmem:[%s2397_s3 + $0x4] sm:$0xf] %vm1259_vm1, %v1412_v21  ;;  %v1183_v32 = vmax.f32 %v1133_v7, 0.0  ;;  %v1593_v34 = vpop.f32.mrf.mxu0  ;;  %v979_v59 = vadd.f32 %v1551_v61, %v882_v55  ;;  %v885_v17 = vadd.f32 %v1490_v40, %v2144_v44  ;;  %v1609_v6 = vadd.f32 %v2410_v37, %v2409_v19  ;;  %v2418_v40 = vld [vmem:[#allocation2_spill] sm:$0xff] }
 0x142   :  { %v1141_v12 = vadd.f32 %v1639_v3, %v1044_v22  ;;  %v1594_v14 = vadd.f32 %v1593_v34, %v1592_v9  ;;  %v1135_v15 = vpop.f32.mrf.mxu1  ;;  %v1539_v3 = vadd.f32 %v2202_v47, %v2198_v45  ;;  %v971_v47 = vadd.f32 %v1545_v29, %v874_v46 }
 0x143   :  { %v1415_v0 = vpack.c.bf16 %v1183_v32, %v1183_v32  ;;  %v1136_v20 = vadd.f32 %v1135_v15, %v1039_v38  ;;  %v1595_v25 = vpop.f32.mrf.mxu0  ;;  %v877_v26 = vadd.f32 %v1484_v63, %v2144_v44  ;;  %v1554_v16 = vadd.f32 %v2412_v50, %v2411_v48 }
 0x144   :  { %v1185_v13 = vmax.f32 %v1141_v12, 0.0  ;;  %v1047_v49 = vadd.f32 %v1594_v14, %v950_v11  ;;  %v2310_v52 = vpop.f32.mrf.mxu1  ;;  %v1618_v21 = vadd.f32 %v2258_v51, %v2413_v18  ;;  %v1076_v9 = vadd.f32 %v1615_v1, %v979_v59  ;;  %v2415_v11 = vld [vmem:[#allocation5_spill] sm:$0xff]  ;;  %v2417_v12 = vld [vmem:[#allocation11_spill] sm:$0xff] }
 0x145   :  { %1264 = vst.msk [vmem:[%s2397_s3 + $0x10] sm:$0xf] %vm1259_vm1, %v1415_v0  ;;  %v1184_v42 = vmax.f32 %v1136_v20, 0.0  ;;  %v1596_v43 = vpop.f32.mrf.mxu0  ;;  %v963_v22 = vadd.f32 %v1539_v3, %v866_v60  ;;  %v1612_v14 = vadd.f32 %v2417_v12, %v2416_v41  ;;  %v1068_v53 = vadd.f32 %v1609_v6, %v971_v47 }
 0x146   :  { %v1417_v54 = vpack.c.bf16 %v1185_v13, %v1185_v13  ;;  %v1144_v56 = vadd.f32 %v1640_v5, %v1047_v49  ;;  %v1597_v31 = vadd.f32 %v1596_v43, %v1595_v25  ;;  %v1148_v33 = vpop.f32.mrf.mxu1  ;;  %v2414_v5 = vld [vmem:[#allocation4_spill] sm:$0xff]  ;;  %v869_v62 = vadd.f32 %v1478_v57, %v2144_v44 }
 0x147   :  { %v1416_v2 = vpack.c.bf16 %v1184_v42, %v1184_v42  ;;  %v1598_v4 = vpop.f32.mrf.mxu0  ;;  %v1548_v36 = vadd.f32 %v2415_v11, %v2414_v5  ;;  %v2419_v42 = vld [vmem:[#allocation3_spill] sm:$0xff] }
 0x148   :  { %1266 = vst.msk [vmem:[%s2397_s3 + $0x18] sm:$0xf] %vm1259_vm1, %v1417_v54  ;;  %v1186_v27 = vmax.f32 %v1144_v56, 0.0  ;;  %v1052_v30 = vadd.f32 %v1597_v31, %v955_v39  ;;  %v2333_v35 = vpop.f32.mrf.mxu1  ;;  %v982_v39 = vadd.f32 %v1554_v16, %v885_v17  ;;  %v1542_v43 = vadd.f32 %v2419_v42, %v2418_v40 }
 0x149   :  { %1265 = vst.msk [vmem:[%s2397_s3 + $0x14] sm:$0xf] %vm1259_vm1, %v1416_v2  ;;  %v1599_v45 = vpop.f32.mrf.mxu0  ;;  %v974_v29 = vadd.f32 %v1548_v36, %v877_v26 }
 0x14a   :  { %v1418_v8 = vpack.c.bf16 %v1186_v27, %v1186_v27  ;;  %v1149_v10 = vadd.f32 %v1148_v33, %v1052_v30  ;;  %v1600_v23 = vadd.f32 %v1599_v45, %v1598_v4  ;;  %v1151_v24 = vpop.f32.mrf.mxu1  ;;  %v1079_v61 = vadd.f32 %v1618_v21, %v982_v39 }
 0x14b   :  { %v1601_v7 = vpop.f32.mrf.mxu0  ;;  %v1071_v63 = vadd.f32 %v1612_v14, %v974_v29  ;;  %v966_v1 = vadd.f32 %v1542_v43, %v869_v62 }
 0x14c   :  { %1267 = vst.msk [vmem:[%s2397_s3 + $0x1c] sm:$0xf] %vm1259_vm1, %v1418_v8  ;;  %v1187_v32 = vmax.f32 %v1149_v10, 0.0  ;;  %v1055_v34 = vadd.f32 %v1600_v23, %v958_v58  ;;  %v1647_v38 = vpop.f32.mrf.mxu1 }
 0x14d   :  { %v1173_v15 = vadd.f32 %v1647_v38, %v1076_v9  ;;  %v1602_v51 = vpop.f32.mrf.mxu0 }
 0x14e   :  { %v1419_v0 = vpack.c.bf16 %v1187_v32, %v1187_v32  ;;  %v1152_v20 = vadd.f32 %v1151_v24, %v1055_v34  ;;  %v1603_v25 = vadd.f32 %v1602_v51, %v1601_v7  ;;  %v1164_v28 = vpop.f32.mrf.mxu1 }
 0x14f   :  { %v1193_v13 = vmax.f32 %v1173_v15, 0.0  ;;  %v1165_v49 = vadd.f32 %v1164_v28, %v1068_v53  ;;  %v1604_v55 = vpop.f32.mrf.mxu0 }
 0x150   :  { %1268 = vst.msk [vmem:[%s2397_s3 + $0x20] sm:$0xf] %vm1259_vm1, %v1419_v0  ;;  %v1188_v46 = vmax.f32 %v1152_v20, 0.0  ;;  %v1060_v54 = vadd.f32 %v1603_v25, %v963_v22  ;;  %v1648_v44 = vpop.f32.mrf.mxu1 }
 0x151   :  { %v1425_v56 = vpack.c.bf16 %v1193_v13, %v1193_v13  ;;  %v1191_v31 = vmax.f32 %v1165_v49, 0.0  ;;  %v1176_v33 = vadd.f32 %v1648_v44, %v1079_v61  ;;  %v1605_v58 = vpop.f32.mrf.mxu0 }
 0x152   :  { %v1420_v2 = vpack.c.bf16 %v1188_v46, %v1188_v46  ;;  %v1157_v4 = vadd.f32 %v2310_v52, %v1060_v54  ;;  %v1606_v60 = vadd.f32 %v1605_v58, %v1604_v55  ;;  %v1167_v3 = vpop.f32.mrf.mxu1 }
 0x153   :  { %1274 = vst.msk [vmem:[%s2397_s3 + $0x38] sm:$0xf] %vm1259_vm1, %v1425_v56  ;;  %v1423_v27 = vpack.c.bf16 %v1191_v31, %v1191_v31  ;;  %v1194_v30 = vmax.f32 %v1176_v33, 0.0  ;;  %v1168_v57 = vadd.f32 %v1167_v3, %v1071_v63 }
 0x154   :  { %1269 = vst.msk [vmem:[%s2397_s3 + $0x24] sm:$0xf] %vm1259_vm1, %v1420_v2  ;;  %v1189_v59 = vmax.f32 %v1157_v4, 0.0  ;;  %v1063_v17 = vadd.f32 %v1606_v60, %v966_v1 }
 0x155   :  { %1272 = vst.msk [vmem:[%s2397_s3 + $0x30] sm:$0xf] %vm1259_vm1, %v1423_v27  ;;  %v1426_v52 = vpack.c.bf16 %v1194_v30, %v1194_v30  ;;  %v1192_v19 = vmax.f32 %v1168_v57, 0.0 }
 0x156   :  { %v1421_v37 = vpack.c.bf16 %v1189_v59, %v1189_v59  ;;  %v1160_v6 = vadd.f32 %v2333_v35, %v1063_v17 }
 0x157   :  { %1275 = vst.msk [vmem:[%s2397_s3 + $0x3c] sm:$0xf] %vm1259_vm1, %v1426_v52  ;;  %v1424_v45 = vpack.c.bf16 %v1192_v19, %v1192_v19 }
 0x158   :  { %1270 = vst.msk [vmem:[%s2397_s3 + $0x28] sm:$0xf] %vm1259_vm1, %v1421_v37  ;;  %v1190_v47 = vmax.f32 %v1160_v6, 0.0 }
 0x159   :  { %1273 = vst.msk [vmem:[%s2397_s3 + $0x34] sm:$0xf] %vm1259_vm1, %v1424_v45 }
 0x15a   :  { %v1422_v8 = vpack.c.bf16 %v1190_v47, %v1190_v47 }
 0x15c   :  { %1271 = vst.msk [vmem:[%s2397_s3 + $0x2c] sm:$0xf] %vm1259_vm1, %v1422_v8 }

// kernel: pnc_forward.10
= control target key start
LH: loop header
LB: loop body
LE: loop exit
PB: predicated region body
PF: predicated region fallthrough
CT: control target
= control target key end

     0   :  { %vm372_vm0 = vcmask 523264   ;;  %s913_s1 = inlined_call_operand.vmem [shape: bf16[576,128], index: 1, kind: input, shape index: {}]   ;;  %s914_s0 = inlined_call_operand.vmem [shape: bf16[32,576], index: 0, kind: input, shape index: {}]   ;;  %s915_s2 = inlined_call_operand.vmem [shape: f32[1,128], index: 2, kind: input, shape index: {}]   ;;  %s916_s3 = inlined_call_operand.vmem [shape: bf16[32,128], index: 3, kind: output, shape index: {}]  }
   0x1   :  { %v696_v0 = vld [vmem:[%s913_s1 + $0x78] sm:$0xff]   ;;  %v700_v4 = vld [vmem:[%s913_s1 + $0x70] sm:$0xff]   ;;  %v704_v8 = vld [vmem:[%s913_s1 + $0x68] sm:$0xff]  }
   0x2   :  { %v697_v1 = vld [vmem:[%s913_s1 + $0xf8] sm:$0xff]   ;;  %622 = vmatprep.subr.bf16.mxu0 %v696_v0  ;;  %v701_v5 = vld [vmem:[%s913_s1 + $0xf0] sm:$0xff]   ;;  %v705_v9 = vld [vmem:[%s913_s1 + $0xe8] sm:$0xff]  }
   0x3   :  { %v698_v2 = vld [vmem:[%s913_s1 + $0x38] sm:$0xff]   ;;  %650 = vmatprep.subr.bf16.mxu1 %v697_v1  ;;  %v702_v6 = vld [vmem:[%s913_s1 + $0x30] sm:$0xff]   ;;  %v706_v10 = vld [vmem:[%s913_s1 + $0x28] sm:$0xff]  }
   0x4   :  { %v699_v3 = vld [vmem:[%s913_s1 + $0xb8] sm:$0xff]   ;;  %623 = vmatpush3.bf16.msra.mxu0 %v698_v2  ;;  %v703_v7 = vld [vmem:[%s913_s1 + $0xb0] sm:$0xff]   ;;  %v707_v11 = vld [vmem:[%s913_s1 + $0xa8] sm:$0xff]  }
   0x5   :  { %651 = vmatpush3.bf16.msra.mxu1 %v699_v3  ;;  %624 = vmatprep.subr.bf16.mxu0 %v700_v4  ;;  %v708_v12 = vld [vmem:[%s913_s1 + $0x60] sm:$0xff]   ;;  %v712_v16 = vld [vmem:[%s913_s1 + $0x58] sm:$0xff]   ;;  %v716_v20 = vld [vmem:[%s913_s1 + $0x50] sm:$0xff]  }
   0x6   :  { %652 = vmatprep.subr.bf16.mxu1 %v701_v5  ;;  %v709_v13 = vld [vmem:[%s913_s1 + $0xe0] sm:$0xff]   ;;  %v713_v17 = vld [vmem:[%s913_s1 + $0xd8] sm:$0xff]   ;;  %v717_v21 = vld [vmem:[%s913_s1 + $0xd0] sm:$0xff]  }
   0x7   :  { %v710_v14 = vld [vmem:[%s913_s1 + $0x20] sm:$0xff]   ;;  %v714_v18 = vld [vmem:[%s913_s1 + $0x18] sm:$0xff]   ;;  %v718_v22 = vld [vmem:[%s913_s1 + $0x10] sm:$0xff]  }
   0x8   :  { %625 = vmatpush3.bf16.msra.mxu0 %v702_v6  ;;  %v711_v15 = vld [vmem:[%s913_s1 + $0xa0] sm:$0xff]   ;;  %v715_v19 = vld [vmem:[%s913_s1 + $0x98] sm:$0xff]   ;;  %v719_v23 = vld [vmem:[%s913_s1 + $0x90] sm:$0xff]  }
   0x9   :  { %653 = vmatpush3.bf16.msra.mxu1 %v703_v7  ;;  %626 = vmatprep.subr.bf16.mxu0 %v704_v8  ;;  %v720_v24 = vld [vmem:[%s913_s1 + $0x48] sm:$0xff]   ;;  %v724_v28 = vld [vmem:[%s913_s1 + $0x40] sm:$0xff]   ;;  %v734_v36 = vld [vmem:[%s913_s1 + $0x118] sm:$0xff]  }
   0xa   :  { %654 = vmatprep.subr.bf16.mxu1 %v705_v9  ;;  %v721_v25 = vld [vmem:[%s913_s1 + $0xc8] sm:$0xff]   ;;  %v725_v29 = vld [vmem:[%s913_s1 + $0xc0] sm:$0xff]   ;;  %v735_v37 = vld [vmem:[%s913_s1 + $0x110] sm:$0xff]  }
   0xb   :  { %v722_v26 = vld [vmem:[%s913_s1 + $0x8] sm:$0xff]   ;;  %v726_v30 = vld [vmem:[%s913_s1] sm:$0xff]  }
   0xc   :  { %627 = vmatpush3.bf16.msra.mxu0 %v706_v10  ;;  %v723_v27 = vld [vmem:[%s913_s1 + $0x88] sm:$0xff]   ;;  %v727_v31 = vld [vmem:[%s913_s1 + $0x80] sm:$0xff]  }
   0xd   :  { %655 = vmatpush3.bf16.msra.mxu1 %v707_v11  ;;  %628 = vmatprep.subr.bf16.mxu0 %v708_v12  ;;  %v728_v32 = vld [vmem:[%s914_s0] ss:$20 sps:$4 sm:$0xff]   ;;  %v730_v33 = vld [vmem:[%s914_s0 + $0x4] ss:$20 sps:$4 sm:$0xff]   ;;  %v731_v34 = vld [vmem:[%s914_s0 + $0x8] ss:$20 sps:$4 sm:$0xff]  }
   0xe   :  { %656 = vmatprep.subr.bf16.mxu1 %v709_v13  ;;  %v733_v35 = vld [vmem:[%s914_s0 + $0xc] ss:$20 sps:$4 sm:$0xff]   ;;  %411 = vmatprep.mubr.bf16.mxu0 %v730_v33  ;;  %v738_v39 = vld [vmem:[%s914_s0 + $0x34] ss:$20 sps:$4 sm:$0xff]   ;;  %v741_v42 = vld [vmem:[%s914_s0 + $0x30] ss:$20 sps:$4 sm:$0xff]  }
   0xf   :  { %460 = vmatprep.mubr.bf16.mxu1 %v733_v35  ;;  %v736_v38 = vld [vmem:[%s914_s0 + $0x2c] ss:$20 sps:$4 sm:$0xff]   ;;  %v740_v40 = vld [vmem:[%s914_s0 + $0x28] ss:$20 sps:$4 sm:$0xff]   ;;  %v744_v43 = vld [vmem:[%s914_s0 + $0x10] ss:$20 sps:$4 sm:$0xff]  }
  0x10   :  { %629 = vmatpush3.bf16.msra.mxu0 %v710_v14  ;;  %v742_v41 = vld [vmem:[%s913_s1 + $0x108] sm:$0xff]   ;;  %v743_v44 = vld [vmem:[%s913_s1 + $0x100] sm:$0xff]  }
  0x11   :  { %657 = vmatpush3.bf16.msra.mxu1 %v711_v15  ;;  %630 = vmatprep.subr.bf16.mxu0 %v712_v16  ;;  %v745_v45 = vld [vmem:[%s914_s0 + $0x38] ss:$20 sps:$4 sm:$0xff]   ;;  %v554_v59 = vld [vmem:[%s915_s2] ss:$0 sm:$0xff] }
  0x12   :  { %658 = vmatprep.subr.bf16.mxu1 %v713_v17 }
  0x14   :  { %631 = vmatpush3.bf16.msra.mxu0 %v714_v18 }
  0x15   :  { %659 = vmatpush3.bf16.msra.mxu1 %v715_v19  ;;  %632 = vmatprep.subr.bf16.mxu0 %v716_v20 }
  0x16   :  { %660 = vmatprep.subr.bf16.mxu1 %v717_v21 }
  0x18   :  { %633 = vmatpush3.bf16.msra.mxu0 %v718_v22 }
  0x19   :  { %661 = vmatpush3.bf16.msra.mxu1 %v719_v23  ;;  %634 = vmatprep.subr.bf16.mxu0 %v720_v24 }
  0x1a   :  { %662 = vmatprep.subr.bf16.mxu1 %v721_v25 }
  0x1c   :  { %635 = vmatpush3.bf16.msra.mxu0 %v722_v26 }
  0x1d   :  { %663 = vmatpush3.bf16.msra.mxu1 %v723_v27  ;;  %636 = vmatprep.subr.bf16.mxu0 %v724_v28 }
  0x1e   :  { %664 = vmatprep.subr.bf16.mxu1 %v725_v29 }
  0x20   :  { %637 = vmatpush3.bf16.msra.mxu0 %v726_v30 }
  0x21   :  { %665 = vmatpush3.bf16.msra.mxu1 %v727_v31  ;;  %684 = vmatprep.subr.bf16.mxu0 %v734_v36 }
  0x23   :  { %412 = vmatmul.mubr.bf16.vlgmr.msra.gmra.mxu0 %v728_v32 }
  0x24   :  { %461 = vmatmul.mubr.bf16.vlgmr.msra.gmra.mxu1 %v731_v34  ;;  %685 = vmatpush3.bf16.msra.mxu0 %v734_v36 }
  0x25   :  { %686 = vmatprep.subr.bf16.mxu0 %v735_v37  ;;  %419 = vmatprep.mubr.bf16.mxu0 %v736_v38 }
  0x26   :  { %468 = vmatprep.mubr.bf16.mxu1 %v738_v39 }
  0x28   :  { %687 = vmatpush3.bf16.msra.mxu0 %v735_v37 }
  0x29   :  { %688 = vmatprep.subr.bf16.mxu0 %v742_v41 }
  0x2b   :  { %420 = vmatmul.mubr.bf16.gmra.mxu0 %v740_v40 }
  0x2c   :  { %469 = vmatmul.mubr.bf16.gmra.mxu1 %v741_v42  ;;  %692 = vmatprep.mubr.msk.bf16.mxu0 %vm372_vm0, %v744_v43 }
  0x2d   :  { %689 = vmatpush3.bf16.msra.mxu0 %v742_v41 }
  0x2e   :  { %690 = vmatprep.subr.bf16.mxu0 %v743_v44 }
  0x31   :  { %691 = vmatpush3.bf16.msra.mxu0 %v743_v44 }
  0x34   :  { %693 = vmatmul.mubr.msk.bf16.vlgmr.msra.gmra.mxu0 %vm372_vm0, %v745_v45 }
  0xe3   :  { %v638_v46 = vpop.f32.mrf.mxu0 }
  0xe4   :  { %v666_v47 = vpop.f32.mrf.mxu1 }
  0xe5   :  { %v639_v48 = vpop.f32.mrf.mxu0 }
  0xe6   :  { %v667_v49 = vpop.f32.mrf.mxu1  ;;  %v640_v60 = vadd.f32 %v639_v48, %v638_v46 }
  0xe7   :  { %v641_v50 = vpop.f32.mrf.mxu0  ;;  %v668_v6 = vadd.f32 %v667_v49, %v666_v47 }
  0xe8   :  { %v669_v51 = vpop.f32.mrf.mxu1  ;;  %v414_v5 = vadd.f32 %v640_v60, %v554_v59 }
  0xe9   :  { %v642_v52 = vpop.f32.mrf.mxu0 }
  0xea   :  { %v670_v53 = vpop.f32.mrf.mxu1  ;;  %v643_v1 = vadd.f32 %v642_v52, %v641_v50  ;;  %v463_v16 = vadd.f32 %v668_v6, %v414_v5 }
  0xeb   :  { %v644_v54 = vpop.f32.mrf.mxu0  ;;  %v671_v14 = vadd.f32 %v670_v53, %v669_v51 }
  0xec   :  { %v672_v55 = vpop.f32.mrf.mxu1  ;;  %v417_v11 = vadd.f32 %v643_v1, %v554_v59 }
  0xed   :  { %v645_v56 = vpop.f32.mrf.mxu0 }
  0xee   :  { %v646_v57 = vadd.f32 %v645_v56, %v644_v54  ;;  %v673_v58 = vpop.f32.mrf.mxu1  ;;  %v466_v20 = vadd.f32 %v671_v14, %v417_v11 }
  0xef   :  { %v674_v61 = vadd.f32 %v673_v58, %v672_v55  ;;  %v647_v62 = vpop.f32.mrf.mxu0 }
  0xf0   :  { %v422_v63 = vadd.f32 %v646_v57, %v554_v59  ;;  %v675_v0 = vpop.f32.mrf.mxu1 }
  0xf1   :  { %v648_v2 = vpop.f32.mrf.mxu0 }
  0xf2   :  { %v649_v3 = vadd.f32 %v648_v2, %v647_v62  ;;  %v676_v4 = vpop.f32.mrf.mxu1  ;;  %v471_v7 = vadd.f32 %v674_v61, %v422_v63 }
  0xf3   :  { %v677_v9 = vadd.f32 %v676_v4, %v675_v0 }
  0xf4   :  { %v425_v8 = vadd.f32 %v649_v3, %v554_v59  ;;  %v694_v10 = vpop.f32.mrf.mxu0 }
  0xf5   :  { %v520_v15 = vadd.f32 %v694_v10, %v471_v7 }
  0xf6   :  { %v511_v12 = vpop.f32.mrf.mxu0  ;;  %v474_v13 = vadd.f32 %v677_v9, %v425_v8 }
  0xf7   :  { %v512_v18 = vadd.f32 %v511_v12, %v463_v16  ;;  %v528_v22 = vmax.f32 %v520_v15, 0.0 }
  0xf8   :  { %v695_v17 = vpop.f32.mrf.mxu0 }
  0xf9   :  { %v523_v19 = vadd.f32 %v695_v17, %v474_v13  ;;  %v526_v25 = vmax.f32 %v512_v18, 0.0 }
  0xfa   :  { %v514_v21 = vpop.f32.mrf.mxu0 }
  0xfb   :  { %v529_v23 = vmax.f32 %v523_v19, 0.0  ;;  %v515_v24 = vadd.f32 %v514_v21, %v466_v20 }
  0xfd   :  { %v619_v26 = vpack.c.bf16 %v529_v23, %v528_v22  ;;  %v527_v27 = vmax.f32 %v515_v24, 0.0 }
  0xff   :  { %621 = vst [vmem:[%s916_s3 + $0x8] sm:$0xff] %v619_v26   ;;  %v614_v28 = vpack.c.bf16 %v527_v27, %v526_v25 }
 0x101   :  { %615 = vst [vmem:[%s916_s3] sm:$0xff] %v614_v28  }

// kernel: pnc_forward.11
= control target key start
LH: loop header
LB: loop body
LE: loop exit
PB: predicated region body
PF: predicated region fallthrough
CT: control target
= control target key end

     0   :  { %s2060_s1 = inlined_call_operand.vmem [shape: bf16[1152,256], index: 1, kind: input, shape index: {}]   ;;  %s2061_s0 = inlined_call_operand.vmem [shape: bf16[16,1152], index: 0, kind: input, shape index: {}]   ;;  %s2062_s2 = inlined_call_operand.vmem [shape: f32[1,256], index: 2, kind: input, shape index: {}]   ;;  %s2063_s3 = inlined_call_operand.vmem [shape: bf16[16,256], index: 3, kind: output, shape index: {}]  }
   0x1   :  { %v1342_v0 = vld [vmem:[%s2060_s1 + $0x74] ss:$8 sps:$4 sm:$0xff]   ;;  %v1344_v1 = vld [vmem:[%s2060_s1 + $0x70] ss:$8 sps:$4 sm:$0xff]   ;;  %v1348_v4 = vld [vmem:[%s2060_s1 + $0x64] ss:$8 sps:$4 sm:$0xff]  }
   0x2   :  { %947 = vmatprep.subr.bf16.mxu0 %v1342_v0  ;;  %v1345_v2 = vld [vmem:[%s2060_s1 + $0x174] ss:$8 sps:$4 sm:$0xff]   ;;  %v1347_v3 = vld [vmem:[%s2060_s1 + $0x170] ss:$8 sps:$4 sm:$0xff]   ;;  %v1350_v5 = vld [vmem:[%s2060_s1 + $0x60] ss:$8 sps:$4 sm:$0xff]  }
   0x3   :  { %948 = vmatpush1.bf16.msra.mxu0 %v1344_v1  ;;  %990 = vmatprep.subr.bf16.mxu1 %v1345_v2  ;;  %v1351_v6 = vld [vmem:[%s2060_s1 + $0x164] ss:$8 sps:$4 sm:$0xff]   ;;  %v1353_v7 = vld [vmem:[%s2060_s1 + $0x160] ss:$8 sps:$4 sm:$0xff]   ;;  %v1354_v8 = vld [vmem:[%s2060_s1 + $0x54] ss:$8 sps:$4 sm:$0xff]  }
   0x4   :  { %991 = vmatpush1.bf16.msra.mxu1 %v1347_v3  ;;  %949 = vmatprep.subr.bf16.mxu0 %v1348_v4  ;;  %v1356_v9 = vld [vmem:[%s2060_s1 + $0x50] ss:$8 sps:$4 sm:$0xff]   ;;  %v1357_v10 = vld [vmem:[%s2060_s1 + $0x154] ss:$8 sps:$4 sm:$0xff]   ;;  %v1360_v11 = vld [vmem:[%s2060_s1 + $0x44] ss:$8 sps:$4 sm:$0xff]  }
   0x5   :  { %992 = vmatprep.subr.bf16.mxu1 %v1351_v6  ;;  %v1359_v12 = vld [vmem:[%s2060_s1 + $0x150] ss:$8 sps:$4 sm:$0xff]   ;;  %v1363_v13 = vld [vmem:[%s2060_s1 + $0x144] ss:$8 sps:$4 sm:$0xff]   ;;  %v1362_v14 = vld [vmem:[%s2060_s1 + $0x40] ss:$8 sps:$4 sm:$0xff]  }
   0x6   :  { %v1366_v15 = vld [vmem:[%s2060_s1 + $0x34] ss:$8 sps:$4 sm:$0xff]   ;;  %v1365_v16 = vld [vmem:[%s2060_s1 + $0x140] ss:$8 sps:$4 sm:$0xff]   ;;  %v1368_v18 = vld [vmem:[%s2060_s1 + $0x30] ss:$8 sps:$4 sm:$0xff]  }
   0x7   :  { %950 = vmatpush1.bf16.msra.mxu0 %v1350_v5  ;;  %v1369_v17 = vld [vmem:[%s2060_s1 + $0x134] ss:$8 sps:$4 sm:$0xff]   ;;  %v1372_v19 = vld [vmem:[%s2060_s1 + $0x24] ss:$8 sps:$4 sm:$0xff]   ;;  %v1371_v20 = vld [vmem:[%s2060_s1 + $0x130] ss:$8 sps:$4 sm:$0xff]  }
   0x8   :  { %951 = vmatprep.subr.bf16.mxu0 %v1354_v8  ;;  %993 = vmatpush1.bf16.msra.mxu1 %v1353_v7  ;;  %v1375_v21 = vld [vmem:[%s2060_s1 + $0x124] ss:$8 sps:$4 sm:$0xff]   ;;  %v1374_v22 = vld [vmem:[%s2060_s1 + $0x20] ss:$8 sps:$4 sm:$0xff]   ;;  %v1378_v23 = vld [vmem:[%s2060_s1 + $0x14] ss:$8 sps:$4 sm:$0xff]  }
   0x9   :  { %994 = vmatprep.subr.bf16.mxu1 %v1357_v10  ;;  %v1377_v24 = vld [vmem:[%s2060_s1 + $0x120] ss:$8 sps:$4 sm:$0xff]   ;;  %v1381_v25 = vld [vmem:[%s2060_s1 + $0x114] ss:$8 sps:$4 sm:$0xff]   ;;  %v1380_v26 = vld [vmem:[%s2060_s1 + $0x10] ss:$8 sps:$4 sm:$0xff]  }
   0xa   :  { %v1384_v27 = vld [vmem:[%s2060_s1 + $0x4] ss:$8 sps:$4 sm:$0xff]   ;;  %v1383_v28 = vld [vmem:[%s2060_s1 + $0x110] ss:$8 sps:$4 sm:$0xff]   ;;  %v1386_v30 = vld [vmem:[%s2060_s1] ss:$8 sps:$4 sm:$0xff]  }
   0xb   :  { %952 = vmatpush1.bf16.msra.mxu0 %v1356_v9  ;;  %v1387_v29 = vld [vmem:[%s2060_s1 + $0x104] ss:$8 sps:$4 sm:$0xff]   ;;  %v1390_v31 = vld [vmem:[%s2060_s1 + $0xf4] ss:$8 sps:$4 sm:$0xff]   ;;  %v1389_v32 = vld [vmem:[%s2060_s1 + $0x100] ss:$8 sps:$4 sm:$0xff]  }
   0xc   :  { %953 = vmatprep.subr.bf16.mxu0 %v1360_v11  ;;  %995 = vmatpush1.bf16.msra.mxu1 %v1359_v12  ;;  %v1393_v33 = vld [vmem:[%s2060_s1 + $0x1f4] ss:$8 sps:$4 sm:$0xff]   ;;  %v1392_v34 = vld [vmem:[%s2060_s1 + $0xf0] ss:$8 sps:$4 sm:$0xff]   ;;  %v1396_v35 = vld [vmem:[%s2060_s1 + $0xe4] ss:$8 sps:$4 sm:$0xff]  }
   0xd   :  { %996 = vmatprep.subr.bf16.mxu1 %v1363_v13  ;;  %v1395_v36 = vld [vmem:[%s2060_s1 + $0x1f0] ss:$8 sps:$4 sm:$0xff]   ;;  %v1399_v37 = vld [vmem:[%s2060_s1 + $0x1e4] ss:$8 sps:$4 sm:$0xff]   ;;  %v1398_v38 = vld [vmem:[%s2060_s1 + $0xe0] ss:$8 sps:$4 sm:$0xff]  }
   0xe   :  { %v1402_v39 = vld [vmem:[%s2060_s1 + $0xd4] ss:$8 sps:$4 sm:$0xff]   ;;  %v1401_v40 = vld [vmem:[%s2060_s1 + $0x1e0] ss:$8 sps:$4 sm:$0xff]   ;;  %v1404_v42 = vld [vmem:[%s2060_s1 + $0xd0] ss:$8 sps:$4 sm:$0xff]  }
   0xf   :  { %954 = vmatpush1.bf16.msra.mxu0 %v1362_v14  ;;  %v1405_v41 = vld [vmem:[%s2060_s1 + $0x1d4] ss:$8 sps:$4 sm:$0xff]   ;;  %v1408_v43 = vld [vmem:[%s2060_s1 + $0xc4] ss:$8 sps:$4 sm:$0xff]   ;;  %v1407_v44 = vld [vmem:[%s2060_s1 + $0x1d0] ss:$8 sps:$4 sm:$0xff]  }
  0x10   :  { %955 = vmatprep.subr.bf16.mxu0 %v1366_v15  ;;  %997 = vmatpush1.bf16.msra.mxu1 %v1365_v16  ;;  %v1411_v45 = vld [vmem:[%s2060_s1 + $0x1c4] ss:$8 sps:$4 sm:$0xff]   ;;  %v1410_v46 = vld [vmem:[%s2060_s1 + $0xc0] ss:$8 sps:$4 sm:$0xff]   ;;  %v1414_v48 = vld [vmem:[%s2060_s1 + $0xb4] ss:$8 sps:$4 sm:$0xff]  }
  0x11   :  { %998 = vmatprep.subr.bf16.mxu1 %v1369_v17  ;;  %v1439_v47 = vld [vmem:[%s2061_s0 + $0x4] ss:$36 sps:$4 sm:$0xff]   ;;  %v1417_v50 = vld [vmem:[%s2060_s1 + $0x1b4] ss:$8 sps:$4 sm:$0xff]   ;;  %v1446_v51 = vld [vmem:[%s2061_s0 + $0xc] ss:$36 sps:$4 sm:$0xff]  }
  0x12   :  { %v1413_v49 = vld [vmem:[%s2060_s1 + $0x1c0] ss:$8 sps:$4 sm:$0xff]   ;;  %979 = vmatprep.mubr.bf16.mxu0 %v1439_v47  ;;  %v1416_v52 = vld [vmem:[%s2060_s1 + $0xb0] ss:$8 sps:$4 sm:$0xff]   ;;  %v1420_v53 = vld [vmem:[%s2060_s1 + $0xa4] ss:$8 sps:$4 sm:$0xff]   ;;  %1022 = vmatprep.mubr.bf16.mxu1 %v1446_v51 }
  0x13   :  { %956 = vmatpush1.bf16.msra.mxu0 %v1368_v18  ;;  %v1419_v54 = vld [vmem:[%s2060_s1 + $0x1b0] ss:$8 sps:$4 sm:$0xff]   ;;  %v1423_v55 = vld [vmem:[%s2060_s1 + $0x1a4] ss:$8 sps:$4 sm:$0xff]   ;;  %v1422_v56 = vld [vmem:[%s2060_s1 + $0xa0] ss:$8 sps:$4 sm:$0xff]  }
  0x14   :  { %957 = vmatprep.subr.bf16.mxu0 %v1372_v19  ;;  %999 = vmatpush1.bf16.msra.mxu1 %v1371_v20  ;;  %v1426_v57 = vld [vmem:[%s2060_s1 + $0x94] ss:$8 sps:$4 sm:$0xff]   ;;  %v1425_v58 = vld [vmem:[%s2060_s1 + $0x1a0] ss:$8 sps:$4 sm:$0xff]   ;;  %v1428_v60 = vld [vmem:[%s2060_s1 + $0x90] ss:$8 sps:$4 sm:$0xff]  }
  0x15   :  { %1000 = vmatprep.subr.bf16.mxu1 %v1375_v21  ;;  %v1429_v59 = vld [vmem:[%s2060_s1 + $0x194] ss:$8 sps:$4 sm:$0xff]   ;;  %v1432_v61 = vld [vmem:[%s2060_s1 + $0x84] ss:$8 sps:$4 sm:$0xff]   ;;  %v1431_v62 = vld [vmem:[%s2060_s1 + $0x190] ss:$8 sps:$4 sm:$0xff]  }
  0x16   :  { %v1435_v63 = vld [vmem:[%s2060_s1 + $0x184] ss:$8 sps:$4 sm:$0xff]   ;;  %v1434_v0 = vld [vmem:[%s2060_s1 + $0x80] ss:$8 sps:$4 sm:$0xff]   ;;  %v1443_v1 = vld [vmem:[%s2060_s1 + $0x274] ss:$8 sps:$4 sm:$0xff]  }
  0x17   :  { %958 = vmatpush1.bf16.msra.mxu0 %v1374_v22  ;;  %v1440_v2 = vld [vmem:[%s2060_s1 + $0x180] ss:$8 sps:$4 sm:$0xff]   ;;  %v1449_v4 = vld [vmem:[%s2060_s1 + $0x374] ss:$8 sps:$4 sm:$0xff]   ;;  %v1441_v5 = vld [vmem:[%s2060_s1 + $0x270] ss:$8 sps:$4 sm:$0xff]  }
  0x18   :  { %959 = vmatprep.subr.bf16.mxu0 %v1378_v23  ;;  %1001 = vmatpush1.bf16.msra.mxu1 %v1377_v24  ;;  %v1437_v3 = vld [vmem:[%s2061_s0] ss:$36 sps:$4 sm:$0xff]   ;;  %v1444_v6 = vld [vmem:[%s2061_s0 + $0x8] ss:$36 sps:$4 sm:$0xff]   ;;  %v1447_v8 = vld [vmem:[%s2060_s1 + $0x370] ss:$8 sps:$4 sm:$0xff]  }
  0x19   :  { %1002 = vmatprep.subr.bf16.mxu1 %v1381_v25  ;;  %v1452_v7 = vld [vmem:[%s2060_s1 + $0x264] ss:$8 sps:$4 sm:$0xff]   ;;  %v1450_v10 = vld [vmem:[%s2060_s1 + $0x260] ss:$8 sps:$4 sm:$0xff]   ;;  %v1458_v11 = vld [vmem:[%s2060_s1 + $0x254] ss:$8 sps:$4 sm:$0xff]  }
  0x1a   :  { %v1455_v9 = vld [vmem:[%s2060_s1 + $0x364] ss:$8 sps:$4 sm:$0xff]   ;;  %v1453_v12 = vld [vmem:[%s2060_s1 + $0x360] ss:$8 sps:$4 sm:$0xff]   ;;  %v1461_v13 = vld [vmem:[%s2060_s1 + $0x354] ss:$8 sps:$4 sm:$0xff]  }
  0x1b   :  { %960 = vmatpush1.bf16.msra.mxu0 %v1380_v26  ;;  %v1456_v14 = vld [vmem:[%s2060_s1 + $0x250] ss:$8 sps:$4 sm:$0xff]   ;;  %v1464_v15 = vld [vmem:[%s2060_s1 + $0x244] ss:$8 sps:$4 sm:$0xff]   ;;  %v1462_v18 = vld [vmem:[%s2060_s1 + $0x240] ss:$8 sps:$4 sm:$0xff]  }
  0x1c   :  { %961 = vmatprep.subr.bf16.mxu0 %v1384_v27  ;;  %1003 = vmatpush1.bf16.msra.mxu1 %v1383_v28  ;;  %v1459_v16 = vld [vmem:[%s2060_s1 + $0x350] ss:$8 sps:$4 sm:$0xff]   ;;  %v1467_v17 = vld [vmem:[%s2060_s1 + $0x344] ss:$8 sps:$4 sm:$0xff]   ;;  %v1470_v19 = vld [vmem:[%s2060_s1 + $0x234] ss:$8 sps:$4 sm:$0xff]  }
  0x1d   :  { %1004 = vmatprep.subr.bf16.mxu1 %v1387_v29  ;;  %v1465_v20 = vld [vmem:[%s2060_s1 + $0x340] ss:$8 sps:$4 sm:$0xff]   ;;  %v1473_v21 = vld [vmem:[%s2060_s1 + $0x334] ss:$8 sps:$4 sm:$0xff]   ;;  %v1468_v22 = vld [vmem:[%s2060_s1 + $0x230] ss:$8 sps:$4 sm:$0xff]  }
  0x1e   :  { %v1476_v23 = vld [vmem:[%s2060_s1 + $0x224] ss:$8 sps:$4 sm:$0xff]   ;;  %v1471_v24 = vld [vmem:[%s2060_s1 + $0x330] ss:$8 sps:$4 sm:$0xff]   ;;  %v1474_v26 = vld [vmem:[%s2060_s1 + $0x220] ss:$8 sps:$4 sm:$0xff]  }
  0x1f   :  { %962 = vmatpush1.bf16.msra.mxu0 %v1386_v30  ;;  %v1479_v25 = vld [vmem:[%s2060_s1 + $0x324] ss:$8 sps:$4 sm:$0xff]   ;;  %v1482_v27 = vld [vmem:[%s2060_s1 + $0x214] ss:$8 sps:$4 sm:$0xff]   ;;  %v1477_v28 = vld [vmem:[%s2060_s1 + $0x320] ss:$8 sps:$4 sm:$0xff]  }
  0x20   :  { %963 = vmatprep.subr.bf16.mxu0 %v1390_v31  ;;  %1005 = vmatpush1.bf16.msra.mxu1 %v1389_v32  ;;  %v1485_v29 = vld [vmem:[%s2060_s1 + $0x314] ss:$8 sps:$4 sm:$0xff]   ;;  %v1480_v30 = vld [vmem:[%s2060_s1 + $0x210] ss:$8 sps:$4 sm:$0xff]   ;;  %v1488_v32 = vld [vmem:[%s2060_s1 + $0x204] ss:$8 sps:$4 sm:$0xff]  }
  0x21   :  { %1006 = vmatprep.subr.bf16.mxu1 %v1393_v33  ;;  %v1483_v31 = vld [vmem:[%s2060_s1 + $0x310] ss:$8 sps:$4 sm:$0xff]   ;;  %v1509_v47 = vld [vmem:[%s2060_s1 + $0x3d4] ss:$8 sps:$4 sm:$0xff]   ;;  %v1515_v51 = vld [vmem:[%s2060_s1 + $0x3c4] ss:$8 sps:$4 sm:$0xff]  }
  0x22   :  { %v1542_v33 = vld [vmem:[%s2061_s0 + $0x14] ss:$36 sps:$4 sm:$0xff]  }
  0x23   :  { %964 = vmatpush2.bf16.msra.mxu0 %v1392_v34  ;;  %v1491_v34 = vld [vmem:[%s2060_s1 + $0x304] ss:$8 sps:$4 sm:$0xff]  }
  0x24   :  { %965 = vmatprep.subr.bf16.mxu0 %v1396_v35  ;;  %1007 = vmatpush2.bf16.msra.mxu1 %v1395_v36  ;;  %v1486_v35 = vld [vmem:[%s2060_s1 + $0x200] ss:$8 sps:$4 sm:$0xff]  }
  0x25   :  { %1008 = vmatprep.subr.bf16.mxu1 %v1399_v37  ;;  %v1548_v36 = vld [vmem:[%s2061_s0 + $0x1c] ss:$36 sps:$4 sm:$0xff]  }
  0x26   :  { %v1494_v37 = vld [vmem:[%s2060_s1 + $0x2f4] ss:$8 sps:$4 sm:$0xff]  }
  0x27   :  { %966 = vmatpush2.bf16.msra.mxu0 %v1398_v38  ;;  %v1489_v38 = vld [vmem:[%s2060_s1 + $0x300] ss:$8 sps:$4 sm:$0xff]  }
  0x28   :  { %967 = vmatprep.subr.bf16.mxu0 %v1402_v39  ;;  %1009 = vmatpush2.bf16.msra.mxu1 %v1401_v40  ;;  %v1497_v39 = vld [vmem:[%s2060_s1 + $0x3f4] ss:$8 sps:$4 sm:$0xff]   ;;  %v1492_v40 = vld [vmem:[%s2060_s1 + $0x2f0] ss:$8 sps:$4 sm:$0xff]  }
  0x29   :  { %1010 = vmatprep.subr.bf16.mxu1 %v1405_v41  ;;  %v1500_v41 = vld [vmem:[%s2060_s1 + $0x2e4] ss:$8 sps:$4 sm:$0xff]  }
  0x2b   :  { %968 = vmatpush2.bf16.msra.mxu0 %v1404_v42  ;;  %v1495_v42 = vld [vmem:[%s2060_s1 + $0x3f0] ss:$8 sps:$4 sm:$0xff]  }
  0x2c   :  { %969 = vmatprep.subr.bf16.mxu0 %v1408_v43  ;;  %1011 = vmatpush2.bf16.msra.mxu1 %v1407_v44  ;;  %v1503_v43 = vld [vmem:[%s2060_s1 + $0x3e4] ss:$8 sps:$4 sm:$0xff]   ;;  %v1498_v44 = vld [vmem:[%s2060_s1 + $0x2e0] ss:$8 sps:$4 sm:$0xff]  }
  0x2d   :  { %1012 = vmatprep.subr.bf16.mxu1 %v1411_v45  ;;  %v1506_v45 = vld [vmem:[%s2060_s1 + $0x2d4] ss:$8 sps:$4 sm:$0xff]  }
  0x2f   :  { %970 = vmatpush2.bf16.msra.mxu0 %v1410_v46  ;;  %v1501_v46 = vld [vmem:[%s2060_s1 + $0x3e0] ss:$8 sps:$4 sm:$0xff]  }
  0x30   :  { %971 = vmatprep.subr.bf16.mxu0 %v1414_v48  ;;  %1013 = vmatpush2.bf16.msra.mxu1 %v1413_v49  ;;  %v1504_v48 = vld [vmem:[%s2060_s1 + $0x2d0] ss:$8 sps:$4 sm:$0xff]   ;;  %v1512_v49 = vld [vmem:[%s2060_s1 + $0x2c4] ss:$8 sps:$4 sm:$0xff]  }
  0x31   :  { %1014 = vmatprep.subr.bf16.mxu1 %v1417_v50  ;;  %v1507_v50 = vld [vmem:[%s2060_s1 + $0x3d0] ss:$8 sps:$4 sm:$0xff]  }
  0x33   :  { %972 = vmatpush2.bf16.msra.mxu0 %v1416_v52  ;;  %v1510_v52 = vld [vmem:[%s2060_s1 + $0x2c0] ss:$8 sps:$4 sm:$0xff]  }
  0x34   :  { %973 = vmatprep.subr.bf16.mxu0 %v1420_v53  ;;  %1015 = vmatpush2.bf16.msra.mxu1 %v1419_v54  ;;  %v1518_v53 = vld [vmem:[%s2060_s1 + $0x2b4] ss:$8 sps:$4 sm:$0xff]   ;;  %v1513_v54 = vld [vmem:[%s2060_s1 + $0x3c0] ss:$8 sps:$4 sm:$0xff]  }
  0x35   :  { %1016 = vmatprep.subr.bf16.mxu1 %v1423_v55  ;;  %v1521_v55 = vld [vmem:[%s2060_s1 + $0x3b4] ss:$8 sps:$4 sm:$0xff]  }
  0x37   :  { %974 = vmatpush2.bf16.msra.mxu0 %v1422_v56  ;;  %v1516_v56 = vld [vmem:[%s2060_s1 + $0x2b0] ss:$8 sps:$4 sm:$0xff]  }
  0x38   :  { %975 = vmatprep.subr.bf16.mxu0 %v1426_v57  ;;  %1017 = vmatpush2.bf16.msra.mxu1 %v1425_v58  ;;  %v1524_v57 = vld [vmem:[%s2060_s1 + $0x2a4] ss:$8 sps:$4 sm:$0xff]   ;;  %v1519_v58 = vld [vmem:[%s2060_s1 + $0x3b0] ss:$8 sps:$4 sm:$0xff]  }
  0x39   :  { %1018 = vmatprep.subr.bf16.mxu1 %v1429_v59  ;;  %v1527_v59 = vld [vmem:[%s2060_s1 + $0x3a4] ss:$8 sps:$4 sm:$0xff]  }
  0x3b   :  { %976 = vmatpush2.bf16.msra.mxu0 %v1428_v60  ;;  %v1522_v60 = vld [vmem:[%s2060_s1 + $0x2a0] ss:$8 sps:$4 sm:$0xff]  }
  0x3c   :  { %977 = vmatprep.subr.bf16.mxu0 %v1432_v61  ;;  %1019 = vmatpush2.bf16.msra.mxu1 %v1431_v62  ;;  %v1530_v61 = vld [vmem:[%s2060_s1 + $0x294] ss:$8 sps:$4 sm:$0xff]   ;;  %v1525_v62 = vld [vmem:[%s2060_s1 + $0x3a0] ss:$8 sps:$4 sm:$0xff]  }
  0x3d   :  { %1020 = vmatprep.subr.bf16.mxu1 %v1435_v63  ;;  %v1533_v63 = vld [vmem:[%s2060_s1 + $0x394] ss:$8 sps:$4 sm:$0xff]  }
  0x3f   :  { %978 = vmatpush2.bf16.msra.mxu0 %v1434_v0  ;;  %v1528_v0 = vld [vmem:[%s2060_s1 + $0x290] ss:$8 sps:$4 sm:$0xff]  }
  0x40   :  { %1033 = vmatprep.subr.bf16.mxu0 %v1443_v1  ;;  %1021 = vmatpush2.bf16.msra.mxu1 %v1440_v2  ;;  %v1536_v1 = vld [vmem:[%s2060_s1 + $0x284] ss:$8 sps:$4 sm:$0xff]   ;;  %v1531_v2 = vld [vmem:[%s2060_s1 + $0x390] ss:$8 sps:$4 sm:$0xff]  }
  0x41   :  { %1076 = vmatprep.subr.bf16.mxu1 %v1449_v4  ;;  %v1534_v4 = vld [vmem:[%s2060_s1 + $0x280] ss:$8 sps:$4 sm:$0xff]  }
  0x42   :  { %980 = vmatmul.mubr.bf16.vlgmr.msra.gmra.mxu0 %v1437_v3  ;;  %v1539_v3 = vld [vmem:[%s2060_s1 + $0x384] ss:$8 sps:$4 sm:$0xff]  }
  0x43   :  { %1034 = vmatpush1.bf16.msra.mxu0 %v1441_v5  ;;  %1023 = vmatmul.mubr.bf16.vlgmr.msra.gmra.mxu1 %v1444_v6  ;;  %v1545_v5 = vld [vmem:[%s2060_s1 + $0x474] ss:$8 sps:$4 sm:$0xff]   ;;  %v1537_v6 = vld [vmem:[%s2060_s1 + $0x380] ss:$8 sps:$4 sm:$0xff]  }
  0x44   :  { %1035 = vmatprep.subr.bf16.mxu0 %v1452_v7  ;;  %1077 = vmatpush1.bf16.msra.mxu1 %v1447_v8  ;;  %v1540_v7 = vld [vmem:[%s2061_s0 + $0x10] ss:$36 sps:$4 sm:$0xff]  }
  0x45   :  { %1078 = vmatprep.subr.bf16.mxu1 %v1455_v9  ;;  %1065 = vmatprep.mubr.bf16.mxu0 %v1542_v33  ;;  %v1543_v8 = vld [vmem:[%s2060_s1 + $0x470] ss:$8 sps:$4 sm:$0xff]  }
  0x46   :  { %1108 = vmatprep.mubr.bf16.mxu1 %v1548_v36  ;;  %v1546_v9 = vld [vmem:[%s2061_s0 + $0x18] ss:$36 sps:$4 sm:$0xff]  }
  0x47   :  { %1036 = vmatpush1.bf16.msra.mxu0 %v1450_v10  ;;  %v1551_v10 = vld [vmem:[%s2060_s1 + $0x464] ss:$8 sps:$4 sm:$0xff]  }
  0x48   :  { %1037 = vmatprep.subr.bf16.mxu0 %v1458_v11  ;;  %1079 = vmatpush1.bf16.msra.mxu1 %v1453_v12  ;;  %v1549_v11 = vld [vmem:[%s2060_s1 + $0x460] ss:$8 sps:$4 sm:$0xff]   ;;  %v1571_v12 = vmov 0  }
  0x49   :  { %1080 = vmatprep.subr.bf16.mxu1 %v1461_v13  ;;  %v1554_v13 = vld [vmem:[%s2060_s1 + $0x454] ss:$8 sps:$4 sm:$0xff]  }
  0x4b   :  { %1038 = vmatpush1.bf16.msra.mxu0 %v1456_v14  ;;  %v1552_v14 = vld [vmem:[%s2060_s1 + $0x450] ss:$8 sps:$4 sm:$0xff]  }
  0x4c   :  { %1039 = vmatprep.subr.bf16.mxu0 %v1464_v15  ;;  %1081 = vmatpush1.bf16.msra.mxu1 %v1459_v16  ;;  %v1557_v15 = vld [vmem:[%s2060_s1 + $0x444] ss:$8 sps:$4 sm:$0xff]   ;;  %v1555_v16 = vld [vmem:[%s2060_s1 + $0x440] ss:$8 sps:$4 sm:$0xff]  }
  0x4d   :  { %1082 = vmatprep.subr.bf16.mxu1 %v1467_v17  ;;  %v1560_v17 = vld [vmem:[%s2060_s1 + $0x434] ss:$8 sps:$4 sm:$0xff]  }
  0x4f   :  { %1040 = vmatpush1.bf16.msra.mxu0 %v1462_v18  ;;  %v1558_v18 = vld [vmem:[%s2060_s1 + $0x430] ss:$8 sps:$4 sm:$0xff]  }
  0x50   :  { %1041 = vmatprep.subr.bf16.mxu0 %v1470_v19  ;;  %1083 = vmatpush1.bf16.msra.mxu1 %v1465_v20  ;;  %v1563_v19 = vld [vmem:[%s2060_s1 + $0x424] ss:$8 sps:$4 sm:$0xff]   ;;  %v1561_v20 = vld [vmem:[%s2060_s1 + $0x420] ss:$8 sps:$4 sm:$0xff]  }
  0x51   :  { %1084 = vmatprep.subr.bf16.mxu1 %v1473_v21  ;;  %v1566_v21 = vld [vmem:[%s2060_s1 + $0x414] ss:$8 sps:$4 sm:$0xff]  }
  0x53   :  { %1042 = vmatpush1.bf16.msra.mxu0 %v1468_v22  ;;  %v1564_v22 = vld [vmem:[%s2060_s1 + $0x410] ss:$8 sps:$4 sm:$0xff]  }
  0x54   :  { %1043 = vmatprep.subr.bf16.mxu0 %v1476_v23  ;;  %1085 = vmatpush1.bf16.msra.mxu1 %v1471_v24  ;;  %v1569_v23 = vld [vmem:[%s2060_s1 + $0x404] ss:$8 sps:$4 sm:$0xff]   ;;  %v1567_v24 = vld [vmem:[%s2060_s1 + $0x400] ss:$8 sps:$4 sm:$0xff]  }
  0x55   :  { %1086 = vmatprep.subr.bf16.mxu1 %v1479_v25  ;;  %v1570_v25 = vld [vmem:[%s2061_s0 + $0x20] ss:$36 sps:$4 sm:$0xff]  }
  0x57   :  { %1044 = vmatpush1.bf16.msra.mxu0 %v1474_v26 }
  0x58   :  { %1045 = vmatprep.subr.bf16.mxu0 %v1482_v27  ;;  %1087 = vmatpush1.bf16.msra.mxu1 %v1477_v28  ;;  %v171_v27 = vlaneseq }
  0x59   :  { %1088 = vmatprep.subr.bf16.mxu1 %v1485_v29 }
  0x5b   :  { %1046 = vmatpush1.bf16.msra.mxu0 %v1480_v30  ;;  %v172_v30 = vshrl.u32 %v171_v27, 7 }
  0x5c   :  { %1047 = vmatprep.subr.bf16.mxu0 %v1488_v32  ;;  %1089 = vmatpush1.bf16.msra.mxu1 %v1483_v31 }
  0x5d   :  { %1090 = vmatprep.subr.bf16.mxu1 %v1491_v34  ;;  %v173_v33 = vsub.s32 0, %v172_v30  ;;  %v169_v34 = vld [vmem:[%s2062_s2] sm:$0x3] }
  0x5f   :  { %1048 = vmatpush1.bf16.msra.mxu0 %v1486_v35  ;;  %v177_v35 = vsub.s32 1, %v172_v30 }
  0x60   :  { %1049 = vmatprep.subr.bf16.mxu0 %v1494_v37  ;;  %1091 = vmatpush1.bf16.msra.mxu1 %v1489_v38  ;;  %v174_v38 = vrot.slane %v169_v34, %v173_v33 }
  0x61   :  { %1092 = vmatprep.subr.bf16.mxu1 %v1497_v39 }
  0x63   :  { %1050 = vmatpush2.bf16.msra.mxu0 %v1492_v40  ;;  %v178_v40 = vrot.slane %v169_v34, %v177_v35 }
  0x64   :  { %1051 = vmatprep.subr.bf16.mxu0 %v1500_v41  ;;  %1093 = vmatpush2.bf16.msra.mxu1 %v1495_v42 }
  0x65   :  { %1094 = vmatprep.subr.bf16.mxu1 %v1503_v43 }
  0x67   :  { %1052 = vmatpush2.bf16.msra.mxu0 %v1498_v44 }
  0x68   :  { %1053 = vmatprep.subr.bf16.mxu0 %v1506_v45  ;;  %1095 = vmatpush2.bf16.msra.mxu1 %v1501_v46 }
  0x69   :  { %1096 = vmatprep.subr.bf16.mxu1 %v1509_v47 }
  0x6b   :  { %1054 = vmatpush2.bf16.msra.mxu0 %v1504_v48 }
  0x6c   :  { %1055 = vmatprep.subr.bf16.mxu0 %v1512_v49  ;;  %1097 = vmatpush2.bf16.msra.mxu1 %v1507_v50 }
  0x6d   :  { %1098 = vmatprep.subr.bf16.mxu1 %v1515_v51 }
  0x6f   :  { %1056 = vmatpush2.bf16.msra.mxu0 %v1510_v52 }
  0x70   :  { %1057 = vmatprep.subr.bf16.mxu0 %v1518_v53  ;;  %1099 = vmatpush2.bf16.msra.mxu1 %v1513_v54 }
  0x71   :  { %1100 = vmatprep.subr.bf16.mxu1 %v1521_v55 }
  0x73   :  { %1058 = vmatpush2.bf16.msra.mxu0 %v1516_v56 }
  0x74   :  { %1059 = vmatprep.subr.bf16.mxu0 %v1524_v57  ;;  %1101 = vmatpush2.bf16.msra.mxu1 %v1519_v58 }
  0x75   :  { %1102 = vmatprep.subr.bf16.mxu1 %v1527_v59 }
  0x77   :  { %1060 = vmatpush2.bf16.msra.mxu0 %v1522_v60 }
  0x78   :  { %1061 = vmatprep.subr.bf16.mxu0 %v1530_v61  ;;  %1103 = vmatpush2.bf16.msra.mxu1 %v1525_v62 }
  0x79   :  { %1104 = vmatprep.subr.bf16.mxu1 %v1533_v63 }
  0x7b   :  { %1062 = vmatpush2.bf16.msra.mxu0 %v1528_v0 }
  0x7c   :  { %1063 = vmatprep.subr.bf16.mxu0 %v1536_v1  ;;  %1105 = vmatpush2.bf16.msra.mxu1 %v1531_v2 }
  0x7d   :  { %1106 = vmatprep.subr.bf16.mxu1 %v1539_v3 }
  0x7f   :  { %1064 = vmatpush2.bf16.msra.mxu0 %v1534_v4 }
  0x80   :  { %1119 = vmatprep.subr.bf16.mxu0 %v1545_v5  ;;  %1107 = vmatpush2.bf16.msra.mxu1 %v1537_v6 }
  0x82   :  { %1066 = vmatmul.mubr.bf16.vlgmr.msra.gmra.mxu0 %v1540_v7 }
  0x83   :  { %1120 = vmatpush1.bf16.msra.mxu0 %v1543_v8  ;;  %1151 = vmatprep.mubr.bf16.mxu0 %v1571_v12 }
  0x84   :  { %1109 = vmatmul.mubr.bf16.vlgmr.msra.gmra.mxu1 %v1546_v9  ;;  %1121 = vmatprep.subr.bf16.mxu0 %v1551_v10 }
  0x87   :  { %1122 = vmatpush1.bf16.msra.mxu0 %v1549_v11 }
  0x88   :  { %1123 = vmatprep.subr.bf16.mxu0 %v1554_v13 }
  0x8b   :  { %1124 = vmatpush1.bf16.msra.mxu0 %v1552_v14 }
  0x8c   :  { %1125 = vmatprep.subr.bf16.mxu0 %v1557_v15 }
  0x8f   :  { %1126 = vmatpush1.bf16.msra.mxu0 %v1555_v16 }
  0x90   :  { %1127 = vmatprep.subr.bf16.mxu0 %v1560_v17 }
  0x93   :  { %1128 = vmatpush1.bf16.msra.mxu0 %v1558_v18 }
  0x94   :  { %1129 = vmatprep.subr.bf16.mxu0 %v1563_v19 }
  0x97   :  { %1130 = vmatpush1.bf16.msra.mxu0 %v1561_v20 }
  0x98   :  { %1131 = vmatprep.subr.bf16.mxu0 %v1566_v21 }
  0x9b   :  { %1132 = vmatpush1.bf16.msra.mxu0 %v1564_v22 }
  0x9c   :  { %1133 = vmatprep.subr.bf16.mxu0 %v1569_v23 }
  0x9f   :  { %1134 = vmatpush1.bf16.msra.mxu0 %v1567_v24 }
  0xa2   :  { %1152 = vmatmul.mubr.bf16.vlgmr.msra.gmra.mxu0 %v1570_v25 }
 0x102   :  { %v981_v26 = vpop.f32.mrf.mxu0 }
 0x103   :  { %v1024_v29 = vpop.f32.mrf.mxu1  ;;  %v982_v42 = vadd.f32 %v981_v26, %v174_v38 }
 0x104   :  { %v983_v28 = vpop.f32.mrf.mxu0 }
 0x105   :  { %v1026_v32 = vpop.f32.mrf.mxu1  ;;  %v984_v45 = vadd.f32 %v983_v28, %v178_v40  ;;  %v1025_v46 = vadd.f32 %v1024_v29, %v982_v42 }
 0x106   :  { %v985_v31 = vpop.f32.mrf.mxu0 }
 0x107   :  { %v1028_v37 = vpop.f32.mrf.mxu1  ;;  %v986_v47 = vadd.f32 %v985_v31, %v174_v38  ;;  %v1027_v50 = vadd.f32 %v1026_v32, %v984_v45 }
 0x108   :  { %v987_v36 = vpop.f32.mrf.mxu0 }
 0x109   :  { %v1030_v41 = vpop.f32.mrf.mxu1  ;;  %v988_v51 = vadd.f32 %v987_v36, %v178_v40  ;;  %v1029_v53 = vadd.f32 %v1028_v37, %v986_v47 }
 0x10b   :  { %v1031_v57 = vadd.f32 %v1030_v41, %v988_v51 }
 0x142   :  { %v1067_v39 = vpop.f32.mrf.mxu0 }
 0x143   :  { %v1068_v52 = vadd.f32 %v1067_v39, %v1025_v46 }
 0x144   :  { %v1069_v43 = vpop.f32.mrf.mxu0  ;;  %v1110_v44 = vpop.f32.mrf.mxu1 }
 0x145   :  { %v1070_v54 = vadd.f32 %v1069_v43, %v1027_v50  ;;  %v1111_v58 = vadd.f32 %v1110_v44, %v1068_v52 }
 0x146   :  { %v1071_v48 = vpop.f32.mrf.mxu0  ;;  %v1112_v49 = vpop.f32.mrf.mxu1 }
 0x147   :  { %v1072_v59 = vadd.f32 %v1071_v48, %v1029_v53  ;;  %v1113_v61 = vadd.f32 %v1112_v49, %v1070_v54 }
 0x148   :  { %v1073_v55 = vpop.f32.mrf.mxu0  ;;  %v1114_v56 = vpop.f32.mrf.mxu1 }
 0x149   :  { %v1074_v62 = vadd.f32 %v1073_v55, %v1031_v57  ;;  %v1115_v2 = vadd.f32 %v1114_v56, %v1072_v59 }
 0x14a   :  { %v1116_v0 = vpop.f32.mrf.mxu1 }
 0x14b   :  { %v1117_v5 = vadd.f32 %v1116_v0, %v1074_v62 }
 0x162   :  { %v1153_v60 = vpop.f32.mrf.mxu0 }
 0x163   :  { %v1154_v63 = vadd.f32 %v1153_v60, %v1111_v58 }
 0x164   :  { %v1155_v1 = vpop.f32.mrf.mxu0 }
 0x165   :  { %v1156_v3 = vadd.f32 %v1155_v1, %v1113_v61  ;;  %v1162_v6 = vmax.f32 %v1154_v63, 0.0 }
 0x166   :  { %v1157_v4 = vpop.f32.mrf.mxu0 }
 0x167   :  { %v1163_v7 = vmax.f32 %v1156_v3, 0.0  ;;  %v1158_v8 = vadd.f32 %v1157_v4, %v1115_v2 }
 0x168   :  { %v1159_v9 = vpop.f32.mrf.mxu0 }
 0x169   :  { %v1339_v10 = vpack.c.bf16 %v1163_v7, %v1162_v6  ;;  %v1160_v11 = vadd.f32 %v1159_v9, %v1117_v5  ;;  %v1164_v12 = vmax.f32 %v1158_v8, 0.0 }
 0x16b   :  { %1178 = vst [vmem:[%s2063_s3] sm:$0xff] %v1339_v10  ;;  %v1165_v13 = vmax.f32 %v1160_v11, 0.0 }
 0x16d   :  { %v1340_v14 = vpack.c.bf16 %v1165_v13, %v1164_v12 }
 0x16f   :  { %1179 = vst [vmem:[%s2063_s3 + $0x8] sm:$0xff] %v1340_v14 }

// kernel: tile.23
= control target key start
LH: loop header
LB: loop body
LE: loop exit
PB: predicated region body
PF: predicated region fallthrough
CT: control target
= control target key end

     0   :  { %s22_s0 = inlined_call_operand.vmem [shape: f32[128], index: 0, kind: input, shape index: {}]   ;;  %s23_s1 = inlined_call_operand.vmem [shape: f32[4,128], index: 1, kind: output, shape index: {}]  }
   0x1   :  { %v4_v0 = vld [vmem:[%s22_s0] ss:$0 sm:$0xff] }
   0x2   :  { %5 = vst [vmem:[%s23_s1] sm:$0xf] %v4_v0 }

// kernel: pnc_forward.12
= control target key start
LH: loop header
LB: loop body
LE: loop exit
PB: predicated region body
PF: predicated region fallthrough
CT: control target
= control target key end

     0   :  { %s7853_s1 = inlined_call_operand.vmem [shape: bf16[2304,512], index: 1, kind: input, shape index: {}]   ;;  %s7854_s0 = inlined_call_operand.vmem [shape: bf16[16,2304], index: 0, kind: input, shape index: {}]   ;;  %s7855_s2 = inlined_call_operand.vmem [shape: f32[1,512], index: 2, kind: input, shape index: {}]   ;;  %s7856_s3 = inlined_call_operand.vmem [shape: bf16[16,512], index: 3, kind: output, shape index: {}]  }
   0x1   :  { %v5016_v0 = vld [vmem:[%s7853_s1 + $0xe4] ss:$16 sps:$4 sm:$0xff]   ;;  %v5020_v2 = vld [vmem:[%s7853_s1 + $0xe0] ss:$16 sps:$4 sm:$0xff]  }
   0x2   :  { %v5018_v1 = vld [vmem:[%s7853_s1 + $0x2e4] ss:$16 sps:$4 sm:$0xff]   ;;  %3600 = vmatprep.subr.bf16.mxu0 %v5016_v0  ;;  %v5021_v3 = vld [vmem:[%s7853_s1 + $0x2e0] ss:$16 sps:$4 sm:$0xff]  }
   0x3   :  { %3643 = vmatprep.subr.bf16.mxu1 %v5018_v1  ;;  %v5022_v4 = vld [vmem:[%s7853_s1 + $0xc4] ss:$16 sps:$4 sm:$0xff]   ;;  %3601 = vmatpush1.bf16.msra.mxu0 %v5020_v2  ;;  %v5026_v6 = vld [vmem:[%s7853_s1 + $0xc0] ss:$16 sps:$4 sm:$0xff]  }
   0x4   :  { %3644 = vmatpush1.bf16.msra.mxu1 %v5021_v3  ;;  %v5024_v5 = vld [vmem:[%s7853_s1 + $0x2c4] ss:$16 sps:$4 sm:$0xff]   ;;  %3602 = vmatprep.subr.bf16.mxu0 %v5022_v4  ;;  %v5027_v7 = vld [vmem:[%s7853_s1 + $0x2c0] ss:$16 sps:$4 sm:$0xff]  }
   0x5   :  { %3645 = vmatprep.subr.bf16.mxu1 %v5024_v5  ;;  %v5028_v8 = vld [vmem:[%s7853_s1 + $0xa4] ss:$16 sps:$4 sm:$0xff]   ;;  %v5032_v10 = vld [vmem:[%s7853_s1 + $0xa0] ss:$16 sps:$4 sm:$0xff]  }
   0x6   :  { %v5030_v9 = vld [vmem:[%s7853_s1 + $0x2a4] ss:$16 sps:$4 sm:$0xff]   ;;  %v5033_v11 = vld [vmem:[%s7853_s1 + $0x2a0] ss:$16 sps:$4 sm:$0xff]  }
   0x7   :  { %3603 = vmatpush1.bf16.msra.mxu0 %v5026_v6  ;;  %v5034_v12 = vld [vmem:[%s7853_s1 + $0x84] ss:$16 sps:$4 sm:$0xff]   ;;  %v5038_v14 = vld [vmem:[%s7853_s1 + $0x80] ss:$16 sps:$4 sm:$0xff]  }
   0x8   :  { %3646 = vmatpush1.bf16.msra.mxu1 %v5027_v7  ;;  %3604 = vmatprep.subr.bf16.mxu0 %v5028_v8  ;;  %v5036_v13 = vld [vmem:[%s7853_s1 + $0x284] ss:$16 sps:$4 sm:$0xff]   ;;  %v5039_v15 = vld [vmem:[%s7853_s1 + $0x280] ss:$16 sps:$4 sm:$0xff]  }
   0x9   :  { %3647 = vmatprep.subr.bf16.mxu1 %v5030_v9  ;;  %v5040_v16 = vld [vmem:[%s7853_s1 + $0x64] ss:$16 sps:$4 sm:$0xff]   ;;  %v5044_v18 = vld [vmem:[%s7853_s1 + $0x60] ss:$16 sps:$4 sm:$0xff]  }
   0xa   :  { %v5042_v17 = vld [vmem:[%s7853_s1 + $0x264] ss:$16 sps:$4 sm:$0xff]   ;;  %v5045_v19 = vld [vmem:[%s7853_s1 + $0x260] ss:$16 sps:$4 sm:$0xff]  }
   0xb   :  { %3605 = vmatpush1.bf16.msra.mxu0 %v5032_v10  ;;  %v5046_v20 = vld [vmem:[%s7853_s1 + $0x44] ss:$16 sps:$4 sm:$0xff]   ;;  %v5050_v22 = vld [vmem:[%s7853_s1 + $0x40] ss:$16 sps:$4 sm:$0xff]  }
   0xc   :  { %3648 = vmatpush1.bf16.msra.mxu1 %v5033_v11  ;;  %3606 = vmatprep.subr.bf16.mxu0 %v5034_v12  ;;  %v5048_v21 = vld [vmem:[%s7853_s1 + $0x244] ss:$16 sps:$4 sm:$0xff]   ;;  %v5051_v23 = vld [vmem:[%s7853_s1 + $0x240] ss:$16 sps:$4 sm:$0xff]  }
   0xd   :  { %3649 = vmatprep.subr.bf16.mxu1 %v5036_v13  ;;  %v5052_v24 = vld [vmem:[%s7853_s1 + $0x24] ss:$16 sps:$4 sm:$0xff]   ;;  %v5056_v26 = vld [vmem:[%s7853_s1 + $0x20] ss:$16 sps:$4 sm:$0xff]  }
   0xe   :  { %v5054_v25 = vld [vmem:[%s7853_s1 + $0x224] ss:$16 sps:$4 sm:$0xff]   ;;  %v5057_v27 = vld [vmem:[%s7853_s1 + $0x220] ss:$16 sps:$4 sm:$0xff]  }
   0xf   :  { %3607 = vmatpush1.bf16.msra.mxu0 %v5038_v14  ;;  %v5058_v28 = vld [vmem:[%s7853_s1 + $0x4] ss:$16 sps:$4 sm:$0xff]   ;;  %v5062_v30 = vld [vmem:[%s7853_s1] ss:$16 sps:$4 sm:$0xff]  }
  0x10   :  { %3650 = vmatpush1.bf16.msra.mxu1 %v5039_v15  ;;  %3608 = vmatprep.subr.bf16.mxu0 %v5040_v16  ;;  %v5060_v29 = vld [vmem:[%s7853_s1 + $0x204] ss:$16 sps:$4 sm:$0xff]   ;;  %v5063_v31 = vld [vmem:[%s7853_s1 + $0x200] ss:$16 sps:$4 sm:$0xff]  }
  0x11   :  { %3651 = vmatprep.subr.bf16.mxu1 %v5042_v17  ;;  %v5064_v32 = vld [vmem:[%s7853_s1 + $0x1e4] ss:$16 sps:$4 sm:$0xff]   ;;  %v5068_v34 = vld [vmem:[%s7853_s1 + $0x1e0] ss:$16 sps:$4 sm:$0xff]  }
  0x12   :  { %v5066_v33 = vld [vmem:[%s7853_s1 + $0x3e4] ss:$16 sps:$4 sm:$0xff]   ;;  %v5069_v35 = vld [vmem:[%s7853_s1 + $0x3e0] ss:$16 sps:$4 sm:$0xff]  }
  0x13   :  { %3609 = vmatpush1.bf16.msra.mxu0 %v5044_v18  ;;  %v5070_v36 = vld [vmem:[%s7853_s1 + $0x1c4] ss:$16 sps:$4 sm:$0xff]   ;;  %v5074_v38 = vld [vmem:[%s7853_s1 + $0x1c0] ss:$16 sps:$4 sm:$0xff]  }
  0x14   :  { %3652 = vmatpush1.bf16.msra.mxu1 %v5045_v19  ;;  %3610 = vmatprep.subr.bf16.mxu0 %v5046_v20  ;;  %v5072_v37 = vld [vmem:[%s7853_s1 + $0x3c4] ss:$16 sps:$4 sm:$0xff]   ;;  %v5075_v39 = vld [vmem:[%s7853_s1 + $0x3c0] ss:$16 sps:$4 sm:$0xff]  }
  0x15   :  { %3653 = vmatprep.subr.bf16.mxu1 %v5048_v21  ;;  %v5076_v40 = vld [vmem:[%s7853_s1 + $0x1a4] ss:$16 sps:$4 sm:$0xff]   ;;  %v5080_v42 = vld [vmem:[%s7853_s1 + $0x1a0] ss:$16 sps:$4 sm:$0xff]  }
  0x16   :  { %v5078_v41 = vld [vmem:[%s7853_s1 + $0x3a4] ss:$16 sps:$4 sm:$0xff]   ;;  %v5081_v43 = vld [vmem:[%s7853_s1 + $0x3a0] ss:$16 sps:$4 sm:$0xff]  }
  0x17   :  { %3611 = vmatpush1.bf16.msra.mxu0 %v5050_v22  ;;  %v5082_v44 = vld [vmem:[%s7853_s1 + $0x184] ss:$16 sps:$4 sm:$0xff]   ;;  %v5086_v46 = vld [vmem:[%s7853_s1 + $0x180] ss:$16 sps:$4 sm:$0xff]  }
  0x18   :  { %3654 = vmatpush1.bf16.msra.mxu1 %v5051_v23  ;;  %3612 = vmatprep.subr.bf16.mxu0 %v5052_v24  ;;  %v5084_v45 = vld [vmem:[%s7853_s1 + $0x384] ss:$16 sps:$4 sm:$0xff]   ;;  %v5087_v47 = vld [vmem:[%s7853_s1 + $0x380] ss:$16 sps:$4 sm:$0xff]  }
  0x19   :  { %3655 = vmatprep.subr.bf16.mxu1 %v5054_v25  ;;  %v5088_v48 = vld [vmem:[%s7853_s1 + $0x164] ss:$16 sps:$4 sm:$0xff]   ;;  %v5092_v52 = vld [vmem:[%s7853_s1 + $0x160] ss:$16 sps:$4 sm:$0xff]  }
  0x1a   :  { %v5114_v49 = vld [vmem:[%s7854_s0 + $0x4] ss:$72 sps:$4 sm:$0xff]   ;;  %v5093_v53 = vld [vmem:[%s7853_s1 + $0x360] ss:$16 sps:$4 sm:$0xff]  }
  0x1b   :  { %3613 = vmatpush1.bf16.msra.mxu0 %v5056_v26  ;;  %v5090_v50 = vld [vmem:[%s7853_s1 + $0x364] ss:$16 sps:$4 sm:$0xff]   ;;  %3632 = vmatprep.mubr.bf16.mxu0 %v5114_v49  ;;  %v5098_v56 = vld [vmem:[%s7853_s1 + $0x140] ss:$16 sps:$4 sm:$0xff]  }
  0x1c   :  { %3656 = vmatpush1.bf16.msra.mxu1 %v5057_v27  ;;  %3614 = vmatprep.subr.bf16.mxu0 %v5058_v28  ;;  %v5117_v51 = vld [vmem:[%s7854_s0 + $0xc] ss:$72 sps:$4 sm:$0xff]   ;;  %v5099_v57 = vld [vmem:[%s7853_s1 + $0x340] ss:$16 sps:$4 sm:$0xff]  }
  0x1d   :  { %3657 = vmatprep.subr.bf16.mxu1 %v5060_v29  ;;  %3675 = vmatprep.mubr.bf16.mxu1 %v5117_v51  ;;  %v5094_v54 = vld [vmem:[%s7853_s1 + $0x144] ss:$16 sps:$4 sm:$0xff]   ;;  %v5104_v60 = vld [vmem:[%s7853_s1 + $0x120] ss:$16 sps:$4 sm:$0xff]  }
  0x1e   :  { %v5096_v55 = vld [vmem:[%s7853_s1 + $0x344] ss:$16 sps:$4 sm:$0xff]   ;;  %v5105_v61 = vld [vmem:[%s7853_s1 + $0x320] ss:$16 sps:$4 sm:$0xff]  }
  0x1f   :  { %3615 = vmatpush1.bf16.msra.mxu0 %v5062_v30  ;;  %v5100_v58 = vld [vmem:[%s7853_s1 + $0x124] ss:$16 sps:$4 sm:$0xff]   ;;  %v5110_v0 = vld [vmem:[%s7853_s1 + $0x100] ss:$16 sps:$4 sm:$0xff]  }
  0x20   :  { %3658 = vmatpush1.bf16.msra.mxu1 %v5063_v31  ;;  %3616 = vmatprep.subr.bf16.mxu0 %v5064_v32  ;;  %v5102_v59 = vld [vmem:[%s7853_s1 + $0x324] ss:$16 sps:$4 sm:$0xff]   ;;  %v5111_v1 = vld [vmem:[%s7853_s1 + $0x300] ss:$16 sps:$4 sm:$0xff]  }
  0x21   :  { %3659 = vmatprep.subr.bf16.mxu1 %v5066_v33  ;;  %v5106_v62 = vld [vmem:[%s7853_s1 + $0x104] ss:$16 sps:$4 sm:$0xff]   ;;  %v5112_v4 = vld [vmem:[%s7854_s0] ss:$72 sps:$4 sm:$0xff]  }
  0x22   :  { %v5108_v63 = vld [vmem:[%s7853_s1 + $0x304] ss:$16 sps:$4 sm:$0xff]   ;;  %v5115_v5 = vld [vmem:[%s7854_s0 + $0x8] ss:$72 sps:$4 sm:$0xff]  }
  0x23   :  { %3617 = vmatpush2.bf16.msra.mxu0 %v5068_v34  ;;  %v5120_v2 = vld [vmem:[%s7853_s1 + $0x4e4] ss:$16 sps:$4 sm:$0xff]   ;;  %v5118_v6 = vld [vmem:[%s7853_s1 + $0x4e0] ss:$16 sps:$4 sm:$0xff]  }
  0x24   :  { %3660 = vmatpush2.bf16.msra.mxu1 %v5069_v35  ;;  %3618 = vmatprep.subr.bf16.mxu0 %v5070_v36  ;;  %v5123_v3 = vld [vmem:[%s7853_s1 + $0x6e4] ss:$16 sps:$4 sm:$0xff]   ;;  %v5121_v7 = vld [vmem:[%s7853_s1 + $0x6e0] ss:$16 sps:$4 sm:$0xff]  }
  0x25   :  { %3661 = vmatprep.subr.bf16.mxu1 %v5072_v37  ;;  %v5126_v8 = vld [vmem:[%s7853_s1 + $0x4c4] ss:$16 sps:$4 sm:$0xff]   ;;  %v5124_v10 = vld [vmem:[%s7853_s1 + $0x4c0] ss:$16 sps:$4 sm:$0xff]  }
  0x26   :  { %v5129_v9 = vld [vmem:[%s7853_s1 + $0x6c4] ss:$16 sps:$4 sm:$0xff]   ;;  %v5127_v11 = vld [vmem:[%s7853_s1 + $0x6c0] ss:$16 sps:$4 sm:$0xff]  }
  0x27   :  { %3619 = vmatpush2.bf16.msra.mxu0 %v5074_v38  ;;  %v5132_v12 = vld [vmem:[%s7853_s1 + $0x4a4] ss:$16 sps:$4 sm:$0xff]   ;;  %v5130_v14 = vld [vmem:[%s7853_s1 + $0x4a0] ss:$16 sps:$4 sm:$0xff]  }
  0x28   :  { %3662 = vmatpush2.bf16.msra.mxu1 %v5075_v39  ;;  %3620 = vmatprep.subr.bf16.mxu0 %v5076_v40  ;;  %v5135_v13 = vld [vmem:[%s7853_s1 + $0x6a4] ss:$16 sps:$4 sm:$0xff]   ;;  %v5133_v15 = vld [vmem:[%s7853_s1 + $0x6a0] ss:$16 sps:$4 sm:$0xff]  }
  0x29   :  { %3663 = vmatprep.subr.bf16.mxu1 %v5078_v41  ;;  %v5138_v16 = vld [vmem:[%s7853_s1 + $0x484] ss:$16 sps:$4 sm:$0xff]   ;;  %v5136_v18 = vld [vmem:[%s7853_s1 + $0x480] ss:$16 sps:$4 sm:$0xff]  }
  0x2a   :  { %v5141_v17 = vld [vmem:[%s7853_s1 + $0x684] ss:$16 sps:$4 sm:$0xff]   ;;  %v5139_v19 = vld [vmem:[%s7853_s1 + $0x680] ss:$16 sps:$4 sm:$0xff]  }
  0x2b   :  { %3621 = vmatpush2.bf16.msra.mxu0 %v5080_v42  ;;  %v5144_v20 = vld [vmem:[%s7853_s1 + $0x464] ss:$16 sps:$4 sm:$0xff]   ;;  %v5142_v22 = vld [vmem:[%s7853_s1 + $0x460] ss:$16 sps:$4 sm:$0xff]  }
  0x2c   :  { %3664 = vmatpush2.bf16.msra.mxu1 %v5081_v43  ;;  %3622 = vmatprep.subr.bf16.mxu0 %v5082_v44  ;;  %v5147_v21 = vld [vmem:[%s7853_s1 + $0x664] ss:$16 sps:$4 sm:$0xff]   ;;  %v5145_v23 = vld [vmem:[%s7853_s1 + $0x660] ss:$16 sps:$4 sm:$0xff]  }
  0x2d   :  { %3665 = vmatprep.subr.bf16.mxu1 %v5084_v45  ;;  %v5150_v24 = vld [vmem:[%s7853_s1 + $0x444] ss:$16 sps:$4 sm:$0xff]   ;;  %v5148_v26 = vld [vmem:[%s7853_s1 + $0x440] ss:$16 sps:$4 sm:$0xff]  }
  0x2e   :  { %v5153_v25 = vld [vmem:[%s7853_s1 + $0x644] ss:$16 sps:$4 sm:$0xff]   ;;  %v5151_v27 = vld [vmem:[%s7853_s1 + $0x640] ss:$16 sps:$4 sm:$0xff]  }
  0x2f   :  { %3623 = vmatpush2.bf16.msra.mxu0 %v5086_v46  ;;  %v5156_v28 = vld [vmem:[%s7853_s1 + $0x424] ss:$16 sps:$4 sm:$0xff]   ;;  %v5154_v30 = vld [vmem:[%s7853_s1 + $0x420] ss:$16 sps:$4 sm:$0xff]  }
  0x30   :  { %3666 = vmatpush2.bf16.msra.mxu1 %v5087_v47  ;;  %3624 = vmatprep.subr.bf16.mxu0 %v5088_v48  ;;  %v5159_v29 = vld [vmem:[%s7853_s1 + $0x624] ss:$16 sps:$4 sm:$0xff]   ;;  %v5157_v31 = vld [vmem:[%s7853_s1 + $0x620] ss:$16 sps:$4 sm:$0xff]  }
  0x31   :  { %3667 = vmatprep.subr.bf16.mxu1 %v5090_v50  ;;  %v5162_v32 = vld [vmem:[%s7853_s1 + $0x404] ss:$16 sps:$4 sm:$0xff]   ;;  %v5160_v36 = vld [vmem:[%s7853_s1 + $0x400] ss:$16 sps:$4 sm:$0xff]  }
  0x32   :  { %v5165_v33 = vld [vmem:[%s7853_s1 + $0x604] ss:$16 sps:$4 sm:$0xff]   ;;  %v5163_v37 = vld [vmem:[%s7853_s1 + $0x600] ss:$16 sps:$4 sm:$0xff]  }
  0x33   :  { %3625 = vmatpush2.bf16.msra.mxu0 %v5092_v52  ;;  %v5216_v34 = vld [vmem:[%s7854_s0 + $0x14] ss:$72 sps:$4 sm:$0xff]   ;;  %v5166_v40 = vld [vmem:[%s7853_s1 + $0x5e0] ss:$16 sps:$4 sm:$0xff]  }
  0x34   :  { %3668 = vmatpush2.bf16.msra.mxu1 %v5093_v53  ;;  %3626 = vmatprep.subr.bf16.mxu0 %v5094_v54  ;;  %v5219_v35 = vld [vmem:[%s7854_s0 + $0x1c] ss:$72 sps:$4 sm:$0xff]   ;;  %v5169_v41 = vld [vmem:[%s7853_s1 + $0x7e0] ss:$16 sps:$4 sm:$0xff]  }
  0x35   :  { %3669 = vmatprep.subr.bf16.mxu1 %v5096_v55  ;;  %v5168_v38 = vld [vmem:[%s7853_s1 + $0x5e4] ss:$16 sps:$4 sm:$0xff]   ;;  %v5172_v44 = vld [vmem:[%s7853_s1 + $0x5c0] ss:$16 sps:$4 sm:$0xff]  }
  0x36   :  { %v5171_v39 = vld [vmem:[%s7853_s1 + $0x7e4] ss:$16 sps:$4 sm:$0xff]   ;;  %v5175_v45 = vld [vmem:[%s7853_s1 + $0x7c0] ss:$16 sps:$4 sm:$0xff]  }
  0x37   :  { %3627 = vmatpush2.bf16.msra.mxu0 %v5098_v56  ;;  %v5174_v42 = vld [vmem:[%s7853_s1 + $0x5c4] ss:$16 sps:$4 sm:$0xff]   ;;  %v5178_v48 = vld [vmem:[%s7853_s1 + $0x5a0] ss:$16 sps:$4 sm:$0xff]  }
  0x38   :  { %3670 = vmatpush2.bf16.msra.mxu1 %v5099_v57  ;;  %3628 = vmatprep.subr.bf16.mxu0 %v5100_v58  ;;  %v5177_v43 = vld [vmem:[%s7853_s1 + $0x7c4] ss:$16 sps:$4 sm:$0xff]   ;;  %v5181_v49 = vld [vmem:[%s7853_s1 + $0x7a0] ss:$16 sps:$4 sm:$0xff]  }
  0x39   :  { %3671 = vmatprep.subr.bf16.mxu1 %v5102_v59  ;;  %v5180_v46 = vld [vmem:[%s7853_s1 + $0x5a4] ss:$16 sps:$4 sm:$0xff]   ;;  %v5184_v52 = vld [vmem:[%s7853_s1 + $0x580] ss:$16 sps:$4 sm:$0xff]  }
  0x3a   :  { %v5183_v47 = vld [vmem:[%s7853_s1 + $0x7a4] ss:$16 sps:$4 sm:$0xff]   ;;  %v5187_v53 = vld [vmem:[%s7853_s1 + $0x780] ss:$16 sps:$4 sm:$0xff]  }
  0x3b   :  { %3629 = vmatpush2.bf16.msra.mxu0 %v5104_v60  ;;  %v5186_v50 = vld [vmem:[%s7853_s1 + $0x584] ss:$16 sps:$4 sm:$0xff]   ;;  %v5190_v56 = vld [vmem:[%s7853_s1 + $0x560] ss:$16 sps:$4 sm:$0xff]  }
  0x3c   :  { %3672 = vmatpush2.bf16.msra.mxu1 %v5105_v61  ;;  %3630 = vmatprep.subr.bf16.mxu0 %v5106_v62  ;;  %v5189_v51 = vld [vmem:[%s7853_s1 + $0x784] ss:$16 sps:$4 sm:$0xff]   ;;  %v5193_v57 = vld [vmem:[%s7853_s1 + $0x760] ss:$16 sps:$4 sm:$0xff]  }
  0x3d   :  { %3673 = vmatprep.subr.bf16.mxu1 %v5108_v63  ;;  %v5192_v54 = vld [vmem:[%s7853_s1 + $0x564] ss:$16 sps:$4 sm:$0xff]   ;;  %v5196_v60 = vld [vmem:[%s7853_s1 + $0x540] ss:$16 sps:$4 sm:$0xff]  }
  0x3e   :  { %v5195_v55 = vld [vmem:[%s7853_s1 + $0x764] ss:$16 sps:$4 sm:$0xff]   ;;  %v5199_v61 = vld [vmem:[%s7853_s1 + $0x740] ss:$16 sps:$4 sm:$0xff]  }
  0x3f   :  { %3631 = vmatpush2.bf16.msra.mxu0 %v5110_v0  ;;  %v5198_v58 = vld [vmem:[%s7853_s1 + $0x544] ss:$16 sps:$4 sm:$0xff]   ;;  %v5202_v0 = vld [vmem:[%s7853_s1 + $0x520] ss:$16 sps:$4 sm:$0xff]  }
  0x40   :  { %3674 = vmatpush2.bf16.msra.mxu1 %v5111_v1  ;;  %3686 = vmatprep.subr.bf16.mxu0 %v5120_v2  ;;  %v5201_v59 = vld [vmem:[%s7853_s1 + $0x744] ss:$16 sps:$4 sm:$0xff]   ;;  %v5205_v1 = vld [vmem:[%s7853_s1 + $0x720] ss:$16 sps:$4 sm:$0xff]  }
  0x41   :  { %3729 = vmatprep.subr.bf16.mxu1 %v5123_v3  ;;  %v5204_v62 = vld [vmem:[%s7853_s1 + $0x524] ss:$16 sps:$4 sm:$0xff]  }
  0x42   :  { %3633 = vmatmul.mubr.bf16.vlgmr.msra.gmra.mxu0 %v5112_v4  ;;  %v5207_v63 = vld [vmem:[%s7853_s1 + $0x724] ss:$16 sps:$4 sm:$0xff]   ;;  %v5208_v4 = vld [vmem:[%s7853_s1 + $0x500] ss:$16 sps:$4 sm:$0xff]  }
  0x43   :  { %3676 = vmatmul.mubr.bf16.vlgmr.msra.gmra.mxu1 %v5115_v5  ;;  %3687 = vmatpush1.bf16.msra.mxu0 %v5118_v6  ;;  %v5210_v2 = vld [vmem:[%s7853_s1 + $0x504] ss:$16 sps:$4 sm:$0xff]   ;;  %v5211_v5 = vld [vmem:[%s7853_s1 + $0x700] ss:$16 sps:$4 sm:$0xff]  }
  0x44   :  { %3730 = vmatpush1.bf16.msra.mxu1 %v5121_v7  ;;  %3688 = vmatprep.subr.bf16.mxu0 %v5126_v8  ;;  %v5213_v3 = vld [vmem:[%s7853_s1 + $0x704] ss:$16 sps:$4 sm:$0xff]   ;;  %v5214_v8 = vld [vmem:[%s7854_s0 + $0x10] ss:$72 sps:$4 sm:$0xff]  }
  0x45   :  { %3731 = vmatprep.subr.bf16.mxu1 %v5129_v9  ;;  %3718 = vmatprep.mubr.bf16.mxu0 %v5216_v34  ;;  %v5222_v6 = vld [vmem:[%s7853_s1 + $0x8e4] ss:$16 sps:$4 sm:$0xff]   ;;  %v5217_v9 = vld [vmem:[%s7854_s0 + $0x18] ss:$72 sps:$4 sm:$0xff]  }
  0x46   :  { %3761 = vmatprep.mubr.bf16.mxu1 %v5219_v35  ;;  %v5225_v7 = vld [vmem:[%s7853_s1 + $0xae4] ss:$16 sps:$4 sm:$0xff]  }
  0x47   :  { %3689 = vmatpush1.bf16.msra.mxu0 %v5124_v10  ;;  %v5220_v10 = vld [vmem:[%s7853_s1 + $0x8e0] ss:$16 sps:$4 sm:$0xff]   ;;  %v5258_v34 = vld [vmem:[%s7853_s1 + $0x824] ss:$16 sps:$4 sm:$0xff]  }
  0x48   :  { %3732 = vmatpush1.bf16.msra.mxu1 %v5127_v11  ;;  %3690 = vmatprep.subr.bf16.mxu0 %v5132_v12  ;;  %v5223_v11 = vld [vmem:[%s7853_s1 + $0xae0] ss:$16 sps:$4 sm:$0xff]   ;;  %v5228_v12 = vld [vmem:[%s7853_s1 + $0x8c4] ss:$16 sps:$4 sm:$0xff]  }
  0x49   :  { %3733 = vmatprep.subr.bf16.mxu1 %v5135_v13  ;;  %v5231_v13 = vld [vmem:[%s7853_s1 + $0xac4] ss:$16 sps:$4 sm:$0xff]  }
  0x4a   :  { %v5261_v35 = vld [vmem:[%s7853_s1 + $0xa24] ss:$16 sps:$4 sm:$0xff]  }
  0x4b   :  { %3691 = vmatpush1.bf16.msra.mxu0 %v5130_v14  ;;  %v5226_v14 = vld [vmem:[%s7853_s1 + $0x8c0] ss:$16 sps:$4 sm:$0xff]  }
  0x4c   :  { %3734 = vmatpush1.bf16.msra.mxu1 %v5133_v15  ;;  %3692 = vmatprep.subr.bf16.mxu0 %v5138_v16  ;;  %v5229_v15 = vld [vmem:[%s7853_s1 + $0xac0] ss:$16 sps:$4 sm:$0xff]   ;;  %v5234_v16 = vld [vmem:[%s7853_s1 + $0x8a4] ss:$16 sps:$4 sm:$0xff]  }
  0x4d   :  { %3735 = vmatprep.subr.bf16.mxu1 %v5141_v17  ;;  %v5237_v17 = vld [vmem:[%s7853_s1 + $0xaa4] ss:$16 sps:$4 sm:$0xff]  }
  0x4f   :  { %3693 = vmatpush1.bf16.msra.mxu0 %v5136_v18  ;;  %v5232_v18 = vld [vmem:[%s7853_s1 + $0x8a0] ss:$16 sps:$4 sm:$0xff]  }
  0x50   :  { %3736 = vmatpush1.bf16.msra.mxu1 %v5139_v19  ;;  %3694 = vmatprep.subr.bf16.mxu0 %v5144_v20  ;;  %v5318_v19 = vld [vmem:[%s7854_s0 + $0x24] ss:$72 sps:$4 sm:$0xff]   ;;  %v5235_v20 = vld [vmem:[%s7853_s1 + $0xaa0] ss:$16 sps:$4 sm:$0xff]  }
  0x51   :  { %3737 = vmatprep.subr.bf16.mxu1 %v5147_v21  ;;  %v5321_v21 = vld [vmem:[%s7854_s0 + $0x2c] ss:$72 sps:$4 sm:$0xff]  }
  0x53   :  { %3695 = vmatpush1.bf16.msra.mxu0 %v5142_v22  ;;  %v5240_v22 = vld [vmem:[%s7853_s1 + $0x884] ss:$16 sps:$4 sm:$0xff]  }
  0x54   :  { %3738 = vmatpush1.bf16.msra.mxu1 %v5145_v23  ;;  %3696 = vmatprep.subr.bf16.mxu0 %v5150_v24  ;;  %v5243_v23 = vld [vmem:[%s7853_s1 + $0xa84] ss:$16 sps:$4 sm:$0xff]   ;;  %v5238_v24 = vld [vmem:[%s7853_s1 + $0x880] ss:$16 sps:$4 sm:$0xff]  }
  0x55   :  { %3739 = vmatprep.subr.bf16.mxu1 %v5153_v25  ;;  %v5241_v25 = vld [vmem:[%s7853_s1 + $0xa80] ss:$16 sps:$4 sm:$0xff]  }
  0x57   :  { %3697 = vmatpush1.bf16.msra.mxu0 %v5148_v26  ;;  %v5246_v26 = vld [vmem:[%s7853_s1 + $0x864] ss:$16 sps:$4 sm:$0xff]  }
  0x58   :  { %3740 = vmatpush1.bf16.msra.mxu1 %v5151_v27  ;;  %3698 = vmatprep.subr.bf16.mxu0 %v5156_v28  ;;  %v5249_v27 = vld [vmem:[%s7853_s1 + $0xa64] ss:$16 sps:$4 sm:$0xff]   ;;  %v5244_v28 = vld [vmem:[%s7853_s1 + $0x860] ss:$16 sps:$4 sm:$0xff]  }
  0x59   :  { %3741 = vmatprep.subr.bf16.mxu1 %v5159_v29  ;;  %v5247_v29 = vld [vmem:[%s7853_s1 + $0xa60] ss:$16 sps:$4 sm:$0xff]  }
  0x5b   :  { %3699 = vmatpush1.bf16.msra.mxu0 %v5154_v30  ;;  %v5252_v30 = vld [vmem:[%s7853_s1 + $0x844] ss:$16 sps:$4 sm:$0xff]  }
  0x5c   :  { %3742 = vmatpush1.bf16.msra.mxu1 %v5157_v31  ;;  %3700 = vmatprep.subr.bf16.mxu0 %v5162_v32  ;;  %v5255_v31 = vld [vmem:[%s7853_s1 + $0xa44] ss:$16 sps:$4 sm:$0xff]   ;;  %v5250_v32 = vld [vmem:[%s7853_s1 + $0x840] ss:$16 sps:$4 sm:$0xff]  }
  0x5d   :  { %3743 = vmatprep.subr.bf16.mxu1 %v5165_v33  ;;  %v5253_v33 = vld [vmem:[%s7853_s1 + $0xa40] ss:$16 sps:$4 sm:$0xff]  }
  0x5f   :  { %3701 = vmatpush1.bf16.msra.mxu0 %v5160_v36  ;;  %v5256_v36 = vld [vmem:[%s7853_s1 + $0x820] ss:$16 sps:$4 sm:$0xff]  }
  0x60   :  { %3744 = vmatpush1.bf16.msra.mxu1 %v5163_v37  ;;  %3702 = vmatprep.subr.bf16.mxu0 %v5168_v38  ;;  %v5259_v37 = vld [vmem:[%s7853_s1 + $0xa20] ss:$16 sps:$4 sm:$0xff]   ;;  %v5264_v38 = vld [vmem:[%s7853_s1 + $0x804] ss:$16 sps:$4 sm:$0xff]  }
  0x61   :  { %3745 = vmatprep.subr.bf16.mxu1 %v5171_v39  ;;  %v5267_v39 = vld [vmem:[%s7853_s1 + $0xa04] ss:$16 sps:$4 sm:$0xff]  }
  0x63   :  { %3703 = vmatpush2.bf16.msra.mxu0 %v5166_v40  ;;  %v5262_v40 = vld [vmem:[%s7853_s1 + $0x800] ss:$16 sps:$4 sm:$0xff]  }
  0x64   :  { %3746 = vmatpush2.bf16.msra.mxu1 %v5169_v41  ;;  %3704 = vmatprep.subr.bf16.mxu0 %v5174_v42  ;;  %v5265_v41 = vld [vmem:[%s7853_s1 + $0xa00] ss:$16 sps:$4 sm:$0xff]   ;;  %v5270_v42 = vld [vmem:[%s7853_s1 + $0x9e4] ss:$16 sps:$4 sm:$0xff]  }
  0x65   :  { %3747 = vmatprep.subr.bf16.mxu1 %v5177_v43  ;;  %v5273_v43 = vld [vmem:[%s7853_s1 + $0xbe4] ss:$16 sps:$4 sm:$0xff]  }
  0x67   :  { %3705 = vmatpush2.bf16.msra.mxu0 %v5172_v44  ;;  %v5268_v44 = vld [vmem:[%s7853_s1 + $0x9e0] ss:$16 sps:$4 sm:$0xff]  }
  0x68   :  { %3748 = vmatpush2.bf16.msra.mxu1 %v5175_v45  ;;  %3706 = vmatprep.subr.bf16.mxu0 %v5180_v46  ;;  %v5271_v45 = vld [vmem:[%s7853_s1 + $0xbe0] ss:$16 sps:$4 sm:$0xff]   ;;  %v5276_v46 = vld [vmem:[%s7853_s1 + $0x9c4] ss:$16 sps:$4 sm:$0xff]  }
  0x69   :  { %3749 = vmatprep.subr.bf16.mxu1 %v5183_v47  ;;  %v5279_v47 = vld [vmem:[%s7853_s1 + $0xbc4] ss:$16 sps:$4 sm:$0xff]  }
  0x6b   :  { %3707 = vmatpush2.bf16.msra.mxu0 %v5178_v48  ;;  %v5274_v48 = vld [vmem:[%s7853_s1 + $0x9c0] ss:$16 sps:$4 sm:$0xff]  }
  0x6c   :  { %3750 = vmatpush2.bf16.msra.mxu1 %v5181_v49  ;;  %3708 = vmatprep.subr.bf16.mxu0 %v5186_v50  ;;  %v5277_v49 = vld [vmem:[%s7853_s1 + $0xbc0] ss:$16 sps:$4 sm:$0xff]   ;;  %v5282_v50 = vld [vmem:[%s7853_s1 + $0x9a4] ss:$16 sps:$4 sm:$0xff]  }
  0x6d   :  { %3751 = vmatprep.subr.bf16.mxu1 %v5189_v51  ;;  %v5285_v51 = vld [vmem:[%s7853_s1 + $0xba4] ss:$16 sps:$4 sm:$0xff]  }
  0x6f   :  { %3709 = vmatpush2.bf16.msra.mxu0 %v5184_v52  ;;  %v5280_v52 = vld [vmem:[%s7853_s1 + $0x9a0] ss:$16 sps:$4 sm:$0xff]  }
  0x70   :  { %3752 = vmatpush2.bf16.msra.mxu1 %v5187_v53  ;;  %3710 = vmatprep.subr.bf16.mxu0 %v5192_v54  ;;  %v5283_v53 = vld [vmem:[%s7853_s1 + $0xba0] ss:$16 sps:$4 sm:$0xff]   ;;  %v5288_v54 = vld [vmem:[%s7853_s1 + $0x984] ss:$16 sps:$4 sm:$0xff]  }
  0x71   :  { %3753 = vmatprep.subr.bf16.mxu1 %v5195_v55  ;;  %v5291_v55 = vld [vmem:[%s7853_s1 + $0xb84] ss:$16 sps:$4 sm:$0xff]  }
  0x73   :  { %3711 = vmatpush2.bf16.msra.mxu0 %v5190_v56  ;;  %v5286_v56 = vld [vmem:[%s7853_s1 + $0x980] ss:$16 sps:$4 sm:$0xff]  }
  0x74   :  { %3754 = vmatpush2.bf16.msra.mxu1 %v5193_v57  ;;  %3712 = vmatprep.subr.bf16.mxu0 %v5198_v58  ;;  %v5289_v57 = vld [vmem:[%s7853_s1 + $0xb80] ss:$16 sps:$4 sm:$0xff]   ;;  %v5294_v58 = vld [vmem:[%s7853_s1 + $0x964] ss:$16 sps:$4 sm:$0xff]  }
  0x75   :  { %3755 = vmatprep.subr.bf16.mxu1 %v5201_v59  ;;  %v5297_v59 = vld [vmem:[%s7853_s1 + $0xb64] ss:$16 sps:$4 sm:$0xff]  }
  0x77   :  { %3713 = vmatpush2.bf16.msra.mxu0 %v5196_v60  ;;  %v5292_v60 = vld [vmem:[%s7853_s1 + $0x960] ss:$16 sps:$4 sm:$0xff]  }
  0x78   :  { %3756 = vmatpush2.bf16.msra.mxu1 %v5199_v61  ;;  %3714 = vmatprep.subr.bf16.mxu0 %v5204_v62  ;;  %v5295_v61 = vld [vmem:[%s7853_s1 + $0xb60] ss:$16 sps:$4 sm:$0xff]   ;;  %v5300_v62 = vld [vmem:[%s7853_s1 + $0x944] ss:$16 sps:$4 sm:$0xff]  }
  0x79   :  { %3757 = vmatprep.subr.bf16.mxu1 %v5207_v63  ;;  %v5303_v63 = vld [vmem:[%s7853_s1 + $0xb44] ss:$16 sps:$4 sm:$0xff]  }
  0x7b   :  { %3715 = vmatpush2.bf16.msra.mxu0 %v5202_v0  ;;  %v5298_v0 = vld [vmem:[%s7853_s1 + $0x940] ss:$16 sps:$4 sm:$0xff]  }
  0x7c   :  { %3758 = vmatpush2.bf16.msra.mxu1 %v5205_v1  ;;  %3716 = vmatprep.subr.bf16.mxu0 %v5210_v2  ;;  %v5301_v1 = vld [vmem:[%s7853_s1 + $0xb40] ss:$16 sps:$4 sm:$0xff]   ;;  %v5306_v2 = vld [vmem:[%s7853_s1 + $0x924] ss:$16 sps:$4 sm:$0xff]  }
  0x7d   :  { %3759 = vmatprep.subr.bf16.mxu1 %v5213_v3  ;;  %v5309_v3 = vld [vmem:[%s7853_s1 + $0xb24] ss:$16 sps:$4 sm:$0xff]  }
  0x7f   :  { %3717 = vmatpush2.bf16.msra.mxu0 %v5208_v4  ;;  %v5304_v4 = vld [vmem:[%s7853_s1 + $0x920] ss:$16 sps:$4 sm:$0xff]  }
  0x80   :  { %3760 = vmatpush2.bf16.msra.mxu1 %v5211_v5  ;;  %3772 = vmatprep.subr.bf16.mxu0 %v5222_v6  ;;  %v5307_v5 = vld [vmem:[%s7853_s1 + $0xb20] ss:$16 sps:$4 sm:$0xff]   ;;  %v5312_v6 = vld [vmem:[%s7853_s1 + $0x904] ss:$16 sps:$4 sm:$0xff]  }
  0x81   :  { %3815 = vmatprep.subr.bf16.mxu1 %v5225_v7  ;;  %v5315_v7 = vld [vmem:[%s7853_s1 + $0xb04] ss:$16 sps:$4 sm:$0xff]  }
  0x82   :  { %3719 = vmatmul.mubr.bf16.vlgmr.msra.gmra.mxu0 %v5214_v8  ;;  %v5310_v8 = vld [vmem:[%s7853_s1 + $0x900] ss:$16 sps:$4 sm:$0xff]  }
  0x83   :  { %3762 = vmatmul.mubr.bf16.vlgmr.msra.gmra.mxu1 %v5217_v9  ;;  %3773 = vmatpush1.bf16.msra.mxu0 %v5220_v10  ;;  %v5313_v9 = vld [vmem:[%s7853_s1 + $0xb00] ss:$16 sps:$4 sm:$0xff]   ;;  %v5324_v10 = vld [vmem:[%s7853_s1 + $0xce4] ss:$16 sps:$4 sm:$0xff]  }
  0x84   :  { %3816 = vmatpush1.bf16.msra.mxu1 %v5223_v11  ;;  %3774 = vmatprep.subr.bf16.mxu0 %v5228_v12  ;;  %v5327_v11 = vld [vmem:[%s7853_s1 + $0xee4] ss:$16 sps:$4 sm:$0xff]   ;;  %v5316_v12 = vld [vmem:[%s7854_s0 + $0x20] ss:$72 sps:$4 sm:$0xff]  }
  0x85   :  { %3817 = vmatprep.subr.bf16.mxu1 %v5231_v13  ;;  %3804 = vmatprep.mubr.bf16.mxu0 %v5318_v19  ;;  %v5319_v13 = vld [vmem:[%s7854_s0 + $0x28] ss:$72 sps:$4 sm:$0xff]   ;;  %v5423_v19 = vld [vmem:[%s7854_s0 + $0x3c] ss:$72 sps:$4 sm:$0xff]  }
  0x86   :  { %3847 = vmatprep.mubr.bf16.mxu1 %v5321_v21  ;;  %v5331_v21 = vld [vmem:[%s7853_s1 + $0xec0] ss:$16 sps:$4 sm:$0xff]  }
  0x87   :  { %3775 = vmatpush1.bf16.msra.mxu0 %v5226_v14  ;;  %v5322_v14 = vld [vmem:[%s7853_s1 + $0xce0] ss:$16 sps:$4 sm:$0xff]  }
  0x88   :  { %3818 = vmatpush1.bf16.msra.mxu1 %v5229_v15  ;;  %3776 = vmatprep.subr.bf16.mxu0 %v5234_v16  ;;  %v5325_v15 = vld [vmem:[%s7853_s1 + $0xee0] ss:$16 sps:$4 sm:$0xff]   ;;  %v5330_v16 = vld [vmem:[%s7853_s1 + $0xcc4] ss:$16 sps:$4 sm:$0xff]  }
  0x89   :  { %3819 = vmatprep.subr.bf16.mxu1 %v5237_v17  ;;  %v5333_v17 = vld [vmem:[%s7853_s1 + $0xec4] ss:$16 sps:$4 sm:$0xff]  }
  0x8b   :  { %3777 = vmatpush1.bf16.msra.mxu0 %v5232_v18  ;;  %v5420_v18 = vld [vmem:[%s7854_s0 + $0x34] ss:$72 sps:$4 sm:$0xff]  }
  0x8c   :  { %3820 = vmatpush1.bf16.msra.mxu1 %v5235_v20  ;;  %3778 = vmatprep.subr.bf16.mxu0 %v5240_v22  ;;  %v5328_v20 = vld [vmem:[%s7853_s1 + $0xcc0] ss:$16 sps:$4 sm:$0xff]   ;;  %v5336_v22 = vld [vmem:[%s7853_s1 + $0xca4] ss:$16 sps:$4 sm:$0xff]  }
  0x8d   :  { %3821 = vmatprep.subr.bf16.mxu1 %v5243_v23  ;;  %v5339_v23 = vld [vmem:[%s7853_s1 + $0xea4] ss:$16 sps:$4 sm:$0xff]  }
  0x8f   :  { %3779 = vmatpush1.bf16.msra.mxu0 %v5238_v24  ;;  %v5334_v24 = vld [vmem:[%s7853_s1 + $0xca0] ss:$16 sps:$4 sm:$0xff]  }
  0x90   :  { %3822 = vmatpush1.bf16.msra.mxu1 %v5241_v25  ;;  %3780 = vmatprep.subr.bf16.mxu0 %v5246_v26  ;;  %v5337_v25 = vld [vmem:[%s7853_s1 + $0xea0] ss:$16 sps:$4 sm:$0xff]   ;;  %v5342_v26 = vld [vmem:[%s7853_s1 + $0xc84] ss:$16 sps:$4 sm:$0xff]  }
  0x91   :  { %3823 = vmatprep.subr.bf16.mxu1 %v5249_v27  ;;  %v5345_v27 = vld [vmem:[%s7853_s1 + $0xe84] ss:$16 sps:$4 sm:$0xff]  }
  0x93   :  { %3781 = vmatpush1.bf16.msra.mxu0 %v5244_v28  ;;  %v5340_v28 = vld [vmem:[%s7853_s1 + $0xc80] ss:$16 sps:$4 sm:$0xff]  }
  0x94   :  { %3824 = vmatpush1.bf16.msra.mxu1 %v5247_v29  ;;  %3782 = vmatprep.subr.bf16.mxu0 %v5252_v30  ;;  %v5343_v29 = vld [vmem:[%s7853_s1 + $0xe80] ss:$16 sps:$4 sm:$0xff]   ;;  %v5348_v30 = vld [vmem:[%s7853_s1 + $0xc64] ss:$16 sps:$4 sm:$0xff]  }
  0x95   :  { %3825 = vmatprep.subr.bf16.mxu1 %v5255_v31  ;;  %v5351_v31 = vld [vmem:[%s7853_s1 + $0xe64] ss:$16 sps:$4 sm:$0xff]  }
  0x97   :  { %3783 = vmatpush1.bf16.msra.mxu0 %v5250_v32  ;;  %v5346_v32 = vld [vmem:[%s7853_s1 + $0xc60] ss:$16 sps:$4 sm:$0xff]  }
  0x98   :  { %3826 = vmatpush1.bf16.msra.mxu1 %v5253_v33  ;;  %3784 = vmatprep.subr.bf16.mxu0 %v5258_v34  ;;  %v5349_v33 = vld [vmem:[%s7853_s1 + $0xe60] ss:$16 sps:$4 sm:$0xff]   ;;  %v5354_v34 = vld [vmem:[%s7853_s1 + $0xc44] ss:$16 sps:$4 sm:$0xff]  }
  0x99   :  { %3827 = vmatprep.subr.bf16.mxu1 %v5261_v35  ;;  %v5357_v35 = vld [vmem:[%s7853_s1 + $0xe44] ss:$16 sps:$4 sm:$0xff]  }
  0x9b   :  { %3785 = vmatpush1.bf16.msra.mxu0 %v5256_v36  ;;  %v5352_v36 = vld [vmem:[%s7853_s1 + $0xc40] ss:$16 sps:$4 sm:$0xff]  }
  0x9c   :  { %3828 = vmatpush1.bf16.msra.mxu1 %v5259_v37  ;;  %3786 = vmatprep.subr.bf16.mxu0 %v5264_v38  ;;  %v5355_v37 = vld [vmem:[%s7853_s1 + $0xe40] ss:$16 sps:$4 sm:$0xff]   ;;  %v5360_v38 = vld [vmem:[%s7853_s1 + $0xc24] ss:$16 sps:$4 sm:$0xff]  }
  0x9d   :  { %3829 = vmatprep.subr.bf16.mxu1 %v5267_v39  ;;  %v5363_v39 = vld [vmem:[%s7853_s1 + $0xe24] ss:$16 sps:$4 sm:$0xff]  }
  0x9f   :  { %3787 = vmatpush1.bf16.msra.mxu0 %v5262_v40  ;;  %v5358_v40 = vld [vmem:[%s7853_s1 + $0xc20] ss:$16 sps:$4 sm:$0xff]  }
  0xa0   :  { %3830 = vmatpush1.bf16.msra.mxu1 %v5265_v41  ;;  %3788 = vmatprep.subr.bf16.mxu0 %v5270_v42  ;;  %v5361_v41 = vld [vmem:[%s7853_s1 + $0xe20] ss:$16 sps:$4 sm:$0xff]   ;;  %v5366_v42 = vld [vmem:[%s7853_s1 + $0xc04] ss:$16 sps:$4 sm:$0xff]  }
  0xa1   :  { %3831 = vmatprep.subr.bf16.mxu1 %v5273_v43  ;;  %v5369_v43 = vld [vmem:[%s7853_s1 + $0xe04] ss:$16 sps:$4 sm:$0xff]  }
  0xa3   :  { %3789 = vmatpush2.bf16.msra.mxu0 %v5268_v44  ;;  %v5364_v44 = vld [vmem:[%s7853_s1 + $0xc00] ss:$16 sps:$4 sm:$0xff]  }
  0xa4   :  { %3832 = vmatpush2.bf16.msra.mxu1 %v5271_v45  ;;  %3790 = vmatprep.subr.bf16.mxu0 %v5276_v46  ;;  %v5367_v45 = vld [vmem:[%s7853_s1 + $0xe00] ss:$16 sps:$4 sm:$0xff]   ;;  %v5372_v46 = vld [vmem:[%s7853_s1 + $0xde4] ss:$16 sps:$4 sm:$0xff]  }
  0xa5   :  { %3833 = vmatprep.subr.bf16.mxu1 %v5279_v47  ;;  %v5375_v47 = vld [vmem:[%s7853_s1 + $0xfe4] ss:$16 sps:$4 sm:$0xff]  }
  0xa7   :  { %3791 = vmatpush2.bf16.msra.mxu0 %v5274_v48  ;;  %v5370_v48 = vld [vmem:[%s7853_s1 + $0xde0] ss:$16 sps:$4 sm:$0xff]  }
  0xa8   :  { %3834 = vmatpush2.bf16.msra.mxu1 %v5277_v49  ;;  %3792 = vmatprep.subr.bf16.mxu0 %v5282_v50  ;;  %v5373_v49 = vld [vmem:[%s7853_s1 + $0xfe0] ss:$16 sps:$4 sm:$0xff]   ;;  %v5378_v50 = vld [vmem:[%s7853_s1 + $0xdc4] ss:$16 sps:$4 sm:$0xff]  }
  0xa9   :  { %3835 = vmatprep.subr.bf16.mxu1 %v5285_v51  ;;  %v5381_v51 = vld [vmem:[%s7853_s1 + $0xfc4] ss:$16 sps:$4 sm:$0xff]  }
  0xab   :  { %3793 = vmatpush2.bf16.msra.mxu0 %v5280_v52  ;;  %v5376_v52 = vld [vmem:[%s7853_s1 + $0xdc0] ss:$16 sps:$4 sm:$0xff]  }
  0xac   :  { %3836 = vmatpush2.bf16.msra.mxu1 %v5283_v53  ;;  %3794 = vmatprep.subr.bf16.mxu0 %v5288_v54  ;;  %v5379_v53 = vld [vmem:[%s7853_s1 + $0xfc0] ss:$16 sps:$4 sm:$0xff]   ;;  %v5384_v54 = vld [vmem:[%s7853_s1 + $0xda4] ss:$16 sps:$4 sm:$0xff]  }
  0xad   :  { %3837 = vmatprep.subr.bf16.mxu1 %v5291_v55  ;;  %v5387_v55 = vld [vmem:[%s7853_s1 + $0xfa4] ss:$16 sps:$4 sm:$0xff]  }
  0xaf   :  { %3795 = vmatpush2.bf16.msra.mxu0 %v5286_v56  ;;  %v5382_v56 = vld [vmem:[%s7853_s1 + $0xda0] ss:$16 sps:$4 sm:$0xff]  }
  0xb0   :  { %3838 = vmatpush2.bf16.msra.mxu1 %v5289_v57  ;;  %3796 = vmatprep.subr.bf16.mxu0 %v5294_v58  ;;  %v5385_v57 = vld [vmem:[%s7853_s1 + $0xfa0] ss:$16 sps:$4 sm:$0xff]   ;;  %v5390_v58 = vld [vmem:[%s7853_s1 + $0xd84] ss:$16 sps:$4 sm:$0xff]  }
  0xb1   :  { %3839 = vmatprep.subr.bf16.mxu1 %v5297_v59  ;;  %v5393_v59 = vld [vmem:[%s7853_s1 + $0xf84] ss:$16 sps:$4 sm:$0xff]  }
  0xb3   :  { %3797 = vmatpush2.bf16.msra.mxu0 %v5292_v60  ;;  %v5388_v60 = vld [vmem:[%s7853_s1 + $0xd80] ss:$16 sps:$4 sm:$0xff]  }
  0xb4   :  { %3840 = vmatpush2.bf16.msra.mxu1 %v5295_v61  ;;  %3798 = vmatprep.subr.bf16.mxu0 %v5300_v62  ;;  %v5391_v61 = vld [vmem:[%s7853_s1 + $0xf80] ss:$16 sps:$4 sm:$0xff]   ;;  %v5396_v62 = vld [vmem:[%s7853_s1 + $0xd64] ss:$16 sps:$4 sm:$0xff]  }
  0xb5   :  { %3841 = vmatprep.subr.bf16.mxu1 %v5303_v63  ;;  %v5399_v63 = vld [vmem:[%s7853_s1 + $0xf64] ss:$16 sps:$4 sm:$0xff]  }
  0xb7   :  { %3799 = vmatpush2.bf16.msra.mxu0 %v5298_v0  ;;  %v5394_v0 = vld [vmem:[%s7853_s1 + $0xd60] ss:$16 sps:$4 sm:$0xff]  }
  0xb8   :  { %3842 = vmatpush2.bf16.msra.mxu1 %v5301_v1  ;;  %3800 = vmatprep.subr.bf16.mxu0 %v5306_v2  ;;  %v5397_v1 = vld [vmem:[%s7853_s1 + $0xf60] ss:$16 sps:$4 sm:$0xff]   ;;  %v5402_v2 = vld [vmem:[%s7853_s1 + $0xd44] ss:$16 sps:$4 sm:$0xff]  }
  0xb9   :  { %3843 = vmatprep.subr.bf16.mxu1 %v5309_v3  ;;  %v5405_v3 = vld [vmem:[%s7853_s1 + $0xf44] ss:$16 sps:$4 sm:$0xff]  }
  0xbb   :  { %3801 = vmatpush2.bf16.msra.mxu0 %v5304_v4  ;;  %v5400_v4 = vld [vmem:[%s7853_s1 + $0xd40] ss:$16 sps:$4 sm:$0xff]  }
  0xbc   :  { %3844 = vmatpush2.bf16.msra.mxu1 %v5307_v5  ;;  %3802 = vmatprep.subr.bf16.mxu0 %v5312_v6  ;;  %v5403_v5 = vld [vmem:[%s7853_s1 + $0xf40] ss:$16 sps:$4 sm:$0xff]   ;;  %v5408_v6 = vld [vmem:[%s7853_s1 + $0xd24] ss:$16 sps:$4 sm:$0xff]  }
  0xbd   :  { %3845 = vmatprep.subr.bf16.mxu1 %v5315_v7  ;;  %v5411_v7 = vld [vmem:[%s7853_s1 + $0xf24] ss:$16 sps:$4 sm:$0xff]  }
  0xbf   :  { %3803 = vmatpush2.bf16.msra.mxu0 %v5310_v8  ;;  %v5406_v8 = vld [vmem:[%s7853_s1 + $0xd20] ss:$16 sps:$4 sm:$0xff]  }
  0xc0   :  { %3846 = vmatpush2.bf16.msra.mxu1 %v5313_v9  ;;  %3858 = vmatprep.subr.bf16.mxu0 %v5324_v10  ;;  %v5409_v9 = vld [vmem:[%s7853_s1 + $0xf20] ss:$16 sps:$4 sm:$0xff]   ;;  %v5414_v10 = vld [vmem:[%s7853_s1 + $0xd04] ss:$16 sps:$4 sm:$0xff]  }
  0xc1   :  { %3901 = vmatprep.subr.bf16.mxu1 %v5327_v11  ;;  %v5417_v11 = vld [vmem:[%s7853_s1 + $0xf04] ss:$16 sps:$4 sm:$0xff]  }
  0xc2   :  { %3805 = vmatmul.mubr.bf16.vlgmr.msra.gmra.mxu0 %v5316_v12  ;;  %v5412_v12 = vld [vmem:[%s7853_s1 + $0xd00] ss:$16 sps:$4 sm:$0xff]  }
  0xc3   :  { %3848 = vmatmul.mubr.bf16.vlgmr.msra.gmra.mxu1 %v5319_v13  ;;  %3859 = vmatpush1.bf16.msra.mxu0 %v5322_v14  ;;  %v5415_v13 = vld [vmem:[%s7853_s1 + $0xf00] ss:$16 sps:$4 sm:$0xff]   ;;  %v5426_v14 = vld [vmem:[%s7853_s1 + $0x10e4] ss:$16 sps:$4 sm:$0xff]  }
  0xc4   :  { %3902 = vmatpush1.bf16.msra.mxu1 %v5325_v15  ;;  %3860 = vmatprep.subr.bf16.mxu0 %v5330_v16  ;;  %v5429_v15 = vld [vmem:[%s7853_s1 + $0xec] ss:$16 sps:$4 sm:$0xff]   ;;  %v5418_v16 = vld [vmem:[%s7854_s0 + $0x30] ss:$72 sps:$4 sm:$0xff]  }
  0xc5   :  { %3903 = vmatprep.subr.bf16.mxu1 %v5333_v17  ;;  %3890 = vmatprep.mubr.bf16.mxu0 %v5420_v18  ;;  %v5421_v17 = vld [vmem:[%s7854_s0 + $0x38] ss:$72 sps:$4 sm:$0xff]  }
  0xc6   :  { %3933 = vmatprep.mubr.bf16.mxu1 %v5423_v19  ;;  %v5424_v18 = vld [vmem:[%s7853_s1 + $0x10e0] ss:$16 sps:$4 sm:$0xff]   ;;  %v5427_v19 = vld [vmem:[%s7853_s1 + $0xe8] ss:$16 sps:$4 sm:$0xff]  }
  0xc7   :  { %3861 = vmatpush1.bf16.msra.mxu0 %v5328_v20  ;;  %v5432_v20 = vld [vmem:[%s7853_s1 + $0x10c4] ss:$16 sps:$4 sm:$0xff]  }
  0xc8   :  { %3904 = vmatpush1.bf16.msra.mxu1 %v5331_v21  ;;  %3862 = vmatprep.subr.bf16.mxu0 %v5336_v22  ;;  %v5435_v21 = vld [vmem:[%s7853_s1 + $0xcc] ss:$16 sps:$4 sm:$0xff]  }
  0xc9   :  { %3905 = vmatprep.subr.bf16.mxu1 %v5339_v23  ;;  %v5522_v22 = vld [vmem:[%s7854_s0 + $0x44] ss:$72 sps:$4 sm:$0xff]   ;;  %v5430_v23 = vld [vmem:[%s7853_s1 + $0x10c0] ss:$16 sps:$4 sm:$0xff]  }
  0xcb   :  { %3863 = vmatpush1.bf16.msra.mxu0 %v5334_v24  ;;  %v5433_v24 = vld [vmem:[%s7853_s1 + $0xc8] ss:$16 sps:$4 sm:$0xff]  }
  0xcc   :  { %3906 = vmatpush1.bf16.msra.mxu1 %v5337_v25  ;;  %3864 = vmatprep.subr.bf16.mxu0 %v5342_v26  ;;  %v5438_v25 = vld [vmem:[%s7853_s1 + $0x10a4] ss:$16 sps:$4 sm:$0xff]   ;;  %v5441_v26 = vld [vmem:[%s7853_s1 + $0xac] ss:$16 sps:$4 sm:$0xff]  }
  0xcd   :  { %3907 = vmatprep.subr.bf16.mxu1 %v5345_v27  ;;  %v5907_v27 = vld [vmem:[%s7854_s0 + $0x4] ss:$72 sps:$4 sm:$0xff]  }
  0xcf   :  { %3865 = vmatpush1.bf16.msra.mxu0 %v5340_v28  ;;  %v5436_v28 = vld [vmem:[%s7853_s1 + $0x10a0] ss:$16 sps:$4 sm:$0xff]  }
  0xd0   :  { %3908 = vmatpush1.bf16.msra.mxu1 %v5343_v29  ;;  %3866 = vmatprep.subr.bf16.mxu0 %v5348_v30  ;;  %v5439_v29 = vld [vmem:[%s7853_s1 + $0xa8] ss:$16 sps:$4 sm:$0xff]   ;;  %v5444_v30 = vld [vmem:[%s7853_s1 + $0x1084] ss:$16 sps:$4 sm:$0xff]  }
  0xd1   :  { %3909 = vmatprep.subr.bf16.mxu1 %v5351_v31  ;;  %v5447_v31 = vld [vmem:[%s7853_s1 + $0x8c] ss:$16 sps:$4 sm:$0xff]  }
  0xd3   :  { %3867 = vmatpush1.bf16.msra.mxu0 %v5346_v32  ;;  %v5442_v32 = vld [vmem:[%s7853_s1 + $0x1080] ss:$16 sps:$4 sm:$0xff]  }
  0xd4   :  { %3910 = vmatpush1.bf16.msra.mxu1 %v5349_v33  ;;  %3868 = vmatprep.subr.bf16.mxu0 %v5354_v34  ;;  %v5445_v33 = vld [vmem:[%s7853_s1 + $0x88] ss:$16 sps:$4 sm:$0xff]   ;;  %v5450_v34 = vld [vmem:[%s7853_s1 + $0x1064] ss:$16 sps:$4 sm:$0xff]  }
  0xd5   :  { %3911 = vmatprep.subr.bf16.mxu1 %v5357_v35  ;;  %v5453_v35 = vld [vmem:[%s7853_s1 + $0x6c] ss:$16 sps:$4 sm:$0xff]  }
  0xd7   :  { %3869 = vmatpush1.bf16.msra.mxu0 %v5352_v36  ;;  %v5448_v36 = vld [vmem:[%s7853_s1 + $0x1060] ss:$16 sps:$4 sm:$0xff]  }
  0xd8   :  { %3912 = vmatpush1.bf16.msra.mxu1 %v5355_v37  ;;  %3870 = vmatprep.subr.bf16.mxu0 %v5360_v38  ;;  %v5451_v37 = vld [vmem:[%s7853_s1 + $0x68] ss:$16 sps:$4 sm:$0xff]   ;;  %v5456_v38 = vld [vmem:[%s7853_s1 + $0x1044] ss:$16 sps:$4 sm:$0xff]  }
  0xd9   :  { %3913 = vmatprep.subr.bf16.mxu1 %v5363_v39  ;;  %v5459_v39 = vld [vmem:[%s7853_s1 + $0x4c] ss:$16 sps:$4 sm:$0xff]  }
  0xdb   :  { %3871 = vmatpush1.bf16.msra.mxu0 %v5358_v40  ;;  %v5454_v40 = vld [vmem:[%s7853_s1 + $0x1040] ss:$16 sps:$4 sm:$0xff]  }
  0xdc   :  { %3914 = vmatpush1.bf16.msra.mxu1 %v5361_v41  ;;  %3872 = vmatprep.subr.bf16.mxu0 %v5366_v42  ;;  %v5457_v41 = vld [vmem:[%s7853_s1 + $0x48] ss:$16 sps:$4 sm:$0xff]   ;;  %v5462_v42 = vld [vmem:[%s7853_s1 + $0x1024] ss:$16 sps:$4 sm:$0xff]  }
  0xdd   :  { %3915 = vmatprep.subr.bf16.mxu1 %v5369_v43  ;;  %v5465_v43 = vld [vmem:[%s7853_s1 + $0x2c] ss:$16 sps:$4 sm:$0xff]  }
  0xdf   :  { %3873 = vmatpush1.bf16.msra.mxu0 %v5364_v44  ;;  %v5460_v44 = vld [vmem:[%s7853_s1 + $0x1020] ss:$16 sps:$4 sm:$0xff]  }
  0xe0   :  { %3916 = vmatpush1.bf16.msra.mxu1 %v5367_v45  ;;  %3874 = vmatprep.subr.bf16.mxu0 %v5372_v46  ;;  %v5463_v45 = vld [vmem:[%s7853_s1 + $0x28] ss:$16 sps:$4 sm:$0xff]   ;;  %v5468_v46 = vld [vmem:[%s7853_s1 + $0x1004] ss:$16 sps:$4 sm:$0xff]  }
  0xe1   :  { %3917 = vmatprep.subr.bf16.mxu1 %v5375_v47  ;;  %v5471_v47 = vld [vmem:[%s7853_s1 + $0xc] ss:$16 sps:$4 sm:$0xff]  }
  0xe3   :  { %3875 = vmatpush2.bf16.msra.mxu0 %v5370_v48  ;;  %v5466_v48 = vld [vmem:[%s7853_s1 + $0x1000] ss:$16 sps:$4 sm:$0xff]  }
  0xe4   :  { %3918 = vmatpush2.bf16.msra.mxu1 %v5373_v49  ;;  %3876 = vmatprep.subr.bf16.mxu0 %v5378_v50  ;;  %v5469_v49 = vld [vmem:[%s7853_s1 + $0x8] ss:$16 sps:$4 sm:$0xff]   ;;  %v5474_v50 = vld [vmem:[%s7853_s1 + $0x11e4] ss:$16 sps:$4 sm:$0xff]  }
  0xe5   :  { %3919 = vmatprep.subr.bf16.mxu1 %v5381_v51  ;;  %v5477_v51 = vld [vmem:[%s7853_s1 + $0x1ec] ss:$16 sps:$4 sm:$0xff]  }
  0xe7   :  { %3877 = vmatpush2.bf16.msra.mxu0 %v5376_v52  ;;  %v5472_v52 = vld [vmem:[%s7853_s1 + $0x11e0] ss:$16 sps:$4 sm:$0xff]  }
  0xe8   :  { %3920 = vmatpush2.bf16.msra.mxu1 %v5379_v53  ;;  %3878 = vmatprep.subr.bf16.mxu0 %v5384_v54  ;;  %v5475_v53 = vld [vmem:[%s7853_s1 + $0x1e8] ss:$16 sps:$4 sm:$0xff]   ;;  %v5480_v54 = vld [vmem:[%s7853_s1 + $0x11c4] ss:$16 sps:$4 sm:$0xff]  }
  0xe9   :  { %3921 = vmatprep.subr.bf16.mxu1 %v5387_v55  ;;  %v5483_v55 = vld [vmem:[%s7853_s1 + $0x1cc] ss:$16 sps:$4 sm:$0xff]  }
  0xeb   :  { %3879 = vmatpush2.bf16.msra.mxu0 %v5382_v56  ;;  %v5478_v56 = vld [vmem:[%s7853_s1 + $0x11c0] ss:$16 sps:$4 sm:$0xff]  }
  0xec   :  { %3922 = vmatpush2.bf16.msra.mxu1 %v5385_v57  ;;  %3880 = vmatprep.subr.bf16.mxu0 %v5390_v58  ;;  %v5481_v57 = vld [vmem:[%s7853_s1 + $0x1c8] ss:$16 sps:$4 sm:$0xff]   ;;  %v5486_v58 = vld [vmem:[%s7853_s1 + $0x11a4] ss:$16 sps:$4 sm:$0xff]  }
  0xed   :  { %3923 = vmatprep.subr.bf16.mxu1 %v5393_v59  ;;  %v5489_v59 = vld [vmem:[%s7853_s1 + $0x1ac] ss:$16 sps:$4 sm:$0xff]  }
  0xef   :  { %3881 = vmatpush2.bf16.msra.mxu0 %v5388_v60  ;;  %v5484_v60 = vld [vmem:[%s7853_s1 + $0x11a0] ss:$16 sps:$4 sm:$0xff]  }
  0xf0   :  { %3924 = vmatpush2.bf16.msra.mxu1 %v5391_v61  ;;  %3882 = vmatprep.subr.bf16.mxu0 %v5396_v62  ;;  %v5487_v61 = vld [vmem:[%s7853_s1 + $0x1a8] ss:$16 sps:$4 sm:$0xff]   ;;  %v5492_v62 = vld [vmem:[%s7853_s1 + $0x1184] ss:$16 sps:$4 sm:$0xff]  }
  0xf1   :  { %3925 = vmatprep.subr.bf16.mxu1 %v5399_v63  ;;  %v5495_v63 = vld [vmem:[%s7853_s1 + $0x18c] ss:$16 sps:$4 sm:$0xff]  }
  0xf3   :  { %3883 = vmatpush2.bf16.msra.mxu0 %v5394_v0  ;;  %v5490_v0 = vld [vmem:[%s7853_s1 + $0x1180] ss:$16 sps:$4 sm:$0xff]  }
  0xf4   :  { %3926 = vmatpush2.bf16.msra.mxu1 %v5397_v1  ;;  %3884 = vmatprep.subr.bf16.mxu0 %v5402_v2  ;;  %v5493_v1 = vld [vmem:[%s7853_s1 + $0x188] ss:$16 sps:$4 sm:$0xff]   ;;  %v5498_v2 = vld [vmem:[%s7853_s1 + $0x1164] ss:$16 sps:$4 sm:$0xff]  }
  0xf5   :  { %3927 = vmatprep.subr.bf16.mxu1 %v5405_v3  ;;  %v5501_v3 = vld [vmem:[%s7853_s1 + $0x16c] ss:$16 sps:$4 sm:$0xff]  }
  0xf7   :  { %3885 = vmatpush2.bf16.msra.mxu0 %v5400_v4  ;;  %v5496_v4 = vld [vmem:[%s7853_s1 + $0x1160] ss:$16 sps:$4 sm:$0xff]  }
  0xf8   :  { %3928 = vmatpush2.bf16.msra.mxu1 %v5403_v5  ;;  %3886 = vmatprep.subr.bf16.mxu0 %v5408_v6  ;;  %v5499_v5 = vld [vmem:[%s7853_s1 + $0x168] ss:$16 sps:$4 sm:$0xff]   ;;  %v5504_v6 = vld [vmem:[%s7853_s1 + $0x1144] ss:$16 sps:$4 sm:$0xff]  }
  0xf9   :  { %3929 = vmatprep.subr.bf16.mxu1 %v5411_v7  ;;  %v5507_v7 = vld [vmem:[%s7853_s1 + $0x14c] ss:$16 sps:$4 sm:$0xff]  }
  0xfb   :  { %3887 = vmatpush2.bf16.msra.mxu0 %v5406_v8  ;;  %v5502_v8 = vld [vmem:[%s7853_s1 + $0x1140] ss:$16 sps:$4 sm:$0xff]  }
  0xfc   :  { %3930 = vmatpush2.bf16.msra.mxu1 %v5409_v9  ;;  %3888 = vmatprep.subr.bf16.mxu0 %v5414_v10  ;;  %v5505_v9 = vld [vmem:[%s7853_s1 + $0x148] ss:$16 sps:$4 sm:$0xff]   ;;  %v5510_v10 = vld [vmem:[%s7853_s1 + $0x1124] ss:$16 sps:$4 sm:$0xff]  }
  0xfd   :  { %3931 = vmatprep.subr.bf16.mxu1 %v5417_v11  ;;  %v5513_v11 = vld [vmem:[%s7853_s1 + $0x12c] ss:$16 sps:$4 sm:$0xff]  }
  0xff   :  { %3889 = vmatpush2.bf16.msra.mxu0 %v5412_v12  ;;  %v5508_v12 = vld [vmem:[%s7853_s1 + $0x1120] ss:$16 sps:$4 sm:$0xff]  }
 0x100   :  { %3932 = vmatpush2.bf16.msra.mxu1 %v5415_v13  ;;  %3944 = vmatprep.subr.bf16.mxu0 %v5426_v14  ;;  %v5511_v13 = vld [vmem:[%s7853_s1 + $0x128] ss:$16 sps:$4 sm:$0xff]   ;;  %v5516_v14 = vld [vmem:[%s7853_s1 + $0x1104] ss:$16 sps:$4 sm:$0xff]  }
 0x101   :  { %3987 = vmatprep.subr.bf16.mxu1 %v5429_v15  ;;  %v5519_v15 = vld [vmem:[%s7853_s1 + $0x10c] ss:$16 sps:$4 sm:$0xff]  }
 0x102   :  { %3891 = vmatmul.mubr.bf16.vlgmr.msra.gmra.mxu0 %v5418_v16  ;;  %v5514_v16 = vld [vmem:[%s7853_s1 + $0x1100] ss:$16 sps:$4 sm:$0xff]  }
 0x103   :  { %3934 = vmatmul.mubr.bf16.vlgmr.msra.gmra.mxu1 %v5421_v17  ;;  %3945 = vmatpush1.bf16.msra.mxu0 %v5424_v18  ;;  %v5517_v17 = vld [vmem:[%s7853_s1 + $0x108] ss:$16 sps:$4 sm:$0xff]  }
 0x104   :  { %3988 = vmatpush1.bf16.msra.mxu1 %v5427_v19  ;;  %3946 = vmatprep.subr.bf16.mxu0 %v5432_v20  ;;  %v5520_v18 = vld [vmem:[%s7854_s0 + $0x40] ss:$72 sps:$4 sm:$0xff]   ;;  %v5525_v19 = vld [vmem:[%s7853_s1 + $0x2ec] ss:$16 sps:$4 sm:$0xff]  }
 0x105   :  { %3989 = vmatprep.subr.bf16.mxu1 %v5435_v21  ;;  %3976 = vmatprep.mubr.bf16.mxu0 %v5522_v22  ;;  %v5528_v20 = vld [vmem:[%s7853_s1 + $0x4ec] ss:$16 sps:$4 sm:$0xff]   ;;  %v5523_v21 = vld [vmem:[%s7853_s1 + $0x2e8] ss:$16 sps:$4 sm:$0xff]  }
 0x106   :  { %4019 = vmatprep.mubr.bf16.mxu1 %v5907_v27  ;;  %v5526_v22 = vld [vmem:[%s7853_s1 + $0x4e8] ss:$16 sps:$4 sm:$0xff]  }
 0x107   :  { %3947 = vmatpush1.bf16.msra.mxu0 %v5430_v23  ;;  %v5531_v23 = vld [vmem:[%s7853_s1 + $0x2cc] ss:$16 sps:$4 sm:$0xff]   ;;  %v5908_v27 = vld [vmem:[%s7854_s0] ss:$72 sps:$4 sm:$0xff]  }
 0x108   :  { %3990 = vmatpush1.bf16.msra.mxu1 %v5433_v24  ;;  %3948 = vmatprep.subr.bf16.mxu0 %v5438_v25  ;;  %v5534_v24 = vld [vmem:[%s7853_s1 + $0x4cc] ss:$16 sps:$4 sm:$0xff]   ;;  %v5529_v25 = vld [vmem:[%s7853_s1 + $0x2c8] ss:$16 sps:$4 sm:$0xff]  }
 0x109   :  { %3991 = vmatprep.subr.bf16.mxu1 %v5441_v26  ;;  %v5532_v26 = vld [vmem:[%s7853_s1 + $0x4c8] ss:$16 sps:$4 sm:$0xff]  }
 0x10b   :  { %3949 = vmatpush1.bf16.msra.mxu0 %v5436_v28  ;;  %v5537_v28 = vld [vmem:[%s7853_s1 + $0x2ac] ss:$16 sps:$4 sm:$0xff]  }
 0x10c   :  { %3992 = vmatpush1.bf16.msra.mxu1 %v5439_v29  ;;  %3950 = vmatprep.subr.bf16.mxu0 %v5444_v30  ;;  %v5540_v29 = vld [vmem:[%s7853_s1 + $0x4ac] ss:$16 sps:$4 sm:$0xff]   ;;  %v5535_v30 = vld [vmem:[%s7853_s1 + $0x2a8] ss:$16 sps:$4 sm:$0xff]  }
 0x10d   :  { %3993 = vmatprep.subr.bf16.mxu1 %v5447_v31  ;;  %v5538_v31 = vld [vmem:[%s7853_s1 + $0x4a8] ss:$16 sps:$4 sm:$0xff]  }
 0x10f   :  { %3951 = vmatpush1.bf16.msra.mxu0 %v5442_v32  ;;  %v5909_v32 = vld [vmem:[%s7854_s0 + $0xc] ss:$72 sps:$4 sm:$0xff]  }
 0x110   :  { %3994 = vmatpush1.bf16.msra.mxu1 %v5445_v33  ;;  %3952 = vmatprep.subr.bf16.mxu0 %v5450_v34  ;;  %v5910_v33 = vld [vmem:[%s7854_s0 + $0x14] ss:$72 sps:$4 sm:$0xff]  }
 0x111   :  { %3995 = vmatprep.subr.bf16.mxu1 %v5453_v35  ;;  %v5543_v34 = vld [vmem:[%s7853_s1 + $0x28c] ss:$16 sps:$4 sm:$0xff]  }
 0x112   :  { %v5546_v35 = vld [vmem:[%s7853_s1 + $0x48c] ss:$16 sps:$4 sm:$0xff]  }
 0x113   :  { %3953 = vmatpush1.bf16.msra.mxu0 %v5448_v36  ;;  %v5541_v36 = vld [vmem:[%s7853_s1 + $0x288] ss:$16 sps:$4 sm:$0xff]  }
 0x114   :  { %3996 = vmatpush1.bf16.msra.mxu1 %v5451_v37  ;;  %3954 = vmatprep.subr.bf16.mxu0 %v5456_v38  ;;  %v5544_v37 = vld [vmem:[%s7853_s1 + $0x488] ss:$16 sps:$4 sm:$0xff]   ;;  %v5549_v38 = vld [vmem:[%s7853_s1 + $0x26c] ss:$16 sps:$4 sm:$0xff]  }
 0x115   :  { %3997 = vmatprep.subr.bf16.mxu1 %v5459_v39  ;;  %v5552_v39 = vld [vmem:[%s7853_s1 + $0x46c] ss:$16 sps:$4 sm:$0xff]  }
 0x117   :  { %3955 = vmatpush1.bf16.msra.mxu0 %v5454_v40  ;;  %v5547_v40 = vld [vmem:[%s7853_s1 + $0x268] ss:$16 sps:$4 sm:$0xff]  }
 0x118   :  { %3998 = vmatpush1.bf16.msra.mxu1 %v5457_v41  ;;  %3956 = vmatprep.subr.bf16.mxu0 %v5462_v42  ;;  %v5550_v41 = vld [vmem:[%s7853_s1 + $0x468] ss:$16 sps:$4 sm:$0xff]   ;;  %v5555_v42 = vld [vmem:[%s7853_s1 + $0x24c] ss:$16 sps:$4 sm:$0xff]  }
 0x119   :  { %3999 = vmatprep.subr.bf16.mxu1 %v5465_v43  ;;  %v5558_v43 = vld [vmem:[%s7853_s1 + $0x44c] ss:$16 sps:$4 sm:$0xff]  }
 0x11b   :  { %3957 = vmatpush1.bf16.msra.mxu0 %v5460_v44  ;;  %v5553_v44 = vld [vmem:[%s7853_s1 + $0x248] ss:$16 sps:$4 sm:$0xff]  }
 0x11c   :  { %4000 = vmatpush1.bf16.msra.mxu1 %v5463_v45  ;;  %3958 = vmatprep.subr.bf16.mxu0 %v5468_v46  ;;  %v5556_v45 = vld [vmem:[%s7853_s1 + $0x448] ss:$16 sps:$4 sm:$0xff]   ;;  %v5561_v46 = vld [vmem:[%s7853_s1 + $0x22c] ss:$16 sps:$4 sm:$0xff]  }
 0x11d   :  { %4001 = vmatprep.subr.bf16.mxu1 %v5471_v47  ;;  %v5564_v47 = vld [vmem:[%s7853_s1 + $0x42c] ss:$16 sps:$4 sm:$0xff]  }
 0x11f   :  { %3959 = vmatpush1.bf16.msra.mxu0 %v5466_v48  ;;  %v5559_v48 = vld [vmem:[%s7853_s1 + $0x228] ss:$16 sps:$4 sm:$0xff]  }
 0x120   :  { %4002 = vmatpush1.bf16.msra.mxu1 %v5469_v49  ;;  %3960 = vmatprep.subr.bf16.mxu0 %v5474_v50  ;;  %v5562_v49 = vld [vmem:[%s7853_s1 + $0x428] ss:$16 sps:$4 sm:$0xff]   ;;  %v5567_v50 = vld [vmem:[%s7853_s1 + $0x20c] ss:$16 sps:$4 sm:$0xff]  }
 0x121   :  { %4003 = vmatprep.subr.bf16.mxu1 %v5477_v51  ;;  %v5570_v51 = vld [vmem:[%s7853_s1 + $0x40c] ss:$16 sps:$4 sm:$0xff]  }
 0x123   :  { %3961 = vmatpush2.bf16.msra.mxu0 %v5472_v52  ;;  %v5565_v52 = vld [vmem:[%s7853_s1 + $0x208] ss:$16 sps:$4 sm:$0xff]  }
 0x124   :  { %4004 = vmatpush2.bf16.msra.mxu1 %v5475_v53  ;;  %3962 = vmatprep.subr.bf16.mxu0 %v5480_v54  ;;  %v5568_v53 = vld [vmem:[%s7853_s1 + $0x408] ss:$16 sps:$4 sm:$0xff]   ;;  %v5573_v54 = vld [vmem:[%s7853_s1 + $0x3ec] ss:$16 sps:$4 sm:$0xff]  }
 0x125   :  { %4005 = vmatprep.subr.bf16.mxu1 %v5483_v55  ;;  %v5576_v55 = vld [vmem:[%s7853_s1 + $0x5ec] ss:$16 sps:$4 sm:$0xff]  }
 0x127   :  { %3963 = vmatpush2.bf16.msra.mxu0 %v5478_v56  ;;  %v5571_v56 = vld [vmem:[%s7853_s1 + $0x3e8] ss:$16 sps:$4 sm:$0xff]  }
 0x128   :  { %4006 = vmatpush2.bf16.msra.mxu1 %v5481_v57  ;;  %3964 = vmatprep.subr.bf16.mxu0 %v5486_v58  ;;  %v5574_v57 = vld [vmem:[%s7853_s1 + $0x5e8] ss:$16 sps:$4 sm:$0xff]   ;;  %v5579_v58 = vld [vmem:[%s7853_s1 + $0x3cc] ss:$16 sps:$4 sm:$0xff]  }
 0x129   :  { %4007 = vmatprep.subr.bf16.mxu1 %v5489_v59  ;;  %v5582_v59 = vld [vmem:[%s7853_s1 + $0x5cc] ss:$16 sps:$4 sm:$0xff]  }
 0x12b   :  { %3965 = vmatpush2.bf16.msra.mxu0 %v5484_v60  ;;  %v5577_v60 = vld [vmem:[%s7853_s1 + $0x3c8] ss:$16 sps:$4 sm:$0xff]  }
 0x12c   :  { %4008 = vmatpush2.bf16.msra.mxu1 %v5487_v61  ;;  %3966 = vmatprep.subr.bf16.mxu0 %v5492_v62  ;;  %v5580_v61 = vld [vmem:[%s7853_s1 + $0x5c8] ss:$16 sps:$4 sm:$0xff]   ;;  %v5585_v62 = vld [vmem:[%s7853_s1 + $0x3ac] ss:$16 sps:$4 sm:$0xff]  }
 0x12d   :  { %4009 = vmatprep.subr.bf16.mxu1 %v5495_v63  ;;  %v5588_v63 = vld [vmem:[%s7853_s1 + $0x5ac] ss:$16 sps:$4 sm:$0xff]  }
 0x12f   :  { %3967 = vmatpush2.bf16.msra.mxu0 %v5490_v0  ;;  %v5583_v0 = vld [vmem:[%s7853_s1 + $0x3a8] ss:$16 sps:$4 sm:$0xff]  }
 0x130   :  { %4010 = vmatpush2.bf16.msra.mxu1 %v5493_v1  ;;  %3968 = vmatprep.subr.bf16.mxu0 %v5498_v2  ;;  %v5586_v1 = vld [vmem:[%s7853_s1 + $0x5a8] ss:$16 sps:$4 sm:$0xff]   ;;  %v5591_v2 = vld [vmem:[%s7853_s1 + $0x38c] ss:$16 sps:$4 sm:$0xff]  }
 0x131   :  { %4011 = vmatprep.subr.bf16.mxu1 %v5501_v3  ;;  %v5594_v3 = vld [vmem:[%s7853_s1 + $0x58c] ss:$16 sps:$4 sm:$0xff]  }
 0x133   :  { %3969 = vmatpush2.bf16.msra.mxu0 %v5496_v4  ;;  %v5589_v4 = vld [vmem:[%s7853_s1 + $0x388] ss:$16 sps:$4 sm:$0xff]  }
 0x134   :  { %4012 = vmatpush2.bf16.msra.mxu1 %v5499_v5  ;;  %3970 = vmatprep.subr.bf16.mxu0 %v5504_v6  ;;  %v5592_v5 = vld [vmem:[%s7853_s1 + $0x588] ss:$16 sps:$4 sm:$0xff]   ;;  %v5597_v6 = vld [vmem:[%s7853_s1 + $0x36c] ss:$16 sps:$4 sm:$0xff]  }
 0x135   :  { %4013 = vmatprep.subr.bf16.mxu1 %v5507_v7  ;;  %v5600_v7 = vld [vmem:[%s7853_s1 + $0x56c] ss:$16 sps:$4 sm:$0xff]  }
 0x137   :  { %3971 = vmatpush2.bf16.msra.mxu0 %v5502_v8  ;;  %v5595_v8 = vld [vmem:[%s7853_s1 + $0x368] ss:$16 sps:$4 sm:$0xff]  }
 0x138   :  { %4014 = vmatpush2.bf16.msra.mxu1 %v5505_v9  ;;  %3972 = vmatprep.subr.bf16.mxu0 %v5510_v10  ;;  %v5598_v9 = vld [vmem:[%s7853_s1 + $0x568] ss:$16 sps:$4 sm:$0xff]   ;;  %v5603_v10 = vld [vmem:[%s7853_s1 + $0x34c] ss:$16 sps:$4 sm:$0xff]  }
 0x139   :  { %4015 = vmatprep.subr.bf16.mxu1 %v5513_v11  ;;  %v5606_v11 = vld [vmem:[%s7853_s1 + $0x54c] ss:$16 sps:$4 sm:$0xff]  }
 0x13b   :  { %3973 = vmatpush2.bf16.msra.mxu0 %v5508_v12  ;;  %v5601_v12 = vld [vmem:[%s7853_s1 + $0x348] ss:$16 sps:$4 sm:$0xff]  }
 0x13c   :  { %4016 = vmatpush2.bf16.msra.mxu1 %v5511_v13  ;;  %3974 = vmatprep.subr.bf16.mxu0 %v5516_v14  ;;  %v5604_v13 = vld [vmem:[%s7853_s1 + $0x548] ss:$16 sps:$4 sm:$0xff]   ;;  %v5609_v14 = vld [vmem:[%s7853_s1 + $0x32c] ss:$16 sps:$4 sm:$0xff]  }
 0x13d   :  { %4017 = vmatprep.subr.bf16.mxu1 %v5519_v15  ;;  %v5612_v15 = vld [vmem:[%s7853_s1 + $0x52c] ss:$16 sps:$4 sm:$0xff]  }
 0x13f   :  { %3975 = vmatpush2.bf16.msra.mxu0 %v5514_v16  ;;  %v5607_v16 = vld [vmem:[%s7853_s1 + $0x328] ss:$16 sps:$4 sm:$0xff]  }
 0x140   :  { %4018 = vmatpush2.bf16.msra.mxu1 %v5517_v17  ;;  %4030 = vmatprep.subr.bf16.mxu0 %v5525_v19  ;;  %v5610_v17 = vld [vmem:[%s7853_s1 + $0x528] ss:$16 sps:$4 sm:$0xff]   ;;  %v5618_v19 = vld [vmem:[%s7853_s1 + $0x50c] ss:$16 sps:$4 sm:$0xff]  }
 0x141   :  { %4073 = vmatprep.subr.bf16.mxu1 %v5528_v20  ;;  %v5613_v20 = vld [vmem:[%s7853_s1 + $0x308] ss:$16 sps:$4 sm:$0xff]  }
 0x142   :  { %3977 = vmatmul.mubr.bf16.vlgmr.msra.gmra.mxu0 %v5520_v18  ;;  %v5615_v18 = vld [vmem:[%s7853_s1 + $0x30c] ss:$16 sps:$4 sm:$0xff]  }
 0x143   :  { %4020 = vmatmul.mubr.bf16.vlgmr.msra.gmra.mxu1 %v5908_v27  ;;  %4031 = vmatpush1.bf16.msra.mxu0 %v5523_v21  ;;  %v5616_v21 = vld [vmem:[%s7853_s1 + $0x508] ss:$16 sps:$4 sm:$0xff]   ;;  %v5630_v27 = vld [vmem:[%s7853_s1 + $0x8cc] ss:$16 sps:$4 sm:$0xff]  }
 0x144   :  { %4074 = vmatpush1.bf16.msra.mxu1 %v5526_v22  ;;  %4032 = vmatprep.subr.bf16.mxu0 %v5531_v23  ;;  %v5621_v22 = vld [vmem:[%s7853_s1 + $0x6ec] ss:$16 sps:$4 sm:$0xff]  }
 0x145   :  { %4075 = vmatprep.subr.bf16.mxu1 %v5534_v24  ;;  %4062 = vmatprep.mubr.bf16.mxu0 %v5909_v32  ;;  %v5624_v23 = vld [vmem:[%s7853_s1 + $0x8ec] ss:$16 sps:$4 sm:$0xff]   ;;  %v5619_v24 = vld [vmem:[%s7853_s1 + $0x6e8] ss:$16 sps:$4 sm:$0xff]  }
 0x146   :  { %4105 = vmatprep.mubr.bf16.mxu1 %v5910_v33  ;;  %v5633_v32 = vld [vmem:[%s7853_s1 + $0x6ac] ss:$16 sps:$4 sm:$0xff]  }
 0x147   :  { %4033 = vmatpush1.bf16.msra.mxu0 %v5529_v25  ;;  %v5622_v25 = vld [vmem:[%s7853_s1 + $0x8e8] ss:$16 sps:$4 sm:$0xff]   ;;  %v5636_v33 = vld [vmem:[%s7853_s1 + $0x8ac] ss:$16 sps:$4 sm:$0xff]  }
 0x148   :  { %4076 = vmatpush1.bf16.msra.mxu1 %v5532_v26  ;;  %4034 = vmatprep.subr.bf16.mxu0 %v5537_v28  ;;  %v5627_v26 = vld [vmem:[%s7853_s1 + $0x6cc] ss:$16 sps:$4 sm:$0xff]   ;;  %v5911_v28 = vld [vmem:[%s7854_s0 + $0x8] ss:$72 sps:$4 sm:$0xff]  }
 0x149   :  { %4077 = vmatprep.subr.bf16.mxu1 %v5540_v29  ;;  %v5912_v29 = vld [vmem:[%s7854_s0 + $0x10] ss:$72 sps:$4 sm:$0xff]  }
 0x14b   :  { %4035 = vmatpush1.bf16.msra.mxu0 %v5535_v30  ;;  %v5625_v30 = vld [vmem:[%s7853_s1 + $0x6c8] ss:$16 sps:$4 sm:$0xff]  }
 0x14c   :  { %4078 = vmatpush1.bf16.msra.mxu1 %v5538_v31  ;;  %4036 = vmatprep.subr.bf16.mxu0 %v5543_v34  ;;  %v5628_v31 = vld [vmem:[%s7853_s1 + $0x8c8] ss:$16 sps:$4 sm:$0xff]   ;;  %v5913_v34 = vld [vmem:[%s7854_s0 + $0x1c] ss:$72 sps:$4 sm:$0xff]  }
 0x14d   :  { %4079 = vmatprep.subr.bf16.mxu1 %v5546_v35  ;;  %v5914_v35 = vld [vmem:[%s7854_s0 + $0x24] ss:$72 sps:$4 sm:$0xff]  }
 0x14f   :  { %4037 = vmatpush1.bf16.msra.mxu0 %v5541_v36  ;;  %v5631_v36 = vld [vmem:[%s7853_s1 + $0x6a8] ss:$16 sps:$4 sm:$0xff]  }
 0x150   :  { %4080 = vmatpush1.bf16.msra.mxu1 %v5544_v37  ;;  %4038 = vmatprep.subr.bf16.mxu0 %v5549_v38  ;;  %v5634_v37 = vld [vmem:[%s7853_s1 + $0x8a8] ss:$16 sps:$4 sm:$0xff]   ;;  %v5639_v38 = vld [vmem:[%s7853_s1 + $0x68c] ss:$16 sps:$4 sm:$0xff]  }
 0x151   :  { %4081 = vmatprep.subr.bf16.mxu1 %v5552_v39  ;;  %v5642_v39 = vld [vmem:[%s7853_s1 + $0x88c] ss:$16 sps:$4 sm:$0xff]  }
 0x153   :  { %4039 = vmatpush1.bf16.msra.mxu0 %v5547_v40  ;;  %v5637_v40 = vld [vmem:[%s7853_s1 + $0x688] ss:$16 sps:$4 sm:$0xff]  }
 0x154   :  { %4082 = vmatpush1.bf16.msra.mxu1 %v5550_v41  ;;  %4040 = vmatprep.subr.bf16.mxu0 %v5555_v42  ;;  %v5640_v41 = vld [vmem:[%s7853_s1 + $0x888] ss:$16 sps:$4 sm:$0xff]   ;;  %v5645_v42 = vld [vmem:[%s7853_s1 + $0x66c] ss:$16 sps:$4 sm:$0xff]  }
 0x155   :  { %4083 = vmatprep.subr.bf16.mxu1 %v5558_v43  ;;  %v5648_v43 = vld [vmem:[%s7853_s1 + $0x86c] ss:$16 sps:$4 sm:$0xff]  }
 0x157   :  { %4041 = vmatpush1.bf16.msra.mxu0 %v5553_v44  ;;  %v5643_v44 = vld [vmem:[%s7853_s1 + $0x668] ss:$16 sps:$4 sm:$0xff]  }
 0x158   :  { %4084 = vmatpush1.bf16.msra.mxu1 %v5556_v45  ;;  %4042 = vmatprep.subr.bf16.mxu0 %v5561_v46  ;;  %v5646_v45 = vld [vmem:[%s7853_s1 + $0x868] ss:$16 sps:$4 sm:$0xff]   ;;  %v5651_v46 = vld [vmem:[%s7853_s1 + $0x64c] ss:$16 sps:$4 sm:$0xff]  }
 0x159   :  { %4085 = vmatprep.subr.bf16.mxu1 %v5564_v47  ;;  %v5654_v47 = vld [vmem:[%s7853_s1 + $0x84c] ss:$16 sps:$4 sm:$0xff]  }
 0x15b   :  { %4043 = vmatpush1.bf16.msra.mxu0 %v5559_v48  ;;  %v5649_v48 = vld [vmem:[%s7853_s1 + $0x648] ss:$16 sps:$4 sm:$0xff]  }
 0x15c   :  { %4086 = vmatpush1.bf16.msra.mxu1 %v5562_v49  ;;  %4044 = vmatprep.subr.bf16.mxu0 %v5567_v50  ;;  %v5652_v49 = vld [vmem:[%s7853_s1 + $0x848] ss:$16 sps:$4 sm:$0xff]   ;;  %v5657_v50 = vld [vmem:[%s7853_s1 + $0x62c] ss:$16 sps:$4 sm:$0xff]  }
 0x15d   :  { %4087 = vmatprep.subr.bf16.mxu1 %v5570_v51  ;;  %v5660_v51 = vld [vmem:[%s7853_s1 + $0x82c] ss:$16 sps:$4 sm:$0xff]  }
 0x15f   :  { %4045 = vmatpush1.bf16.msra.mxu0 %v5565_v52  ;;  %v5655_v52 = vld [vmem:[%s7853_s1 + $0x628] ss:$16 sps:$4 sm:$0xff]  }
 0x160   :  { %4088 = vmatpush1.bf16.msra.mxu1 %v5568_v53  ;;  %4046 = vmatprep.subr.bf16.mxu0 %v5573_v54  ;;  %v5658_v53 = vld [vmem:[%s7853_s1 + $0x828] ss:$16 sps:$4 sm:$0xff]   ;;  %v5663_v54 = vld [vmem:[%s7853_s1 + $0x60c] ss:$16 sps:$4 sm:$0xff]  }
 0x161   :  { %4089 = vmatprep.subr.bf16.mxu1 %v5576_v55  ;;  %v5666_v55 = vld [vmem:[%s7853_s1 + $0x80c] ss:$16 sps:$4 sm:$0xff]  }
 0x163   :  { %4047 = vmatpush2.bf16.msra.mxu0 %v5571_v56  ;;  %v5661_v56 = vld [vmem:[%s7853_s1 + $0x608] ss:$16 sps:$4 sm:$0xff]  }
 0x164   :  { %4090 = vmatpush2.bf16.msra.mxu1 %v5574_v57  ;;  %4048 = vmatprep.subr.bf16.mxu0 %v5579_v58  ;;  %v5664_v57 = vld [vmem:[%s7853_s1 + $0x808] ss:$16 sps:$4 sm:$0xff]   ;;  %v5669_v58 = vld [vmem:[%s7853_s1 + $0x7ec] ss:$16 sps:$4 sm:$0xff]  }
 0x165   :  { %4091 = vmatprep.subr.bf16.mxu1 %v5582_v59  ;;  %v5672_v59 = vld [vmem:[%s7853_s1 + $0x9ec] ss:$16 sps:$4 sm:$0xff]  }
 0x167   :  { %4049 = vmatpush2.bf16.msra.mxu0 %v5577_v60  ;;  %v5667_v60 = vld [vmem:[%s7853_s1 + $0x7e8] ss:$16 sps:$4 sm:$0xff]  }
 0x168   :  { %4092 = vmatpush2.bf16.msra.mxu1 %v5580_v61  ;;  %4050 = vmatprep.subr.bf16.mxu0 %v5585_v62  ;;  %v5670_v61 = vld [vmem:[%s7853_s1 + $0x9e8] ss:$16 sps:$4 sm:$0xff]   ;;  %v5675_v62 = vld [vmem:[%s7853_s1 + $0x7cc] ss:$16 sps:$4 sm:$0xff]  }
 0x169   :  { %4093 = vmatprep.subr.bf16.mxu1 %v5588_v63  ;;  %v5678_v63 = vld [vmem:[%s7853_s1 + $0x9cc] ss:$16 sps:$4 sm:$0xff]  }
 0x16b   :  { %4051 = vmatpush2.bf16.msra.mxu0 %v5583_v0  ;;  %v5673_v0 = vld [vmem:[%s7853_s1 + $0x7c8] ss:$16 sps:$4 sm:$0xff]  }
 0x16c   :  { %4094 = vmatpush2.bf16.msra.mxu1 %v5586_v1  ;;  %4052 = vmatprep.subr.bf16.mxu0 %v5591_v2  ;;  %v5676_v1 = vld [vmem:[%s7853_s1 + $0x9c8] ss:$16 sps:$4 sm:$0xff]   ;;  %v5681_v2 = vld [vmem:[%s7853_s1 + $0x7ac] ss:$16 sps:$4 sm:$0xff]  }
 0x16d   :  { %4095 = vmatprep.subr.bf16.mxu1 %v5594_v3  ;;  %v5684_v3 = vld [vmem:[%s7853_s1 + $0x9ac] ss:$16 sps:$4 sm:$0xff]  }
 0x16f   :  { %4053 = vmatpush2.bf16.msra.mxu0 %v5589_v4  ;;  %v5679_v4 = vld [vmem:[%s7853_s1 + $0x7a8] ss:$16 sps:$4 sm:$0xff]  }
 0x170   :  { %4096 = vmatpush2.bf16.msra.mxu1 %v5592_v5  ;;  %4054 = vmatprep.subr.bf16.mxu0 %v5597_v6  ;;  %v5682_v5 = vld [vmem:[%s7853_s1 + $0x9a8] ss:$16 sps:$4 sm:$0xff]   ;;  %v5687_v6 = vld [vmem:[%s7853_s1 + $0x78c] ss:$16 sps:$4 sm:$0xff]  }
 0x171   :  { %4097 = vmatprep.subr.bf16.mxu1 %v5600_v7  ;;  %v5690_v7 = vld [vmem:[%s7853_s1 + $0x98c] ss:$16 sps:$4 sm:$0xff]  }
 0x173   :  { %4055 = vmatpush2.bf16.msra.mxu0 %v5595_v8  ;;  %v5685_v8 = vld [vmem:[%s7853_s1 + $0x788] ss:$16 sps:$4 sm:$0xff]  }
 0x174   :  { %4098 = vmatpush2.bf16.msra.mxu1 %v5598_v9  ;;  %4056 = vmatprep.subr.bf16.mxu0 %v5603_v10  ;;  %v5688_v9 = vld [vmem:[%s7853_s1 + $0x988] ss:$16 sps:$4 sm:$0xff]   ;;  %v5693_v10 = vld [vmem:[%s7853_s1 + $0x76c] ss:$16 sps:$4 sm:$0xff]  }
 0x175   :  { %4099 = vmatprep.subr.bf16.mxu1 %v5606_v11  ;;  %v5696_v11 = vld [vmem:[%s7853_s1 + $0x96c] ss:$16 sps:$4 sm:$0xff]  }
 0x177   :  { %4057 = vmatpush2.bf16.msra.mxu0 %v5601_v12  ;;  %v5691_v12 = vld [vmem:[%s7853_s1 + $0x768] ss:$16 sps:$4 sm:$0xff]  }
 0x178   :  { %4100 = vmatpush2.bf16.msra.mxu1 %v5604_v13  ;;  %4058 = vmatprep.subr.bf16.mxu0 %v5609_v14  ;;  %v5694_v13 = vld [vmem:[%s7853_s1 + $0x968] ss:$16 sps:$4 sm:$0xff]   ;;  %v5699_v14 = vld [vmem:[%s7853_s1 + $0x74c] ss:$16 sps:$4 sm:$0xff]  }
 0x179   :  { %4101 = vmatprep.subr.bf16.mxu1 %v5612_v15  ;;  %v5702_v15 = vld [vmem:[%s7853_s1 + $0x94c] ss:$16 sps:$4 sm:$0xff]  }
 0x17b   :  { %4059 = vmatpush2.bf16.msra.mxu0 %v5607_v16  ;;  %v5697_v16 = vld [vmem:[%s7853_s1 + $0x748] ss:$16 sps:$4 sm:$0xff]  }
 0x17c   :  { %4102 = vmatpush2.bf16.msra.mxu1 %v5610_v17  ;;  %4060 = vmatprep.subr.bf16.mxu0 %v5615_v18  ;;  %v5700_v17 = vld [vmem:[%s7853_s1 + $0x948] ss:$16 sps:$4 sm:$0xff]   ;;  %v5705_v18 = vld [vmem:[%s7853_s1 + $0x72c] ss:$16 sps:$4 sm:$0xff]  }
 0x17d   :  { %4103 = vmatprep.subr.bf16.mxu1 %v5618_v19  ;;  %v5708_v19 = vld [vmem:[%s7853_s1 + $0x92c] ss:$16 sps:$4 sm:$0xff]  }
 0x17f   :  { %4061 = vmatpush2.bf16.msra.mxu0 %v5613_v20  ;;  %v5703_v20 = vld [vmem:[%s7853_s1 + $0x728] ss:$16 sps:$4 sm:$0xff]  }
 0x180   :  { %4104 = vmatpush2.bf16.msra.mxu1 %v5616_v21  ;;  %4116 = vmatprep.subr.bf16.mxu0 %v5621_v22  ;;  %v5706_v21 = vld [vmem:[%s7853_s1 + $0x928] ss:$16 sps:$4 sm:$0xff]   ;;  %v5711_v22 = vld [vmem:[%s7853_s1 + $0x70c] ss:$16 sps:$4 sm:$0xff]  }
 0x181   :  { %4159 = vmatprep.subr.bf16.mxu1 %v5624_v23  ;;  %v5714_v23 = vld [vmem:[%s7853_s1 + $0x90c] ss:$16 sps:$4 sm:$0xff]  }
 0x182   :  { %4063 = vmatmul.mubr.bf16.vlgmr.msra.gmra.mxu0 %v5911_v28  ;;  %v5715_v28 = vld [vmem:[%s7853_s1 + $0xae8] ss:$16 sps:$4 sm:$0xff]  }
 0x183   :  { %4106 = vmatmul.mubr.bf16.vlgmr.msra.gmra.mxu1 %v5912_v29  ;;  %4117 = vmatpush1.bf16.msra.mxu0 %v5619_v24  ;;  %v5709_v24 = vld [vmem:[%s7853_s1 + $0x708] ss:$16 sps:$4 sm:$0xff]  }
 0x184   :  { %4160 = vmatpush1.bf16.msra.mxu1 %v5622_v25  ;;  %4118 = vmatprep.subr.bf16.mxu0 %v5627_v26  ;;  %v5712_v25 = vld [vmem:[%s7853_s1 + $0x908] ss:$16 sps:$4 sm:$0xff]   ;;  %v5717_v26 = vld [vmem:[%s7853_s1 + $0xaec] ss:$16 sps:$4 sm:$0xff]  }
 0x185   :  { %4161 = vmatprep.subr.bf16.mxu1 %v5630_v27  ;;  %4148 = vmatprep.mubr.bf16.mxu0 %v5913_v34  ;;  %v5720_v27 = vld [vmem:[%s7853_s1 + $0xcec] ss:$16 sps:$4 sm:$0xff]   ;;  %v5718_v29 = vld [vmem:[%s7853_s1 + $0xce8] ss:$16 sps:$4 sm:$0xff]  }
 0x186   :  { %4191 = vmatprep.mubr.bf16.mxu1 %v5914_v35  ;;  %v5721_v34 = vld [vmem:[%s7853_s1 + $0xac8] ss:$16 sps:$4 sm:$0xff]  }
 0x187   :  { %4119 = vmatpush1.bf16.msra.mxu0 %v5625_v30  ;;  %v5723_v30 = vld [vmem:[%s7853_s1 + $0xacc] ss:$16 sps:$4 sm:$0xff]   ;;  %v5724_v35 = vld [vmem:[%s7853_s1 + $0xcc8] ss:$16 sps:$4 sm:$0xff]  }
 0x188   :  { %4162 = vmatpush1.bf16.msra.mxu1 %v5628_v31  ;;  %4120 = vmatprep.subr.bf16.mxu0 %v5633_v32  ;;  %v5726_v31 = vld [vmem:[%s7853_s1 + $0xccc] ss:$16 sps:$4 sm:$0xff]   ;;  %v5915_v32 = vld [vmem:[%s7854_s0 + $0x18] ss:$72 sps:$4 sm:$0xff]  }
 0x189   :  { %4163 = vmatprep.subr.bf16.mxu1 %v5636_v33  ;;  %v5916_v33 = vld [vmem:[%s7854_s0 + $0x20] ss:$72 sps:$4 sm:$0xff]  }
 0x18b   :  { %4121 = vmatpush1.bf16.msra.mxu0 %v5631_v36  ;;  %v5729_v36 = vld [vmem:[%s7853_s1 + $0xaac] ss:$16 sps:$4 sm:$0xff]  }
 0x18c   :  { %4164 = vmatpush1.bf16.msra.mxu1 %v5634_v37  ;;  %4122 = vmatprep.subr.bf16.mxu0 %v5639_v38  ;;  %v5732_v37 = vld [vmem:[%s7853_s1 + $0xcac] ss:$16 sps:$4 sm:$0xff]  }
 0x18d   :  { %4165 = vmatprep.subr.bf16.mxu1 %v5642_v39  ;;  %v5917_v38 = vld [vmem:[%s7854_s0 + $0x2c] ss:$72 sps:$4 sm:$0xff]  }
 0x18e   :  { %v5918_v39 = vld [vmem:[%s7854_s0 + $0x34] ss:$72 sps:$4 sm:$0xff]  }
 0x18f   :  { %4123 = vmatpush1.bf16.msra.mxu0 %v5637_v40  ;;  %v5727_v40 = vld [vmem:[%s7853_s1 + $0xaa8] ss:$16 sps:$4 sm:$0xff]  }
 0x190   :  { %4166 = vmatpush1.bf16.msra.mxu1 %v5640_v41  ;;  %4124 = vmatprep.subr.bf16.mxu0 %v5645_v42  ;;  %v5730_v41 = vld [vmem:[%s7853_s1 + $0xca8] ss:$16 sps:$4 sm:$0xff]   ;;  %v5735_v42 = vld [vmem:[%s7853_s1 + $0xa8c] ss:$16 sps:$4 sm:$0xff]  }
 0x191   :  { %4167 = vmatprep.subr.bf16.mxu1 %v5648_v43  ;;  %v5738_v43 = vld [vmem:[%s7853_s1 + $0xc8c] ss:$16 sps:$4 sm:$0xff]  }
 0x193   :  { %4125 = vmatpush1.bf16.msra.mxu0 %v5643_v44  ;;  %v7421_v44 = vpop.f32.mrf.mxu0 }
 0x194   :  { %4168 = vmatpush1.bf16.msra.mxu1 %v5646_v45  ;;  %4126 = vmatprep.subr.bf16.mxu0 %v5651_v46  ;;  %v5733_v45 = vld [vmem:[%s7853_s1 + $0xa88] ss:$16 sps:$4 sm:$0xff]  }
 0x195   :  { %4169 = vmatprep.subr.bf16.mxu1 %v5654_v47  ;;  %v5736_v46 = vld [vmem:[%s7853_s1 + $0xc88] ss:$16 sps:$4 sm:$0xff]   ;;  %v5741_v47 = vld [vmem:[%s7853_s1 + $0xa6c] ss:$16 sps:$4 sm:$0xff]  }
 0x197   :  { %4127 = vmatpush1.bf16.msra.mxu0 %v5649_v48  ;;  %v5744_v48 = vld [vmem:[%s7853_s1 + $0xc6c] ss:$16 sps:$4 sm:$0xff]  }
 0x198   :  { %4170 = vmatpush1.bf16.msra.mxu1 %v5652_v49  ;;  %4128 = vmatprep.subr.bf16.mxu0 %v5657_v50  ;;  %v7435_v49 = vpop.f32.mrf.mxu0  ;;  %v5739_v50 = vld [vmem:[%s7853_s1 + $0xa68] ss:$16 sps:$4 sm:$0xff]  }
 0x199   :  { %4171 = vmatprep.subr.bf16.mxu1 %v5660_v51  ;;  %v5742_v51 = vld [vmem:[%s7853_s1 + $0xc68] ss:$16 sps:$4 sm:$0xff]  }
 0x19b   :  { %4129 = vmatpush1.bf16.msra.mxu0 %v5655_v52  ;;  %v7443_v52 = vpop.f32.mrf.mxu1 }
 0x19c   :  { %4172 = vmatpush1.bf16.msra.mxu1 %v5658_v53  ;;  %4130 = vmatprep.subr.bf16.mxu0 %v5663_v54  ;;  %v5747_v53 = vld [vmem:[%s7853_s1 + $0xa4c] ss:$16 sps:$4 sm:$0xff]  }
 0x19d   :  { %4173 = vmatprep.subr.bf16.mxu1 %v5666_v55  ;;  %v5750_v54 = vld [vmem:[%s7853_s1 + $0xc4c] ss:$16 sps:$4 sm:$0xff]   ;;  %v7451_v55 = vpop.f32.mrf.mxu0 }
 0x19f   :  { %4131 = vmatpush1.bf16.msra.mxu0 %v5661_v56  ;;  %v5745_v56 = vld [vmem:[%s7853_s1 + $0xa48] ss:$16 sps:$4 sm:$0xff]  }
 0x1a0   :  { %4174 = vmatpush1.bf16.msra.mxu1 %v5664_v57  ;;  %4132 = vmatprep.subr.bf16.mxu0 %v5669_v58  ;;  %v5748_v57 = vld [vmem:[%s7853_s1 + $0xc48] ss:$16 sps:$4 sm:$0xff]   ;;  %v7459_v58 = vpop.f32.mrf.mxu1 }
 0x1a1   :  { %4175 = vmatprep.subr.bf16.mxu1 %v5672_v59  ;;  %v5753_v59 = vld [vmem:[%s7853_s1 + $0xa2c] ss:$16 sps:$4 sm:$0xff]  }
 0x1a3   :  { %4133 = vmatpush2.bf16.msra.mxu0 %v5667_v60  ;;  %v5756_v60 = vld [vmem:[%s7853_s1 + $0xc2c] ss:$16 sps:$4 sm:$0xff]  }
 0x1a4   :  { %4176 = vmatpush2.bf16.msra.mxu1 %v5670_v61  ;;  %4134 = vmatprep.subr.bf16.mxu0 %v5675_v62  ;;  %v7467_v61 = vpop.f32.mrf.mxu0  ;;  %v5751_v62 = vld [vmem:[%s7853_s1 + $0xa28] ss:$16 sps:$4 sm:$0xff]  }
 0x1a5   :  { %4177 = vmatprep.subr.bf16.mxu1 %v5678_v63  ;;  %v5754_v63 = vld [vmem:[%s7853_s1 + $0xc28] ss:$16 sps:$4 sm:$0xff]  }
 0x1a7   :  { %4135 = vmatpush2.bf16.msra.mxu0 %v5673_v0  ;;  %v7475_v0 = vpop.f32.mrf.mxu1 }
 0x1a8   :  { %4178 = vmatpush2.bf16.msra.mxu1 %v5676_v1  ;;  %4136 = vmatprep.subr.bf16.mxu0 %v5681_v2  ;;  %v7477_v1 = vpop.f32.mrf.mxu0  ;;  %v5759_v2 = vld [vmem:[%s7853_s1 + $0xa0c] ss:$16 sps:$4 sm:$0xff]  }
 0x1a9   :  { %4179 = vmatprep.subr.bf16.mxu1 %v5684_v3  ;;  %v5762_v3 = vld [vmem:[%s7853_s1 + $0xc0c] ss:$16 sps:$4 sm:$0xff]  }
 0x1ab   :  { %4137 = vmatpush2.bf16.msra.mxu0 %v5679_v4  ;;  %v610_v4 = vlaneseq }
 0x1ac   :  { %4180 = vmatpush2.bf16.msra.mxu1 %v5682_v5  ;;  %4138 = vmatprep.subr.bf16.mxu0 %v5687_v6  ;;  %v5757_v5 = vld [vmem:[%s7853_s1 + $0xa08] ss:$16 sps:$4 sm:$0xff]  }
 0x1ad   :  { %4181 = vmatprep.subr.bf16.mxu1 %v5690_v7  ;;  %v5760_v6 = vld [vmem:[%s7853_s1 + $0xc08] ss:$16 sps:$4 sm:$0xff]   ;;  %v7491_v7 = vpop.f32.mrf.mxu1 }
 0x1af   :  { %4139 = vmatpush2.bf16.msra.mxu0 %v5685_v8  ;;  %v7493_v8 = vpop.f32.mrf.mxu0 }
 0x1b0   :  { %4182 = vmatpush2.bf16.msra.mxu1 %v5688_v9  ;;  %4140 = vmatprep.subr.bf16.mxu0 %v5693_v10  ;;  %v5765_v9 = vld [vmem:[%s7853_s1 + $0xbec] ss:$16 sps:$4 sm:$0xff]  }
 0x1b1   :  { %4183 = vmatprep.subr.bf16.mxu1 %v5696_v11  ;;  %v5768_v10 = vld [vmem:[%s7853_s1 + $0xdec] ss:$16 sps:$4 sm:$0xff]   ;;  %v7501_v11 = vpop.f32.mrf.mxu1 }
 0x1b3   :  { %4141 = vmatpush2.bf16.msra.mxu0 %v5691_v12  ;;  %v7503_v12 = vshrl.u32 %v610_v4, 7 }
 0x1b4   :  { %4184 = vmatpush2.bf16.msra.mxu1 %v5694_v13  ;;  %4142 = vmatprep.subr.bf16.mxu0 %v5699_v14  ;;  %v5763_v13 = vld [vmem:[%s7853_s1 + $0xbe8] ss:$16 sps:$4 sm:$0xff]  }
 0x1b5   :  { %4185 = vmatprep.subr.bf16.mxu1 %v5702_v15  ;;  %v5766_v14 = vld [vmem:[%s7853_s1 + $0xde8] ss:$16 sps:$4 sm:$0xff]   ;;  %v7511_v15 = vpop.f32.mrf.mxu0 }
 0x1b7   :  { %4143 = vmatpush2.bf16.msra.mxu0 %v5697_v16  ;;  %v5771_v16 = vld [vmem:[%s7853_s1 + $0xbcc] ss:$16 sps:$4 sm:$0xff]  }
 0x1b8   :  { %4186 = vmatpush2.bf16.msra.mxu1 %v5700_v17  ;;  %4144 = vmatprep.subr.bf16.mxu0 %v5705_v18  ;;  %v5774_v17 = vld [vmem:[%s7853_s1 + $0xdcc] ss:$16 sps:$4 sm:$0xff]   ;;  %v7519_v18 = vpop.f32.mrf.mxu1 }
 0x1b9   :  { %4187 = vmatprep.subr.bf16.mxu1 %v5708_v19  ;;  %v612_v19 = vsub.s32 0, %v7503_v12 }
 0x1bb   :  { %4145 = vmatpush2.bf16.msra.mxu0 %v5703_v20  ;;  %v5769_v20 = vld [vmem:[%s7853_s1 + $0xbc8] ss:$16 sps:$4 sm:$0xff]  }
 0x1bc   :  { %4188 = vmatpush2.bf16.msra.mxu1 %v5706_v21  ;;  %4146 = vmatprep.subr.bf16.mxu0 %v5711_v22  ;;  %v5772_v21 = vld [vmem:[%s7853_s1 + $0xdc8] ss:$16 sps:$4 sm:$0xff]   ;;  %v7531_v22 = vld [vmem:[%s7855_s2] sm:$0xf] }
 0x1bd   :  { %4189 = vmatprep.subr.bf16.mxu1 %v5714_v23  ;;  %v7533_v23 = vpop.f32.mrf.mxu0 }
 0x1bf   :  { %4147 = vmatpush2.bf16.msra.mxu0 %v5709_v24  ;;  %v5777_v24 = vld [vmem:[%s7853_s1 + $0xbac] ss:$16 sps:$4 sm:$0xff]  }
 0x1c0   :  { %4190 = vmatpush2.bf16.msra.mxu1 %v5712_v25  ;;  %4202 = vmatprep.subr.bf16.mxu0 %v5717_v26  ;;  %v5780_v25 = vld [vmem:[%s7853_s1 + $0xdac] ss:$16 sps:$4 sm:$0xff]   ;;  %v616_v26 = vsub.s32 1, %v7503_v12 }
 0x1c1   :  { %4245 = vmatprep.subr.bf16.mxu1 %v5720_v27  ;;  %v7542_v27 = vpop.f32.mrf.mxu1 }
 0x1c2   :  { %4149 = vmatmul.mubr.bf16.vlgmr.msra.gmra.mxu0 %v5915_v32  ;;  %v5783_v32 = vld [vmem:[%s7853_s1 + $0xb8c] ss:$16 sps:$4 sm:$0xff]  }
 0x1c3   :  { %4192 = vmatmul.mubr.bf16.vlgmr.msra.gmra.mxu1 %v5916_v33  ;;  %4203 = vmatpush1.bf16.msra.mxu0 %v5715_v28  ;;  %v3806_v28 = vpop.f32.mrf.mxu0  ;;  %v5786_v33 = vld [vmem:[%s7853_s1 + $0xd8c] ss:$16 sps:$4 sm:$0xff]  }
 0x1c4   :  { %4246 = vmatpush1.bf16.msra.mxu1 %v5718_v29  ;;  %4204 = vmatprep.subr.bf16.mxu0 %v5723_v30  ;;  %v613_v29 = vrot.slane %v7531_v22, %v612_v19  ;;  %v5775_v30 = vld [vmem:[%s7853_s1 + $0xba8] ss:$16 sps:$4 sm:$0xff]  }
 0x1c5   :  { %4247 = vmatprep.subr.bf16.mxu1 %v5726_v31  ;;  %4234 = vmatprep.mubr.bf16.mxu0 %v5917_v38  ;;  %v5778_v31 = vld [vmem:[%s7853_s1 + $0xda8] ss:$16 sps:$4 sm:$0xff]  }
 0x1c6   :  { %4277 = vmatprep.mubr.bf16.mxu1 %v5918_v39  ;;  %v5781_v38 = vld [vmem:[%s7853_s1 + $0xb88] ss:$16 sps:$4 sm:$0xff]  }
 0x1c7   :  { %4205 = vmatpush1.bf16.msra.mxu0 %v5721_v34  ;;  %v617_v34 = vrot.slane %v7531_v22, %v616_v26  ;;  %v5784_v39 = vld [vmem:[%s7853_s1 + $0xd88] ss:$16 sps:$4 sm:$0xff]  }
 0x1c8   :  { %4248 = vmatpush1.bf16.msra.mxu1 %v5724_v35  ;;  %4206 = vmatprep.subr.bf16.mxu0 %v5729_v36  ;;  %v3769_v35 = vpop.f32.mrf.mxu1  ;;  %v3808_v36 = vpop.f32.mrf.mxu0  ;;  %v5805_v19 = vld [vmem:[%s7853_s1 + $0xb08] ss:$16 sps:$4 sm:$0xff]  }
 0x1c9   :  { %4249 = vmatprep.subr.bf16.mxu1 %v5732_v37  ;;  %v3635_v37 = vadd.f32 %v7421_v44, %v613_v29 }
 0x1ca   :  { %v3810_v44 = vpop.f32.mrf.mxu0 }
 0x1cb   :  { %4207 = vmatpush1.bf16.msra.mxu0 %v5727_v40  ;;  %v3849_v40 = vpop.f32.mrf.mxu1 }
 0x1cc   :  { %4250 = vmatpush1.bf16.msra.mxu1 %v5730_v41  ;;  %4208 = vmatprep.subr.bf16.mxu0 %v5735_v42  ;;  %v5789_v41 = vld [vmem:[%s7853_s1 + $0xb6c] ss:$16 sps:$4 sm:$0xff]  }
 0x1cd   :  { %4251 = vmatprep.subr.bf16.mxu1 %v5738_v43  ;;  %v5792_v42 = vld [vmem:[%s7853_s1 + $0xd6c] ss:$16 sps:$4 sm:$0xff]   ;;  %v3637_v43 = vadd.f32 %v7435_v49, %v617_v34 }
 0x1ce   :  { %v5795_v49 = vld [vmem:[%s7853_s1 + $0xb4c] ss:$16 sps:$4 sm:$0xff]  }
 0x1cf   :  { %4209 = vmatpush1.bf16.msra.mxu0 %v5733_v45  ;;  %v3678_v45 = vadd.f32 %v7443_v52, %v3635_v37  ;;  %v3680_v52 = vadd.f32 %v7459_v58, %v3637_v43 }
 0x1d0   :  { %4252 = vmatpush1.bf16.msra.mxu1 %v5736_v46  ;;  %4210 = vmatprep.subr.bf16.mxu0 %v5741_v47  ;;  %v3639_v46 = vadd.f32 %v7451_v55, %v613_v29  ;;  %v5787_v47 = vld [vmem:[%s7853_s1 + $0xb68] ss:$16 sps:$4 sm:$0xff]   ;;  %v3812_v55 = vpop.f32.mrf.mxu0 }
 0x1d1   :  { %4253 = vmatprep.subr.bf16.mxu1 %v5744_v48  ;;  %v5790_v48 = vld [vmem:[%s7853_s1 + $0xd68] ss:$16 sps:$4 sm:$0xff]  }
 0x1d3   :  { %4211 = vmatpush1.bf16.msra.mxu0 %v5739_v50  ;;  %v3851_v50 = vpop.f32.mrf.mxu1 }
 0x1d4   :  { %4254 = vmatpush1.bf16.msra.mxu1 %v5742_v51  ;;  %4212 = vmatprep.subr.bf16.mxu0 %v5747_v53  ;;  %v5798_v51 = vld [vmem:[%s7853_s1 + $0xd4c] ss:$16 sps:$4 sm:$0xff]   ;;  %v3641_v53 = vadd.f32 %v7467_v61, %v617_v34 }
 0x1d5   :  { %4255 = vmatprep.subr.bf16.mxu1 %v5750_v54  ;;  %v3721_v54 = vadd.f32 %v7477_v1, %v3678_v45  ;;  %v3853_v58 = vpop.f32.mrf.mxu1  ;;  %v5801_v61 = vld [vmem:[%s7853_s1 + $0xb2c] ss:$16 sps:$4 sm:$0xff]  }
 0x1d6   :  { %v5819_v34 = vld [vmem:[%s7853_s1 + $0xecc] ss:$16 sps:$4 sm:$0xff]  }
 0x1d7   :  { %4213 = vmatpush1.bf16.msra.mxu0 %v5745_v56  ;;  %v3682_v56 = vadd.f32 %v7475_v0, %v3639_v46  ;;  %v3684_v0 = vadd.f32 %v7491_v7, %v3641_v53  ;;  %v3764_v1 = vadd.f32 %v7501_v11, %v3721_v54  ;;  %v3855_v7 = vpop.f32.mrf.mxu1  ;;  %v5810_v11 = vld [vmem:[%s7853_s1 + $0xd0c] ss:$16 sps:$4 sm:$0xff]   ;;  %v5817_v46 = vld [vmem:[%s7853_s1 + $0xec8] ss:$16 sps:$4 sm:$0xff]  }
 0x1d8   :  { %4256 = vmatpush1.bf16.msra.mxu1 %v5748_v57  ;;  %4214 = vmatprep.subr.bf16.mxu0 %v5753_v59  ;;  %v3723_v57 = vadd.f32 %v7493_v8, %v3680_v52  ;;  %v5793_v59 = vld [vmem:[%s7853_s1 + $0xb48] ss:$16 sps:$4 sm:$0xff]   ;;  %v5921_v53 = vld [vmem:[%s7854_s0 + $0x3c] ss:$72 sps:$4 sm:$0xff]  }
 0x1d9   :  { %4257 = vmatprep.subr.bf16.mxu1 %v5756_v60  ;;  %v5796_v60 = vld [vmem:[%s7853_s1 + $0xd48] ss:$16 sps:$4 sm:$0xff]   ;;  %v3727_v4 = vadd.f32 %v7533_v23, %v3684_v0  ;;  %v5813_v23 = vld [vmem:[%s7853_s1 + $0xeec] ss:$16 sps:$4 sm:$0xff]  }
 0x1da   :  { %v5802_v8 = vld [vmem:[%s7853_s1 + $0xd28] ss:$16 sps:$4 sm:$0xff]   ;;  %v5922_v54 = vld [vmem:[%s7854_s0 + $0x44] ss:$72 sps:$4 sm:$0xff]  }
 0x1db   :  { %4215 = vmatpush1.bf16.msra.mxu0 %v5751_v62  ;;  %v3892_v62 = vpop.f32.mrf.mxu0  ;;  %v5831_v0 = vld [vmem:[%s7853_s1 + $0xe8c] ss:$16 sps:$4 sm:$0xff]  }
 0x1dc   :  { %4258 = vmatpush1.bf16.msra.mxu1 %v5754_v63  ;;  %4216 = vmatprep.subr.bf16.mxu0 %v5759_v2  ;;  %v5804_v63 = vld [vmem:[%s7853_s1 + $0xd2c] ss:$16 sps:$4 sm:$0xff]   ;;  %v3725_v2 = vadd.f32 %v7511_v15, %v3682_v56  ;;  %v3935_v15 = vpop.f32.mrf.mxu1 }
 0x1dd   :  { %4259 = vmatprep.subr.bf16.mxu1 %v5762_v3  ;;  %v3766_v3 = vadd.f32 %v7519_v18, %v3723_v57 }
 0x1df   :  { %4217 = vmatpush1.bf16.msra.mxu0 %v5757_v5  ;;  %v3807_v5 = vadd.f32 %v3806_v28, %v3764_v1  ;;  %v3937_v28 = vpop.f32.mrf.mxu1  ;;  %v5834_v1 = vld [vmem:[%s7853_s1 + $0x108c] ss:$16 sps:$4 sm:$0xff]  }
 0x1e0   :  { %4260 = vmatpush1.bf16.msra.mxu1 %v5760_v6  ;;  %4218 = vmatprep.subr.bf16.mxu0 %v5765_v9  ;;  %v5799_v6 = vld [vmem:[%s7853_s1 + $0xb28] ss:$16 sps:$4 sm:$0xff]   ;;  %v3894_v9 = vpop.f32.mrf.mxu0 }
 0x1e1   :  { %4261 = vmatprep.subr.bf16.mxu1 %v5768_v10  ;;  %v5807_v10 = vld [vmem:[%s7853_s1 + $0xb0c] ss:$16 sps:$4 sm:$0xff]  }
 0x1e3   :  { %4219 = vmatpush2.bf16.msra.mxu0 %v5763_v13  ;;  %v3768_v13 = vadd.f32 %v7542_v27, %v3725_v2 }
 0x1e4   :  { %4262 = vmatpush2.bf16.msra.mxu1 %v5766_v14  ;;  %4220 = vmatprep.subr.bf16.mxu0 %v5771_v16  ;;  %v3809_v14 = vadd.f32 %v3808_v36, %v3766_v3  ;;  %v3770_v16 = vadd.f32 %v3769_v35, %v3727_v4  ;;  %v5822_v35 = vld [vmem:[%s7853_s1 + $0x10cc] ss:$16 sps:$4 sm:$0xff]  }
 0x1e5   :  { %4263 = vmatprep.subr.bf16.mxu1 %v5774_v17  ;;  %v3850_v17 = vadd.f32 %v3849_v40, %v3807_v5  ;;  %v3811_v18 = vadd.f32 %v3810_v44, %v3768_v13  ;;  %v5838_v13 = vld [vmem:[%s7853_s1 + $0x1068] ss:$16 sps:$4 sm:$0xff]  }
 0x1e6   :  { %v3813_v26 = vadd.f32 %v3812_v55, %v3770_v16  ;;  %v5841_v16 = vld [vmem:[%s7853_s1 + $0xe48] ss:$16 sps:$4 sm:$0xff]  }
 0x1e7   :  { %4221 = vmatpush2.bf16.msra.mxu0 %v5769_v20  ;;  %v5808_v20 = vld [vmem:[%s7853_s1 + $0xd08] ss:$16 sps:$4 sm:$0xff]   ;;  %v3893_v27 = vadd.f32 %v3892_v62, %v3850_v17  ;;  %v3854_v29 = vadd.f32 %v3853_v58, %v3811_v18  ;;  %v5849_v18 = vld [vmem:[%s7853_s1 + $0xe2c] ss:$16 sps:$4 sm:$0xff]  }
 0x1e8   :  { %4264 = vmatpush2.bf16.msra.mxu1 %v5772_v21  ;;  %4222 = vmatprep.subr.bf16.mxu0 %v5777_v24  ;;  %v3896_v21 = vpop.f32.mrf.mxu0  ;;  %v5816_v24 = vld [vmem:[%s7853_s1 + $0x10ec] ss:$16 sps:$4 sm:$0xff]   ;;  %v3856_v36 = vadd.f32 %v3855_v7, %v3813_v26  ;;  %v5823_v62 = vld [vmem:[%s7853_s1 + $0xea8] ss:$16 sps:$4 sm:$0xff]  }
 0x1e9   :  { %4265 = vmatprep.subr.bf16.mxu1 %v5780_v25  ;;  %v3852_v25 = vadd.f32 %v3851_v50, %v3809_v14  ;;  %v3936_v37 = vadd.f32 %v3935_v15, %v3893_v27  ;;  %v5825_v50 = vld [vmem:[%s7853_s1 + $0xeac] ss:$16 sps:$4 sm:$0xff]   ;;  %v5844_v17 = vld [vmem:[%s7853_s1 + $0x1048] ss:$16 sps:$4 sm:$0xff]  }
 0x1ea   :  { %v5837_v7 = vld [vmem:[%s7853_s1 + $0xe6c] ss:$16 sps:$4 sm:$0xff]   ;;  %v5856_v26 = vld [vmem:[%s7853_s1 + $0x1008] ss:$16 sps:$4 sm:$0xff]  }
 0x1eb   :  { %4223 = vmatpush2.bf16.msra.mxu0 %v5775_v30  ;;  %v3895_v30 = vadd.f32 %v3894_v9, %v3852_v25  ;;  %v5840_v9 = vld [vmem:[%s7853_s1 + $0x106c] ss:$16 sps:$4 sm:$0xff]   ;;  %v5853_v25 = vld [vmem:[%s7853_s1 + $0xe08] ss:$16 sps:$4 sm:$0xff]  }
 0x1ec   :  { %4266 = vmatpush2.bf16.msra.mxu1 %v5778_v31  ;;  %4224 = vmatprep.subr.bf16.mxu0 %v5783_v32  ;;  %v5811_v31 = vld [vmem:[%s7853_s1 + $0xee8] ss:$16 sps:$4 sm:$0xff]   ;;  %v5843_v14 = vld [vmem:[%s7853_s1 + $0xe4c] ss:$16 sps:$4 sm:$0xff]  }
 0x1ed   :  { %4267 = vmatprep.subr.bf16.mxu1 %v5786_v33  ;;  %v5814_v32 = vld [vmem:[%s7853_s1 + $0x10e8] ss:$16 sps:$4 sm:$0xff]   ;;  %v3898_v33 = vpop.f32.mrf.mxu0  ;;  %v3938_v43 = vadd.f32 %v3937_v28, %v3895_v30  ;;  %v5846_v15 = vld [vmem:[%s7853_s1 + $0x104c] ss:$16 sps:$4 sm:$0xff]  }
 0x1ee   :  { %v3899_v44 = vadd.f32 %v3898_v33, %v3856_v36  ;;  %v5861_v27 = vld [vmem:[%s7853_s1 + $0xfec] ss:$16 sps:$4 sm:$0xff]   ;;  %v5862_v30 = vld [vmem:[%s7853_s1 + $0x11e8] ss:$16 sps:$4 sm:$0xff]  }
 0x1ef   :  { %4225 = vmatpush2.bf16.msra.mxu0 %v5781_v38  ;;  %v3897_v38 = vadd.f32 %v3896_v21, %v3854_v29  ;;  %v5850_v21 = vld [vmem:[%s7853_s1 + $0x1028] ss:$16 sps:$4 sm:$0xff]   ;;  %v5864_v28 = vld [vmem:[%s7853_s1 + $0x11ec] ss:$16 sps:$4 sm:$0xff]  }
 0x1f0   :  { %4268 = vmatpush2.bf16.msra.mxu1 %v5784_v39  ;;  %4226 = vmatprep.subr.bf16.mxu0 %v5789_v41  ;;  %v3939_v39 = vpop.f32.mrf.mxu1  ;;  %v5919_v41 = vld [vmem:[%s7854_s0 + $0x28] ss:$72 sps:$4 sm:$0xff]   ;;  %v5876_v36 = vld [vmem:[%s7853_s1 + $0x11ac] ss:$16 sps:$4 sm:$0xff]  }
 0x1f1   :  { %4269 = vmatprep.subr.bf16.mxu1 %v5792_v42  ;;  %v5920_v42 = vld [vmem:[%s7854_s0 + $0x30] ss:$72 sps:$4 sm:$0xff]  }
 0x1f2   :  { %v3941_v55 = vpop.f32.mrf.mxu1  ;;  %v5859_v29 = vld [vmem:[%s7853_s1 + $0xfe8] ss:$16 sps:$4 sm:$0xff]  }
 0x1f3   :  { %4227 = vmatpush2.bf16.msra.mxu0 %v5787_v47  ;;  %v5820_v47 = vld [vmem:[%s7853_s1 + $0x10c8] ss:$16 sps:$4 sm:$0xff]   ;;  %v3942_v57 = vadd.f32 %v3941_v55, %v3899_v44  ;;  %v5888_v44 = vld [vmem:[%s7853_s1 + $0x116c] ss:$16 sps:$4 sm:$0xff]  }
 0x1f4   :  { %4270 = vmatpush2.bf16.msra.mxu1 %v5790_v48  ;;  %4228 = vmatprep.subr.bf16.mxu0 %v5795_v49  ;;  %v5828_v49 = vld [vmem:[%s7853_s1 + $0x10ac] ss:$16 sps:$4 sm:$0xff]   ;;  %v5865_v33 = vld [vmem:[%s7853_s1 + $0xfc8] ss:$16 sps:$4 sm:$0xff]  }
 0x1f5   :  { %4271 = vmatprep.subr.bf16.mxu1 %v5798_v51  ;;  %v3940_v51 = vadd.f32 %v3939_v39, %v3897_v38  ;;  %v5874_v38 = vld [vmem:[%s7853_s1 + $0x11a8] ss:$16 sps:$4 sm:$0xff]   ;;  %v5879_v39 = vld [vmem:[%s7853_s1 + $0xf8c] ss:$16 sps:$4 sm:$0xff]  }
 0x1f6   :  { %v5903_v55 = vld [vmem:[%s7853_s1 + $0xf0c] ss:$16 sps:$4 sm:$0xff]  }
 0x1f7   :  { %4229 = vmatpush2.bf16.msra.mxu0 %v5793_v59 }
 0x1f8   :  { %4272 = vmatpush2.bf16.msra.mxu1 %v5796_v60  ;;  %4230 = vmatprep.subr.bf16.mxu0 %v5801_v61  ;;  %v5826_v61 = vld [vmem:[%s7853_s1 + $0x10a8] ss:$16 sps:$4 sm:$0xff]  }
 0x1f9   :  { %4273 = vmatprep.subr.bf16.mxu1 %v5804_v63 }
 0x1fb   :  { %4231 = vmatpush2.bf16.msra.mxu0 %v5799_v6  ;;  %v5829_v6 = vld [vmem:[%s7853_s1 + $0xe88] ss:$16 sps:$4 sm:$0xff]  }
 0x1fc   :  { %4274 = vmatpush2.bf16.msra.mxu1 %v5802_v8  ;;  %4232 = vmatprep.subr.bf16.mxu0 %v5807_v10  ;;  %v5832_v8 = vld [vmem:[%s7853_s1 + $0x1088] ss:$16 sps:$4 sm:$0xff]  }
 0x1fd   :  { %4275 = vmatprep.subr.bf16.mxu1 %v5810_v11  ;;  %v5835_v11 = vld [vmem:[%s7853_s1 + $0xe68] ss:$16 sps:$4 sm:$0xff]  }
 0x1ff   :  { %4233 = vmatpush2.bf16.msra.mxu0 %v5805_v19  ;;  %v5852_v19 = vld [vmem:[%s7853_s1 + $0x102c] ss:$16 sps:$4 sm:$0xff]  }
 0x200   :  { %4276 = vmatpush2.bf16.msra.mxu1 %v5808_v20  ;;  %4288 = vmatprep.subr.bf16.mxu0 %v5813_v23  ;;  %v5847_v20 = vld [vmem:[%s7853_s1 + $0xe28] ss:$16 sps:$4 sm:$0xff]   ;;  %v5855_v23 = vld [vmem:[%s7853_s1 + $0xe0c] ss:$16 sps:$4 sm:$0xff]  }
 0x201   :  { %4331 = vmatprep.subr.bf16.mxu1 %v5816_v24  ;;  %v5858_v24 = vld [vmem:[%s7853_s1 + $0x100c] ss:$16 sps:$4 sm:$0xff]  }
 0x202   :  { %v3978_v40 = vpop.f32.mrf.mxu0  ;;  %4235 = vmatmul.mubr.bf16.vlgmr.msra.gmra.mxu0 %v5919_v41  ;;  %v5877_v41 = vld [vmem:[%s7853_s1 + $0xf88] ss:$16 sps:$4 sm:$0xff]  }
 0x203   :  { %4278 = vmatmul.mubr.bf16.vlgmr.msra.gmra.mxu1 %v5920_v42  ;;  %v3979_v45 = vadd.f32 %v3978_v40, %v3936_v37  ;;  %4289 = vmatpush1.bf16.msra.mxu0 %v5811_v31  ;;  %v5867_v31 = vld [vmem:[%s7853_s1 + $0xfcc] ss:$16 sps:$4 sm:$0xff]   ;;  %v5871_v37 = vld [vmem:[%s7853_s1 + $0xfa8] ss:$16 sps:$4 sm:$0xff]  }
 0x204   :  { %4332 = vmatpush1.bf16.msra.mxu1 %v5814_v32  ;;  %v3980_v48 = vpop.f32.mrf.mxu0  ;;  %4290 = vmatprep.subr.bf16.mxu0 %v5819_v34  ;;  %v5870_v32 = vld [vmem:[%s7853_s1 + $0x11cc] ss:$16 sps:$4 sm:$0xff]   ;;  %v5868_v34 = vld [vmem:[%s7853_s1 + $0x11c8] ss:$16 sps:$4 sm:$0xff]  }
 0x205   :  { %4333 = vmatprep.subr.bf16.mxu1 %v5822_v35  ;;  %v3981_v52 = vadd.f32 %v3980_v48, %v3938_v43  ;;  %4320 = vmatprep.mubr.bf16.mxu0 %v5921_v53  ;;  %v4374_v59 = vmax.f32 %v3979_v45, 0.0  ;;  %v5873_v35 = vld [vmem:[%s7853_s1 + $0xfac] ss:$16 sps:$4 sm:$0xff]   ;;  %v5880_v42 = vld [vmem:[%s7853_s1 + $0x1188] ss:$16 sps:$4 sm:$0xff]  }
 0x206   :  { %4363 = vmatprep.mubr.bf16.mxu1 %v5922_v54  ;;  %v3982_v56 = vpop.f32.mrf.mxu0  ;;  %v5882_v40 = vld [vmem:[%s7853_s1 + $0x118c] ss:$16 sps:$4 sm:$0xff]   ;;  %v5883_v45 = vld [vmem:[%s7853_s1 + $0xf68] ss:$16 sps:$4 sm:$0xff]  }
 0x207   :  { %v4375_v60 = vmax.f32 %v3981_v52, 0.0  ;;  %v3983_v58 = vadd.f32 %v3982_v56, %v3940_v51  ;;  %4291 = vmatpush1.bf16.msra.mxu0 %v5817_v46  ;;  %v5885_v43 = vld [vmem:[%s7853_s1 + $0xf6c] ss:$16 sps:$4 sm:$0xff]   ;;  %v5886_v46 = vld [vmem:[%s7853_s1 + $0x1168] ss:$16 sps:$4 sm:$0xff]  }
 0x208   :  { %4334 = vmatpush1.bf16.msra.mxu1 %v5820_v47  ;;  %v3984_v63 = vpop.f32.mrf.mxu0  ;;  %4292 = vmatprep.subr.bf16.mxu0 %v5825_v50  ;;  %v5891_v47 = vld [vmem:[%s7853_s1 + $0xf4c] ss:$16 sps:$4 sm:$0xff]   ;;  %v5889_v50 = vld [vmem:[%s7853_s1 + $0xf48] ss:$16 sps:$4 sm:$0xff]  }
 0x209   :  { %4335 = vmatprep.subr.bf16.mxu1 %v5828_v49  ;;  %v5012_v2 = vpack.c.bf16 %v4375_v60, %v4374_v59  ;;  %v3985_v3 = vadd.f32 %v3984_v63, %v3942_v57  ;;  %v4378_v4 = vmax.f32 %v3983_v58, 0.0  ;;  %v5894_v48 = vld [vmem:[%s7853_s1 + $0x114c] ss:$16 sps:$4 sm:$0xff]   ;;  %v5892_v49 = vld [vmem:[%s7853_s1 + $0x1148] ss:$16 sps:$4 sm:$0xff]  }
 0x20a   :  { %v5897_v51 = vld [vmem:[%s7853_s1 + $0xf2c] ss:$16 sps:$4 sm:$0xff]   ;;  %v5895_v53 = vld [vmem:[%s7853_s1 + $0xf28] ss:$16 sps:$4 sm:$0xff]  }
 0x20b   :  { %4406 = vst [vmem:[%s7856_s3] sm:$0xff] %v5012_v2  ;;  %v4379_v5 = vmax.f32 %v3985_v3, 0.0  ;;  %4293 = vmatpush1.bf16.msra.mxu0 %v5823_v62  ;;  %v5900_v52 = vld [vmem:[%s7853_s1 + $0x112c] ss:$16 sps:$4 sm:$0xff]   ;;  %v5898_v54 = vld [vmem:[%s7853_s1 + $0x1128] ss:$16 sps:$4 sm:$0xff]   ;;  %v4021_v62 = vpop.f32.mrf.mxu1 }
 0x20c   :  { %4336 = vmatpush1.bf16.msra.mxu1 %v5826_v61  ;;  %4294 = vmatprep.subr.bf16.mxu0 %v5831_v0  ;;  %v5906_v56 = vld [vmem:[%s7853_s1 + $0x110c] ss:$16 sps:$4 sm:$0xff]   ;;  %v5901_v57 = vld [vmem:[%s7853_s1 + $0xf08] ss:$16 sps:$4 sm:$0xff]  }
 0x20d   :  { %4337 = vmatprep.subr.bf16.mxu1 %v5834_v1  ;;  %v5014_v10 = vpack.c.bf16 %v4379_v5, %v4378_v4  ;;  %v5904_v59 = vld [vmem:[%s7853_s1 + $0x1108] ss:$16 sps:$4 sm:$0xff]   ;;  %v4023_v61 = vpop.f32.mrf.mxu1 }
 0x20e   :  { %v5923_v60 = vld [vmem:[%s7854_s0 + $0x38] ss:$72 sps:$4 sm:$0xff]  }
 0x20f   :  { %4408 = vst [vmem:[%s7856_s3 + $0x10] sm:$0xff] %v5014_v10  ;;  %4295 = vmatpush1.bf16.msra.mxu0 %v5829_v6  ;;  %v5924_v58 = vld [vmem:[%s7854_s0 + $0x40] ss:$72 sps:$4 sm:$0xff]   ;;  %v4025_v63 = vpop.f32.mrf.mxu1 }
 0x210   :  { %4338 = vmatpush1.bf16.msra.mxu1 %v5832_v8  ;;  %4296 = vmatprep.subr.bf16.mxu0 %v5837_v7 }
 0x211   :  { %4339 = vmatprep.subr.bf16.mxu1 %v5840_v9  ;;  %v4027_v0 = vpop.f32.mrf.mxu1 }
 0x213   :  { %4297 = vmatpush1.bf16.msra.mxu0 %v5835_v11  ;;  %v620_v11 = vsub.s32 2, %v7503_v12 }
 0x214   :  { %4340 = vmatpush1.bf16.msra.mxu1 %v5838_v13  ;;  %4298 = vmatprep.subr.bf16.mxu0 %v5843_v14  ;;  %v624_v13 = vsub.s32 3, %v7503_v12 }
 0x215   :  { %4341 = vmatprep.subr.bf16.mxu1 %v5846_v15 }
 0x217   :  { %4299 = vmatpush1.bf16.msra.mxu0 %v5841_v16  ;;  %v621_v16 = vrot.slane %v7531_v22, %v620_v11 }
 0x218   :  { %4342 = vmatpush1.bf16.msra.mxu1 %v5844_v17  ;;  %4300 = vmatprep.subr.bf16.mxu0 %v5849_v18  ;;  %v625_v17 = vrot.slane %v7531_v22, %v624_v13 }
 0x219   :  { %4343 = vmatprep.subr.bf16.mxu1 %v5852_v19 }
 0x21b   :  { %4301 = vmatpush1.bf16.msra.mxu0 %v5847_v20  ;;  %v4022_v20 = vadd.f32 %v4021_v62, %v621_v16 }
 0x21c   :  { %4344 = vmatpush1.bf16.msra.mxu1 %v5850_v21  ;;  %4302 = vmatprep.subr.bf16.mxu0 %v5855_v23  ;;  %v4024_v21 = vadd.f32 %v4023_v61, %v625_v17 }
 0x21d   :  { %4345 = vmatprep.subr.bf16.mxu1 %v5858_v24 }
 0x21f   :  { %4303 = vmatpush1.bf16.msra.mxu0 %v5853_v25 }
 0x220   :  { %4346 = vmatpush1.bf16.msra.mxu1 %v5856_v26  ;;  %4304 = vmatprep.subr.bf16.mxu0 %v5861_v27  ;;  %v4026_v26 = vadd.f32 %v4025_v63, %v621_v16 }
 0x221   :  { %4347 = vmatprep.subr.bf16.mxu1 %v5864_v28 }
 0x223   :  { %4305 = vmatpush2.bf16.msra.mxu0 %v5859_v29 }
 0x224   :  { %4348 = vmatpush2.bf16.msra.mxu1 %v5862_v30  ;;  %4306 = vmatprep.subr.bf16.mxu0 %v5867_v31  ;;  %v4028_v30 = vadd.f32 %v4027_v0, %v625_v17 }
 0x225   :  { %4349 = vmatprep.subr.bf16.mxu1 %v5870_v32 }
 0x227   :  { %4307 = vmatpush2.bf16.msra.mxu0 %v5865_v33 }
 0x228   :  { %4350 = vmatpush2.bf16.msra.mxu1 %v5868_v34  ;;  %4308 = vmatprep.subr.bf16.mxu0 %v5873_v35 }
 0x229   :  { %4351 = vmatprep.subr.bf16.mxu1 %v5876_v36 }
 0x22b   :  { %4309 = vmatpush2.bf16.msra.mxu0 %v5871_v37 }
 0x22c   :  { %4352 = vmatpush2.bf16.msra.mxu1 %v5874_v38  ;;  %4310 = vmatprep.subr.bf16.mxu0 %v5879_v39 }
 0x22d   :  { %4353 = vmatprep.subr.bf16.mxu1 %v5882_v40 }
 0x22f   :  { %4311 = vmatpush2.bf16.msra.mxu0 %v5877_v41 }
 0x230   :  { %4354 = vmatpush2.bf16.msra.mxu1 %v5880_v42  ;;  %4312 = vmatprep.subr.bf16.mxu0 %v5885_v43 }
 0x231   :  { %4355 = vmatprep.subr.bf16.mxu1 %v5888_v44 }
 0x233   :  { %4313 = vmatpush2.bf16.msra.mxu0 %v5883_v45 }
 0x234   :  { %4356 = vmatpush2.bf16.msra.mxu1 %v5886_v46  ;;  %4314 = vmatprep.subr.bf16.mxu0 %v5891_v47 }
 0x235   :  { %4357 = vmatprep.subr.bf16.mxu1 %v5894_v48 }
 0x237   :  { %4315 = vmatpush2.bf16.msra.mxu0 %v5889_v50 }
 0x238   :  { %4358 = vmatpush2.bf16.msra.mxu1 %v5892_v49  ;;  %4316 = vmatprep.subr.bf16.mxu0 %v5897_v51 }
 0x239   :  { %4359 = vmatprep.subr.bf16.mxu1 %v5900_v52 }
 0x23b   :  { %4317 = vmatpush2.bf16.msra.mxu0 %v5895_v53 }
 0x23c   :  { %4360 = vmatpush2.bf16.msra.mxu1 %v5898_v54  ;;  %4318 = vmatprep.subr.bf16.mxu0 %v5903_v55 }
 0x23d   :  { %4361 = vmatprep.subr.bf16.mxu1 %v5906_v56 }
 0x23f   :  { %4319 = vmatpush2.bf16.msra.mxu0 %v5901_v57 }
 0x240   :  { %4362 = vmatpush2.bf16.msra.mxu1 %v5904_v59 }
 0x242   :  { %4321 = vmatmul.mubr.bf16.vlgmr.msra.gmra.mxu0 %v5923_v60  ;;  %v4064_v1 = vpop.f32.mrf.mxu0 }
 0x243   :  { %4364 = vmatmul.mubr.bf16.vlgmr.msra.gmra.mxu1 %v5924_v58  ;;  %v4107_v2 = vpop.f32.mrf.mxu1  ;;  %v4065_v23 = vadd.f32 %v4064_v1, %v4022_v20 }
 0x244   :  { %v4066_v3 = vpop.f32.mrf.mxu0 }
 0x245   :  { %v4109_v4 = vpop.f32.mrf.mxu1  ;;  %v4067_v27 = vadd.f32 %v4066_v3, %v4024_v21  ;;  %v4108_v31 = vadd.f32 %v4107_v2, %v4065_v23 }
 0x246   :  { %v4068_v5 = vpop.f32.mrf.mxu0 }
 0x247   :  { %v4111_v6 = vpop.f32.mrf.mxu1  ;;  %v4069_v12 = vadd.f32 %v4068_v5, %v4026_v26  ;;  %v4110_v32 = vadd.f32 %v4109_v4, %v4067_v27 }
 0x248   :  { %v4070_v8 = vpop.f32.mrf.mxu0 }
 0x249   :  { %v4113_v7 = vpop.f32.mrf.mxu1  ;;  %v4071_v33 = vadd.f32 %v4070_v8, %v4028_v30  ;;  %v4112_v22 = vadd.f32 %v4111_v6, %v4069_v12 }
 0x24b   :  { %v4114_v38 = vadd.f32 %v4113_v7, %v4071_v33 }
 0x282   :  { %v4150_v9 = vpop.f32.mrf.mxu0 }
 0x283   :  { %v4193_v10 = vpop.f32.mrf.mxu1  ;;  %v4151_v34 = vadd.f32 %v4150_v9, %v4108_v31 }
 0x284   :  { %v4152_v14 = vpop.f32.mrf.mxu0 }
 0x285   :  { %v4195_v15 = vpop.f32.mrf.mxu1  ;;  %v4153_v37 = vadd.f32 %v4152_v14, %v4110_v32  ;;  %v4194_v39 = vadd.f32 %v4193_v10, %v4151_v34 }
 0x286   :  { %v4154_v18 = vpop.f32.mrf.mxu0 }
 0x287   :  { %v4197_v19 = vpop.f32.mrf.mxu1  ;;  %v4155_v40 = vadd.f32 %v4154_v18, %v4112_v22  ;;  %v4196_v43 = vadd.f32 %v4195_v15, %v4153_v37 }
 0x288   :  { %v4156_v24 = vpop.f32.mrf.mxu0 }
 0x289   :  { %v4199_v25 = vpop.f32.mrf.mxu1  ;;  %v4157_v44 = vadd.f32 %v4156_v24, %v4114_v38  ;;  %v4198_v46 = vadd.f32 %v4197_v19, %v4155_v40 }
 0x28b   :  { %v4200_v49 = vadd.f32 %v4199_v25, %v4157_v44 }
 0x2c2   :  { %v4236_v28 = vpop.f32.mrf.mxu0 }
 0x2c3   :  { %v4279_v29 = vpop.f32.mrf.mxu1  ;;  %v4237_v45 = vadd.f32 %v4236_v28, %v4194_v39 }
 0x2c4   :  { %v4238_v35 = vpop.f32.mrf.mxu0 }
 0x2c5   :  { %v4281_v36 = vpop.f32.mrf.mxu1  ;;  %v4239_v47 = vadd.f32 %v4238_v35, %v4196_v43  ;;  %v4280_v51 = vadd.f32 %v4279_v29, %v4237_v45 }
 0x2c6   :  { %v4240_v41 = vpop.f32.mrf.mxu0 }
 0x2c7   :  { %v4283_v42 = vpop.f32.mrf.mxu1  ;;  %v4241_v52 = vadd.f32 %v4240_v41, %v4198_v46  ;;  %v4282_v55 = vadd.f32 %v4281_v36, %v4239_v47 }
 0x2c8   :  { %v4242_v48 = vpop.f32.mrf.mxu0 }
 0x2c9   :  { %v4285_v50 = vpop.f32.mrf.mxu1  ;;  %v4243_v56 = vadd.f32 %v4242_v48, %v4200_v49  ;;  %v4284_v58 = vadd.f32 %v4283_v42, %v4241_v52 }
 0x2cb   :  { %v4286_v1 = vadd.f32 %v4285_v50, %v4243_v56 }
 0x302   :  { %v4322_v53 = vpop.f32.mrf.mxu0 }
 0x303   :  { %v4365_v54 = vpop.f32.mrf.mxu1  ;;  %v4323_v57 = vadd.f32 %v4322_v53, %v4280_v51 }
 0x304   :  { %v4324_v59 = vpop.f32.mrf.mxu0 }
 0x305   :  { %v4367_v60 = vpop.f32.mrf.mxu1  ;;  %v4366_v62 = vadd.f32 %v4365_v54, %v4323_v57  ;;  %v4325_v61 = vadd.f32 %v4324_v59, %v4282_v55 }
 0x306   :  { %v4326_v63 = vpop.f32.mrf.mxu0 }
 0x307   :  { %v4369_v0 = vpop.f32.mrf.mxu1  ;;  %v4368_v2 = vadd.f32 %v4367_v60, %v4325_v61  ;;  %v4327_v3 = vadd.f32 %v4326_v63, %v4284_v58  ;;  %v4376_v5 = vmax.f32 %v4366_v62, 0.0 }
 0x308   :  { %v4328_v4 = vpop.f32.mrf.mxu0 }
 0x309   :  { %v4377_v6 = vmax.f32 %v4368_v2, 0.0  ;;  %v4370_v8 = vadd.f32 %v4369_v0, %v4327_v3  ;;  %v4329_v7 = vadd.f32 %v4328_v4, %v4286_v1  ;;  %v4371_v9 = vpop.f32.mrf.mxu1 }
 0x30b   :  { %v5013_v10 = vpack.c.bf16 %v4377_v6, %v4376_v5  ;;  %v4372_v11 = vadd.f32 %v4371_v9, %v4329_v7  ;;  %v4380_v13 = vmax.f32 %v4370_v8, 0.0 }
 0x30d   :  { %4407 = vst [vmem:[%s7856_s3 + $0x8] sm:$0xff] %v5013_v10  ;;  %v4381_v14 = vmax.f32 %v4372_v11, 0.0 }
 0x30f   :  { %v5015_v15 = vpack.c.bf16 %v4381_v14, %v4380_v13 }
 0x311   :  { %4409 = vst [vmem:[%s7856_s3 + $0x18] sm:$0xff] %v5015_v15 }

// kernel: tile.28
= control target key start
LH: loop header
LB: loop body
LE: loop exit
PB: predicated region body
PF: predicated region fallthrough
CT: control target
= control target key end

     0   :  { %s22_s0 = inlined_call_operand.vmem [shape: f32[64], index: 0, kind: input, shape index: {}]   ;;  %s23_s1 = inlined_call_operand.vmem [shape: f32[4,64], index: 1, kind: output, shape index: {}]  }
   0x1   :  { %v4_v0 = vld [vmem:[%s22_s0] ss:$0 sm:$0xff] }
   0x2   :  { %5 = vst [vmem:[%s23_s1] sm:$0xf] %v4_v0 }

// kernel: tile.29
= control target key start
LH: loop header
LB: loop body
LE: loop exit
PB: predicated region body
PF: predicated region fallthrough
CT: control target
= control target key end

     0   :  { %s7_s8 = smov 3  ;;  %vm9_vm0 = vcmask 523264   ;;  %s34_s9 = smov 64   ;;  %vm16_vm1 = vcmask 1048064   ;;  %s54_s0 = inlined_call_operand.vmem [shape: f32[4,64], index: 0, kind: input, shape index: {}]   ;;  %s55_s1 = inlined_call_operand.vmem [shape: f32[1,256], index: 1, kind: output, shape index: {}]  }
   0x1   :  { %v5_v0 = vld [vmem:[%s54_s0] sm:$0xf]  ;;  %s12_s0 = smov 3 }
   0x2   :  { %6 = vst [vmem:[#allocation1] sm:$0xf] %v5_v0 }
   0x9   :  { %v13_v1 = vld [vmem:[#allocation1 + $0x1] ss:$2 sm:%s12_s0]   ;;  %v8_v2 = vld [vmem:[#allocation1] ss:$2 sm:%s7_s8]  }
   0xa   :  { %14 = vrot.lane.b32.xlu0 %v13_v1, %s34_s9  ;;  %10 = vst.msk [vmem:[#allocation0] ss:$8 sm:$0x3] %vm9_vm0, %v8_v2  }
  0x7c   :  { %v15_v3 = vpop.permute.xlu0 %14  }
  0x7d   :  { %17 = vst.msk [vmem:[#allocation0] ss:$8 sm:$0x3] %vm16_vm1, %v15_v3  }
  0x84   :  { %v22_v4 = vld [vmem:[#allocation0] sm:$0x1]  ;;  %v27_v5 = vld [vmem:[#allocation0 + $0x8] sm:$0x1] }
  0x85   :  { %25 = vst [vmem:[%s55_s1] sm:$0x1] %v22_v4  ;;  %32 = vst [vmem:[%s55_s1 + $0x1] sm:$0x1] %v27_v5 }

// kernel: pnc_forward.13
= control target key start
LH: loop header
LB: loop body
LE: loop exit
PB: predicated region body
PF: predicated region fallthrough
CT: control target
= control target key end

     0   :  { %s2259_s1 = inlined_call_operand.vmem [shape: bf16[1152,256], index: 1, kind: input, shape index: {}]   ;;  %s2260_s0 = inlined_call_operand.vmem [shape: bf16[32,1152], index: 0, kind: input, shape index: {}]   ;;  %s2261_s2 = inlined_call_operand.vmem [shape: f32[1,256], index: 2, kind: input, shape index: {}]   ;;  %s2262_s3 = inlined_call_operand.vmem [shape: bf16[32,256], index: 3, kind: output, shape index: {}]  }
   0x1   :  { %v1495_v0 = vld [vmem:[%s2259_s1 + $0x74] ss:$8 sps:$4 sm:$0xff]   ;;  %v1499_v2 = vld [vmem:[%s2259_s1 + $0x70] ss:$8 sps:$4 sm:$0xff]   ;;  %v1501_v4 = vld [vmem:[%s2259_s1 + $0x64] ss:$8 sps:$4 sm:$0xff]  }
   0x2   :  { %v1497_v1 = vld [vmem:[%s2259_s1 + $0x174] ss:$8 sps:$4 sm:$0xff]   ;;  %1003 = vmatprep.subr.bf16.mxu0 %v1495_v0  ;;  %v1500_v3 = vld [vmem:[%s2259_s1 + $0x170] ss:$8 sps:$4 sm:$0xff]   ;;  %v1503_v5 = vld [vmem:[%s2259_s1 + $0x164] ss:$8 sps:$4 sm:$0xff]  }
   0x3   :  { %1056 = vmatprep.subr.bf16.mxu1 %v1497_v1  ;;  %1004 = vmatpush1.bf16.msra.mxu0 %v1499_v2  ;;  %v1505_v6 = vld [vmem:[%s2259_s1 + $0x60] ss:$8 sps:$4 sm:$0xff]   ;;  %v1507_v8 = vld [vmem:[%s2259_s1 + $0x54] ss:$8 sps:$4 sm:$0xff]   ;;  %v1511_v10 = vld [vmem:[%s2259_s1 + $0x50] ss:$8 sps:$4 sm:$0xff]  }
   0x4   :  { %1057 = vmatpush1.bf16.msra.mxu1 %v1500_v3  ;;  %1005 = vmatprep.subr.bf16.mxu0 %v1501_v4  ;;  %v1506_v7 = vld [vmem:[%s2259_s1 + $0x160] ss:$8 sps:$4 sm:$0xff]   ;;  %v1509_v9 = vld [vmem:[%s2259_s1 + $0x154] ss:$8 sps:$4 sm:$0xff]   ;;  %v1512_v11 = vld [vmem:[%s2259_s1 + $0x150] ss:$8 sps:$4 sm:$0xff]  }
   0x5   :  { %1058 = vmatprep.subr.bf16.mxu1 %v1503_v5  ;;  %v1513_v12 = vld [vmem:[%s2259_s1 + $0x44] ss:$8 sps:$4 sm:$0xff]   ;;  %v1517_v14 = vld [vmem:[%s2259_s1 + $0x40] ss:$8 sps:$4 sm:$0xff]   ;;  %v1519_v16 = vld [vmem:[%s2259_s1 + $0x34] ss:$8 sps:$4 sm:$0xff]  }
   0x6   :  { %v1515_v13 = vld [vmem:[%s2259_s1 + $0x144] ss:$8 sps:$4 sm:$0xff]   ;;  %v1518_v15 = vld [vmem:[%s2259_s1 + $0x140] ss:$8 sps:$4 sm:$0xff]   ;;  %v1521_v17 = vld [vmem:[%s2259_s1 + $0x134] ss:$8 sps:$4 sm:$0xff]  }
   0x7   :  { %1006 = vmatpush1.bf16.msra.mxu0 %v1505_v6  ;;  %v1523_v18 = vld [vmem:[%s2259_s1 + $0x30] ss:$8 sps:$4 sm:$0xff]   ;;  %v1525_v20 = vld [vmem:[%s2259_s1 + $0x24] ss:$8 sps:$4 sm:$0xff]   ;;  %v1529_v22 = vld [vmem:[%s2259_s1 + $0x20] ss:$8 sps:$4 sm:$0xff]  }
   0x8   :  { %1059 = vmatpush1.bf16.msra.mxu1 %v1506_v7  ;;  %1007 = vmatprep.subr.bf16.mxu0 %v1507_v8  ;;  %v1524_v19 = vld [vmem:[%s2259_s1 + $0x130] ss:$8 sps:$4 sm:$0xff]   ;;  %v1527_v21 = vld [vmem:[%s2259_s1 + $0x124] ss:$8 sps:$4 sm:$0xff]   ;;  %v1530_v23 = vld [vmem:[%s2259_s1 + $0x120] ss:$8 sps:$4 sm:$0xff]  }
   0x9   :  { %1060 = vmatprep.subr.bf16.mxu1 %v1509_v9  ;;  %v1531_v24 = vld [vmem:[%s2259_s1 + $0x14] ss:$8 sps:$4 sm:$0xff]   ;;  %v1535_v26 = vld [vmem:[%s2259_s1 + $0x10] ss:$8 sps:$4 sm:$0xff]   ;;  %v1537_v28 = vld [vmem:[%s2259_s1 + $0x4] ss:$8 sps:$4 sm:$0xff]  }
   0xa   :  { %v1533_v25 = vld [vmem:[%s2259_s1 + $0x114] ss:$8 sps:$4 sm:$0xff]   ;;  %v1536_v27 = vld [vmem:[%s2259_s1 + $0x110] ss:$8 sps:$4 sm:$0xff]   ;;  %v1539_v29 = vld [vmem:[%s2259_s1 + $0x104] ss:$8 sps:$4 sm:$0xff]  }
   0xb   :  { %1008 = vmatpush1.bf16.msra.mxu0 %v1511_v10  ;;  %v1541_v30 = vld [vmem:[%s2259_s1] ss:$8 sps:$4 sm:$0xff]   ;;  %v1543_v32 = vld [vmem:[%s2259_s1 + $0xf4] ss:$8 sps:$4 sm:$0xff]   ;;  %v1547_v34 = vld [vmem:[%s2259_s1 + $0xf0] ss:$8 sps:$4 sm:$0xff]  }
   0xc   :  { %1061 = vmatpush1.bf16.msra.mxu1 %v1512_v11  ;;  %1009 = vmatprep.subr.bf16.mxu0 %v1513_v12  ;;  %v1542_v31 = vld [vmem:[%s2259_s1 + $0x100] ss:$8 sps:$4 sm:$0xff]   ;;  %v1545_v33 = vld [vmem:[%s2259_s1 + $0x1f4] ss:$8 sps:$4 sm:$0xff]   ;;  %v1548_v35 = vld [vmem:[%s2259_s1 + $0x1f0] ss:$8 sps:$4 sm:$0xff]  }
   0xd   :  { %1062 = vmatprep.subr.bf16.mxu1 %v1515_v13  ;;  %v1549_v36 = vld [vmem:[%s2259_s1 + $0xe4] ss:$8 sps:$4 sm:$0xff]   ;;  %v1553_v38 = vld [vmem:[%s2259_s1 + $0xe0] ss:$8 sps:$4 sm:$0xff]   ;;  %v1555_v40 = vld [vmem:[%s2259_s1 + $0xd4] ss:$8 sps:$4 sm:$0xff]  }
   0xe   :  { %v1551_v37 = vld [vmem:[%s2259_s1 + $0x1e4] ss:$8 sps:$4 sm:$0xff]   ;;  %v1554_v39 = vld [vmem:[%s2259_s1 + $0x1e0] ss:$8 sps:$4 sm:$0xff]   ;;  %v1557_v41 = vld [vmem:[%s2259_s1 + $0x1d4] ss:$8 sps:$4 sm:$0xff]  }
   0xf   :  { %1010 = vmatpush1.bf16.msra.mxu0 %v1517_v14  ;;  %v1559_v42 = vld [vmem:[%s2259_s1 + $0xd0] ss:$8 sps:$4 sm:$0xff]   ;;  %v1561_v44 = vld [vmem:[%s2259_s1 + $0xc4] ss:$8 sps:$4 sm:$0xff]   ;;  %v1565_v46 = vld [vmem:[%s2259_s1 + $0xc0] ss:$8 sps:$4 sm:$0xff]  }
  0x10   :  { %1063 = vmatpush1.bf16.msra.mxu1 %v1518_v15  ;;  %1011 = vmatprep.subr.bf16.mxu0 %v1519_v16  ;;  %v1560_v43 = vld [vmem:[%s2259_s1 + $0x1d0] ss:$8 sps:$4 sm:$0xff]   ;;  %v1563_v45 = vld [vmem:[%s2259_s1 + $0x1c4] ss:$8 sps:$4 sm:$0xff]   ;;  %v1566_v47 = vld [vmem:[%s2259_s1 + $0x1c0] ss:$8 sps:$4 sm:$0xff]  }
  0x11   :  { %1064 = vmatprep.subr.bf16.mxu1 %v1521_v17  ;;  %v1567_v48 = vld [vmem:[%s2259_s1 + $0xb4] ss:$8 sps:$4 sm:$0xff]   ;;  %v1593_v49 = vld [vmem:[%s2260_s0 + $0x4] ss:$36 sps:$4 sm:$0xff]   ;;  %v1596_v51 = vld [vmem:[%s2260_s0 + $0xc] ss:$36 sps:$4 sm:$0xff]  }
  0x12   :  { %v1569_v50 = vld [vmem:[%s2259_s1 + $0x1b4] ss:$8 sps:$4 sm:$0xff]   ;;  %1035 = vmatprep.mubr.bf16.mxu0 %v1593_v49  ;;  %v1571_v52 = vld [vmem:[%s2259_s1 + $0xb0] ss:$8 sps:$4 sm:$0xff]   ;;  %1088 = vmatprep.mubr.bf16.mxu1 %v1596_v51  ;;  %v1573_v54 = vld [vmem:[%s2259_s1 + $0xa4] ss:$8 sps:$4 sm:$0xff]  }
  0x13   :  { %1012 = vmatpush1.bf16.msra.mxu0 %v1523_v18  ;;  %v1572_v53 = vld [vmem:[%s2259_s1 + $0x1b0] ss:$8 sps:$4 sm:$0xff]   ;;  %v1575_v55 = vld [vmem:[%s2259_s1 + $0x1a4] ss:$8 sps:$4 sm:$0xff]   ;;  %v1577_v56 = vld [vmem:[%s2259_s1 + $0xa0] ss:$8 sps:$4 sm:$0xff]  }
  0x14   :  { %1065 = vmatpush1.bf16.msra.mxu1 %v1524_v19  ;;  %1013 = vmatprep.subr.bf16.mxu0 %v1525_v20  ;;  %v1578_v57 = vld [vmem:[%s2259_s1 + $0x1a0] ss:$8 sps:$4 sm:$0xff]   ;;  %v1579_v58 = vld [vmem:[%s2259_s1 + $0x94] ss:$8 sps:$4 sm:$0xff]   ;;  %v1583_v60 = vld [vmem:[%s2259_s1 + $0x90] ss:$8 sps:$4 sm:$0xff]  }
  0x15   :  { %1066 = vmatprep.subr.bf16.mxu1 %v1527_v21  ;;  %v1581_v59 = vld [vmem:[%s2259_s1 + $0x194] ss:$8 sps:$4 sm:$0xff]   ;;  %v1584_v61 = vld [vmem:[%s2259_s1 + $0x190] ss:$8 sps:$4 sm:$0xff]   ;;  %v1585_v62 = vld [vmem:[%s2259_s1 + $0x84] ss:$8 sps:$4 sm:$0xff]  }
  0x16   :  { %v1587_v63 = vld [vmem:[%s2259_s1 + $0x184] ss:$8 sps:$4 sm:$0xff]   ;;  %v1589_v0 = vld [vmem:[%s2259_s1 + $0x80] ss:$8 sps:$4 sm:$0xff]   ;;  %v1599_v2 = vld [vmem:[%s2259_s1 + $0x274] ss:$8 sps:$4 sm:$0xff]  }
  0x17   :  { %1014 = vmatpush1.bf16.msra.mxu0 %v1529_v22  ;;  %v1590_v1 = vld [vmem:[%s2259_s1 + $0x180] ss:$8 sps:$4 sm:$0xff]   ;;  %v1602_v3 = vld [vmem:[%s2259_s1 + $0x374] ss:$8 sps:$4 sm:$0xff]   ;;  %v1597_v6 = vld [vmem:[%s2259_s1 + $0x270] ss:$8 sps:$4 sm:$0xff]  }
  0x18   :  { %1067 = vmatpush1.bf16.msra.mxu1 %v1530_v23  ;;  %1015 = vmatprep.subr.bf16.mxu0 %v1531_v24  ;;  %v1591_v4 = vld [vmem:[%s2260_s0] ss:$36 sps:$4 sm:$0xff]   ;;  %v1594_v5 = vld [vmem:[%s2260_s0 + $0x8] ss:$36 sps:$4 sm:$0xff]   ;;  %v1600_v7 = vld [vmem:[%s2259_s1 + $0x370] ss:$8 sps:$4 sm:$0xff]  }
  0x19   :  { %1068 = vmatprep.subr.bf16.mxu1 %v1533_v25  ;;  %v1605_v8 = vld [vmem:[%s2259_s1 + $0x264] ss:$8 sps:$4 sm:$0xff]   ;;  %v1603_v10 = vld [vmem:[%s2259_s1 + $0x260] ss:$8 sps:$4 sm:$0xff]   ;;  %v1611_v12 = vld [vmem:[%s2259_s1 + $0x254] ss:$8 sps:$4 sm:$0xff]  }
  0x1a   :  { %v1608_v9 = vld [vmem:[%s2259_s1 + $0x364] ss:$8 sps:$4 sm:$0xff]   ;;  %v1606_v11 = vld [vmem:[%s2259_s1 + $0x360] ss:$8 sps:$4 sm:$0xff]   ;;  %v1614_v13 = vld [vmem:[%s2259_s1 + $0x354] ss:$8 sps:$4 sm:$0xff]  }
  0x1b   :  { %1016 = vmatpush1.bf16.msra.mxu0 %v1535_v26  ;;  %v1609_v14 = vld [vmem:[%s2259_s1 + $0x250] ss:$8 sps:$4 sm:$0xff]   ;;  %v1617_v16 = vld [vmem:[%s2259_s1 + $0x244] ss:$8 sps:$4 sm:$0xff]   ;;  %v1615_v18 = vld [vmem:[%s2259_s1 + $0x240] ss:$8 sps:$4 sm:$0xff]  }
  0x1c   :  { %1069 = vmatpush1.bf16.msra.mxu1 %v1536_v27  ;;  %1017 = vmatprep.subr.bf16.mxu0 %v1537_v28  ;;  %v1612_v15 = vld [vmem:[%s2259_s1 + $0x350] ss:$8 sps:$4 sm:$0xff]   ;;  %v1620_v17 = vld [vmem:[%s2259_s1 + $0x344] ss:$8 sps:$4 sm:$0xff]   ;;  %v1618_v19 = vld [vmem:[%s2259_s1 + $0x340] ss:$8 sps:$4 sm:$0xff]  }
  0x1d   :  { %1070 = vmatprep.subr.bf16.mxu1 %v1539_v29  ;;  %v1623_v20 = vld [vmem:[%s2259_s1 + $0x234] ss:$8 sps:$4 sm:$0xff]   ;;  %v1669_v22 = vld [vmem:[%s2260_s0 + $0x4c] ss:$36 sps:$4 sm:$0xff]   ;;  %v1627_v28 = vld [vmem:[%s2259_s1 + $0x220] ss:$8 sps:$4 sm:$0xff]  }
  0x1e   :  { %v1626_v21 = vld [vmem:[%s2259_s1 + $0x334] ss:$8 sps:$4 sm:$0xff]   ;;  %v1621_v23 = vld [vmem:[%s2259_s1 + $0x230] ss:$8 sps:$4 sm:$0xff]   ;;  %v1629_v25 = vld [vmem:[%s2259_s1 + $0x224] ss:$8 sps:$4 sm:$0xff]  }
  0x1f   :  { %1018 = vmatpush1.bf16.msra.mxu0 %v1541_v30  ;;  %v1624_v24 = vld [vmem:[%s2259_s1 + $0x330] ss:$8 sps:$4 sm:$0xff]   ;;  %v1632_v26 = vld [vmem:[%s2259_s1 + $0x324] ss:$8 sps:$4 sm:$0xff]   ;;  %v1630_v30 = vld [vmem:[%s2259_s1 + $0x320] ss:$8 sps:$4 sm:$0xff]  }
  0x20   :  { %1071 = vmatpush1.bf16.msra.mxu1 %v1542_v31  ;;  %1019 = vmatprep.subr.bf16.mxu0 %v1543_v32  ;;  %v1677_v27 = vld [vmem:[%s2260_s0 + $0x48] ss:$36 sps:$4 sm:$0xff]   ;;  %v1678_v29 = vld [vmem:[%s2260_s0 + $0x54] ss:$36 sps:$4 sm:$0xff]  }
  0x21   :  { %1072 = vmatprep.subr.bf16.mxu1 %v1545_v33  ;;  %v1680_v31 = vld [vmem:[%s2260_s0 + $0x50] ss:$36 sps:$4 sm:$0xff]   ;;  %v1654_v49 = vld [vmem:[%s2259_s1 + $0x3e0] ss:$8 sps:$4 sm:$0xff]  }
  0x22   :  { %v1635_v32 = vld [vmem:[%s2259_s1 + $0x214] ss:$8 sps:$4 sm:$0xff]  }
  0x23   :  { %1020 = vmatpush2.bf16.msra.mxu0 %v1547_v34  ;;  %v1638_v33 = vld [vmem:[%s2259_s1 + $0x314] ss:$8 sps:$4 sm:$0xff]   ;;  %v1633_v34 = vld [vmem:[%s2259_s1 + $0x210] ss:$8 sps:$4 sm:$0xff]  }
  0x24   :  { %1073 = vmatpush2.bf16.msra.mxu1 %v1548_v35  ;;  %1021 = vmatprep.subr.bf16.mxu0 %v1549_v36  ;;  %v1636_v35 = vld [vmem:[%s2259_s1 + $0x310] ss:$8 sps:$4 sm:$0xff]   ;;  %v1641_v36 = vld [vmem:[%s2259_s1 + $0x204] ss:$8 sps:$4 sm:$0xff]   ;;  %v1662_v51 = vld [vmem:[%s2259_s1 + $0x3d4] ss:$8 sps:$4 sm:$0xff]  }
  0x25   :  { %1074 = vmatprep.subr.bf16.mxu1 %v1551_v37  ;;  %v1644_v37 = vld [vmem:[%s2259_s1 + $0x304] ss:$8 sps:$4 sm:$0xff]  }
  0x27   :  { %1022 = vmatpush2.bf16.msra.mxu0 %v1553_v38  ;;  %v1639_v38 = vld [vmem:[%s2259_s1 + $0x200] ss:$8 sps:$4 sm:$0xff]  }
  0x28   :  { %1075 = vmatpush2.bf16.msra.mxu1 %v1554_v39  ;;  %1023 = vmatprep.subr.bf16.mxu0 %v1555_v40  ;;  %v1642_v39 = vld [vmem:[%s2259_s1 + $0x300] ss:$8 sps:$4 sm:$0xff]   ;;  %v1647_v40 = vld [vmem:[%s2259_s1 + $0x2f4] ss:$8 sps:$4 sm:$0xff]  }
  0x29   :  { %1076 = vmatprep.subr.bf16.mxu1 %v1557_v41  ;;  %v1701_v41 = vld [vmem:[%s2260_s0 + $0x14] ss:$36 sps:$4 sm:$0xff]  }
  0x2b   :  { %1024 = vmatpush2.bf16.msra.mxu0 %v1559_v42  ;;  %v1650_v42 = vld [vmem:[%s2259_s1 + $0x3f4] ss:$8 sps:$4 sm:$0xff]  }
  0x2c   :  { %1077 = vmatpush2.bf16.msra.mxu1 %v1560_v43  ;;  %1025 = vmatprep.subr.bf16.mxu0 %v1561_v44  ;;  %v1704_v43 = vld [vmem:[%s2260_s0 + $0x1c] ss:$36 sps:$4 sm:$0xff]   ;;  %v1645_v44 = vld [vmem:[%s2259_s1 + $0x2f0] ss:$8 sps:$4 sm:$0xff]  }
  0x2d   :  { %1078 = vmatprep.subr.bf16.mxu1 %v1563_v45  ;;  %v1648_v45 = vld [vmem:[%s2259_s1 + $0x3f0] ss:$8 sps:$4 sm:$0xff]  }
  0x2f   :  { %1026 = vmatpush2.bf16.msra.mxu0 %v1565_v46  ;;  %v1653_v46 = vld [vmem:[%s2259_s1 + $0x2e4] ss:$8 sps:$4 sm:$0xff]  }
  0x30   :  { %1079 = vmatpush2.bf16.msra.mxu1 %v1566_v47  ;;  %1027 = vmatprep.subr.bf16.mxu0 %v1567_v48  ;;  %v1656_v47 = vld [vmem:[%s2259_s1 + $0x3e4] ss:$8 sps:$4 sm:$0xff]   ;;  %v1651_v48 = vld [vmem:[%s2259_s1 + $0x2e0] ss:$8 sps:$4 sm:$0xff]  }
  0x31   :  { %1080 = vmatprep.subr.bf16.mxu1 %v1569_v50  ;;  %v1659_v50 = vld [vmem:[%s2259_s1 + $0x2d4] ss:$8 sps:$4 sm:$0xff]  }
  0x33   :  { %1028 = vmatpush2.bf16.msra.mxu0 %v1571_v52  ;;  %v1657_v52 = vld [vmem:[%s2259_s1 + $0x2d0] ss:$8 sps:$4 sm:$0xff]  }
  0x34   :  { %1081 = vmatpush2.bf16.msra.mxu1 %v1572_v53  ;;  %1029 = vmatprep.subr.bf16.mxu0 %v1573_v54  ;;  %v1660_v53 = vld [vmem:[%s2259_s1 + $0x3d0] ss:$8 sps:$4 sm:$0xff]   ;;  %v1665_v54 = vld [vmem:[%s2259_s1 + $0x2c4] ss:$8 sps:$4 sm:$0xff]  }
  0x35   :  { %1082 = vmatprep.subr.bf16.mxu1 %v1575_v55  ;;  %v1668_v55 = vld [vmem:[%s2259_s1 + $0x3c4] ss:$8 sps:$4 sm:$0xff]  }
  0x37   :  { %1030 = vmatpush2.bf16.msra.mxu0 %v1577_v56  ;;  %v1663_v56 = vld [vmem:[%s2259_s1 + $0x2c0] ss:$8 sps:$4 sm:$0xff]  }
  0x38   :  { %1083 = vmatpush2.bf16.msra.mxu1 %v1578_v57  ;;  %1031 = vmatprep.subr.bf16.mxu0 %v1579_v58  ;;  %v1666_v57 = vld [vmem:[%s2259_s1 + $0x3c0] ss:$8 sps:$4 sm:$0xff]   ;;  %v1673_v58 = vld [vmem:[%s2259_s1 + $0x2b4] ss:$8 sps:$4 sm:$0xff]  }
  0x39   :  { %1084 = vmatprep.subr.bf16.mxu1 %v1581_v59  ;;  %v1676_v59 = vld [vmem:[%s2259_s1 + $0x3b4] ss:$8 sps:$4 sm:$0xff]  }
  0x3b   :  { %1032 = vmatpush2.bf16.msra.mxu0 %v1583_v60  ;;  %v1671_v60 = vld [vmem:[%s2259_s1 + $0x2b0] ss:$8 sps:$4 sm:$0xff]  }
  0x3c   :  { %1085 = vmatpush2.bf16.msra.mxu1 %v1584_v61  ;;  %1033 = vmatprep.subr.bf16.mxu0 %v1585_v62  ;;  %v1674_v61 = vld [vmem:[%s2259_s1 + $0x3b0] ss:$8 sps:$4 sm:$0xff]   ;;  %v1683_v62 = vld [vmem:[%s2259_s1 + $0x2a4] ss:$8 sps:$4 sm:$0xff]  }
  0x3d   :  { %1086 = vmatprep.subr.bf16.mxu1 %v1587_v63  ;;  %v1686_v63 = vld [vmem:[%s2259_s1 + $0x3a4] ss:$8 sps:$4 sm:$0xff]  }
  0x3f   :  { %1034 = vmatpush2.bf16.msra.mxu0 %v1589_v0  ;;  %v1681_v0 = vld [vmem:[%s2259_s1 + $0x2a0] ss:$8 sps:$4 sm:$0xff]  }
  0x40   :  { %1087 = vmatpush2.bf16.msra.mxu1 %v1590_v1  ;;  %1109 = vmatprep.subr.bf16.mxu0 %v1599_v2  ;;  %v1684_v1 = vld [vmem:[%s2259_s1 + $0x3a0] ss:$8 sps:$4 sm:$0xff]   ;;  %v1689_v2 = vld [vmem:[%s2259_s1 + $0x294] ss:$8 sps:$4 sm:$0xff]  }
  0x41   :  { %1162 = vmatprep.subr.bf16.mxu1 %v1602_v3  ;;  %v1692_v3 = vld [vmem:[%s2259_s1 + $0x394] ss:$8 sps:$4 sm:$0xff]  }
  0x42   :  { %1036 = vmatmul.mubr.bf16.vlgmr.msra.gmra.mxu0 %v1591_v4  ;;  %v1687_v4 = vld [vmem:[%s2259_s1 + $0x290] ss:$8 sps:$4 sm:$0xff]  }
  0x43   :  { %1089 = vmatmul.mubr.bf16.vlgmr.msra.gmra.mxu1 %v1594_v5  ;;  %1110 = vmatpush1.bf16.msra.mxu0 %v1597_v6  ;;  %v1690_v5 = vld [vmem:[%s2259_s1 + $0x390] ss:$8 sps:$4 sm:$0xff]   ;;  %v1695_v6 = vld [vmem:[%s2259_s1 + $0x284] ss:$8 sps:$4 sm:$0xff]  }
  0x44   :  { %1163 = vmatpush1.bf16.msra.mxu1 %v1600_v7  ;;  %1111 = vmatprep.subr.bf16.mxu0 %v1605_v8  ;;  %v1698_v7 = vld [vmem:[%s2259_s1 + $0x384] ss:$8 sps:$4 sm:$0xff]   ;;  %v1693_v8 = vld [vmem:[%s2259_s1 + $0x280] ss:$8 sps:$4 sm:$0xff]  }
  0x45   :  { %1164 = vmatprep.subr.bf16.mxu1 %v1608_v9  ;;  %1045 = vmatprep.mubr.bf16.mxu0 %v1669_v22  ;;  %v1696_v9 = vld [vmem:[%s2259_s1 + $0x380] ss:$8 sps:$4 sm:$0xff]   ;;  %v1722_v22 = vld [vmem:[%s2259_s1 + $0x444] ss:$8 sps:$4 sm:$0xff]  }
  0x46   :  { %1098 = vmatprep.mubr.bf16.mxu1 %v1678_v29  ;;  %v1731_v29 = vld [vmem:[%s2259_s1 + $0x414] ss:$8 sps:$4 sm:$0xff]  }
  0x47   :  { %1112 = vmatpush1.bf16.msra.mxu0 %v1603_v10  ;;  %v1707_v10 = vld [vmem:[%s2259_s1 + $0x474] ss:$8 sps:$4 sm:$0xff]  }
  0x48   :  { %1165 = vmatpush1.bf16.msra.mxu1 %v1606_v11  ;;  %1113 = vmatprep.subr.bf16.mxu0 %v1611_v12  ;;  %v1699_v11 = vld [vmem:[%s2260_s0 + $0x10] ss:$36 sps:$4 sm:$0xff]   ;;  %v1702_v12 = vld [vmem:[%s2260_s0 + $0x18] ss:$36 sps:$4 sm:$0xff]  }
  0x49   :  { %1166 = vmatprep.subr.bf16.mxu1 %v1614_v13  ;;  %v1705_v13 = vld [vmem:[%s2259_s1 + $0x470] ss:$8 sps:$4 sm:$0xff]  }
  0x4a   :  { %1046 = vmatmul.mubr.bf16.gmra.mxu0 %v1677_v27  ;;  %v1728_v27 = vld [vmem:[%s2259_s1 + $0x424] ss:$8 sps:$4 sm:$0xff]  }
  0x4b   :  { %1114 = vmatpush1.bf16.msra.mxu0 %v1609_v14  ;;  %1099 = vmatmul.mubr.bf16.gmra.mxu1 %v1680_v31  ;;  %v1710_v14 = vld [vmem:[%s2259_s1 + $0x464] ss:$8 sps:$4 sm:$0xff]  }
  0x4c   :  { %1167 = vmatpush1.bf16.msra.mxu1 %v1612_v15  ;;  %1115 = vmatprep.subr.bf16.mxu0 %v1617_v16  ;;  %v1711_v15 = vld [vmem:[%s2260_s0 + $0x5c] ss:$36 sps:$4 sm:$0xff]   ;;  %v1717_v16 = vld [vmem:[%s2260_s0 + $0x64] ss:$36 sps:$4 sm:$0xff]  }
  0x4d   :  { %1168 = vmatprep.subr.bf16.mxu1 %v1620_v17  ;;  %1141 = vmatprep.mubr.bf16.mxu0 %v1701_v41  ;;  %v1708_v17 = vld [vmem:[%s2259_s1 + $0x460] ss:$8 sps:$4 sm:$0xff]   ;;  %v1734_v31 = vld [vmem:[%s2259_s1 + $0x404] ss:$8 sps:$4 sm:$0xff]  }
  0x4e   :  { %1194 = vmatprep.mubr.bf16.mxu1 %v1704_v43 }
  0x4f   :  { %1116 = vmatpush1.bf16.msra.mxu0 %v1615_v18  ;;  %v1716_v18 = vld [vmem:[%s2259_s1 + $0x454] ss:$8 sps:$4 sm:$0xff]  }
  0x50   :  { %1169 = vmatpush1.bf16.msra.mxu1 %v1618_v19  ;;  %1117 = vmatprep.subr.bf16.mxu0 %v1623_v20  ;;  %v1713_v19 = vld [vmem:[%s2260_s0 + $0x58] ss:$36 sps:$4 sm:$0xff]   ;;  %v1719_v20 = vld [vmem:[%s2260_s0 + $0x60] ss:$36 sps:$4 sm:$0xff]  }
  0x51   :  { %1170 = vmatprep.subr.bf16.mxu1 %v1626_v21  ;;  %v1714_v21 = vld [vmem:[%s2259_s1 + $0x450] ss:$8 sps:$4 sm:$0xff]  }
  0x53   :  { %1118 = vmatpush1.bf16.msra.mxu0 %v1621_v23  ;;  %v1720_v23 = vld [vmem:[%s2259_s1 + $0x440] ss:$8 sps:$4 sm:$0xff]  }
  0x54   :  { %1171 = vmatpush1.bf16.msra.mxu1 %v1624_v24  ;;  %1119 = vmatprep.subr.bf16.mxu0 %v1629_v25  ;;  %v1725_v24 = vld [vmem:[%s2259_s1 + $0x434] ss:$8 sps:$4 sm:$0xff]   ;;  %v1737_v25 = vmov 0  }
  0x55   :  { %1172 = vmatprep.subr.bf16.mxu1 %v1632_v26  ;;  %v1723_v26 = vld [vmem:[%s2259_s1 + $0x430] ss:$8 sps:$4 sm:$0xff]  }
  0x57   :  { %1120 = vmatpush1.bf16.msra.mxu0 %v1627_v28  ;;  %v1726_v28 = vld [vmem:[%s2259_s1 + $0x420] ss:$8 sps:$4 sm:$0xff]  }
  0x58   :  { %1173 = vmatpush1.bf16.msra.mxu1 %v1630_v30  ;;  %1121 = vmatprep.subr.bf16.mxu0 %v1635_v32  ;;  %v1729_v30 = vld [vmem:[%s2259_s1 + $0x410] ss:$8 sps:$4 sm:$0xff]   ;;  %v1732_v32 = vld [vmem:[%s2259_s1 + $0x400] ss:$8 sps:$4 sm:$0xff]  }
  0x59   :  { %1174 = vmatprep.subr.bf16.mxu1 %v1638_v33  ;;  %v1735_v33 = vld [vmem:[%s2260_s0 + $0x20] ss:$36 sps:$4 sm:$0xff]  }
  0x5b   :  { %1122 = vmatpush1.bf16.msra.mxu0 %v1633_v34  ;;  %v1736_v34 = vld [vmem:[%s2260_s0 + $0x68] ss:$36 sps:$4 sm:$0xff]  }
  0x5c   :  { %1175 = vmatpush1.bf16.msra.mxu1 %v1636_v35  ;;  %1123 = vmatprep.subr.bf16.mxu0 %v1641_v36 }
  0x5d   :  { %1176 = vmatprep.subr.bf16.mxu1 %v1644_v37 }
  0x5f   :  { %1124 = vmatpush1.bf16.msra.mxu0 %v1639_v38 }
  0x60   :  { %1177 = vmatpush1.bf16.msra.mxu1 %v1642_v39  ;;  %1125 = vmatprep.subr.bf16.mxu0 %v1647_v40 }
  0x61   :  { %1178 = vmatprep.subr.bf16.mxu1 %v1650_v42 }
  0x63   :  { %1126 = vmatpush2.bf16.msra.mxu0 %v1645_v44 }
  0x64   :  { %1179 = vmatpush2.bf16.msra.mxu1 %v1648_v45  ;;  %1127 = vmatprep.subr.bf16.mxu0 %v1653_v46 }
  0x65   :  { %1180 = vmatprep.subr.bf16.mxu1 %v1656_v47 }
  0x67   :  { %1128 = vmatpush2.bf16.msra.mxu0 %v1651_v48 }
  0x68   :  { %1181 = vmatpush2.bf16.msra.mxu1 %v1654_v49  ;;  %1129 = vmatprep.subr.bf16.mxu0 %v1659_v50 }
  0x69   :  { %1182 = vmatprep.subr.bf16.mxu1 %v1662_v51 }
  0x6b   :  { %1130 = vmatpush2.bf16.msra.mxu0 %v1657_v52 }
  0x6c   :  { %1183 = vmatpush2.bf16.msra.mxu1 %v1660_v53  ;;  %1131 = vmatprep.subr.bf16.mxu0 %v1665_v54  ;;  %v181_v53 = vlaneseq }
  0x6d   :  { %1184 = vmatprep.subr.bf16.mxu1 %v1668_v55 }
  0x6f   :  { %1132 = vmatpush2.bf16.msra.mxu0 %v1663_v56  ;;  %v182_v56 = vshrl.u32 %v181_v53, 7 }
  0x70   :  { %1185 = vmatpush2.bf16.msra.mxu1 %v1666_v57  ;;  %1133 = vmatprep.subr.bf16.mxu0 %v1673_v58 }
  0x71   :  { %1186 = vmatprep.subr.bf16.mxu1 %v1676_v59  ;;  %v183_v59 = vsub.s32 0, %v182_v56 }
  0x73   :  { %1134 = vmatpush2.bf16.msra.mxu0 %v1671_v60  ;;  %v179_v60 = vld [vmem:[%s2261_s2] sm:$0x3] }
  0x74   :  { %1187 = vmatpush2.bf16.msra.mxu1 %v1674_v61  ;;  %1135 = vmatprep.subr.bf16.mxu0 %v1683_v62  ;;  %v187_v62 = vsub.s32 1, %v182_v56 }
  0x75   :  { %1188 = vmatprep.subr.bf16.mxu1 %v1686_v63 }
  0x77   :  { %1136 = vmatpush2.bf16.msra.mxu0 %v1681_v0  ;;  %v184_v0 = vrot.slane %v179_v60, %v183_v59 }
  0x78   :  { %1189 = vmatpush2.bf16.msra.mxu1 %v1684_v1  ;;  %1137 = vmatprep.subr.bf16.mxu0 %v1689_v2 }
  0x79   :  { %1190 = vmatprep.subr.bf16.mxu1 %v1692_v3  ;;  %v188_v3 = vrot.slane %v179_v60, %v187_v62 }
  0x7b   :  { %1138 = vmatpush2.bf16.msra.mxu0 %v1687_v4 }
  0x7c   :  { %1191 = vmatpush2.bf16.msra.mxu1 %v1690_v5  ;;  %1139 = vmatprep.subr.bf16.mxu0 %v1695_v6 }
  0x7d   :  { %1192 = vmatprep.subr.bf16.mxu1 %v1698_v7 }
  0x7f   :  { %1140 = vmatpush2.bf16.msra.mxu0 %v1693_v8 }
  0x80   :  { %1193 = vmatpush2.bf16.msra.mxu1 %v1696_v9  ;;  %1215 = vmatprep.subr.bf16.mxu0 %v1707_v10 }
  0x81   :  { %1478 = vmatprep.subr.bf16.mxu1 %v1707_v10 }
  0x82   :  { %1142 = vmatmul.mubr.bf16.vlgmr.msra.gmra.mxu0 %v1699_v11 }
  0x83   :  { %1195 = vmatmul.mubr.bf16.vlgmr.msra.gmra.mxu1 %v1702_v12  ;;  %1216 = vmatpush1.bf16.msra.mxu0 %v1705_v13 }
  0x84   :  { %1486 = vmatpush1.bf16.msra.mxu1 %v1705_v13  ;;  %1217 = vmatprep.subr.bf16.mxu0 %v1710_v14 }
  0x85   :  { %1479 = vmatprep.subr.bf16.mxu1 %v1710_v14  ;;  %1151 = vmatprep.mubr.bf16.mxu0 %v1711_v15 }
  0x86   :  { %1204 = vmatprep.mubr.bf16.mxu1 %v1717_v16 }
  0x87   :  { %1218 = vmatpush1.bf16.msra.mxu0 %v1708_v17 }
  0x88   :  { %1487 = vmatpush1.bf16.msra.mxu1 %v1708_v17  ;;  %1219 = vmatprep.subr.bf16.mxu0 %v1716_v18 }
  0x89   :  { %1480 = vmatprep.subr.bf16.mxu1 %v1716_v18 }
  0x8a   :  { %1152 = vmatmul.mubr.bf16.gmra.mxu0 %v1713_v19 }
  0x8b   :  { %1205 = vmatmul.mubr.bf16.gmra.mxu1 %v1719_v20  ;;  %1220 = vmatpush1.bf16.msra.mxu0 %v1714_v21 }
  0x8c   :  { %1488 = vmatpush1.bf16.msra.mxu1 %v1714_v21  ;;  %1221 = vmatprep.subr.bf16.mxu0 %v1722_v22 }
  0x8d   :  { %1481 = vmatprep.subr.bf16.mxu1 %v1722_v22  ;;  %1247 = vmatprep.mubr.bf16.mxu0 %v1737_v25 }
  0x8e   :  { %1257 = vmatprep.mubr.bf16.mxu1 %v1737_v25 }
  0x8f   :  { %1222 = vmatpush1.bf16.msra.mxu0 %v1720_v23 }
  0x90   :  { %1489 = vmatpush1.bf16.msra.mxu1 %v1720_v23  ;;  %1223 = vmatprep.subr.bf16.mxu0 %v1725_v24 }
  0x91   :  { %1482 = vmatprep.subr.bf16.mxu1 %v1725_v24 }
  0x93   :  { %1224 = vmatpush1.bf16.msra.mxu0 %v1723_v26 }
  0x94   :  { %1490 = vmatpush1.bf16.msra.mxu1 %v1723_v26  ;;  %1225 = vmatprep.subr.bf16.mxu0 %v1728_v27 }
  0x95   :  { %1483 = vmatprep.subr.bf16.mxu1 %v1728_v27 }
  0x97   :  { %1226 = vmatpush1.bf16.msra.mxu0 %v1726_v28 }
  0x98   :  { %1491 = vmatpush1.bf16.msra.mxu1 %v1726_v28  ;;  %1227 = vmatprep.subr.bf16.mxu0 %v1731_v29 }
  0x99   :  { %1484 = vmatprep.subr.bf16.mxu1 %v1731_v29 }
  0x9b   :  { %1228 = vmatpush1.bf16.msra.mxu0 %v1729_v30 }
  0x9c   :  { %1492 = vmatpush1.bf16.msra.mxu1 %v1729_v30  ;;  %1229 = vmatprep.subr.bf16.mxu0 %v1734_v31 }
  0x9d   :  { %1485 = vmatprep.subr.bf16.mxu1 %v1734_v31 }
  0x9f   :  { %1230 = vmatpush1.bf16.msra.mxu0 %v1732_v32 }
  0xa0   :  { %1493 = vmatpush1.bf16.msra.mxu1 %v1732_v32 }
  0xa2   :  { %1248 = vmatmul.mubr.bf16.vlgmr.msra.gmra.mxu0 %v1735_v33 }
  0xa3   :  { %1258 = vmatmul.mubr.bf16.vlgmr.msra.gmra.mxu1 %v1736_v34 }
 0x102   :  { %v1037_v35 = vpop.f32.mrf.mxu0 }
 0x103   :  { %v1090_v36 = vpop.f32.mrf.mxu1  ;;  %v1038_v4 = vadd.f32 %v1037_v35, %v184_v0 }
 0x104   :  { %v1039_v37 = vpop.f32.mrf.mxu0 }
 0x105   :  { %v1092_v38 = vpop.f32.mrf.mxu1  ;;  %v1040_v8 = vadd.f32 %v1039_v37, %v188_v3  ;;  %v1091_v10 = vadd.f32 %v1090_v36, %v1038_v4 }
 0x106   :  { %v1041_v39 = vpop.f32.mrf.mxu0 }
 0x107   :  { %v1094_v40 = vpop.f32.mrf.mxu1  ;;  %v1042_v12 = vadd.f32 %v1041_v39, %v184_v0  ;;  %v1093_v16 = vadd.f32 %v1092_v38, %v1040_v8 }
 0x108   :  { %v1043_v41 = vpop.f32.mrf.mxu0 }
 0x109   :  { %v1096_v42 = vpop.f32.mrf.mxu1  ;;  %v1044_v20 = vadd.f32 %v1043_v41, %v188_v3  ;;  %v1095_v24 = vadd.f32 %v1094_v40, %v1042_v12 }
 0x10a   :  { %v1047_v43 = vpop.f32.mrf.mxu0 }
 0x10b   :  { %v1100_v44 = vpop.f32.mrf.mxu1  ;;  %v1048_v5 = vadd.f32 %v1047_v43, %v184_v0  ;;  %v1097_v30 = vadd.f32 %v1096_v42, %v1044_v20 }
 0x10c   :  { %v1049_v45 = vpop.f32.mrf.mxu0 }
 0x10d   :  { %v1102_v46 = vpop.f32.mrf.mxu1  ;;  %v1050_v9 = vadd.f32 %v1049_v45, %v188_v3  ;;  %v1101_v11 = vadd.f32 %v1100_v44, %v1048_v5 }
 0x10e   :  { %v1051_v47 = vpop.f32.mrf.mxu0 }
 0x10f   :  { %v1104_v48 = vpop.f32.mrf.mxu1  ;;  %v1052_v13 = vadd.f32 %v1051_v47, %v184_v0  ;;  %v1103_v17 = vadd.f32 %v1102_v46, %v1050_v9 }
 0x110   :  { %v1053_v49 = vpop.f32.mrf.mxu0 }
 0x111   :  { %v1106_v50 = vpop.f32.mrf.mxu1  ;;  %v1054_v21 = vadd.f32 %v1053_v49, %v188_v3  ;;  %v1105_v25 = vadd.f32 %v1104_v48, %v1052_v13 }
 0x113   :  { %v1107_v31 = vadd.f32 %v1106_v50, %v1054_v21 }
 0x142   :  { %v1143_v51 = vpop.f32.mrf.mxu0 }
 0x143   :  { %v1196_v52 = vpop.f32.mrf.mxu1  ;;  %v1144_v18 = vadd.f32 %v1143_v51, %v1091_v10 }
 0x144   :  { %v1145_v54 = vpop.f32.mrf.mxu0 }
 0x145   :  { %v1198_v55 = vpop.f32.mrf.mxu1  ;;  %v1146_v22 = vadd.f32 %v1145_v54, %v1093_v16  ;;  %v1197_v28 = vadd.f32 %v1196_v52, %v1144_v18 }
 0x146   :  { %v1147_v57 = vpop.f32.mrf.mxu0 }
 0x147   :  { %v1200_v58 = vpop.f32.mrf.mxu1  ;;  %v1148_v32 = vadd.f32 %v1147_v57, %v1095_v24  ;;  %v1199_v36 = vadd.f32 %v1198_v55, %v1146_v22 }
 0x148   :  { %v1149_v61 = vpop.f32.mrf.mxu0 }
 0x149   :  { %v1202_v63 = vpop.f32.mrf.mxu1  ;;  %v1150_v41 = vadd.f32 %v1149_v61, %v1097_v30  ;;  %v1201_v47 = vadd.f32 %v1200_v58, %v1148_v32 }
 0x14a   :  { %v1153_v1 = vpop.f32.mrf.mxu0 }
 0x14b   :  { %v1206_v2 = vpop.f32.mrf.mxu1  ;;  %v1154_v19 = vadd.f32 %v1153_v1, %v1101_v11  ;;  %v1203_v54 = vadd.f32 %v1202_v63, %v1150_v41 }
 0x14c   :  { %v1155_v6 = vpop.f32.mrf.mxu0 }
 0x14d   :  { %v1208_v7 = vpop.f32.mrf.mxu1  ;;  %v1156_v23 = vadd.f32 %v1155_v6, %v1103_v17  ;;  %v1207_v29 = vadd.f32 %v1206_v2, %v1154_v19 }
 0x14e   :  { %v1157_v14 = vpop.f32.mrf.mxu0 }
 0x14f   :  { %v1210_v15 = vpop.f32.mrf.mxu1  ;;  %v1158_v33 = vadd.f32 %v1157_v14, %v1105_v25  ;;  %v1209_v37 = vadd.f32 %v1208_v7, %v1156_v23 }
 0x150   :  { %v1159_v26 = vpop.f32.mrf.mxu0 }
 0x151   :  { %v1212_v27 = vpop.f32.mrf.mxu1  ;;  %v1160_v43 = vadd.f32 %v1159_v26, %v1107_v31  ;;  %v1211_v48 = vadd.f32 %v1210_v15, %v1158_v33 }
 0x153   :  { %v1213_v56 = vadd.f32 %v1212_v27, %v1160_v43 }
 0x162   :  { %v1249_v34 = vpop.f32.mrf.mxu0 }
 0x163   :  { %v1259_v35 = vpop.f32.mrf.mxu1  ;;  %v1250_v38 = vadd.f32 %v1249_v34, %v1197_v28 }
 0x164   :  { %v1260_v39 = vadd.f32 %v1259_v35, %v1207_v29  ;;  %v1251_v44 = vpop.f32.mrf.mxu0 }
 0x165   :  { %v1261_v45 = vpop.f32.mrf.mxu1  ;;  %v1252_v40 = vadd.f32 %v1251_v44, %v1199_v36  ;;  %v1268_v42 = vmax.f32 %v1250_v38, 0.0 }
 0x166   :  { %v1262_v46 = vadd.f32 %v1261_v45, %v1209_v37  ;;  %v1253_v49 = vpop.f32.mrf.mxu0  ;;  %v1272_v50 = vmax.f32 %v1260_v39, 0.0 }
 0x167   :  { %v1263_v51 = vpop.f32.mrf.mxu1  ;;  %v1269_v52 = vmax.f32 %v1252_v40, 0.0  ;;  %v1254_v55 = vadd.f32 %v1253_v49, %v1201_v47 }
 0x168   :  { %v1273_v53 = vmax.f32 %v1262_v46, 0.0  ;;  %v1264_v57 = vadd.f32 %v1263_v51, %v1211_v48  ;;  %v1255_v59 = vpop.f32.mrf.mxu0 }
 0x169   :  { %v1265_v60 = vpop.f32.mrf.mxu1  ;;  %v1474_v61 = vpack.c.bf16 %v1269_v52, %v1268_v42  ;;  %v1256_v0 = vadd.f32 %v1255_v59, %v1203_v54  ;;  %v1270_v58 = vmax.f32 %v1254_v55, 0.0 }
 0x16a   :  { %v1476_v62 = vpack.c.bf16 %v1273_v53, %v1272_v50  ;;  %v1266_v1 = vadd.f32 %v1265_v60, %v1213_v56  ;;  %v1274_v2 = vmax.f32 %v1264_v57, 0.0 }
 0x16b   :  { %1300 = vst [vmem:[%s2262_s3] sm:$0xff] %v1474_v61  ;;  %v1271_v63 = vmax.f32 %v1256_v0, 0.0 }
 0x16c   :  { %1302 = vst [vmem:[%s2262_s3 + $0x10] sm:$0xff] %v1476_v62  ;;  %v1275_v3 = vmax.f32 %v1266_v1, 0.0 }
 0x16d   :  { %v1475_v4 = vpack.c.bf16 %v1271_v63, %v1270_v58 }
 0x16e   :  { %v1477_v5 = vpack.c.bf16 %v1275_v3, %v1274_v2 }
 0x16f   :  { %1301 = vst [vmem:[%s2262_s3 + $0x8] sm:$0xff] %v1475_v4 }
 0x170   :  { %1303 = vst [vmem:[%s2262_s3 + $0x18] sm:$0xff] %v1477_v5 }

// kernel: tile.33
= control target key start
LH: loop header
LB: loop body
LE: loop exit
PB: predicated region body
PF: predicated region fallthrough
CT: control target
= control target key end

     0   :  { %s22_s0 = inlined_call_operand.vmem [shape: f32[32], index: 0, kind: input, shape index: {}]   ;;  %s23_s1 = inlined_call_operand.vmem [shape: f32[4,32], index: 1, kind: output, shape index: {}]  }
   0x1   :  { %v4_v0 = vld [vmem:[%s22_s0] ss:$0 sm:$0xff] }
   0x2   :  { %5 = vst [vmem:[%s23_s1] sm:$0xf] %v4_v0 }

// kernel: tile.34
= control target key start
LH: loop header
LB: loop body
LE: loop exit
PB: predicated region body
PF: predicated region fallthrough
CT: control target
= control target key end

     0   :  { %vm8_vm0 = vcmask 261120   ;;  %s40_s8 = smov 32   ;;  %s41_s9 = smov 64   ;;  %vm14_vm1 = vcmask 1048320   ;;  %vm20_vm2 = vcmask 785920   ;;  %vm26_vm3 = vcmask 523520   ;;  %s58_s0 = inlined_call_operand.vmem [shape: f32[4,32], index: 0, kind: input, shape index: {}]   ;;  %s59_s1 = inlined_call_operand.vmem [shape: f32[1,128], index: 1, kind: output, shape index: {}]  }
   0x1   :  { %v5_v0 = vld [vmem:[%s58_s0] sm:$0xf]  ;;  %s39_s0 = smov 96  }
   0x2   :  { %6 = vst [vmem:[#allocation1] sm:$0xf] %v5_v0 }
   0x9   :  { %v11_v1 = vld [vmem:[#allocation1 + $0x3] sm:$0x1]   ;;  %v23_v2 = vld [vmem:[#allocation1 + $0x1] sm:$0x1]   ;;  %v7_v3 = vld [vmem:[#allocation1] sm:$0x1]  }
   0xa   :  { %12 = vrot.lane.b32.xlu0 %v11_v1, %s39_s0  ;;  %24 = vrot.lane.b32.xlu1 %v23_v2, %s40_s8  ;;  %v17_v4 = vld [vmem:[#allocation1 + $0x2] sm:$0x1]   ;;  %9 = vst.msk [vmem:[#allocation0] sm:$0x1] %vm8_vm0, %v7_v3  }
   0xe   :  { %18 = vrot.lane.b32.xlu0 %v17_v4, %s41_s9 }
  0x7c   :  { %v13_v5 = vpop.permute.xlu0 %12   ;;  %v25_v6 = vpop.permute.xlu1 %24  }
  0x7d   :  { %15 = vst.msk [vmem:[#allocation0] sm:$0x1] %vm14_vm1, %v13_v5  }
  0x80   :  { %v19_v7 = vpop.permute.xlu0 %18  }
  0x81   :  { %21 = vst.msk [vmem:[#allocation0] sm:$0x1] %vm20_vm2, %v19_v7  }
  0x82   :  { %27 = vst.msk [vmem:[#allocation0] sm:$0x1] %vm26_vm3, %v25_v6  }
  0x89   :  { %v32_v8 = vld [vmem:[#allocation0] sm:$0x1] }
  0x8a   :  { %35 = vst [vmem:[%s59_s1] sm:$0x1] %v32_v8 }

// kernel: pnc_forward.14
= control target key start
LH: loop header
LB: loop body
LE: loop exit
PB: predicated region body
PF: predicated region fallthrough
CT: control target
= control target key end

     0   :  { %vm558_vm0 = vcmask 523264   ;;  %s1757_s1 = inlined_call_operand.vmem [shape: bf16[576,128], index: 1, kind: input, shape index: {}]   ;;  %s1758_s0 = inlined_call_operand.vmem [shape: bf16[128,576], index: 0, kind: input, shape index: {}]   ;;  %s1759_s2 = inlined_call_operand.vmem [shape: f32[1,128], index: 2, kind: input, shape index: {}]   ;;  %s1760_s3 = inlined_call_operand.vmem [shape: bf16[128,128], index: 3, kind: output, shape index: {}]  }
   0x1   :  { %v1310_v0 = vld [vmem:[%s1757_s1 + $0x78] sm:$0xff]   ;;  %v1314_v4 = vld [vmem:[%s1757_s1 + $0x70] sm:$0xff]   ;;  %v1318_v8 = vld [vmem:[%s1757_s1 + $0x68] sm:$0xff]  }
   0x2   :  { %v1311_v1 = vld [vmem:[%s1757_s1 + $0xf8] sm:$0xff]   ;;  %1138 = vmatprep.subr.bf16.mxu0 %v1310_v0  ;;  %v1315_v5 = vld [vmem:[%s1757_s1 + $0xf0] sm:$0xff]   ;;  %v1319_v9 = vld [vmem:[%s1757_s1 + $0xe8] sm:$0xff]  }
   0x3   :  { %v1312_v2 = vld [vmem:[%s1757_s1 + $0x38] sm:$0xff]   ;;  %1202 = vmatprep.subr.bf16.mxu1 %v1311_v1  ;;  %v1316_v6 = vld [vmem:[%s1757_s1 + $0x30] sm:$0xff]   ;;  %v1320_v10 = vld [vmem:[%s1757_s1 + $0x28] sm:$0xff]  }
   0x4   :  { %v1313_v3 = vld [vmem:[%s1757_s1 + $0xb8] sm:$0xff]   ;;  %1139 = vmatpush3.bf16.msra.mxu0 %v1312_v2  ;;  %v1317_v7 = vld [vmem:[%s1757_s1 + $0xb0] sm:$0xff]   ;;  %v1321_v11 = vld [vmem:[%s1757_s1 + $0xa8] sm:$0xff]  }
   0x5   :  { %1203 = vmatpush3.bf16.msra.mxu1 %v1313_v3  ;;  %1140 = vmatprep.subr.bf16.mxu0 %v1314_v4  ;;  %v1322_v12 = vld [vmem:[%s1757_s1 + $0x60] sm:$0xff]   ;;  %v1326_v16 = vld [vmem:[%s1757_s1 + $0x58] sm:$0xff]   ;;  %v1330_v20 = vld [vmem:[%s1757_s1 + $0x50] sm:$0xff]  }
   0x6   :  { %1204 = vmatprep.subr.bf16.mxu1 %v1315_v5  ;;  %v1323_v13 = vld [vmem:[%s1757_s1 + $0xe0] sm:$0xff]   ;;  %v1327_v17 = vld [vmem:[%s1757_s1 + $0xd8] sm:$0xff]   ;;  %v1331_v21 = vld [vmem:[%s1757_s1 + $0xd0] sm:$0xff]  }
   0x7   :  { %v1324_v14 = vld [vmem:[%s1757_s1 + $0x20] sm:$0xff]   ;;  %v1328_v18 = vld [vmem:[%s1757_s1 + $0x18] sm:$0xff]   ;;  %v1332_v22 = vld [vmem:[%s1757_s1 + $0x10] sm:$0xff]  }
   0x8   :  { %1141 = vmatpush3.bf16.msra.mxu0 %v1316_v6  ;;  %v1325_v15 = vld [vmem:[%s1757_s1 + $0xa0] sm:$0xff]   ;;  %v1329_v19 = vld [vmem:[%s1757_s1 + $0x98] sm:$0xff]   ;;  %v1333_v23 = vld [vmem:[%s1757_s1 + $0x90] sm:$0xff]  }
   0x9   :  { %1205 = vmatpush3.bf16.msra.mxu1 %v1317_v7  ;;  %1142 = vmatprep.subr.bf16.mxu0 %v1318_v8  ;;  %v1334_v24 = vld [vmem:[%s1757_s1 + $0x48] sm:$0xff]   ;;  %v1338_v28 = vld [vmem:[%s1757_s1 + $0x40] sm:$0xff]   ;;  %v1348_v36 = vld [vmem:[%s1757_s1 + $0x118] sm:$0xff]  }
   0xa   :  { %1206 = vmatprep.subr.bf16.mxu1 %v1319_v9  ;;  %v1335_v25 = vld [vmem:[%s1757_s1 + $0xc8] sm:$0xff]   ;;  %v1339_v29 = vld [vmem:[%s1757_s1 + $0xc0] sm:$0xff]   ;;  %v1361_v42 = vld [vmem:[%s1757_s1 + $0x110] sm:$0xff]  }
   0xb   :  { %v1336_v26 = vld [vmem:[%s1757_s1 + $0x8] sm:$0xff]   ;;  %v1340_v30 = vld [vmem:[%s1757_s1] sm:$0xff]   ;;  %v1357_v43 = vld [vmem:[%s1758_s0 + $0x5c] ss:$20 sps:$4 sm:$0xff]  }
   0xc   :  { %1143 = vmatpush3.bf16.msra.mxu0 %v1320_v10  ;;  %v1337_v27 = vld [vmem:[%s1757_s1 + $0x88] sm:$0xff]   ;;  %v1341_v31 = vld [vmem:[%s1757_s1 + $0x80] sm:$0xff]   ;;  %v1362_v47 = vld [vmem:[%s1758_s0 + $0x7c] ss:$20 sps:$4 sm:$0xff]  }
   0xd   :  { %1207 = vmatpush3.bf16.msra.mxu1 %v1321_v11  ;;  %1144 = vmatprep.subr.bf16.mxu0 %v1322_v12  ;;  %v1342_v32 = vld [vmem:[%s1758_s0] ss:$20 sps:$4 sm:$0xff]   ;;  %v1344_v33 = vld [vmem:[%s1758_s0 + $0x4] ss:$20 sps:$4 sm:$0xff]   ;;  %v1345_v34 = vld [vmem:[%s1758_s0 + $0x8] ss:$20 sps:$4 sm:$0xff]  }
   0xe   :  { %1208 = vmatprep.subr.bf16.mxu1 %v1323_v13  ;;  %v1347_v35 = vld [vmem:[%s1758_s0 + $0xc] ss:$20 sps:$4 sm:$0xff]   ;;  %615 = vmatprep.mubr.bf16.mxu0 %v1344_v33  ;;  %v1351_v38 = vld [vmem:[%s1758_s0 + $0x34] ss:$20 sps:$4 sm:$0xff]   ;;  %v1354_v40 = vld [vmem:[%s1758_s0 + $0x30] ss:$20 sps:$4 sm:$0xff]  }
   0xf   :  { %712 = vmatprep.mubr.bf16.mxu1 %v1347_v35  ;;  %v1349_v37 = vld [vmem:[%s1758_s0 + $0x2c] ss:$20 sps:$4 sm:$0xff]   ;;  %v1353_v39 = vld [vmem:[%s1758_s0 + $0x28] ss:$20 sps:$4 sm:$0xff]   ;;  %v1359_v44 = vld [vmem:[%s1758_s0 + $0x50] ss:$20 sps:$4 sm:$0xff]  }
  0x10   :  { %1145 = vmatpush3.bf16.msra.mxu0 %v1324_v14  ;;  %v1355_v41 = vld [vmem:[%s1758_s0 + $0x54] ss:$20 sps:$4 sm:$0xff]   ;;  %v1360_v45 = vld [vmem:[%s1758_s0 + $0x58] ss:$20 sps:$4 sm:$0xff]   ;;  %v1387_v49 = vld [vmem:[%s1757_s1 + $0x100] sm:$0xff]  }
  0x11   :  { %1209 = vmatpush3.bf16.msra.mxu1 %v1325_v15  ;;  %1146 = vmatprep.subr.bf16.mxu0 %v1326_v16  ;;  %v1374_v46 = vld [vmem:[%s1757_s1 + $0x108] sm:$0xff]   ;;  %v1364_v48 = vld [vmem:[%s1758_s0 + $0x84] ss:$20 sps:$4 sm:$0xff]   ;;  %v1367_v51 = vld [vmem:[%s1758_s0 + $0x80] ss:$20 sps:$4 sm:$0xff]  }
  0x12   :  { %1210 = vmatprep.subr.bf16.mxu1 %v1327_v17  ;;  %v1366_v50 = vld [vmem:[%s1758_s0 + $0x78] ss:$20 sps:$4 sm:$0xff]   ;;  %v1372_v54 = vld [vmem:[%s1758_s0 + $0xa0] ss:$20 sps:$4 sm:$0xff]   ;;  %v1373_v55 = vld [vmem:[%s1758_s0 + $0xa8] ss:$20 sps:$4 sm:$0xff]  }
  0x13   :  { %v1368_v52 = vld [vmem:[%s1758_s0 + $0xa4] ss:$20 sps:$4 sm:$0xff]   ;;  %v1370_v53 = vld [vmem:[%s1758_s0 + $0xac] ss:$20 sps:$4 sm:$0xff]   ;;  %v1377_v57 = vld [vmem:[%s1758_s0 + $0xd4] ss:$20 sps:$4 sm:$0xff]  }
  0x14   :  { %1147 = vmatpush3.bf16.msra.mxu0 %v1328_v18  ;;  %v1375_v56 = vld [vmem:[%s1758_s0 + $0xcc] ss:$20 sps:$4 sm:$0xff]   ;;  %v1379_v58 = vld [vmem:[%s1758_s0 + $0xc8] ss:$20 sps:$4 sm:$0xff]   ;;  %v1380_v59 = vld [vmem:[%s1758_s0 + $0xd0] ss:$20 sps:$4 sm:$0xff]  }
  0x15   :  { %1211 = vmatpush3.bf16.msra.mxu1 %v1329_v19  ;;  %1148 = vmatprep.subr.bf16.mxu0 %v1330_v20  ;;  %v1381_v60 = vld [vmem:[%s1758_s0 + $0xf4] ss:$20 sps:$4 sm:$0xff]   ;;  %v1383_v61 = vld [vmem:[%s1758_s0 + $0xfc] ss:$20 sps:$4 sm:$0xff]   ;;  %v1386_v63 = vld [vmem:[%s1758_s0 + $0xf8] ss:$20 sps:$4 sm:$0xff]  }
  0x16   :  { %1212 = vmatprep.subr.bf16.mxu1 %v1331_v21  ;;  %v1385_v62 = vld [vmem:[%s1758_s0 + $0xf0] ss:$20 sps:$4 sm:$0xff]   ;;  %v1392_v2 = vld [vmem:[%s1758_s0 + $0x118] ss:$20 sps:$4 sm:$0xff]   ;;  %v1393_v3 = vld [vmem:[%s1758_s0 + $0x120] ss:$20 sps:$4 sm:$0xff]  }
  0x17   :  { %v1388_v0 = vld [vmem:[%s1758_s0 + $0x11c] ss:$20 sps:$4 sm:$0xff]   ;;  %v1390_v1 = vld [vmem:[%s1758_s0 + $0x124] ss:$20 sps:$4 sm:$0xff]   ;;  %v1398_v8 = vld [vmem:[%s1758_s0 + $0x60] ss:$20 sps:$4 sm:$0xff]  }
  0x18   :  { %1149 = vmatpush3.bf16.msra.mxu0 %v1332_v22  ;;  %v1394_v4 = vld [vmem:[%s1758_s0 + $0x10] ss:$20 sps:$4 sm:$0xff]   ;;  %v1396_v6 = vld [vmem:[%s1758_s0 + $0x38] ss:$20 sps:$4 sm:$0xff]   ;;  %v1399_v9 = vld [vmem:[%s1758_s0 + $0x100] ss:$20 sps:$4 sm:$0xff]  }
  0x19   :  { %1213 = vmatpush3.bf16.msra.mxu1 %v1333_v23  ;;  %1150 = vmatprep.subr.bf16.mxu0 %v1334_v24  ;;  %v1395_v5 = vld [vmem:[%s1758_s0 + $0xb0] ss:$20 sps:$4 sm:$0xff]   ;;  %v1397_v7 = vld [vmem:[%s1758_s0 + $0xd8] ss:$20 sps:$4 sm:$0xff]   ;;  %v1400_v10 = vld [vmem:[%s1758_s0 + $0x88] ss:$20 sps:$4 sm:$0xff]  }
  0x1a   :  { %1214 = vmatprep.subr.bf16.mxu1 %v1335_v25  ;;  %v1401_v11 = vld [vmem:[%s1758_s0 + $0x128] ss:$20 sps:$4 sm:$0xff]   ;;  %v1661_v14 = vld [vmem:[%s1759_s2] ss:$0 sm:$0xff] }
  0x1c   :  { %1151 = vmatpush3.bf16.msra.mxu0 %v1336_v26 }
  0x1d   :  { %1215 = vmatpush3.bf16.msra.mxu1 %v1337_v27  ;;  %1152 = vmatprep.subr.bf16.mxu0 %v1338_v28 }
  0x1e   :  { %1216 = vmatprep.subr.bf16.mxu1 %v1339_v29 }
  0x20   :  { %1153 = vmatpush3.bf16.msra.mxu0 %v1340_v30 }
  0x21   :  { %1217 = vmatpush3.bf16.msra.mxu1 %v1341_v31  ;;  %1278 = vmatprep.subr.bf16.mxu0 %v1348_v36 }
  0x22   :  { %1302 = vmatprep.subr.bf16.mxu1 %v1348_v36 }
  0x23   :  { %616 = vmatmul.mubr.bf16.vlgmr.msra.gmra.mxu0 %v1342_v32 }
  0x24   :  { %713 = vmatmul.mubr.bf16.vlgmr.msra.gmra.mxu1 %v1345_v34  ;;  %1279 = vmatpush3.bf16.msra.mxu0 %v1348_v36 }
  0x25   :  { %1306 = vmatpush3.bf16.msra.mxu1 %v1348_v36  ;;  %623 = vmatprep.mubr.bf16.mxu0 %v1349_v37 }
  0x26   :  { %720 = vmatprep.mubr.bf16.mxu1 %v1351_v38  ;;  %1280 = vmatprep.subr.bf16.mxu0 %v1361_v42 }
  0x27   :  { %1303 = vmatprep.subr.bf16.mxu1 %v1361_v42 }
  0x28   :  { %1281 = vmatpush3.bf16.msra.mxu0 %v1361_v42 }
  0x29   :  { %1307 = vmatpush3.bf16.msra.mxu1 %v1361_v42  ;;  %1282 = vmatprep.subr.bf16.mxu0 %v1374_v46 }
  0x2a   :  { %1304 = vmatprep.subr.bf16.mxu1 %v1374_v46 }
  0x2b   :  { %624 = vmatmul.mubr.bf16.gmra.mxu0 %v1353_v39 }
  0x2c   :  { %721 = vmatmul.mubr.bf16.gmra.mxu1 %v1354_v40  ;;  %631 = vmatprep.mubr.bf16.mxu0 %v1355_v41 }
  0x2d   :  { %728 = vmatprep.mubr.bf16.mxu1 %v1357_v43  ;;  %1283 = vmatpush3.bf16.msra.mxu0 %v1374_v46 }
  0x2e   :  { %1308 = vmatpush3.bf16.msra.mxu1 %v1374_v46  ;;  %1284 = vmatprep.subr.bf16.mxu0 %v1387_v49 }
  0x2f   :  { %1305 = vmatprep.subr.bf16.mxu1 %v1387_v49 }
  0x31   :  { %1285 = vmatpush3.bf16.msra.mxu0 %v1387_v49 }
  0x32   :  { %1309 = vmatpush3.bf16.msra.mxu1 %v1387_v49 }
  0x33   :  { %632 = vmatmul.mubr.bf16.gmra.mxu0 %v1359_v44 }
  0x34   :  { %729 = vmatmul.mubr.bf16.gmra.mxu1 %v1360_v45  ;;  %639 = vmatprep.mubr.bf16.mxu0 %v1362_v47 }
  0x35   :  { %736 = vmatprep.mubr.bf16.mxu1 %v1364_v48 }
  0x3b   :  { %640 = vmatmul.mubr.bf16.gmra.mxu0 %v1366_v50 }
  0x3c   :  { %737 = vmatmul.mubr.bf16.gmra.mxu1 %v1367_v51  ;;  %647 = vmatprep.mubr.bf16.mxu0 %v1368_v52 }
  0x3d   :  { %744 = vmatprep.mubr.bf16.mxu1 %v1370_v53 }
  0x43   :  { %648 = vmatmul.mubr.bf16.gmra.mxu0 %v1372_v54 }
  0x44   :  { %745 = vmatmul.mubr.bf16.gmra.mxu1 %v1373_v55  ;;  %655 = vmatprep.mubr.bf16.mxu0 %v1375_v56 }
  0x45   :  { %752 = vmatprep.mubr.bf16.mxu1 %v1377_v57 }
  0x4b   :  { %656 = vmatmul.mubr.bf16.gmra.mxu0 %v1379_v58 }
  0x4c   :  { %753 = vmatmul.mubr.bf16.gmra.mxu1 %v1380_v59  ;;  %663 = vmatprep.mubr.bf16.mxu0 %v1381_v60 }
  0x4d   :  { %760 = vmatprep.mubr.bf16.mxu1 %v1383_v61 }
  0x53   :  { %664 = vmatmul.mubr.bf16.gmra.mxu0 %v1385_v62 }
  0x54   :  { %761 = vmatmul.mubr.bf16.gmra.mxu1 %v1386_v63  ;;  %671 = vmatprep.mubr.bf16.mxu0 %v1388_v0 }
  0x55   :  { %768 = vmatprep.mubr.bf16.mxu1 %v1390_v1 }
  0x5b   :  { %672 = vmatmul.mubr.bf16.gmra.mxu0 %v1392_v2 }
  0x5c   :  { %769 = vmatmul.mubr.bf16.gmra.mxu1 %v1393_v3  ;;  %1286 = vmatprep.mubr.msk.bf16.mxu0 %vm558_vm0, %v1394_v4 }
  0x5d   :  { %1294 = vmatprep.mubr.msk.bf16.mxu1 %vm558_vm0, %v1395_v5 }
  0x63   :  { %1287 = vmatmul.mubr.msk.bf16.vlgmr.msra.gmra.mxu0 %vm558_vm0, %v1396_v6 }
  0x64   :  { %1295 = vmatmul.mubr.msk.bf16.vlgmr.msra.gmra.mxu1 %vm558_vm0, %v1397_v7  ;;  %1290 = vmatprep.mubr.msk.bf16.mxu0 %vm558_vm0, %v1398_v8 }
  0x65   :  { %1298 = vmatprep.mubr.msk.bf16.mxu1 %vm558_vm0, %v1399_v9 }
  0x6b   :  { %1291 = vmatmul.mubr.msk.bf16.gmra.mxu0 %vm558_vm0, %v1400_v10 }
  0x6c   :  { %1299 = vmatmul.mubr.msk.bf16.gmra.mxu1 %vm558_vm0, %v1401_v11 }
  0xe3   :  { %v1154_v12 = vpop.f32.mrf.mxu0 }
  0xe4   :  { %v1218_v13 = vpop.f32.mrf.mxu1 }
  0xe5   :  { %v1155_v15 = vpop.f32.mrf.mxu0 }
  0xe6   :  { %v1156_v16 = vadd.f32 %v1155_v15, %v1154_v12  ;;  %v1219_v17 = vpop.f32.mrf.mxu1 }
  0xe7   :  { %v1157_v18 = vpop.f32.mrf.mxu0  ;;  %v1220_v20 = vadd.f32 %v1219_v17, %v1218_v13 }
  0xe8   :  { %v618_v19 = vadd.f32 %v1156_v16, %v1661_v14  ;;  %v1664_v21 = vpop.f32.mrf.mxu1 }
  0xe9   :  { %v1158_v22 = vpop.f32.mrf.mxu0 }
  0xea   :  { %v1666_v23 = vpop.f32.mrf.mxu1  ;;  %v1668_v24 = vadd.f32 %v1220_v20, %v618_v19  ;;  %v1159_v6 = vadd.f32 %v1158_v22, %v1157_v18 }
  0xeb   :  { %v1160_v25 = vpop.f32.mrf.mxu0 }
  0xec   :  { %1761 = vst [vmem:[#allocation2_spill] sm:$0xff] %v1668_v24  ;;  %v1224_v26 = vpop.f32.mrf.mxu1  ;;  %v621_v15 = vadd.f32 %v1159_v6, %v1661_v14 }
  0xed   :  { %v1161_v27 = vpop.f32.mrf.mxu0 }
  0xee   :  { %v1225_v28 = vpop.f32.mrf.mxu1  ;;  %v1162_v8 = vadd.f32 %v1161_v27, %v1160_v25  ;;  %v1223_v25 = vadd.f32 %v1666_v23, %v1664_v21 }
  0xef   :  { %v1163_v29 = vpop.f32.mrf.mxu0  ;;  %v1226_v27 = vadd.f32 %v1225_v28, %v1224_v26 }
  0xf0   :  { %v1227_v30 = vpop.f32.mrf.mxu1  ;;  %v626_v19 = vadd.f32 %v1162_v8, %v1661_v14 }
  0xf1   :  { %v1164_v31 = vpop.f32.mrf.mxu0 }
  0xf2   :  { %v1228_v32 = vpop.f32.mrf.mxu1  ;;  %v1165_v9 = vadd.f32 %v1164_v31, %v1163_v29 }
  0xf3   :  { %v1166_v33 = vpop.f32.mrf.mxu0  ;;  %v1229_v29 = vadd.f32 %v1228_v32, %v1227_v30 }
  0xf4   :  { %v1230_v34 = vpop.f32.mrf.mxu1  ;;  %v629_v20 = vadd.f32 %v1165_v9, %v1661_v14  ;;  %v718_v9 = vadd.f32 %v1223_v25, %v621_v15 }
  0xf5   :  { %v1167_v35 = vpop.f32.mrf.mxu0 }
  0xf6   :  { %v1231_v36 = vpop.f32.mrf.mxu1  ;;  %v1168_v10 = vadd.f32 %v1167_v35, %v1166_v33  ;;  %v726_v24 = vadd.f32 %v1229_v29, %v629_v20 }
  0xf7   :  { %v1169_v37 = vpop.f32.mrf.mxu0  ;;  %v1232_v35 = vadd.f32 %v1231_v36, %v1230_v34 }
  0xf8   :  { %v1670_v38 = vpop.f32.mrf.mxu1  ;;  %v634_v18 = vadd.f32 %v1168_v10, %v1661_v14  ;;  %v723_v10 = vadd.f32 %v1226_v27, %v626_v19 }
  0xf9   :  { %v1170_v39 = vpop.f32.mrf.mxu0 }
  0xfa   :  { %v1672_v40 = vpop.f32.mrf.mxu1  ;;  %v1171_v6 = vadd.f32 %v1170_v39, %v1169_v37  ;;  %v1702_v21 = vadd.f32 %v1232_v35, %v634_v18 }
  0xfb   :  { %v1172_v41 = vpop.f32.mrf.mxu0  ;;  %v1706_v23 = vadd.f32 %v1672_v40, %v1670_v38 }
  0xfc   :  { %v1674_v42 = vpop.f32.mrf.mxu1  ;;  %v1711_v34 = vadd.f32 %v1171_v6, %v1661_v14 }
  0xfd   :  { %v1173_v43 = vpop.f32.mrf.mxu0 }
  0xfe   :  { %v1237_v44 = vpop.f32.mrf.mxu1  ;;  %v1174_v16 = vadd.f32 %v1173_v43, %v1172_v41 }
  0xff   :  { %v1175_v45 = vpop.f32.mrf.mxu0  ;;  %v1238_v26 = vadd.f32 %v1237_v44, %v1674_v42 }
 0x100   :  { %v1676_v46 = vpop.f32.mrf.mxu1  ;;  %v642_v8 = vadd.f32 %v1174_v16, %v1661_v14 }
 0x101   :  { %v1176_v47 = vpop.f32.mrf.mxu0 }
 0x102   :  { %v1678_v48 = vpop.f32.mrf.mxu1  ;;  %v1177_v28 = vadd.f32 %v1176_v47, %v1175_v45 }
 0x103   :  { %v1178_v49 = vpop.f32.mrf.mxu0  ;;  %v1241_v15 = vadd.f32 %v1678_v48, %v1676_v46 }
 0x104   :  { %v1680_v50 = vpop.f32.mrf.mxu1 }
 0x105   :  { %v1179_v51 = vpop.f32.mrf.mxu0 }
 0x106   :  { %v1243_v52 = vpop.f32.mrf.mxu1  ;;  %v1180_v31 = vadd.f32 %v1179_v51, %v1178_v49 }
 0x107   :  { %v1181_v53 = vpop.f32.mrf.mxu0  ;;  %v1244_v51 = vadd.f32 %v1243_v52, %v1680_v50 }
 0x108   :  { %v1245_v54 = vpop.f32.mrf.mxu1  ;;  %v650_v30 = vadd.f32 %v1180_v31, %v1661_v14 }
 0x109   :  { %v1182_v55 = vpop.f32.mrf.mxu0 }
 0x10a   :  { %v1246_v56 = vpop.f32.mrf.mxu1  ;;  %v1183_v41 = vadd.f32 %v1182_v55, %v1181_v53  ;;  %v739_v55 = vadd.f32 %v1238_v26, %v642_v8 }
 0x10b   :  { %v1184_v57 = vpop.f32.mrf.mxu0  ;;  %v1247_v53 = vadd.f32 %v1246_v56, %v1245_v54 }
 0x10c   :  { %v1248_v58 = vpop.f32.mrf.mxu1  ;;  %v653_v36 = vadd.f32 %v1183_v41, %v1661_v14 }
 0x10d   :  { %v1185_v59 = vpop.f32.mrf.mxu0 }
 0x10e   :  { %v1249_v60 = vpop.f32.mrf.mxu1  ;;  %v1186_v22 = vadd.f32 %v1185_v59, %v1184_v57  ;;  %v750_v54 = vadd.f32 %v1247_v53, %v653_v36 }
 0x10f   :  { %v1187_v61 = vpop.f32.mrf.mxu0  ;;  %v1250_v37 = vadd.f32 %v1249_v60, %v1248_v58  ;;  %v747_v60 = vadd.f32 %v1244_v51, %v650_v30 }
 0x110   :  { %v1251_v62 = vpop.f32.mrf.mxu1  ;;  %v658_v57 = vadd.f32 %v1186_v22, %v1661_v14 }
 0x111   :  { %v1188_v63 = vpop.f32.mrf.mxu0 }
 0x112   :  { %v1252_v0 = vpop.f32.mrf.mxu1  ;;  %v1189_v43 = vadd.f32 %v1188_v63, %v1187_v61  ;;  %v755_v47 = vadd.f32 %v1250_v37, %v658_v57  ;;  %v645_v63 = vadd.f32 %v1177_v28, %v1661_v14 }
 0x113   :  { %v1190_v1 = vpop.f32.mrf.mxu0  ;;  %v1253_v42 = vadd.f32 %v1252_v0, %v1251_v62  ;;  %v1765_v0 = vld [vmem:[#allocation2_spill] sm:$0xff] }
 0x114   :  { %v1682_v2 = vpop.f32.mrf.mxu1  ;;  %v661_v39 = vadd.f32 %v1189_v43, %v1661_v14  ;;  %v742_v37 = vadd.f32 %v1241_v15, %v645_v63 }
 0x115   :  { %v1191_v3 = vpop.f32.mrf.mxu0 }
 0x116   :  { %v1684_v4 = vpop.f32.mrf.mxu1  ;;  %v1192_v44 = vadd.f32 %v1191_v3, %v1190_v1  ;;  %v758_v52 = vadd.f32 %v1253_v42, %v661_v39 }
 0x117   :  { %v1193_v5 = vpop.f32.mrf.mxu0  ;;  %v1256_v56 = vadd.f32 %v1684_v4, %v1682_v2 }
 0x118   :  { %v1686_v7 = vpop.f32.mrf.mxu1 }
 0x119   :  { %1762 = vst [vmem:[#allocation3_spill] sm:$0xff] %v1686_v7  ;;  %v1194_v11 = vpop.f32.mrf.mxu0 }
 0x11a   :  { %v1688_v12 = vpop.f32.mrf.mxu1  ;;  %v1195_v45 = vadd.f32 %v1194_v11, %v1193_v5 }
 0x11b   :  { %1763 = vst [vmem:[#allocation4_spill] sm:$0xff] %v1688_v12  ;;  %v1196_v13 = vpop.f32.mrf.mxu0 }
 0x11c   :  { %v1691_v17 = vpop.f32.mrf.mxu1  ;;  %v669_v46 = vadd.f32 %v1195_v45, %v1661_v14 }
 0x11d   :  { %1764 = vst [vmem:[#allocation5_spill] sm:$0xff] %v1691_v17  ;;  %v1197_v7 = vpop.f32.mrf.mxu0 }
 0x11e   :  { %v1261_v33 = vpop.f32.mrf.mxu1  ;;  %v1198_v38 = vadd.f32 %v1197_v7, %v1196_v13  ;;  %v666_v7 = vadd.f32 %v1192_v44, %v1661_v14  ;;  %v734_v44 = vadd.f32 %v1706_v23, %v1711_v34 }
 0x11f   :  { %v1199_v12 = vpop.f32.mrf.mxu0 }
 0x120   :  { %v1699_v17 = vpop.f32.mrf.mxu1  ;;  %v674_v62 = vadd.f32 %v1198_v38, %v1661_v14  ;;  %v763_v30 = vadd.f32 %v1256_v56, %v666_v7  ;;  %v1767_v39 = vld [vmem:[#allocation3_spill] sm:$0xff] }
 0x121   :  { %v1200_v59 = vpop.f32.mrf.mxu0 }
 0x122   :  { %v1264_v32 = vpop.f32.mrf.mxu1  ;;  %v1201_v19 = vadd.f32 %v1200_v59, %v1199_v12 }
 0x123   :  { %v1288_v49 = vpop.f32.mrf.mxu0  ;;  %v1265_v59 = vadd.f32 %v1264_v32, %v1699_v17 }
 0x124   :  { %v1296_v40 = vpop.f32.mrf.mxu1  ;;  %v820_v58 = vadd.f32 %v1288_v49, %v723_v10  ;;  %v1766_v13 = vld [vmem:[#allocation5_spill] sm:$0xff]  ;;  %v677_v2 = vadd.f32 %v1201_v19, %v1661_v14  ;;  %v1768_v49 = vld [vmem:[#allocation4_spill] sm:$0xff] }
 0x125   :  { %v811_v61 = vpop.f32.mrf.mxu0  ;;  %v852_v20 = vadd.f32 %v1296_v40, %v755_v47  ;;  %v1262_v18 = vadd.f32 %v1261_v33, %v1766_v13  ;;  %v1259_v51 = vadd.f32 %v1768_v49, %v1767_v39 }
 0x126   :  { %v843_v16 = vpop.f32.mrf.mxu1  ;;  %v812_v1 = vadd.f32 %v811_v61, %v1765_v0  ;;  %v876_v22 = vmax.f32 %v820_v58, 0.0  ;;  %v774_v38 = vadd.f32 %v1265_v59, %v677_v2 }
 0x127   :  { %v1289_v50 = vpop.f32.mrf.mxu0  ;;  %v844_v48 = vadd.f32 %v843_v16, %v747_v60  ;;  %v884_v4 = vmax.f32 %v852_v20, 0.0  ;;  %v771_v8 = vadd.f32 %v1262_v18, %v674_v62  ;;  %v766_v63 = vadd.f32 %v1259_v51, %v669_v46 }
 0x128   :  { %v823_v3 = vadd.f32 %v1289_v50, %v726_v24  ;;  %v1297_v5 = vpop.f32.mrf.mxu1  ;;  %v874_v6 = vmax.f32 %v812_v1, 0.0 }
 0x129   :  { %v855_v11 = vadd.f32 %v1297_v5, %v758_v52  ;;  %v814_v12 = vpop.f32.mrf.mxu0  ;;  %v882_v10 = vmax.f32 %v844_v48, 0.0 }
 0x12a   :  { %v877_v25 = vmax.f32 %v823_v3, 0.0  ;;  %v815_v27 = vadd.f32 %v814_v12, %v718_v9  ;;  %v846_v29 = vpop.f32.mrf.mxu1 }
 0x12b   :  { %v885_v31 = vmax.f32 %v855_v11, 0.0  ;;  %v847_v35 = vadd.f32 %v846_v29, %v750_v54  ;;  %v1292_v24 = vpop.f32.mrf.mxu0 }
 0x12c   :  { %v1099_v41 = vpack.c.bf16 %v877_v25, %v876_v22  ;;  %v875_v43 = vmax.f32 %v815_v27, 0.0  ;;  %v1300_v57 = vpop.f32.mrf.mxu1  ;;  %v836_v9 = vadd.f32 %v1292_v24, %v739_v55 }
 0x12d   :  { %v1119_v26 = vpack.c.bf16 %v885_v31, %v884_v4  ;;  %v883_v33 = vmax.f32 %v847_v35, 0.0  ;;  %v827_v28 = vpop.f32.mrf.mxu0  ;;  %v868_v32 = vadd.f32 %v1300_v57, %v771_v8 }
 0x12e   :  { %1131 = vst [vmem:[%s1760_s3 + $0x8] sm:$0xff] %v1099_v41   ;;  %v1094_v14 = vpack.c.bf16 %v875_v43, %v874_v6  ;;  %v859_v36 = vpop.f32.mrf.mxu1  ;;  %v828_v40 = vadd.f32 %v827_v28, %v1702_v21  ;;  %v880_v15 = vmax.f32 %v836_v9, 0.0 }
 0x12f   :  { %1135 = vst [vmem:[%s1760_s3 + $0x28] sm:$0xff] %v1119_v26   ;;  %v1114_v17 = vpack.c.bf16 %v883_v33, %v882_v10  ;;  %v1293_v53 = vpop.f32.mrf.mxu0  ;;  %v860_v45 = vadd.f32 %v859_v36, %v763_v30  ;;  %v888_v19 = vmax.f32 %v868_v32, 0.0 }
 0x130   :  { %1095 = vst [vmem:[%s1760_s3] sm:$0xff] %v1094_v14   ;;  %v839_v55 = vadd.f32 %v1293_v53, %v742_v37  ;;  %v1301_v42 = vpop.f32.mrf.mxu1  ;;  %v878_v50 = vmax.f32 %v828_v40, 0.0 }
 0x131   :  { %1134 = vst [vmem:[%s1760_s3 + $0x20] sm:$0xff] %v1114_v17   ;;  %v871_v47 = vadd.f32 %v1301_v42, %v774_v38  ;;  %v830_v61 = vpop.f32.mrf.mxu0  ;;  %v886_v56 = vmax.f32 %v860_v45, 0.0 }
 0x132   :  { %v881_v58 = vmax.f32 %v839_v55, 0.0  ;;  %v831_v60 = vadd.f32 %v830_v61, %v734_v44  ;;  %v862_v16 = vpop.f32.mrf.mxu1 }
 0x133   :  { %v889_v20 = vmax.f32 %v871_v47, 0.0  ;;  %v863_v21 = vadd.f32 %v862_v16, %v766_v63 }
 0x134   :  { %v1109_v52 = vpack.c.bf16 %v881_v58, %v880_v15  ;;  %v879_v54 = vmax.f32 %v831_v60, 0.0 }
 0x135   :  { %v1129_v23 = vpack.c.bf16 %v889_v20, %v888_v19  ;;  %v887_v34 = vmax.f32 %v863_v21, 0.0 }
 0x136   :  { %1133 = vst [vmem:[%s1760_s3 + $0x18] sm:$0xff] %v1109_v52   ;;  %v1104_v62 = vpack.c.bf16 %v879_v54, %v878_v50 }
 0x137   :  { %1137 = vst [vmem:[%s1760_s3 + $0x38] sm:$0xff] %v1129_v23   ;;  %v1124_v0 = vpack.c.bf16 %v887_v34, %v886_v56 }
 0x138   :  { %1132 = vst [vmem:[%s1760_s3 + $0x10] sm:$0xff] %v1104_v62  }
 0x139   :  { %1136 = vst [vmem:[%s1760_s3 + $0x30] sm:$0xff] %v1124_v0  }

// kernel: tile.38
= control target key start
LH: loop header
LB: loop body
LE: loop exit
PB: predicated region body
PF: predicated region fallthrough
CT: control target
= control target key end

     0   :  { %s22_s0 = inlined_call_operand.vmem [shape: f32[3], index: 0, kind: input, shape index: {}]   ;;  %s23_s1 = inlined_call_operand.vmem [shape: f32[4,3], index: 1, kind: output, shape index: {}]  }
   0x1   :  { %v4_v0 = vld [vmem:[%s22_s0] ss:$0 sm:$0xff] }
   0x2   :  { %5 = vst [vmem:[%s23_s1] sm:$0xf] %v4_v0 }

// kernel: tile.39
= control target key start
LH: loop header
LB: loop body
LE: loop exit
PB: predicated region body
PF: predicated region fallthrough
CT: control target
= control target key end

     0   :  { %vm8_vm0 = vcmask 23552   ;;  %s40_s8 = smov 3   ;;  %s41_s9 = smov 6   ;;  %vm14_vm1 = vcmask 97352   ;;  %vm20_vm2 = vcmask 72752   ;;  %vm26_vm3 = vcmask 48152   ;;  %s58_s0 = inlined_call_operand.vmem [shape: f32[4,3], index: 0, kind: input, shape index: {}]   ;;  %s59_s1 = inlined_call_operand.vmem [shape: f32[1,12], index: 1, kind: output, shape index: {}]  }
   0x1   :  { %v5_v0 = vld [vmem:[%s58_s0] sm:$0xf]  ;;  %s39_s0 = smov 9  }
   0x2   :  { %6 = vst [vmem:[#allocation1] sm:$0xf] %v5_v0 }
   0x9   :  { %v11_v1 = vld [vmem:[#allocation1 + $0x3] sm:$0x1]   ;;  %v23_v2 = vld [vmem:[#allocation1 + $0x1] sm:$0x1]   ;;  %v7_v3 = vld [vmem:[#allocation1] sm:$0x1]  }
   0xa   :  { %12 = vrot.lane.b32.xlu0 %v11_v1, %s39_s0  ;;  %24 = vrot.lane.b32.xlu1 %v23_v2, %s40_s8  ;;  %v17_v4 = vld [vmem:[#allocation1 + $0x2] sm:$0x1]   ;;  %9 = vst.msk [vmem:[#allocation0] sm:$0x1] %vm8_vm0, %v7_v3  }
   0xe   :  { %18 = vrot.lane.b32.xlu0 %v17_v4, %s41_s9 }
  0x7c   :  { %v13_v5 = vpop.permute.xlu0 %12   ;;  %v25_v6 = vpop.permute.xlu1 %24  }
  0x7d   :  { %15 = vst.msk [vmem:[#allocation0] sm:$0x1] %vm14_vm1, %v13_v5  }
  0x80   :  { %v19_v7 = vpop.permute.xlu0 %18  }
  0x81   :  { %21 = vst.msk [vmem:[#allocation0] sm:$0x1] %vm20_vm2, %v19_v7  }
  0x82   :  { %27 = vst.msk [vmem:[#allocation0] sm:$0x1] %vm26_vm3, %v25_v6  }
  0x89   :  { %v32_v8 = vld [vmem:[#allocation0] sm:$0x1] }
  0x8a   :  { %35 = vst [vmem:[%s59_s1] sm:$0x1] %v32_v8 }

// kernel: pnc_forward.15
= control target key start
LH: loop header
LB: loop body
LE: loop exit
PB: predicated region body
PF: predicated region fallthrough
CT: control target
= control target key end

     0   :  { %v2523_v0 = vmov 0   ;;  %vm774_vm0 = vcmask 261120   ;;  %vm1769_vm1 = vcmask 97280   ;;  %s3430_s1 = inlined_call_operand.vmem [shape: bf16[288,12], index: 1, kind: input, shape index: {}]   ;;  %s3431_s0 = inlined_call_operand.vmem [shape: bf16[512,288], index: 0, kind: input, shape index: {}]   ;;  %s3432_s2 = inlined_call_operand.vmem [shape: f32[1,12], index: 2, kind: input, shape index: {}]   ;;  %s3433_s3 = inlined_call_operand.vmem [shape: f32[512,12], index: 3, kind: output, shape index: {}]  }
   0x1   :  { %871 = vmatprep.subr.bf16.mxu0 %v2523_v0  ;;  %2087 = vmatprep.subr.bf16.mxu1 %v2523_v0  ;;  %v2120_v1 = vld [vmem:[%s3430_s1 + $0x38] sm:$0xff]   ;;  %v2121_v2 = vld [vmem:[%s3430_s1 + $0x30] sm:$0xff]   ;;  %v2122_v3 = vld [vmem:[%s3430_s1 + $0x28] sm:$0xff]  }
   0x2   :  { %872 = vmatpush1.bf16.msra.mxu0 %v2120_v1  ;;  %2103 = vmatpush1.bf16.msra.mxu1 %v2120_v1  ;;  %v2123_v4 = vld [vmem:[%s3430_s1 + $0x20] sm:$0xff]   ;;  %v2124_v5 = vld [vmem:[%s3430_s1 + $0x18] sm:$0xff]   ;;  %v2125_v7 = vld [vmem:[%s3430_s1 + $0x10] sm:$0xff]  }
   0x3   :  { %873 = vmatprep.subr.bf16.mxu0 %v2523_v0  ;;  %2088 = vmatprep.subr.bf16.mxu1 %v2523_v0  ;;  %v2138_v6 = vld [vmem:[%s3431_s0 + $0x4] ss:$12 sps:$4 sm:$0xff]   ;;  %v2126_v9 = vld [vmem:[%s3430_s1 + $0x8] sm:$0xff]   ;;  %v2128_v11 = vld [vmem:[%s3430_s1 + $0x78] sm:$0xff]  }
   0x4   :  { %v2141_v8 = vld [vmem:[%s3431_s0 + $0x244] ss:$12 sps:$4 sm:$0xff]   ;;  %903 = vmatprep.mubr.bf16.mxu0 %v2138_v6  ;;  %v2130_v13 = vld [vmem:[%s3430_s1 + $0x68] sm:$0xff]   ;;  %v2132_v15 = vld [vmem:[%s3430_s1 + $0x58] sm:$0xff]  }
   0x5   :  { %1095 = vmatprep.mubr.bf16.mxu1 %v2141_v8  ;;  %v2127_v10 = vld [vmem:[%s3430_s1] sm:$0xff]   ;;  %v2129_v12 = vld [vmem:[%s3430_s1 + $0x70] sm:$0xff]   ;;  %v2134_v17 = vld [vmem:[%s3430_s1 + $0x48] sm:$0xff]  }
   0x6   :  { %874 = vmatpush1.bf16.msra.mxu0 %v2121_v2  ;;  %2104 = vmatpush1.bf16.msra.mxu1 %v2121_v2  ;;  %v2131_v14 = vld [vmem:[%s3430_s1 + $0x60] sm:$0xff]   ;;  %v2133_v16 = vld [vmem:[%s3430_s1 + $0x50] sm:$0xff]   ;;  %v2142_v19 = vld [vmem:[%s3430_s1 + $0x88] sm:$0xff]  }
   0x7   :  { %875 = vmatprep.subr.bf16.mxu0 %v2523_v0  ;;  %2089 = vmatprep.subr.bf16.mxu1 %v2523_v0  ;;  %v2135_v18 = vld [vmem:[%s3430_s1 + $0x40] sm:$0xff]   ;;  %v2143_v22 = vld [vmem:[%s3431_s0 + $0x1c] ss:$12 sps:$4 sm:$0xff]   ;;  %v2155_v31 = vld [vmem:[%s3431_s0 + $0x4c] ss:$12 sps:$4 sm:$0xff]  }
   0x8   :  { %v2136_v20 = vld [vmem:[%s3431_s0] ss:$12 sps:$4 sm:$0xff]   ;;  %v2145_v23 = vld [vmem:[%s3431_s0 + $0x25c] ss:$12 sps:$4 sm:$0xff]   ;;  %v2147_v25 = vld [vmem:[%s3431_s0 + $0x18] ss:$12 sps:$4 sm:$0xff]  }
   0x9   :  { %v2139_v21 = vld [vmem:[%s3431_s0 + $0x240] ss:$12 sps:$4 sm:$0xff]   ;;  %v2148_v26 = vld [vmem:[%s3431_s0 + $0x258] ss:$12 sps:$4 sm:$0xff]   ;;  %v2153_v29 = vld [vmem:[%s3431_s0 + $0x30] ss:$12 sps:$4 sm:$0xff]  }
   0xa   :  { %876 = vmatpush1.bf16.msra.mxu0 %v2122_v3  ;;  %2105 = vmatpush1.bf16.msra.mxu1 %v2122_v3  ;;  %v2167_v24 = vld [vmem:[%s3430_s1 + $0x80] sm:$0xff]   ;;  %v2154_v30 = vld [vmem:[%s3431_s0 + $0x270] ss:$12 sps:$4 sm:$0xff]   ;;  %v2157_v32 = vld [vmem:[%s3431_s0 + $0x28c] ss:$12 sps:$4 sm:$0xff]  }
   0xb   :  { %877 = vmatprep.subr.bf16.mxu0 %v2523_v0  ;;  %2090 = vmatprep.subr.bf16.mxu1 %v2523_v0  ;;  %v2149_v27 = vld [vmem:[%s3431_s0 + $0x34] ss:$12 sps:$4 sm:$0xff]   ;;  %v2161_v35 = vld [vmem:[%s3431_s0 + $0x64] ss:$12 sps:$4 sm:$0xff]   ;;  %v2168_v39 = vld [vmem:[%s3431_s0 + $0x7c] ss:$12 sps:$4 sm:$0xff]  }
   0xc   :  { %v2151_v28 = vld [vmem:[%s3431_s0 + $0x274] ss:$12 sps:$4 sm:$0xff]   ;;  %v2163_v36 = vld [vmem:[%s3431_s0 + $0x2a4] ss:$12 sps:$4 sm:$0xff]   ;;  %v2170_v40 = vld [vmem:[%s3431_s0 + $0x2bc] ss:$12 sps:$4 sm:$0xff]  }
   0xd   :  { %v2159_v33 = vld [vmem:[%s3431_s0 + $0x48] ss:$12 sps:$4 sm:$0xff]   ;;  %v2165_v37 = vld [vmem:[%s3431_s0 + $0x60] ss:$12 sps:$4 sm:$0xff]   ;;  %v2172_v41 = vld [vmem:[%s3431_s0 + $0x78] ss:$12 sps:$4 sm:$0xff]  }
   0xe   :  { %878 = vmatpush1.bf16.msra.mxu0 %v2123_v4  ;;  %2106 = vmatpush1.bf16.msra.mxu1 %v2123_v4  ;;  %v2160_v34 = vld [vmem:[%s3431_s0 + $0x288] ss:$12 sps:$4 sm:$0xff]   ;;  %v2166_v38 = vld [vmem:[%s3431_s0 + $0x2a0] ss:$12 sps:$4 sm:$0xff]   ;;  %v2173_v42 = vld [vmem:[%s3431_s0 + $0x2b8] ss:$12 sps:$4 sm:$0xff]  }
   0xf   :  { %879 = vmatprep.subr.bf16.mxu0 %v2523_v0  ;;  %2091 = vmatprep.subr.bf16.mxu1 %v2523_v0  ;;  %v2174_v43 = vld [vmem:[%s3431_s0 + $0x94] ss:$12 sps:$4 sm:$0xff]   ;;  %v2178_v45 = vld [vmem:[%s3431_s0 + $0x90] ss:$12 sps:$4 sm:$0xff]   ;;  %v2180_v47 = vld [vmem:[%s3431_s0 + $0xac] ss:$12 sps:$4 sm:$0xff]  }
  0x10   :  { %v2176_v44 = vld [vmem:[%s3431_s0 + $0x2d4] ss:$12 sps:$4 sm:$0xff]   ;;  %v2179_v46 = vld [vmem:[%s3431_s0 + $0x2d0] ss:$12 sps:$4 sm:$0xff]   ;;  %v2182_v48 = vld [vmem:[%s3431_s0 + $0x2ec] ss:$12 sps:$4 sm:$0xff]  }
  0x11   :  { %v2184_v49 = vld [vmem:[%s3431_s0 + $0xa8] ss:$12 sps:$4 sm:$0xff]   ;;  %v2186_v51 = vld [vmem:[%s3431_s0 + $0xc4] ss:$12 sps:$4 sm:$0xff]   ;;  %v2189_v53 = vld [vmem:[%s3431_s0 + $0xc0] ss:$12 sps:$4 sm:$0xff]  }
  0x12   :  { %880 = vmatpush1.bf16.msra.mxu0 %v2124_v5  ;;  %2107 = vmatpush1.bf16.msra.mxu1 %v2124_v5  ;;  %v2185_v50 = vld [vmem:[%s3431_s0 + $0x2e8] ss:$12 sps:$4 sm:$0xff]   ;;  %v2190_v54 = vld [vmem:[%s3431_s0 + $0x20] ss:$12 sps:$4 sm:$0xff]   ;;  %v2193_v56 = vld [vmem:[%s3431_s0 + $0x38] ss:$12 sps:$4 sm:$0xff]  }
  0x13   :  { %881 = vmatprep.subr.bf16.mxu0 %v2523_v0  ;;  %2092 = vmatprep.subr.bf16.mxu1 %v2523_v0  ;;  %v2188_v52 = vld [vmem:[%s3431_s0 + $0x8] ss:$12 sps:$4 sm:$0xff]   ;;  %v2194_v57 = vld [vmem:[%s3431_s0 + $0xd8] ss:$12 sps:$4 sm:$0xff]   ;;  %v2195_v58 = vld [vmem:[%s3431_s0 + $0x50] ss:$12 sps:$4 sm:$0xff]  }
  0x14   :  { %v2191_v55 = vld [vmem:[%s3431_s0 + $0xdc] ss:$12 sps:$4 sm:$0xff]   ;;  %v2196_v59 = vld [vmem:[%s3431_s0 + $0xf4] ss:$12 sps:$4 sm:$0xff]   ;;  %v2201_v63 = vld [vmem:[%s3431_s0 + $0x10c] ss:$12 sps:$4 sm:$0xff]  }
  0x15   :  { %v2198_v60 = vld [vmem:[%s3431_s0 + $0x68] ss:$12 sps:$4 sm:$0xff]   ;;  %v2199_v61 = vld [vmem:[%s3431_s0 + $0xf0] ss:$12 sps:$4 sm:$0xff]   ;;  %v2200_v62 = vld [vmem:[%s3431_s0 + $0x80] ss:$12 sps:$4 sm:$0xff]  }
  0x16   :  { %882 = vmatpush1.bf16.msra.mxu0 %v2125_v7  ;;  %2108 = vmatpush1.bf16.msra.mxu1 %v2125_v7  ;;  %v2204_v1 = vld [vmem:[%s3431_s0 + $0x108] ss:$12 sps:$4 sm:$0xff]   ;;  %v2205_v2 = vld [vmem:[%s3431_s0 + $0xb0] ss:$12 sps:$4 sm:$0xff]   ;;  %v2209_v5 = vld [vmem:[%s3431_s0 + $0x120] ss:$12 sps:$4 sm:$0xff]  }
  0x17   :  { %883 = vmatprep.subr.bf16.mxu0 %v2523_v0  ;;  %2093 = vmatprep.subr.bf16.mxu1 %v2523_v0  ;;  %v2206_v3 = vld [vmem:[%s3431_s0 + $0x124] ss:$12 sps:$4 sm:$0xff]   ;;  %v2208_v4 = vld [vmem:[%s3431_s0 + $0xc8] ss:$12 sps:$4 sm:$0xff]   ;;  %v2210_v6 = vld [vmem:[%s3431_s0 + $0xe0] ss:$12 sps:$4 sm:$0xff]  }
  0x18   :  { %v2211_v7 = vld [vmem:[%s3431_s0 + $0x13c] ss:$12 sps:$4 sm:$0xff]   ;;  %v2213_v8 = vld [vmem:[%s3431_s0 + $0xf8] ss:$12 sps:$4 sm:$0xff]  }
  0x1a   :  { %884 = vmatpush1.bf16.msra.mxu0 %v2126_v9  ;;  %2109 = vmatpush1.bf16.msra.mxu1 %v2126_v9  ;;  %v2214_v9 = vld [vmem:[%s3431_s0 + $0x138] ss:$12 sps:$4 sm:$0xff]  }
  0x1b   :  { %885 = vmatprep.subr.bf16.mxu0 %v2523_v0  ;;  %2094 = vmatprep.subr.bf16.mxu1 %v2523_v0 }
  0x1e   :  { %886 = vmatpush1.bf16.msra.mxu0 %v2127_v10  ;;  %2110 = vmatpush1.bf16.msra.mxu1 %v2127_v10  ;;  %v2215_v10 = vld [vmem:[%s3431_s0 + $0x110] ss:$12 sps:$4 sm:$0xff]  }
  0x1f   :  { %887 = vmatprep.subr.bf16.mxu0 %v2523_v0  ;;  %2095 = vmatprep.subr.bf16.mxu1 %v2523_v0 }
  0x22   :  { %888 = vmatpush2.bf16.msra.mxu0 %v2128_v11  ;;  %2111 = vmatpush2.bf16.msra.mxu1 %v2128_v11  ;;  %v2216_v11 = vld [vmem:[%s3431_s0 + $0x154] ss:$12 sps:$4 sm:$0xff]  }
  0x23   :  { %889 = vmatprep.subr.bf16.mxu0 %v2523_v0  ;;  %2096 = vmatprep.subr.bf16.mxu1 %v2523_v0 }
  0x26   :  { %890 = vmatpush2.bf16.msra.mxu0 %v2129_v12  ;;  %2112 = vmatpush2.bf16.msra.mxu1 %v2129_v12  ;;  %v2218_v12 = vld [vmem:[%s3431_s0 + $0x128] ss:$12 sps:$4 sm:$0xff]  }
  0x27   :  { %891 = vmatprep.subr.bf16.mxu0 %v2523_v0  ;;  %2097 = vmatprep.subr.bf16.mxu1 %v2523_v0 }
  0x2a   :  { %892 = vmatpush2.bf16.msra.mxu0 %v2130_v13  ;;  %2113 = vmatpush2.bf16.msra.mxu1 %v2130_v13  ;;  %v2219_v13 = vld [vmem:[%s3431_s0 + $0x150] ss:$12 sps:$4 sm:$0xff]  }
  0x2b   :  { %893 = vmatprep.subr.bf16.mxu0 %v2523_v0  ;;  %2098 = vmatprep.subr.bf16.mxu1 %v2523_v0 }
  0x2e   :  { %894 = vmatpush2.bf16.msra.mxu0 %v2131_v14  ;;  %2114 = vmatpush2.bf16.msra.mxu1 %v2131_v14  ;;  %v2220_v14 = vld [vmem:[%s3431_s0 + $0x140] ss:$12 sps:$4 sm:$0xff]  }
  0x2f   :  { %895 = vmatprep.subr.bf16.mxu0 %v2523_v0  ;;  %2099 = vmatprep.subr.bf16.mxu1 %v2523_v0 }
  0x32   :  { %896 = vmatpush2.bf16.msra.mxu0 %v2132_v15  ;;  %2115 = vmatpush2.bf16.msra.mxu1 %v2132_v15  ;;  %v2221_v15 = vld [vmem:[%s3431_s0 + $0x16c] ss:$12 sps:$4 sm:$0xff]  }
  0x33   :  { %897 = vmatprep.subr.bf16.mxu0 %v2523_v0  ;;  %2100 = vmatprep.subr.bf16.mxu1 %v2523_v0 }
  0x36   :  { %898 = vmatpush2.bf16.msra.mxu0 %v2133_v16  ;;  %2116 = vmatpush2.bf16.msra.mxu1 %v2133_v16  ;;  %v2223_v16 = vld [vmem:[%s3431_s0 + $0x158] ss:$12 sps:$4 sm:$0xff]  }
  0x37   :  { %899 = vmatprep.subr.bf16.mxu0 %v2523_v0  ;;  %2101 = vmatprep.subr.bf16.mxu1 %v2523_v0 }
  0x3a   :  { %900 = vmatpush2.bf16.msra.mxu0 %v2134_v17  ;;  %2117 = vmatpush2.bf16.msra.mxu1 %v2134_v17  ;;  %v2224_v17 = vld [vmem:[%s3431_s0 + $0x168] ss:$12 sps:$4 sm:$0xff]  }
  0x3b   :  { %901 = vmatprep.subr.bf16.mxu0 %v2523_v0  ;;  %2102 = vmatprep.subr.bf16.mxu1 %v2523_v0  ;;  %v2203_v0 = vld [vmem:[%s3431_s0 + $0x98] ss:$12 sps:$4 sm:$0xff]  }
  0x3e   :  { %902 = vmatpush2.bf16.msra.mxu0 %v2135_v18  ;;  %2118 = vmatpush2.bf16.msra.mxu1 %v2135_v18  ;;  %v2225_v18 = vld [vmem:[%s3431_s0 + $0x170] ss:$12 sps:$4 sm:$0xff]  }
  0x3f   :  { %2019 = vmatprep.subr.bf16.mxu1 %v2142_v19 }
  0x41   :  { %904 = vmatmul.mubr.bf16.vlgmr.msra.gmra.mxu0 %v2136_v20  ;;  %1096 = vmatmul.mubr.bf16.vlgmr.msra.gmra.mxu1 %v2139_v21  ;;  %v2228_v20 = vld [vmem:[%s3431_s0 + $0x188] ss:$12 sps:$4 sm:$0xff]   ;;  %v2229_v21 = vld [vmem:[%s3431_s0 + $0x180] ss:$12 sps:$4 sm:$0xff]  }
  0x42   :  { %2020 = vmatpush3.bf16.msra.mxu1 %v2142_v19  ;;  %911 = vmatprep.mubr.bf16.mxu0 %v2143_v22  ;;  %v2226_v19 = vld [vmem:[%s3431_s0 + $0x184] ss:$12 sps:$4 sm:$0xff]   ;;  %v2230_v22 = vld [vmem:[%s3431_s0 + $0x1a0] ss:$12 sps:$4 sm:$0xff]  }
  0x43   :  { %1103 = vmatprep.mubr.bf16.mxu1 %v2145_v23  ;;  %2021 = vmatprep.subr.bf16.mxu1 %v2167_v24  ;;  %v2231_v23 = vld [vmem:[%s3431_s0 + $0x19c] ss:$12 sps:$4 sm:$0xff]  }
  0x46   :  { %2022 = vmatpush3.bf16.msra.mxu1 %v2167_v24  ;;  %v2233_v24 = vld [vmem:[%s3431_s0 + $0x1b8] ss:$12 sps:$4 sm:$0xff]  }
  0x49   :  { %912 = vmatmul.mubr.bf16.gmra.mxu0 %v2147_v25  ;;  %1104 = vmatmul.mubr.bf16.gmra.mxu1 %v2148_v26  ;;  %v2234_v25 = vld [vmem:[%s3431_s0 + $0x198] ss:$12 sps:$4 sm:$0xff]   ;;  %v2235_v26 = vld [vmem:[%s3431_s0 + $0x1d0] ss:$12 sps:$4 sm:$0xff]  }
  0x4a   :  { %919 = vmatprep.mubr.bf16.mxu0 %v2149_v27  ;;  %1111 = vmatprep.mubr.bf16.mxu1 %v2151_v28  ;;  %v2236_v27 = vld [vmem:[%s3431_s0 + $0x1b4] ss:$12 sps:$4 sm:$0xff]  }
  0x4b   :  { %v2238_v28 = vld [vmem:[%s3431_s0 + $0x1e8] ss:$12 sps:$4 sm:$0xff]  }
  0x51   :  { %920 = vmatmul.mubr.bf16.gmra.mxu0 %v2153_v29  ;;  %1112 = vmatmul.mubr.bf16.gmra.mxu1 %v2154_v30  ;;  %v2239_v29 = vld [vmem:[%s3431_s0 + $0x1b0] ss:$12 sps:$4 sm:$0xff]   ;;  %v2240_v30 = vld [vmem:[%s3431_s0 + $0x200] ss:$12 sps:$4 sm:$0xff]  }
  0x52   :  { %927 = vmatprep.mubr.bf16.mxu0 %v2155_v31  ;;  %1119 = vmatprep.mubr.bf16.mxu1 %v2157_v32  ;;  %v2241_v31 = vld [vmem:[%s3431_s0 + $0x1cc] ss:$12 sps:$4 sm:$0xff]  }
  0x53   :  { %v2243_v32 = vld [vmem:[%s3431_s0 + $0x218] ss:$12 sps:$4 sm:$0xff]  }
  0x59   :  { %928 = vmatmul.mubr.bf16.gmra.mxu0 %v2159_v33  ;;  %1120 = vmatmul.mubr.bf16.gmra.mxu1 %v2160_v34  ;;  %v2244_v33 = vld [vmem:[%s3431_s0 + $0x1c8] ss:$12 sps:$4 sm:$0xff]   ;;  %v2245_v34 = vld [vmem:[%s3431_s0 + $0x230] ss:$12 sps:$4 sm:$0xff]  }
  0x5a   :  { %935 = vmatprep.mubr.bf16.mxu0 %v2161_v35  ;;  %1127 = vmatprep.mubr.bf16.mxu1 %v2163_v36  ;;  %v2246_v35 = vld [vmem:[%s3431_s0 + $0x1e4] ss:$12 sps:$4 sm:$0xff]   ;;  %v2248_v36 = vld [vmem:[%s3431_s0 + $0x248] ss:$12 sps:$4 sm:$0xff]  }
  0x61   :  { %936 = vmatmul.mubr.bf16.gmra.mxu0 %v2165_v37  ;;  %1128 = vmatmul.mubr.bf16.gmra.mxu1 %v2166_v38  ;;  %v2249_v37 = vld [vmem:[%s3431_s0 + $0x1e0] ss:$12 sps:$4 sm:$0xff]  }
  0x62   :  { %943 = vmatprep.mubr.bf16.mxu0 %v2168_v39  ;;  %1135 = vmatprep.mubr.bf16.mxu1 %v2170_v40  ;;  %v2250_v38 = vld [vmem:[%s3431_s0 + $0x260] ss:$12 sps:$4 sm:$0xff]   ;;  %v2251_v39 = vld [vmem:[%s3431_s0 + $0x1fc] ss:$12 sps:$4 sm:$0xff]   ;;  %v2253_v40 = vld [vmem:[%s3431_s0 + $0x278] ss:$12 sps:$4 sm:$0xff]  }
  0x69   :  { %944 = vmatmul.mubr.bf16.gmra.mxu0 %v2172_v41  ;;  %1136 = vmatmul.mubr.bf16.gmra.mxu1 %v2173_v42  ;;  %v2254_v41 = vld [vmem:[%s3431_s0 + $0x1f8] ss:$12 sps:$4 sm:$0xff]   ;;  %v2255_v42 = vld [vmem:[%s3431_s0 + $0x290] ss:$12 sps:$4 sm:$0xff]  }
  0x6a   :  { %951 = vmatprep.mubr.bf16.mxu0 %v2174_v43  ;;  %1143 = vmatprep.mubr.bf16.mxu1 %v2176_v44  ;;  %v2256_v43 = vld [vmem:[%s3431_s0 + $0x214] ss:$12 sps:$4 sm:$0xff]  }
  0x6b   :  { %v2258_v44 = vld [vmem:[%s3431_s0 + $0x2a8] ss:$12 sps:$4 sm:$0xff]  }
  0x71   :  { %952 = vmatmul.mubr.bf16.gmra.mxu0 %v2178_v45  ;;  %1144 = vmatmul.mubr.bf16.gmra.mxu1 %v2179_v46  ;;  %v2259_v45 = vld [vmem:[%s3431_s0 + $0x210] ss:$12 sps:$4 sm:$0xff]   ;;  %v2260_v46 = vld [vmem:[%s3431_s0 + $0x2c0] ss:$12 sps:$4 sm:$0xff]  }
  0x72   :  { %959 = vmatprep.mubr.bf16.mxu0 %v2180_v47  ;;  %1151 = vmatprep.mubr.bf16.mxu1 %v2182_v48  ;;  %v2261_v47 = vld [vmem:[%s3431_s0 + $0x22c] ss:$12 sps:$4 sm:$0xff]  }
  0x73   :  { %v2263_v48 = vld [vmem:[%s3431_s0 + $0x2d8] ss:$12 sps:$4 sm:$0xff]  }
  0x79   :  { %960 = vmatmul.mubr.bf16.gmra.mxu0 %v2184_v49  ;;  %1152 = vmatmul.mubr.bf16.gmra.mxu1 %v2185_v50  ;;  %v2264_v49 = vld [vmem:[%s3431_s0 + $0x228] ss:$12 sps:$4 sm:$0xff]   ;;  %v2265_v50 = vld [vmem:[%s3431_s0 + $0x2f0] ss:$12 sps:$4 sm:$0xff]  }
  0x7a   :  { %967 = vmatprep.mubr.bf16.mxu0 %v2186_v51  ;;  %2023 = vmatprep.mubr.msk.bf16.mxu1 %vm774_vm0, %v2188_v52 }
  0x81   :  { %968 = vmatmul.mubr.bf16.gmra.mxu0 %v2189_v53  ;;  %2024 = vmatmul.mubr.msk.bf16.vlgmr.msra.gmra.mxu1 %vm774_vm0, %v2190_v54 }
  0x82   :  { %975 = vmatprep.mubr.bf16.mxu0 %v2191_v55  ;;  %2027 = vmatprep.mubr.msk.bf16.mxu1 %vm774_vm0, %v2193_v56 }
  0x89   :  { %976 = vmatmul.mubr.bf16.gmra.mxu0 %v2194_v57  ;;  %2028 = vmatmul.mubr.msk.bf16.gmra.mxu1 %vm774_vm0, %v2195_v58 }
  0x8a   :  { %983 = vmatprep.mubr.bf16.mxu0 %v2196_v59  ;;  %2031 = vmatprep.mubr.msk.bf16.mxu1 %vm774_vm0, %v2198_v60 }
  0x91   :  { %984 = vmatmul.mubr.bf16.gmra.mxu0 %v2199_v61  ;;  %2032 = vmatmul.mubr.msk.bf16.gmra.mxu1 %vm774_vm0, %v2200_v62 }
  0x92   :  { %991 = vmatprep.mubr.bf16.mxu0 %v2201_v63  ;;  %2035 = vmatprep.mubr.msk.bf16.mxu1 %vm774_vm0, %v2203_v0 }
  0x99   :  { %992 = vmatmul.mubr.bf16.gmra.mxu0 %v2204_v1  ;;  %2036 = vmatmul.mubr.msk.bf16.gmra.mxu1 %vm774_vm0, %v2205_v2 }
  0x9a   :  { %999 = vmatprep.mubr.bf16.mxu0 %v2206_v3  ;;  %2039 = vmatprep.mubr.msk.bf16.mxu1 %vm774_vm0, %v2208_v4 }
  0xa1   :  { %1000 = vmatmul.mubr.bf16.gmra.mxu0 %v2209_v5  ;;  %2040 = vmatmul.mubr.msk.bf16.gmra.mxu1 %vm774_vm0, %v2210_v6 }
  0xa2   :  { %1007 = vmatprep.mubr.bf16.mxu0 %v2211_v7  ;;  %2043 = vmatprep.mubr.msk.bf16.mxu1 %vm774_vm0, %v2213_v8 }
  0xa9   :  { %1008 = vmatmul.mubr.bf16.gmra.mxu0 %v2214_v9  ;;  %2044 = vmatmul.mubr.msk.bf16.gmra.mxu1 %vm774_vm0, %v2215_v10 }
  0xaa   :  { %1015 = vmatprep.mubr.bf16.mxu0 %v2216_v11  ;;  %2047 = vmatprep.mubr.msk.bf16.mxu1 %vm774_vm0, %v2218_v12 }
  0xb1   :  { %1016 = vmatmul.mubr.bf16.gmra.mxu0 %v2219_v13  ;;  %2048 = vmatmul.mubr.msk.bf16.gmra.mxu1 %vm774_vm0, %v2220_v14 }
  0xb2   :  { %1023 = vmatprep.mubr.bf16.mxu0 %v2221_v15  ;;  %2051 = vmatprep.mubr.msk.bf16.mxu1 %vm774_vm0, %v2223_v16 }
  0xb9   :  { %1024 = vmatmul.mubr.bf16.gmra.mxu0 %v2224_v17  ;;  %2052 = vmatmul.mubr.msk.bf16.gmra.mxu1 %vm774_vm0, %v2225_v18 }
  0xba   :  { %1031 = vmatprep.mubr.bf16.mxu0 %v2226_v19  ;;  %2055 = vmatprep.mubr.msk.bf16.mxu1 %vm774_vm0, %v2228_v20 }
  0xc1   :  { %1032 = vmatmul.mubr.bf16.gmra.mxu0 %v2229_v21  ;;  %2056 = vmatmul.mubr.msk.bf16.gmra.mxu1 %vm774_vm0, %v2230_v22 }
  0xc2   :  { %1039 = vmatprep.mubr.bf16.mxu0 %v2231_v23  ;;  %2059 = vmatprep.mubr.msk.bf16.mxu1 %vm774_vm0, %v2233_v24 }
  0xc9   :  { %1040 = vmatmul.mubr.bf16.gmra.mxu0 %v2234_v25  ;;  %2060 = vmatmul.mubr.msk.bf16.gmra.mxu1 %vm774_vm0, %v2235_v26 }
  0xca   :  { %1047 = vmatprep.mubr.bf16.mxu0 %v2236_v27  ;;  %2063 = vmatprep.mubr.msk.bf16.mxu1 %vm774_vm0, %v2238_v28 }
  0xd1   :  { %1048 = vmatmul.mubr.bf16.gmra.mxu0 %v2239_v29  ;;  %2064 = vmatmul.mubr.msk.bf16.gmra.mxu1 %vm774_vm0, %v2240_v30 }
  0xd2   :  { %1055 = vmatprep.mubr.bf16.mxu0 %v2241_v31  ;;  %2067 = vmatprep.mubr.msk.bf16.mxu1 %vm774_vm0, %v2243_v32 }
  0xd9   :  { %1056 = vmatmul.mubr.bf16.gmra.mxu0 %v2244_v33  ;;  %2068 = vmatmul.mubr.msk.bf16.gmra.mxu1 %vm774_vm0, %v2245_v34 }
  0xda   :  { %1063 = vmatprep.mubr.bf16.mxu0 %v2246_v35  ;;  %2071 = vmatprep.mubr.msk.bf16.mxu1 %vm774_vm0, %v2248_v36 }
  0xe1   :  { %1064 = vmatmul.mubr.bf16.gmra.mxu0 %v2249_v37  ;;  %2072 = vmatmul.mubr.msk.bf16.gmra.mxu1 %vm774_vm0, %v2250_v38 }
  0xe2   :  { %1071 = vmatprep.mubr.bf16.mxu0 %v2251_v39  ;;  %2075 = vmatprep.mubr.msk.bf16.mxu1 %vm774_vm0, %v2253_v40 }
  0xe9   :  { %1072 = vmatmul.mubr.bf16.gmra.mxu0 %v2254_v41  ;;  %2076 = vmatmul.mubr.msk.bf16.gmra.mxu1 %vm774_vm0, %v2255_v42 }
  0xea   :  { %1079 = vmatprep.mubr.bf16.mxu0 %v2256_v43  ;;  %2079 = vmatprep.mubr.msk.bf16.mxu1 %vm774_vm0, %v2258_v44 }
  0xf1   :  { %1080 = vmatmul.mubr.bf16.gmra.mxu0 %v2259_v45  ;;  %2080 = vmatmul.mubr.msk.bf16.gmra.mxu1 %vm774_vm0, %v2260_v46 }
  0xf2   :  { %1087 = vmatprep.mubr.bf16.mxu0 %v2261_v47  ;;  %2083 = vmatprep.mubr.msk.bf16.mxu1 %vm774_vm0, %v2263_v48 }
  0xf9   :  { %1088 = vmatmul.mubr.bf16.gmra.mxu0 %v2264_v49  ;;  %2084 = vmatmul.mubr.msk.bf16.gmra.mxu1 %vm774_vm0, %v2265_v50  ;;  %v3013_v49 = vld [vmem:[%s3432_s2] ss:$0 sm:$0xff] }
 0x101   :  { %v2950_v51 = vpop.f32.mrf.mxu0  ;;  %v2952_v52 = vpop.f32.mrf.mxu1 }
 0x103   :  { %v907_v53 = vpop.f32.mrf.mxu0  ;;  %v1099_v54 = vpop.f32.mrf.mxu1 }
 0x105   :  { %v2954_v55 = vpop.f32.mrf.mxu0  ;;  %v2956_v56 = vpop.f32.mrf.mxu1 }
 0x107   :  { %v910_v57 = vpop.f32.mrf.mxu0  ;;  %v1102_v58 = vpop.f32.mrf.mxu1 }
 0x109   :  { %v913_v59 = vpop.f32.mrf.mxu0  ;;  %v2958_v60 = vpop.f32.mrf.mxu1 }
 0x10a   :  { %v914_v54 = vadd.f32 %v3013_v49, %v913_v59 }
 0x10b   :  { %v915_v61 = vpop.f32.mrf.mxu0  ;;  %v1107_v62 = vpop.f32.mrf.mxu1 }
 0x10c   :  { %v906_v61 = vadd.f32 %v3013_v49, %v2950_v51 }
 0x10d   :  { %v916_v63 = vpop.f32.mrf.mxu0  ;;  %v2960_v0 = vpop.f32.mrf.mxu1 }
 0x10f   :  { %v918_v1 = vpop.f32.mrf.mxu0  ;;  %v1110_v2 = vpop.f32.mrf.mxu1 }
 0x111   :  { %v2962_v3 = vpop.f32.mrf.mxu0  ;;  %v2964_v4 = vpop.f32.mrf.mxu1 }
 0x113   :  { %v923_v5 = vpop.f32.mrf.mxu0  ;;  %v1115_v6 = vpop.f32.mrf.mxu1 }
 0x114   :  { %v917_v5 = vadd.f32 %v3013_v49, %v916_v63 }
 0x115   :  { %v2966_v7 = vpop.f32.mrf.mxu0  ;;  %v2968_v8 = vpop.f32.mrf.mxu1 }
 0x117   :  { %v926_v9 = vpop.f32.mrf.mxu0  ;;  %v1118_v10 = vpop.f32.mrf.mxu1 }
 0x119   :  { %v2970_v11 = vpop.f32.mrf.mxu0  ;;  %v2972_v12 = vpop.f32.mrf.mxu1 }
 0x11a   :  { %v930_v63 = vadd.f32 %v3013_v49, %v2970_v11 }
 0x11b   :  { %v931_v13 = vpop.f32.mrf.mxu0  ;;  %v1123_v14 = vpop.f32.mrf.mxu1 }
 0x11c   :  { %v909_v14 = vadd.f32 %v3013_v49, %v2954_v55 }
 0x11d   :  { %v2974_v15 = vpop.f32.mrf.mxu0  ;;  %v2976_v16 = vpop.f32.mrf.mxu1 }
 0x11f   :  { %v934_v17 = vpop.f32.mrf.mxu0  ;;  %v1126_v18 = vpop.f32.mrf.mxu1 }
 0x121   :  { %v2978_v19 = vpop.f32.mrf.mxu0  ;;  %v2980_v20 = vpop.f32.mrf.mxu1 }
 0x123   :  { %v939_v21 = vpop.f32.mrf.mxu0  ;;  %v1131_v22 = vpop.f32.mrf.mxu1 }
 0x125   :  { %v2982_v23 = vpop.f32.mrf.mxu0  ;;  %v2984_v24 = vpop.f32.mrf.mxu1 }
 0x127   :  { %v942_v25 = vpop.f32.mrf.mxu0  ;;  %v1134_v26 = vpop.f32.mrf.mxu1 }
 0x129   :  { %v2986_v27 = vpop.f32.mrf.mxu0  ;;  %v2988_v28 = vpop.f32.mrf.mxu1 }
 0x12b   :  { %v947_v29 = vpop.f32.mrf.mxu0  ;;  %v1139_v30 = vpop.f32.mrf.mxu1 }
 0x12d   :  { %v2990_v31 = vpop.f32.mrf.mxu0  ;;  %v2992_v32 = vpop.f32.mrf.mxu1 }
 0x12f   :  { %v950_v33 = vpop.f32.mrf.mxu0  ;;  %v1142_v34 = vpop.f32.mrf.mxu1 }
 0x130   :  { %v922_v33 = vadd.f32 %v3013_v49, %v2962_v3 }
 0x131   :  { %v2994_v35 = vpop.f32.mrf.mxu0  ;;  %v2996_v36 = vpop.f32.mrf.mxu1 }
 0x133   :  { %v955_v37 = vpop.f32.mrf.mxu0  ;;  %v1147_v38 = vpop.f32.mrf.mxu1 }
 0x135   :  { %v2998_v39 = vpop.f32.mrf.mxu0  ;;  %v3000_v40 = vpop.f32.mrf.mxu1 }
 0x137   :  { %v958_v41 = vpop.f32.mrf.mxu0  ;;  %v1150_v42 = vpop.f32.mrf.mxu1 }
 0x138   :  { %v933_v42 = vadd.f32 %v3013_v49, %v2974_v15  ;;  %v946_v15 = vadd.f32 %v3013_v49, %v2986_v27  ;;  %v949_v27 = vadd.f32 %v3013_v49, %v2990_v31 }
 0x139   :  { %v3002_v43 = vpop.f32.mrf.mxu0  ;;  %v3004_v44 = vpop.f32.mrf.mxu1 }
 0x13b   :  { %v963_v45 = vpop.f32.mrf.mxu0  ;;  %v1155_v46 = vpop.f32.mrf.mxu1 }
 0x13d   :  { %v3006_v47 = vpop.f32.mrf.mxu0  ;;  %v3008_v48 = vpop.f32.mrf.mxu1 }
 0x13f   :  { %v966_v50 = vpop.f32.mrf.mxu0  ;;  %v1158_v53 = vpop.f32.mrf.mxu1 }
 0x141   :  { %v3016_v57 = vpop.f32.mrf.mxu0  ;;  %v2025_v58 = vpop.f32.mrf.mxu1 }
 0x142   :  { %v1203_v62 = vadd.f32 %v2025_v58, %v914_v54  ;;  %v925_v54 = vadd.f32 %v3013_v49, %v2966_v7 }
 0x143   :  { %v971_v1 = vpop.f32.mrf.mxu0  ;;  %v1194_v2 = vpop.f32.mrf.mxu1 }
 0x144   :  { %v1451_v6 = vsub.f32 0.0, %v1203_v62  ;;  %v1195_v9 = vadd.f32 %v1194_v2, %v906_v61 }
 0x145   :  { %v3021_v10 = vpop.f32.mrf.mxu0  ;;  %v2026_v13 = vpop.f32.mrf.mxu1 }
 0x146   :  { %v1517_v59 = vmul.f32 1.442695, %v1451_v6  ;;  %v1449_v17 = vsub.f32 0.0, %v1195_v9  ;;  %v1206_v18 = vadd.f32 %v2026_v13, %v917_v5 }
 0x147   :  { %v974_v21 = vpop.f32.mrf.mxu0  ;;  %v1197_v22 = vpop.f32.mrf.mxu1 }
 0x148   :  { %2266 = vpow2.f32 %v1517_v59  ;;  %v1513_v51 = vmul.f32 1.442695, %v1449_v17  ;;  %v1452_v25 = vsub.f32 0.0, %v1206_v18  ;;  %v1198_v26 = vadd.f32 %v1197_v22, %v909_v14 }
 0x149   :  { %v3027_v29 = vpop.f32.mrf.mxu0  ;;  %v2029_v30 = vpop.f32.mrf.mxu1  ;;  %v938_v14 = vadd.f32 %v3013_v49, %v2978_v19  ;;  %v941_v19 = vadd.f32 %v3013_v49, %v2982_v23 }
 0x14a   :  { %2268 = vpow2.f32 %v1513_v51  ;;  %v1519_v55 = vmul.f32 1.442695, %v1452_v25  ;;  %v1450_v34 = vsub.f32 0.0, %v1198_v26  ;;  %v1219_v37 = vadd.f32 %v2029_v30, %v930_v63 }
 0x14b   :  { %v979_v38 = vpop.f32.mrf.mxu0  ;;  %v1210_v41 = vpop.f32.mrf.mxu1 }
 0x14c   :  { %2270 = vpow2.f32 %v1519_v55  ;;  %v1515_v45 = vmul.f32 1.442695, %v1450_v34  ;;  %v1211_v46 = vadd.f32 %v1210_v41, %v922_v33  ;;  %v1455_v50 = vsub.f32 0.0, %v1219_v37 }
 0x14d   :  { %v3033_v11 = vpop.f32.mrf.mxu0  ;;  %v2030_v53 = vpop.f32.mrf.mxu1 }
 0x14e   :  { %2272 = vpow2.f32 %v1515_v45  ;;  %v1453_v3 = vsub.f32 0.0, %v1211_v46  ;;  %v1222_v58 = vadd.f32 %v2030_v53, %v933_v42  ;;  %v1525_v61 = vmul.f32 1.442695, %v1455_v50 }
 0x14f   :  { %v982_v62 = vpop.f32.mrf.mxu0  ;;  %v1213_v1 = vpop.f32.mrf.mxu1  ;;  %v962_v53 = vadd.f32 %v3013_v49, %v3002_v43 }
 0x150   :  { %v1521_v2 = vmul.f32 1.442695, %v1453_v3  ;;  %v1456_v5 = vsub.f32 0.0, %v1222_v58  ;;  %v1214_v6 = vadd.f32 %v1213_v1, %v925_v54  ;;  %2274 = vpow2.f32 %v1525_v61 }
 0x151   :  { %v3039_v9 = vpop.f32.mrf.mxu0  ;;  %v2033_v13 = vpop.f32.mrf.mxu1  ;;  %v954_v58 = vadd.f32 %v3013_v49, %v2994_v35 }
 0x152   :  { %2276 = vpow2.f32 %v1521_v2  ;;  %v1527_v7 = vmul.f32 1.442695, %v1456_v5  ;;  %v1454_v59 = vsub.f32 0.0, %v1214_v6  ;;  %v1235_v17 = vadd.f32 %v2033_v13, %v946_v15 }
 0x153   :  { %v987_v18 = vpop.f32.mrf.mxu0  ;;  %v1226_v21 = vpop.f32.mrf.mxu1  ;;  %v965_v2 = vadd.f32 %v3013_v49, %v3006_v47 }
 0x154   :  { %2278 = vpow2.f32 %v1527_v7  ;;  %v1523_v22 = vmul.f32 1.442695, %v1454_v59  ;;  %v1227_v51 = vadd.f32 %v1226_v21, %v938_v14  ;;  %v1459_v26 = vsub.f32 0.0, %v1235_v17 }
 0x155   :  { %v2267_v25 = vpop.eup %2266  ;;  %v3045_v63 = vpop.f32.mrf.mxu0  ;;  %v957_v21 = vadd.f32 %v3013_v49, %v2998_v39 }
 0x156   :  { %v2034_v30 = vpop.f32.mrf.mxu1  ;;  %v1643_v33 = vadd.f32 1.0, %v2267_v25  ;;  %2280 = vpow2.f32 %v1523_v22  ;;  %v1457_v55 = vsub.f32 0.0, %v1227_v51  ;;  %v1533_v37 = vmul.f32 1.442695, %v1459_v26 }
 0x157   :  { %v2269_v34 = vpop.eup %2268  ;;  %v1238_v38 = vadd.f32 %v2034_v30, %v949_v27  ;;  %v990_v41 = vpop.f32.mrf.mxu0 }
 0x158   :  { %v1229_v42 = vpop.f32.mrf.mxu1  ;;  %2282 = vrcp.f32 %v1643_v33  ;;  %v1641_v45 = vadd.f32 1.0, %v2269_v34  ;;  %v1529_v46 = vmul.f32 1.442695, %v1457_v55 }
 0x159   :  { %v1230_v50 = vadd.f32 %v1229_v42, %v941_v19  ;;  %v2271_v31 = vpop.eup %2270  ;;  %2284 = vpow2.f32 %v1533_v37  ;;  %v1460_v54 = vsub.f32 0.0, %v1238_v38  ;;  %v3051_v3 = vpop.f32.mrf.mxu0  ;;  %v978_v37 = vadd.f32 %v3013_v49, %v3027_v29 }
 0x15a   :  { %v2037_v23 = vpop.f32.mrf.mxu1  ;;  %2286 = vrcp.f32 %v1641_v45  ;;  %v1644_v61 = vadd.f32 1.0, %v2271_v31  ;;  %v970_v42 = vadd.f32 %v3013_v49, %v3016_v57  ;;  %v981_v31 = vadd.f32 %v3013_v49, %v3033_v11 }
 0x15b   :  { %v1458_v62 = vsub.f32 0.0, %v1230_v50  ;;  %v2273_v1 = vpop.eup %2272  ;;  %2288 = vpow2.f32 %v1529_v46  ;;  %v1535_v5 = vmul.f32 1.442695, %v1460_v54  ;;  %v1251_v6 = vadd.f32 %v2037_v23, %v962_v53  ;;  %v995_v15 = vpop.f32.mrf.mxu0 }
 0x15c   :  { %v1242_v43 = vpop.f32.mrf.mxu1  ;;  %2290 = vrcp.f32 %v1644_v61  ;;  %v1642_v13 = vadd.f32 1.0, %v2273_v1  ;;  %v973_v11 = vadd.f32 %v3013_v49, %v3021_v10 }
 0x15d   :  { %v1531_v14 = vmul.f32 1.442695, %v1458_v62  ;;  %v1243_v7 = vadd.f32 %v1242_v43, %v954_v58  ;;  %2292 = vpow2.f32 %v1535_v5  ;;  %v1463_v59 = vsub.f32 0.0, %v1251_v6  ;;  %v3057_v17 = vpop.f32.mrf.mxu0  ;;  %v2275_v18 = vpop.eup %2274 }
 0x15e   :  { %v2038_v35 = vpop.f32.mrf.mxu1  ;;  %2294 = vrcp.f32 %v1642_v13  ;;  %v1647_v25 = vadd.f32 1.0, %v2275_v18 }
 0x15f   :  { %v1461_v47 = vsub.f32 0.0, %v1243_v7  ;;  %v1254_v22 = vadd.f32 %v2038_v35, %v965_v2  ;;  %v2277_v51 = vpop.eup %2276  ;;  %2296 = vpow2.f32 %v1531_v14  ;;  %v1541_v27 = vmul.f32 1.442695, %v1463_v59  ;;  %v998_v26 = vpop.f32.mrf.mxu0 }
 0x160   :  { %v1245_v30 = vpop.f32.mrf.mxu1  ;;  %v1645_v19 = vadd.f32 1.0, %v2277_v51  ;;  %2298 = vrcp.f32 %v1647_v25  ;;  %v994_v25 = vadd.f32 %v3013_v49, %v3051_v3 }
 0x161   :  { %v1464_v33 = vsub.f32 0.0, %v1254_v22  ;;  %v1246_v55 = vadd.f32 %v1245_v30, %v957_v21  ;;  %v2279_v34 = vpop.eup %2278  ;;  %v1537_v38 = vmul.f32 1.442695, %v1461_v47  ;;  %v3063_v39 = vpop.f32.mrf.mxu0 }
 0x162   :  { %v2041_v41 = vpop.f32.mrf.mxu1  ;;  %2300 = vrcp.f32 %v1645_v19  ;;  %v1648_v45 = vadd.f32 1.0, %v2279_v34  ;;  %v986_v19 = vadd.f32 %v3013_v49, %v3039_v9 }
 0x163   :  { %v1462_v46 = vsub.f32 0.0, %v1246_v55  ;;  %v2281_v50 = vpop.eup %2280  ;;  %2302 = vpow2.f32 %v1541_v27  ;;  %v1543_v53 = vmul.f32 1.442695, %v1464_v33  ;;  %v1267_v54 = vadd.f32 %v2041_v41, %v978_v37  ;;  %v1003_v23 = vpop.f32.mrf.mxu0 }
 0x164   :  { %v1258_v29 = vpop.f32.mrf.mxu1  ;;  %2304 = vrcp.f32 %v1648_v45  ;;  %v1646_v58 = vadd.f32 1.0, %v2281_v50  ;;  %v997_v45 = vadd.f32 %v3013_v49, %v3057_v17 }
 0x165   :  { %v1539_v61 = vmul.f32 1.442695, %v1462_v46  ;;  %v1259_v62 = vadd.f32 %v1258_v29, %v970_v42  ;;  %v2283_v1 = vpop.eup %2282  ;;  %2306 = vpow2.f32 %v1537_v38  ;;  %v1467_v2 = vsub.f32 0.0, %v1267_v54  ;;  %v3069_v57 = vpop.f32.mrf.mxu0 }
 0x166   :  { %v2042_v5 = vpop.f32.mrf.mxu1  ;;  %v2285_v6 = vpop.eup %2284  ;;  %1772 = vst.msk [vmem:[%s3433_s3 + $0x10] sm:$0xff] %vm1769_vm1, %v2283_v1  ;;  %2308 = vrcp.f32 %v1646_v58  ;;  %v989_v29 = vadd.f32 %v3013_v49, %v3045_v63 }
 0x167   :  { %v1465_v15 = vsub.f32 0.0, %v1259_v62  ;;  %v1270_v43 = vadd.f32 %v2042_v5, %v981_v31  ;;  %v2287_v13 = vpop.eup %2286  ;;  %v1651_v14 = vadd.f32 1.0, %v2285_v6  ;;  %2310 = vpow2.f32 %v1543_v53  ;;  %v1006_v59 = vpop.f32.mrf.mxu0 }
 0x168   :  { %v1549_v7 = vmul.f32 1.442695, %v1467_v2  ;;  %v1261_v35 = vpop.f32.mrf.mxu1  ;;  %v2289_v18 = vpop.eup %2288  ;;  %1770 = vst.msk [vmem:[%s3433_s3] sm:$0xff] %vm1769_vm1, %v2287_v13  ;;  %2312 = vpow2.f32 %v1539_v61 }
 0x169   :  { %v1545_v21 = vmul.f32 1.442695, %v1465_v15  ;;  %v1468_v47 = vsub.f32 0.0, %v1270_v43  ;;  %v1262_v22 = vadd.f32 %v1261_v35, %v973_v11  ;;  %v2291_v10 = vpop.eup %2290  ;;  %2314 = vrcp.f32 %v1651_v14  ;;  %v1009_v27 = vpop.f32.mrf.mxu0 }
 0x16a   :  { %v1649_v51 = vadd.f32 1.0, %v2289_v18  ;;  %v2045_v26 = vpop.f32.mrf.mxu1  ;;  %v2293_v30 = vpop.eup %2292  ;;  %1773 = vst.msk [vmem:[%s3433_s3 + $0x18] sm:$0xff] %vm1769_vm1, %v2291_v10  ;;  %2316 = vpow2.f32 %v1549_v7  ;;  %v1010_v13 = vadd.f32 %v3013_v49, %v1009_v27  ;;  %v1002_v35 = vadd.f32 %v3013_v49, %v3063_v39 }
 0x16b   :  { %v1551_v33 = vmul.f32 1.442695, %v1468_v47  ;;  %v1466_v55 = vsub.f32 0.0, %v1262_v22  ;;  %v2295_v34 = vpop.eup %2294  ;;  %v1652_v37 = vadd.f32 1.0, %v2293_v30  ;;  %v1283_v38 = vadd.f32 %v2045_v26, %v994_v25  ;;  %v1011_v41 = vpop.f32.mrf.mxu0 }
 0x16c   :  { %2318 = vrcp.f32 %v1649_v51  ;;  %v1274_v3 = vpop.f32.mrf.mxu1  ;;  %v2297_v42 = vpop.eup %2296  ;;  %1771 = vst.msk [vmem:[%s3433_s3 + $0x8] sm:$0xff] %vm1769_vm1, %v2295_v34 }
 0x16d   :  { %2320 = vpow2.f32 %v1545_v21  ;;  %v1547_v9 = vmul.f32 1.442695, %v1466_v55  ;;  %v1275_v46 = vadd.f32 %v1274_v3, %v986_v19  ;;  %v1650_v50 = vadd.f32 1.0, %v2297_v42  ;;  %v1012_v53 = vpop.f32.mrf.mxu0  ;;  %v2299_v23 = vpop.eup %2298 }
 0x16e   :  { %2322 = vrcp.f32 %v1652_v37  ;;  %v1471_v31 = vsub.f32 0.0, %v1283_v38  ;;  %v2046_v54 = vpop.f32.mrf.mxu1  ;;  %1776 = vst.msk [vmem:[%s3433_s3 + $0x30] sm:$0xff] %vm1769_vm1, %v2299_v23  ;;  %v1005_v3 = vadd.f32 %v3013_v49, %v3069_v57 }
 0x16f   :  { %2324 = vpow2.f32 %v1551_v33  ;;  %v1469_v58 = vsub.f32 0.0, %v1275_v46  ;;  %v1286_v61 = vadd.f32 %v2046_v54, %v997_v45  ;;  %v2301_v62 = vpop.eup %2300  ;;  %v1014_v1 = vpop.f32.mrf.mxu0  ;;  %v1013_v33 = vadd.f32 %v3013_v49, %v1012_v53 }
 0x170   :  { %2326 = vrcp.f32 %v1650_v50  ;;  %v1557_v17 = vmul.f32 1.442695, %v1471_v31  ;;  %v1277_v2 = vpop.f32.mrf.mxu1  ;;  %v2303_v5 = vpop.eup %2302  ;;  %1774 = vst.msk [vmem:[%s3433_s3 + $0x20] sm:$0xff] %vm1769_vm1, %v2301_v62 }
 0x171   :  { %2328 = vpow2.f32 %v1547_v9  ;;  %v1553_v63 = vmul.f32 1.442695, %v1469_v58  ;;  %v1472_v6 = vsub.f32 0.0, %v1286_v61  ;;  %v1278_v11 = vadd.f32 %v1277_v2, %v989_v29  ;;  %v2305_v15 = vpop.eup %2304  ;;  %v1017_v14 = vpop.f32.mrf.mxu0 }
 0x172   :  { %v1655_v43 = vadd.f32 1.0, %v2303_v5  ;;  %2330 = vpow2.f32 %v1557_v17  ;;  %v2049_v7 = vpop.f32.mrf.mxu1  ;;  %v2307_v59 = vpop.eup %2306  ;;  %1777 = vst.msk [vmem:[%s3433_s3 + $0x38] sm:$0xff] %vm1769_vm1, %v2305_v15 }
 0x173   :  { %2332 = vpow2.f32 %v1553_v63  ;;  %v1559_v18 = vmul.f32 1.442695, %v1472_v6  ;;  %v1470_v21 = vsub.f32 0.0, %v1278_v11  ;;  %v2309_v47 = vpop.eup %2308  ;;  %v1653_v22 = vadd.f32 1.0, %v2307_v59  ;;  %v1019_v51 = vpop.f32.mrf.mxu0 }
 0x174   :  { %2334 = vrcp.f32 %v1655_v43  ;;  %v1299_v10 = vadd.f32 %v2049_v7, %v1010_v13  ;;  %v1290_v25 = vpop.f32.mrf.mxu1  ;;  %v2311_v27 = vpop.eup %2310  ;;  %1775 = vst.msk [vmem:[%s3433_s3 + $0x28] sm:$0xff] %vm1769_vm1, %v2309_v47  ;;  %v1018_v6 = vadd.f32 %v3013_v49, %v1017_v14 }
 0x175   :  { %2336 = vpow2.f32 %v1559_v18  ;;  %v1555_v26 = vmul.f32 1.442695, %v1470_v21  ;;  %v1291_v30 = vadd.f32 %v1290_v25, %v1002_v35  ;;  %v2313_v19 = vpop.eup %2312  ;;  %v1656_v39 = vadd.f32 1.0, %v2311_v27  ;;  %v1020_v34 = vpop.f32.mrf.mxu0 }
 0x176   :  { %2338 = vrcp.f32 %v1653_v22  ;;  %v1475_v55 = vsub.f32 0.0, %v1299_v10  ;;  %v2050_v37 = vpop.f32.mrf.mxu1  ;;  %v2315_v38 = vpop.eup %2314  ;;  %v1654_v41 = vadd.f32 1.0, %v2313_v19 }
 0x177   :  { %2340 = vpow2.f32 %v1555_v26  ;;  %v1473_v42 = vsub.f32 0.0, %v1291_v30  ;;  %v2317_v45 = vpop.eup %2316  ;;  %1780 = vst.msk [vmem:[%s3433_s3 + $0x50] sm:$0xff] %vm1769_vm1, %v2315_v38  ;;  %v1302_v46 = vadd.f32 %v2050_v37, %v1013_v33  ;;  %v1022_v50 = vpop.f32.mrf.mxu0  ;;  %v1021_v30 = vadd.f32 %v3013_v49, %v1020_v34 }
 0x178   :  { %2342 = vrcp.f32 %v1656_v39  ;;  %v1565_v9 = vmul.f32 1.442695, %v1475_v55  ;;  %v1293_v31 = vpop.f32.mrf.mxu1  ;;  %v1659_v54 = vadd.f32 1.0, %v2317_v45 }
 0x179   :  { %v2319_v53 = vpop.eup %2318  ;;  %2344 = vrcp.f32 %v1654_v41  ;;  %v1561_v23 = vmul.f32 1.442695, %v1473_v42  ;;  %v1294_v29 = vadd.f32 %v1293_v31, %v1005_v3  ;;  %v1476_v57 = vsub.f32 0.0, %v1302_v46  ;;  %v1025_v61 = vpop.f32.mrf.mxu0 }
 0x17a   :  { %v2321_v58 = vpop.eup %2320  ;;  %1778 = vst.msk [vmem:[%s3433_s3 + $0x40] sm:$0xff] %vm1769_vm1, %v2319_v53  ;;  %2346 = vpow2.f32 %v1565_v9  ;;  %v2053_v62 = vpop.f32.mrf.mxu1  ;;  %v1026_v5 = vadd.f32 %v3013_v49, %v1025_v61 }
 0x17b   :  { %v2323_v17 = vpop.eup %2322  ;;  %2348 = vrcp.f32 %v1659_v54  ;;  %v1657_v1 = vadd.f32 1.0, %v2321_v58  ;;  %v1474_v2 = vsub.f32 0.0, %v1294_v29  ;;  %v1567_v11 = vmul.f32 1.442695, %v1476_v57  ;;  %v1027_v15 = vpop.f32.mrf.mxu0 }
 0x17c   :  { %v2325_v63 = vpop.eup %2324  ;;  %1781 = vst.msk [vmem:[%s3433_s3 + $0x58] sm:$0xff] %vm1769_vm1, %v2323_v17  ;;  %2350 = vpow2.f32 %v1561_v23  ;;  %v1306_v43 = vpop.f32.mrf.mxu1  ;;  %v1315_v35 = vadd.f32 %v2053_v62, %v1026_v5 }
 0x17d   :  { %v2327_v13 = vpop.eup %2326  ;;  %2352 = vrcp.f32 %v1657_v1  ;;  %v1660_v7 = vadd.f32 1.0, %v2325_v63  ;;  %v1563_v59 = vmul.f32 1.442695, %v1474_v2  ;;  %v1307_v21 = vadd.f32 %v1306_v43, %v1018_v6  ;;  %v1028_v47 = vpop.f32.mrf.mxu0 }
 0x17e   :  { %v2329_v18 = vpop.eup %2328  ;;  %1779 = vst.msk [vmem:[%s3433_s3 + $0x48] sm:$0xff] %vm1769_vm1, %v2327_v13  ;;  %2354 = vpow2.f32 %v1567_v11  ;;  %v2054_v22 = vpop.f32.mrf.mxu1  ;;  %v1479_v51 = vsub.f32 0.0, %v1315_v35  ;;  %v1029_v25 = vadd.f32 %v3013_v49, %v1028_v47 }
 0x17f   :  { %v2331_v14 = vpop.eup %2330  ;;  %2356 = vrcp.f32 %v1660_v7  ;;  %v1658_v10 = vadd.f32 1.0, %v2329_v18  ;;  %v1477_v19 = vsub.f32 0.0, %v1307_v21  ;;  %v1030_v39 = vpop.f32.mrf.mxu0 }
 0x180   :  { %v2333_v27 = vpop.eup %2332  ;;  %v1663_v26 = vadd.f32 1.0, %v2331_v14  ;;  %2358 = vpow2.f32 %v1563_v59  ;;  %v1309_v33 = vpop.f32.mrf.mxu1  ;;  %v1573_v38 = vmul.f32 1.442695, %v1479_v51  ;;  %v1318_v41 = vadd.f32 %v2054_v22, %v1029_v25 }
 0x181   :  { %v2335_v55 = vpop.eup %2334  ;;  %2360 = vrcp.f32 %v1658_v10  ;;  %v1661_v37 = vadd.f32 1.0, %v2333_v27  ;;  %v1569_v42 = vmul.f32 1.442695, %v1477_v19  ;;  %v1310_v45 = vadd.f32 %v1309_v33, %v1021_v30  ;;  %v1033_v9 = vpop.f32.mrf.mxu0 }
 0x182   :  { %v2337_v3 = vpop.eup %2336  ;;  %1784 = vst.msk [vmem:[%s3433_s3 + $0x70] sm:$0xff] %vm1769_vm1, %v2335_v55  ;;  %2362 = vrcp.f32 %v1663_v26  ;;  %v2057_v34 = vpop.f32.mrf.mxu1  ;;  %v1480_v31 = vsub.f32 0.0, %v1318_v41  ;;  %v1034_v53 = vadd.f32 %v3013_v49, %v1033_v9 }
 0x183   :  { %v2339_v46 = vpop.eup %2338  ;;  %2364 = vrcp.f32 %v1661_v37  ;;  %v1664_v50 = vadd.f32 1.0, %v2337_v3  ;;  %v1478_v23 = vsub.f32 0.0, %v1310_v45  ;;  %v1035_v29 = vpop.f32.mrf.mxu0 }
 0x184   :  { %v2341_v54 = vpop.eup %2340  ;;  %1782 = vst.msk [vmem:[%s3433_s3 + $0x60] sm:$0xff] %vm1769_vm1, %v2339_v46  ;;  %2366 = vpow2.f32 %v1573_v38  ;;  %v1322_v58 = vpop.f32.mrf.mxu1  ;;  %v1575_v62 = vmul.f32 1.442695, %v1480_v31 }
 0x185   :  { %v2343_v57 = vpop.eup %2342  ;;  %2368 = vrcp.f32 %v1664_v50  ;;  %v1662_v61 = vadd.f32 1.0, %v2341_v54  ;;  %v1323_v17 = vadd.f32 %v1322_v58, %v1034_v53  ;;  %v1571_v2 = vmul.f32 1.442695, %v1478_v23  ;;  %v1036_v5 = vpop.f32.mrf.mxu0 }
 0x186   :  { %v2345_v1 = vpop.eup %2344  ;;  %1785 = vst.msk [vmem:[%s3433_s3 + $0x78] sm:$0xff] %vm1769_vm1, %v2343_v57  ;;  %2370 = vpow2.f32 %v1569_v42  ;;  %v2058_v63 = vpop.f32.mrf.mxu1  ;;  %v1037_v15 = vadd.f32 %v3013_v49, %v1036_v5 }
 0x187   :  { %v2347_v6 = vpop.eup %2346  ;;  %1783 = vst.msk [vmem:[%s3433_s3 + $0x68] sm:$0xff] %vm1769_vm1, %v2345_v1  ;;  %2372 = vrcp.f32 %v1662_v61  ;;  %v1481_v11 = vsub.f32 0.0, %v1323_v17  ;;  %v1038_v7 = vpop.f32.mrf.mxu0 }
 0x188   :  { %v2349_v43 = vpop.eup %2348  ;;  %v1667_v13 = vadd.f32 1.0, %v2347_v6  ;;  %2374 = vpow2.f32 %v1575_v62  ;;  %v1325_v59 = vpop.f32.mrf.mxu1 }
 0x189   :  { %v2351_v35 = vpop.eup %2350  ;;  %1788 = vst.msk [vmem:[%s3433_s3 + $0x90] sm:$0xff] %vm1769_vm1, %v2349_v43  ;;  %2376 = vpow2.f32 %v1571_v2  ;;  %v1577_v18 = vmul.f32 1.442695, %v1481_v11  ;;  %v1326_v21 = vadd.f32 %v1325_v59, %v1037_v15  ;;  %v1041_v14 = vpop.f32.mrf.mxu0 }
 0x18a   :  { %v2353_v47 = vpop.eup %2352  ;;  %2378 = vrcp.f32 %v1667_v13  ;;  %v1665_v22 = vadd.f32 1.0, %v2351_v35  ;;  %v3161_v10 = vpop.f32.mrf.mxu1  ;;  %v1042_v27 = vadd.f32 %v3013_v49, %v1041_v14 }
 0x18b   :  { %v2355_v51 = vpop.eup %2354  ;;  %1786 = vst.msk [vmem:[%s3433_s3 + $0x80] sm:$0xff] %vm1769_vm1, %v2353_v47  ;;  %2380 = vpow2.f32 %v1577_v18  ;;  %v1482_v25 = vsub.f32 0.0, %v1326_v21  ;;  %v1043_v19 = vpop.f32.mrf.mxu0 }
 0x18c   :  { %v2357_v26 = vpop.eup %2356  ;;  %2382 = vrcp.f32 %v1665_v22  ;;  %v1668_v30 = vadd.f32 1.0, %v2355_v51  ;;  %v1338_v39 = vpop.f32.mrf.mxu1  ;;  %v1331_v37 = vadd.f32 %v2057_v34, %v1042_v27 }
 0x18d   :  { %v2359_v33 = vpop.eup %2358  ;;  %1789 = vst.msk [vmem:[%s3433_s3 + $0x98] sm:$0xff] %vm1769_vm1, %v2357_v26  ;;  %v1579_v55 = vmul.f32 1.442695, %v1482_v25  ;;  %v1044_v3 = vpop.f32.mrf.mxu0 }
 0x18e   :  { %v2361_v38 = vpop.eup %2360  ;;  %2384 = vrcp.f32 %v1668_v30  ;;  %v1666_v41 = vadd.f32 1.0, %v2359_v33  ;;  %v3172_v42 = vpop.f32.mrf.mxu1  ;;  %v1483_v9 = vsub.f32 0.0, %v1331_v37  ;;  %v1045_v46 = vadd.f32 %v3013_v49, %v1044_v3 }
 0x18f   :  { %v2363_v45 = vpop.eup %2362  ;;  %1787 = vst.msk [vmem:[%s3433_s3 + $0x88] sm:$0xff] %vm1769_vm1, %v2361_v38  ;;  %2386 = vpow2.f32 %v1579_v55  ;;  %v1046_v34 = vpop.f32.mrf.mxu0 }
 0x190   :  { %v2365_v50 = vpop.eup %2364  ;;  %1792 = vst.msk [vmem:[%s3433_s3 + $0xb0] sm:$0xff] %vm1769_vm1, %v2363_v45  ;;  %2388 = vrcp.f32 %v1666_v41  ;;  %v1341_v31 = vpop.f32.mrf.mxu1  ;;  %v1581_v54 = vmul.f32 1.442695, %v1483_v9  ;;  %v1334_v23 = vadd.f32 %v2058_v63, %v1045_v46 }
 0x191   :  { %v2367_v53 = vpop.eup %2366  ;;  %1790 = vst.msk [vmem:[%s3433_s3 + $0xa0] sm:$0xff] %vm1769_vm1, %v2365_v50  ;;  %v1049_v57 = vpop.f32.mrf.mxu0 }
 0x192   :  { %v2369_v29 = vpop.eup %2368  ;;  %v1671_v58 = vadd.f32 1.0, %v2367_v53  ;;  %v3187_v61 = vpop.f32.mrf.mxu1  ;;  %2390 = vpow2.f32 %v1581_v54  ;;  %v1484_v17 = vsub.f32 0.0, %v1334_v23  ;;  %v1050_v1 = vadd.f32 %v3013_v49, %v1049_v57 }
 0x193   :  { %v2371_v62 = vpop.eup %2370  ;;  %1793 = vst.msk [vmem:[%s3433_s3 + $0xb8] sm:$0xff] %vm1769_vm1, %v2369_v29  ;;  %v1051_v6 = vpop.f32.mrf.mxu0 }
 0x194   :  { %v2373_v2 = vpop.eup %2372  ;;  %2392 = vrcp.f32 %v1671_v58  ;;  %v1669_v5 = vadd.f32 1.0, %v2371_v62  ;;  %v3194_v63 = vpop.f32.mrf.mxu1  ;;  %v1583_v15 = vmul.f32 1.442695, %v1484_v17  ;;  %v1339_v43 = vadd.f32 %v1338_v39, %v1050_v1 }
 0x195   :  { %v2375_v11 = vpop.eup %2374  ;;  %1791 = vst.msk [vmem:[%s3433_s3 + $0xa8] sm:$0xff] %vm1769_vm1, %v2373_v2  ;;  %v1052_v59 = vpop.f32.mrf.mxu0 }
 0x196   :  { %v2377_v13 = vpop.eup %2376  ;;  %2394 = vrcp.f32 %v1669_v5  ;;  %v1672_v7 = vadd.f32 1.0, %v2375_v11  ;;  %v3200_v35 = vpop.f32.mrf.mxu1  ;;  %v1485_v47 = vsub.f32 0.0, %v1339_v43  ;;  %v1053_v22 = vadd.f32 %v3013_v49, %v1052_v59 }
 0x197   :  { %v2379_v18 = vpop.eup %2378  ;;  %v1670_v21 = vadd.f32 1.0, %v2377_v13  ;;  %2396 = vpow2.f32 %v1583_v15  ;;  %v1054_v51 = vpop.f32.mrf.mxu0 }
 0x198   :  { %v2381_v14 = vpop.eup %2380  ;;  %1796 = vst.msk [vmem:[%s3433_s3 + $0xd0] sm:$0xff] %vm1769_vm1, %v2379_v18  ;;  %2398 = vrcp.f32 %v1672_v7  ;;  %v3207_v25 = vpop.f32.mrf.mxu1  ;;  %v1585_v30 = vmul.f32 1.442695, %v1485_v47  ;;  %v1342_v19 = vadd.f32 %v1341_v31, %v1053_v22 }
 0x199   :  { %v2383_v27 = vpop.eup %2382  ;;  %2400 = vrcp.f32 %v1670_v21  ;;  %v1673_v26 = vadd.f32 1.0, %v2381_v14  ;;  %v1057_v39 = vpop.f32.mrf.mxu0 }
 0x19a   :  { %1794 = vst.msk [vmem:[%s3433_s3 + $0xc0] sm:$0xff] %vm1769_vm1, %v2383_v27  ;;  %v3213_v33 = vpop.f32.mrf.mxu1  ;;  %v1486_v37 = vsub.f32 0.0, %v1342_v19  ;;  %v1058_v38 = vadd.f32 %v3013_v49, %v1057_v39  ;;  %v1101_v27 = vadd.f32 %v3013_v49, %v2956_v56 }
 0x19b   :  { %v2385_v55 = vpop.eup %2384  ;;  %2402 = vrcp.f32 %v1673_v26  ;;  %v1059_v3 = vpop.f32.mrf.mxu0  ;;  %v1114_v26 = vadd.f32 %v3013_v49, %v2964_v4  ;;  %v1117_v4 = vadd.f32 %v3013_v49, %v2968_v8 }
 0x19c   :  { %v2387_v41 = vpop.eup %2386  ;;  %1797 = vst.msk [vmem:[%s3433_s3 + $0xd8] sm:$0xff] %vm1769_vm1, %v2385_v55  ;;  %2404 = vpow2.f32 %v1585_v30  ;;  %v3220_v45 = vpop.f32.mrf.mxu1  ;;  %v1587_v50 = vmul.f32 1.442695, %v1486_v37  ;;  %v1347_v34 = vadd.f32 %v3161_v10, %v1058_v38  ;;  %v1106_v10 = vadd.f32 %v3013_v49, %v2958_v60 }
 0x19d   :  { %v2389_v9 = vpop.eup %2388  ;;  %v1674_v46 = vadd.f32 1.0, %v2387_v41  ;;  %v1060_v31 = vpop.f32.mrf.mxu0  ;;  %v1098_v60 = vadd.f32 %v3013_v49, %v2952_v52  ;;  %v1109_v52 = vadd.f32 %v3013_v49, %v2960_v0 }
 0x19e   :  { %1795 = vst.msk [vmem:[%s3433_s3 + $0xc8] sm:$0xff] %vm1769_vm1, %v2389_v9  ;;  %v3227_v53 = vpop.f32.mrf.mxu1  ;;  %v1487_v54 = vsub.f32 0.0, %v1347_v34  ;;  %v1061_v23 = vadd.f32 %v3013_v49, %v1060_v31  ;;  %v1122_v31 = vadd.f32 %v3013_v49, %v2972_v12 }
 0x19f   :  { %2406 = vrcp.f32 %v1674_v46  ;;  %v2391_v29 = vpop.eup %2390  ;;  %v1062_v58 = vpop.f32.mrf.mxu0 }
 0x1a0   :  { %2408 = vpow2.f32 %v1587_v50  ;;  %v3230_v57 = vpop.f32.mrf.mxu1  ;;  %v1675_v17 = vadd.f32 1.0, %v2391_v29  ;;  %v1589_v1 = vmul.f32 1.442695, %v1487_v54  ;;  %v1350_v2 = vadd.f32 %v3172_v42, %v1061_v23 }
 0x1a1   :  { %v2393_v62 = vpop.eup %2392  ;;  %v1065_v5 = vpop.f32.mrf.mxu0 }
 0x1a2   :  { %1800 = vst.msk [vmem:[%s3433_s3 + $0xf0] sm:$0xff] %vm1769_vm1, %v2393_v62  ;;  %v2073_v6 = vpop.f32.mrf.mxu1  ;;  %2410 = vrcp.f32 %v1675_v17  ;;  %v1488_v15 = vsub.f32 0.0, %v1350_v2  ;;  %v1066_v43 = vadd.f32 %v3013_v49, %v1065_v5  ;;  %v3274_v17 = vld [vmem:[%s3432_s2] ss:$0 sm:$0xff] }
 0x1a3   :  { %v2395_v11 = vpop.eup %2394  ;;  %v1395_v13 = vadd.f32 %v2073_v6, %v1106_v10  ;;  %2412 = vpow2.f32 %v1589_v1  ;;  %v1067_v42 = vpop.f32.mrf.mxu0  ;;  %v1125_v2 = vadd.f32 %v3274_v17, %v2976_v16 }
 0x1a4   :  { %v2397_v7 = vpop.eup %2396  ;;  %1798 = vst.msk [vmem:[%s3433_s3 + $0xe0] sm:$0xff] %vm1769_vm1, %v2395_v11  ;;  %v1386_v59 = vpop.f32.mrf.mxu1  ;;  %v1591_v47 = vmul.f32 1.442695, %v1488_v15  ;;  %v1355_v22 = vadd.f32 %v3194_v63, %v1066_v43 }
 0x1a5   :  { %v2399_v18 = vpop.eup %2398  ;;  %v1676_v21 = vadd.f32 1.0, %v2397_v7  ;;  %v1499_v14 = vsub.f32 0.0, %v1395_v13  ;;  %v1387_v30 = vadd.f32 %v1386_v59, %v1098_v60  ;;  %v1068_v19 = vpop.f32.mrf.mxu0 }
 0x1a6   :  { %v2401_v51 = vpop.eup %2400  ;;  %1801 = vst.msk [vmem:[%s3433_s3 + $0xf8] sm:$0xff] %vm1769_vm1, %v2399_v18  ;;  %v2074_v39 = vpop.f32.mrf.mxu1  ;;  %v1489_v56 = vsub.f32 0.0, %v1355_v22  ;;  %v1069_v0 = vadd.f32 %v3013_v49, %v1068_v19 }
 0x1a7   :  { %1799 = vst.msk [vmem:[%s3433_s3 + $0xe8] sm:$0xff] %vm1769_vm1, %v2401_v51  ;;  %2414 = vrcp.f32 %v1676_v21  ;;  %v1613_v63 = vmul.f32 1.442695, %v1499_v14  ;;  %v1497_v37 = vsub.f32 0.0, %v1387_v30  ;;  %v1398_v38 = vadd.f32 %v2074_v39, %v1109_v52  ;;  %v1070_v41 = vpop.f32.mrf.mxu0 }
 0x1a8   :  { %v2403_v55 = vpop.eup %2402  ;;  %2416 = vpow2.f32 %v1591_v47  ;;  %v1389_v3 = vpop.f32.mrf.mxu1  ;;  %v1593_v46 = vmul.f32 1.442695, %v1489_v56  ;;  %v1358_v50 = vadd.f32 %v3207_v25, %v1069_v0  ;;  %v1138_v14 = vadd.f32 %v3274_v17, %v2988_v28 }
 0x1a9   :  { %v2405_v9 = vpop.eup %2404  ;;  %1802 = vst.msk [vmem:[%s3433_s3 + $0x100] sm:$0xff] %vm1769_vm1, %v2403_v55  ;;  %2418 = vpow2.f32 %v1613_v63  ;;  %v1390_v34 = vadd.f32 %v1389_v3, %v1101_v27  ;;  %v1609_v54 = vmul.f32 1.442695, %v1497_v37  ;;  %v1500_v23 = vsub.f32 0.0, %v1398_v38  ;;  %v1073_v29 = vpop.f32.mrf.mxu0 }
 0x1aa   :  { %v1677_v8 = vadd.f32 1.0, %v2405_v9  ;;  %v2077_v58 = vpop.f32.mrf.mxu1  ;;  %2420 = vpow2.f32 %v1593_v46  ;;  %v1490_v62 = vsub.f32 0.0, %v1358_v50  ;;  %v1074_v1 = vadd.f32 %v3274_v17, %v1073_v29 }
 0x1ab   :  { %v1498_v10 = vsub.f32 0.0, %v1390_v34  ;;  %v1615_v12 = vmul.f32 1.442695, %v1500_v23  ;;  %v1411_v49 = vadd.f32 %v2077_v58, %v1122_v31  ;;  %v1075_v5 = vpop.f32.mrf.mxu0  ;;  %v1130_v9 = vadd.f32 %v3274_v17, %v2980_v20 }
 0x1ac   :  { %v2407_v25 = vpop.eup %2406  ;;  %2422 = vrcp.f32 %v1677_v8  ;;  %v1402_v6 = vpop.f32.mrf.mxu1  ;;  %v1595_v15 = vmul.f32 1.442695, %v1490_v62  ;;  %v1363_v13 = vadd.f32 %v3187_v61, %v1074_v1 }
 0x1ad   :  { %v2409_v11 = vpop.eup %2408  ;;  %1803 = vst.msk [vmem:[%s3433_s3 + $0x108] sm:$0xff] %vm1769_vm1, %v2407_v25  ;;  %2424 = vpow2.f32 %v1609_v54  ;;  %v1611_v43 = vmul.f32 1.442695, %v1498_v10  ;;  %v1503_v60 = vsub.f32 0.0, %v1411_v49  ;;  %v1403_v16 = vadd.f32 %v1402_v6, %v1114_v26  ;;  %v1076_v42 = vpop.f32.mrf.mxu0 }
 0x1ae   :  { %v1678_v7 = vadd.f32 1.0, %v2409_v11  ;;  %2426 = vpow2.f32 %v1615_v12  ;;  %v2078_v59 = vpop.f32.mrf.mxu1  ;;  %v1491_v18 = vsub.f32 0.0, %v1363_v13  ;;  %v1077_v21 = vadd.f32 %v3274_v17, %v1076_v42 }
 0x1af   :  { %2428 = vpow2.f32 %v1595_v15  ;;  %v1414_v47 = vadd.f32 %v2078_v59, %v1125_v2  ;;  %v2411_v22 = vpop.eup %2410  ;;  %v1621_v51 = vmul.f32 1.442695, %v1503_v60  ;;  %v1501_v27 = vsub.f32 0.0, %v1403_v16  ;;  %v1078_v52 = vpop.f32.mrf.mxu0 }
 0x1b0   :  { %2430 = vrcp.f32 %v1678_v7  ;;  %v1405_v61 = vpop.f32.mrf.mxu1  ;;  %v2413_v30 = vpop.eup %2412  ;;  %1804 = vst.msk [vmem:[%s3433_s3 + $0x110] sm:$0xff] %vm1769_vm1, %v2411_v22  ;;  %v1597_v26 = vmul.f32 1.442695, %v1491_v18  ;;  %v1366_v19 = vadd.f32 %v3200_v35, %v1077_v21 }
 0x1b1   :  { %2432 = vpow2.f32 %v1611_v43  ;;  %v1504_v39 = vsub.f32 0.0, %v1414_v47  ;;  %v1679_v56 = vadd.f32 1.0, %v2413_v30  ;;  %v1617_v63 = vmul.f32 1.442695, %v1501_v27  ;;  %v1081_v0 = vpop.f32.mrf.mxu0 }
 0x1b2   :  { %2434 = vpow2.f32 %v1621_v51  ;;  %v1406_v28 = vadd.f32 %v1405_v61, %v1117_v4  ;;  %v2081_v55 = vpop.f32.mrf.mxu1  ;;  %v1492_v37 = vsub.f32 0.0, %v1366_v19  ;;  %v1082_v41 = vadd.f32 %v3274_v17, %v1081_v0 }
 0x1b3   :  { %2436 = vpow2.f32 %v1597_v26  ;;  %v1623_v38 = vmul.f32 1.442695, %v1504_v39  ;;  %v1427_v50 = vadd.f32 %v2081_v55, %v1138_v14  ;;  %v1083_v35 = vpop.f32.mrf.mxu0  ;;  %v1141_v43 = vadd.f32 %v3274_v17, %v2992_v32 }
 0x1b4   :  { %v2415_v3 = vpop.eup %2414  ;;  %2438 = vrcp.f32 %v1679_v56  ;;  %v1502_v46 = vsub.f32 0.0, %v1406_v28  ;;  %v1418_v34 = vpop.f32.mrf.mxu1  ;;  %v1599_v4 = vmul.f32 1.442695, %v1492_v37  ;;  %v1371_v8 = vadd.f32 %v3220_v45, %v1082_v41 }
 0x1b5   :  { %v2417_v31 = vpop.eup %2416  ;;  %1805 = vst.msk [vmem:[%s3433_s3 + $0x118] sm:$0xff] %vm1769_vm1, %v2415_v3  ;;  %2440 = vpow2.f32 %v1617_v63  ;;  %v1419_v20 = vadd.f32 %v1418_v34, %v1130_v9  ;;  %v1084_v58 = vpop.f32.mrf.mxu0  ;;  %v1507_v25 = vsub.f32 0.0, %v1427_v50  ;;  %v1133_v27 = vadd.f32 %v3274_v17, %v2984_v24 }
 0x1b6   :  { %v2419_v54 = vpop.eup %2418  ;;  %v1680_v23 = vadd.f32 1.0, %v2417_v31  ;;  %2442 = vpow2.f32 %v1623_v38  ;;  %v1619_v29 = vmul.f32 1.442695, %v1502_v46  ;;  %v2082_v62 = vpop.f32.mrf.mxu1  ;;  %v1493_v1 = vsub.f32 0.0, %v1371_v8 }
 0x1b7   :  { %v1691_v10 = vadd.f32 1.0, %v2419_v54  ;;  %2444 = vpow2.f32 %v1599_v4  ;;  %v2421_v2 = vpop.eup %2420  ;;  %v1085_v12 = vadd.f32 %v3274_v17, %v1084_v58  ;;  %v1086_v49 = vpop.f32.mrf.mxu0  ;;  %v1629_v42 = vmul.f32 1.442695, %v1507_v25 }
 0x1b8   :  { %2446 = vrcp.f32 %v1680_v23  ;;  %v1421_v5 = vpop.f32.mrf.mxu1  ;;  %v1681_v11 = vadd.f32 1.0, %v2421_v2  ;;  %v1601_v45 = vmul.f32 1.442695, %v1493_v1  ;;  %v1505_v59 = vsub.f32 0.0, %v1419_v20 }
 0x1b9   :  { %v2423_v6 = vpop.eup %2422  ;;  %2448 = vrcp.f32 %v1691_v10  ;;  %v1089_v13 = vpop.f32.mrf.mxu0  ;;  %v1374_v47 = vadd.f32 %v3230_v57, %v1085_v12  ;;  %v1430_v22 = vadd.f32 %v2082_v62, %v1141_v43  ;;  %v1146_v26 = vadd.f32 %v3274_v17, %v2996_v36 }
 0x1ba   :  { %v2425_v15 = vpop.eup %2424  ;;  %1806 = vst.msk [vmem:[%s3433_s3 + $0x120] sm:$0xff] %vm1769_vm1, %v2423_v6  ;;  %2450 = vpow2.f32 %v1619_v29  ;;  %v2085_v7 = vpop.f32.mrf.mxu1  ;;  %v1090_v61 = vadd.f32 %v3274_v17, %v1089_v13  ;;  %v1154_v19 = vadd.f32 %v3274_v17, %v3004_v44  ;;  %v1625_v56 = vmul.f32 1.442695, %v1505_v59 }
 0x1bb   :  { %v2427_v60 = vpop.eup %2426  ;;  %2452 = vrcp.f32 %v1681_v11  ;;  %v1689_v16 = vadd.f32 1.0, %v2425_v15  ;;  %v1091_v32 = vpop.f32.mrf.mxu0  ;;  %v1422_v63 = vadd.f32 %v1421_v5, %v1133_v27  ;;  %v1494_v55 = vsub.f32 0.0, %v1374_v47 }
 0x1bc   :  { %v2429_v18 = vpop.eup %2428  ;;  %v1692_v21 = vadd.f32 1.0, %v2427_v60  ;;  %2454 = vpow2.f32 %v1601_v45  ;;  %v1434_v14 = vpop.f32.mrf.mxu1  ;;  %v1508_v36 = vsub.f32 0.0, %v1430_v22  ;;  %v1379_v3 = vadd.f32 %v3213_v33, %v1090_v61 }
 0x1bd   :  { %v2431_v51 = vpop.eup %2430  ;;  %2456 = vrcp.f32 %v1689_v16  ;;  %v1682_v52 = vadd.f32 1.0, %v2429_v18  ;;  %v1092_v57 = vpop.f32.mrf.mxu0  ;;  %v1149_v50 = vadd.f32 %v3274_v17, %v3000_v40  ;;  %v1157_v35 = vadd.f32 %v3274_v17, %v3008_v48 }
 0x1be   :  { %v2433_v30 = vpop.eup %2432  ;;  %1807 = vst.msk [vmem:[%s3433_s3 + $0x128] sm:$0xff] %vm1769_vm1, %v2431_v51  ;;  %2458 = vrcp.f32 %v1692_v21  ;;  %v2086_v37 = vpop.f32.mrf.mxu1  ;;  %v1093_v9 = vadd.f32 %v3274_v17, %v1092_v57  ;;  %v1443_v34 = vadd.f32 %v2085_v7, %v1154_v19  ;;  %v1506_v33 = vsub.f32 0.0, %v1422_v63 }
 0x1bf   :  { %v2435_v39 = vpop.eup %2434  ;;  %2460 = vrcp.f32 %v1682_v52  ;;  %v1690_v24 = vadd.f32 1.0, %v2433_v30  ;;  %v1094_v38 = vpop.f32.mrf.mxu0  ;;  %v1435_v8 = vadd.f32 %v1434_v14, %v1146_v26  ;;  %v1603_v29 = vmul.f32 1.442695, %v1494_v55 }
 0x1c0   :  { %v2437_v28 = vpop.eup %2436  ;;  %v1695_v0 = vadd.f32 1.0, %v2435_v39  ;;  %2462 = vpow2.f32 %v1629_v42  ;;  %v1631_v40 = vmul.f32 1.442695, %v1508_v36  ;;  %v1437_v20 = vpop.f32.mrf.mxu1  ;;  %v1495_v17 = vsub.f32 0.0, %v1379_v3 }
 0x1c1   :  { %v2439_v44 = vpop.eup %2438  ;;  %2464 = vrcp.f32 %v1690_v24  ;;  %v1683_v41 = vadd.f32 1.0, %v2437_v28  ;;  %v1382_v62 = vadd.f32 %v3227_v53, %v1093_v9  ;;  %v1511_v1 = vsub.f32 0.0, %v1443_v34 }
 0x1c2   :  { %v2441_v46 = vpop.eup %2440  ;;  %1808 = vst.msk [vmem:[%s3433_s3 + $0x130] sm:$0xff] %vm1769_vm1, %v2439_v44  ;;  %2466 = vrcp.f32 %v1695_v0  ;;  %v1446_v25 = vadd.f32 %v2086_v37, %v1157_v35  ;;  %v1627_v12 = vmul.f32 1.442695, %v1506_v33  ;;  %v1509_v49 = vsub.f32 0.0, %v1435_v8 }
 0x1c3   :  { %v2443_v31 = vpop.eup %2442  ;;  %2468 = vrcp.f32 %v1683_v41  ;;  %v1693_v4 = vadd.f32 1.0, %v2441_v46  ;;  %v1438_v5 = vadd.f32 %v1437_v20, %v1149_v50  ;;  %v1605_v45 = vmul.f32 1.442695, %v1495_v17 }
 0x1c4   :  { %v2445_v54 = vpop.eup %2444  ;;  %v1696_v23 = vadd.f32 1.0, %v2443_v31  ;;  %2470 = vpow2.f32 %v1625_v56  ;;  %v1496_v15 = vsub.f32 0.0, %v1382_v62  ;;  %v1637_v7 = vmul.f32 1.442695, %v1511_v1 }
 0x1c5   :  { %v2447_v58 = vpop.eup %2446  ;;  %2472 = vrcp.f32 %v1693_v4  ;;  %v1684_v48 = vadd.f32 1.0, %v2445_v54  ;;  %v1512_v60 = vsub.f32 0.0, %v1446_v25  ;;  %v1633_v42 = vmul.f32 1.442695, %v1509_v49 }
 0x1c6   :  { %v2449_v10 = vpop.eup %2448  ;;  %1809 = vst.msk [vmem:[%s3433_s3 + $0x138] sm:$0xff] %vm1769_vm1, %v2447_v58  ;;  %2474 = vrcp.f32 %v1696_v23  ;;  %v1510_v59 = vsub.f32 0.0, %v1438_v5  ;;  %v1607_v47 = vmul.f32 1.442695, %v1496_v15 }
 0x1c7   :  { %v2451_v2 = vpop.eup %2450  ;;  %1820 = vst.msk [vmem:[%s3433_s3 + $0x190] sm:$0xff] %vm1769_vm1, %v2449_v10  ;;  %2476 = vrcp.f32 %v1684_v48  ;;  %v1639_v14 = vmul.f32 1.442695, %v1512_v60 }
 0x1c8   :  { %v2453_v53 = vpop.eup %2452  ;;  %v1694_v6 = vadd.f32 1.0, %v2451_v2  ;;  %2478 = vpow2.f32 %v1603_v29  ;;  %v1635_v27 = vmul.f32 1.442695, %v1510_v59 }
 0x1c9   :  { %v2455_v11 = vpop.eup %2454  ;;  %1810 = vst.msk [vmem:[%s3433_s3 + $0x140] sm:$0xff] %vm1769_vm1, %v2453_v53  ;;  %2480 = vpow2.f32 %v1631_v40 }
 0x1ca   :  { %v2457_v43 = vpop.eup %2456  ;;  %2482 = vrcp.f32 %v1694_v6  ;;  %v1685_v13 = vadd.f32 1.0, %v2455_v11 }
 0x1cb   :  { %v2459_v16 = vpop.eup %2458  ;;  %1818 = vst.msk [vmem:[%s3433_s3 + $0x180] sm:$0xff] %vm1769_vm1, %v2457_v43  ;;  %2484 = vpow2.f32 %v1627_v12 }
 0x1cc   :  { %v2461_v18 = vpop.eup %2460  ;;  %1821 = vst.msk [vmem:[%s3433_s3 + $0x198] sm:$0xff] %vm1769_vm1, %v2459_v16  ;;  %2486 = vrcp.f32 %v1685_v13 }
 0x1cd   :  { %v2463_v21 = vpop.eup %2462  ;;  %1811 = vst.msk [vmem:[%s3433_s3 + $0x148] sm:$0xff] %vm1769_vm1, %v2461_v18  ;;  %2488 = vpow2.f32 %v1605_v45 }
 0x1ce   :  { %v2465_v22 = vpop.eup %2464  ;;  %v1699_v32 = vadd.f32 1.0, %v2463_v21  ;;  %2490 = vpow2.f32 %v1637_v7 }
 0x1cf   :  { %v2467_v51 = vpop.eup %2466  ;;  %1819 = vst.msk [vmem:[%s3433_s3 + $0x188] sm:$0xff] %vm1769_vm1, %v2465_v22  ;;  %2492 = vpow2.f32 %v1633_v42 }
 0x1d0   :  { %v2469_v52 = vpop.eup %2468  ;;  %1824 = vst.msk [vmem:[%s3433_s3 + $0x1b0] sm:$0xff] %vm1769_vm1, %v2467_v51  ;;  %2494 = vrcp.f32 %v1699_v32 }
 0x1d1   :  { %v2471_v61 = vpop.eup %2470  ;;  %1812 = vst.msk [vmem:[%s3433_s3 + $0x150] sm:$0xff] %vm1769_vm1, %v2469_v52  ;;  %2496 = vpow2.f32 %v1607_v47 }
 0x1d2   :  { %v2473_v30 = vpop.eup %2472  ;;  %v1697_v26 = vadd.f32 1.0, %v2471_v61  ;;  %2498 = vpow2.f32 %v1639_v14 }
 0x1d3   :  { %v2475_v19 = vpop.eup %2474  ;;  %1822 = vst.msk [vmem:[%s3433_s3 + $0x1a0] sm:$0xff] %vm1769_vm1, %v2473_v30  ;;  %2500 = vpow2.f32 %v1635_v27 }
 0x1d4   :  { %v2477_v57 = vpop.eup %2476  ;;  %1825 = vst.msk [vmem:[%s3433_s3 + $0x1b8] sm:$0xff] %vm1769_vm1, %v2475_v19  ;;  %2502 = vrcp.f32 %v1697_v26 }
 0x1d5   :  { %v2479_v39 = vpop.eup %2478  ;;  %1813 = vst.msk [vmem:[%s3433_s3 + $0x158] sm:$0xff] %vm1769_vm1, %v2477_v57 }
 0x1d6   :  { %v2481_v24 = vpop.eup %2480  ;;  %v1686_v56 = vadd.f32 1.0, %v2479_v39 }
 0x1d7   :  { %v2483_v63 = vpop.eup %2482  ;;  %v1700_v28 = vadd.f32 1.0, %v2481_v24 }
 0x1d8   :  { %v2485_v0 = vpop.eup %2484  ;;  %1823 = vst.msk [vmem:[%s3433_s3 + $0x1a8] sm:$0xff] %vm1769_vm1, %v2483_v63  ;;  %2504 = vrcp.f32 %v1686_v56 }
 0x1d9   :  { %v2487_v55 = vpop.eup %2486  ;;  %2506 = vrcp.f32 %v1700_v28  ;;  %v1698_v36 = vadd.f32 1.0, %v2485_v0 }
 0x1da   :  { %v2489_v37 = vpop.eup %2488  ;;  %1814 = vst.msk [vmem:[%s3433_s3 + $0x160] sm:$0xff] %vm1769_vm1, %v2487_v55 }
 0x1db   :  { %v2491_v38 = vpop.eup %2490  ;;  %2508 = vrcp.f32 %v1698_v36  ;;  %v1687_v44 = vadd.f32 1.0, %v2489_v37 }
 0x1dc   :  { %v2493_v41 = vpop.eup %2492  ;;  %v1703_v3 = vadd.f32 1.0, %v2491_v38 }
 0x1dd   :  { %v2495_v9 = vpop.eup %2494  ;;  %2510 = vrcp.f32 %v1687_v44  ;;  %v1701_v46 = vadd.f32 1.0, %v2493_v41 }
 0x1de   :  { %v2497_v50 = vpop.eup %2496  ;;  %1828 = vst.msk [vmem:[%s3433_s3 + $0x1d0] sm:$0xff] %vm1769_vm1, %v2495_v9  ;;  %2512 = vrcp.f32 %v1703_v3 }
 0x1df   :  { %v2499_v35 = vpop.eup %2498  ;;  %2514 = vrcp.f32 %v1701_v46  ;;  %v1688_v34 = vadd.f32 1.0, %v2497_v50 }
 0x1e0   :  { %v2501_v31 = vpop.eup %2500  ;;  %v1704_v4 = vadd.f32 1.0, %v2499_v35 }
 0x1e1   :  { %v2503_v33 = vpop.eup %2502  ;;  %2516 = vrcp.f32 %v1688_v34  ;;  %v1702_v8 = vadd.f32 1.0, %v2501_v31 }
 0x1e2   :  { %1826 = vst.msk [vmem:[%s3433_s3 + $0x1c0] sm:$0xff] %vm1769_vm1, %v2503_v33  ;;  %2518 = vrcp.f32 %v1704_v4 }
 0x1e3   :  { %2520 = vrcp.f32 %v1702_v8 }
 0x1e5   :  { %v2505_v54 = vpop.eup %2504 }
 0x1e6   :  { %v2507_v23 = vpop.eup %2506  ;;  %1815 = vst.msk [vmem:[%s3433_s3 + $0x168] sm:$0xff] %vm1769_vm1, %v2505_v54 }
 0x1e7   :  { %1829 = vst.msk [vmem:[%s3433_s3 + $0x1d8] sm:$0xff] %vm1769_vm1, %v2507_v23 }
 0x1e8   :  { %v2509_v29 = vpop.eup %2508 }
 0x1e9   :  { %1827 = vst.msk [vmem:[%s3433_s3 + $0x1c8] sm:$0xff] %vm1769_vm1, %v2509_v29 }
 0x1ea   :  { %v2511_v40 = vpop.eup %2510 }
 0x1eb   :  { %v2513_v20 = vpop.eup %2512  ;;  %1816 = vst.msk [vmem:[%s3433_s3 + $0x170] sm:$0xff] %vm1769_vm1, %v2511_v40 }
 0x1ec   :  { %v2515_v58 = vpop.eup %2514  ;;  %1832 = vst.msk [vmem:[%s3433_s3 + $0x1f0] sm:$0xff] %vm1769_vm1, %v2513_v20 }
 0x1ed   :  { %1830 = vst.msk [vmem:[%s3433_s3 + $0x1e0] sm:$0xff] %vm1769_vm1, %v2515_v58 }
 0x1ee   :  { %v2517_v48 = vpop.eup %2516 }
 0x1ef   :  { %v2519_v17 = vpop.eup %2518  ;;  %1817 = vst.msk [vmem:[%s3433_s3 + $0x178] sm:$0xff] %vm1769_vm1, %v2517_v48 }
 0x1f0   :  { %v2521_v62 = vpop.eup %2520  ;;  %1833 = vst.msk [vmem:[%s3433_s3 + $0x1f8] sm:$0xff] %vm1769_vm1, %v2519_v17 }
 0x1f1   :  { %1831 = vst.msk [vmem:[%s3433_s3 + $0x1e8] sm:$0xff] %vm1769_vm1, %v2521_v62 }

</bundles_post_ra>
